<compile_context>
chip_gen: v7x
topology: tpu7x:2x2x1
jax: 0.10.0
libtpu: 0.0.40
codegen_flags: <defaults>
</compile_context>

<pallas_src>
import functools

import jax
import jax.numpy as jnp
from jax.experimental import pallas as pl
from jax.experimental.pallas import tpu as pltpu

D_IN = 50
D_H1 = 100
D_H2 = 250
D_OUT = 220500  # nn.Linear(250, 220500)

TILE_N = 8192  # output-feature tile for the final matmul (multiple of 128)


def _decode3_kernel(h2_ref, w3_ref, b3_ref, o_ref):
    # h2: (B, 250)   w3 tile: (250, TILE_N)   b3 tile: (1, TILE_N)
    o_ref[...] = (
        jnp.dot(h2_ref[...], w3_ref[...], preferred_element_type=jnp.float32)
        + b3_ref[...]
    )


@functools.partial(jax.jit, static_argnames=("tile_n",))
def complex_var_decoder(stimulus, w1, b1, w2, b2, w3, b3, *, tile_n=TILE_N):
    """stimulus: (B, 50) float32 -> (B, 220500) float32."""
    B = stimulus.shape[0]

    # Tiny layers: compute once outside the kernel (negligible FLOPs).
    h1 = jnp.maximum(stimulus @ w1 + b1, 0.0)  # (B, 100)
    h2 = jnp.maximum(h1 @ w2 + b2, 0.0)        # (B, 250)

    n_tiles = pl.cdiv(D_OUT, tile_n)  # ragged last block handled by Pallas

    out = pl.pallas_call(
        _decode3_kernel,
        out_shape=jax.ShapeDtypeStruct((B, D_OUT), jnp.float32),
        grid_spec=pltpu.PrefetchScalarGridSpec(
            num_scalar_prefetch=0,
            grid=(n_tiles,),
            in_specs=[
                pl.BlockSpec((B, D_H2), lambda j: (0, 0)),      # h2 (replicated)
                pl.BlockSpec((D_H2, tile_n), lambda j: (0, j)),  # w3 tile (dominant stream)
                pl.BlockSpec((1, tile_n), lambda j: (0, j)),     # b3 tile
            ],
            out_specs=pl.BlockSpec((B, tile_n), lambda j: (0, j)),
        ),
        compiler_params=pltpu.CompilerParams(
            dimension_semantics=("parallel",),
            vmem_limit_bytes=40 << 20,  # ~16 MiB actually used (2x 7.8 MiB w3 tiles)
        ),
    )(h2, w3, b3)

    return out


def _init_linear(key, fan_in, fan_out):
    """Deterministic init mimicking PyTorch nn.Linear (uniform +/- 1/sqrt(fan_in)).
    Returned weight is [in, out] (transposed vs. PyTorch)."""
    kw, kb = jax.random.split(key)
    bound = 1.0 / jnp.sqrt(fan_in)
    w = jax.random.uniform(kw, (fan_in, fan_out), jnp.float32, -bound, bound)
    b = jax.random.uniform(kb, (1, fan_out), jnp.float32, -bound, bound)
    return w, b


if __name__ == "__main__":
    key = jax.random.PRNGKey(0)
    k_x, k1, k2, k3 = jax.random.split(key, 4)

    B = 2
    stimulus = jax.random.normal(k_x, (B, D_IN), jnp.float32)

    w1, b1 = _init_linear(k1, D_IN, D_H1)
    w2, b2 = _init_linear(k2, D_H1, D_H2)
    w3, b3 = _init_linear(k3, D_H2, D_OUT)

    out = complex_var_decoder(stimulus, w1, b1, w2, b2, w3, b3)
    out = jax.block_until_ready(out)

    # Pure-JAX reference of the same forward pass.
    h1 = jnp.maximum(stimulus @ w1 + b1, 0.0)
    h2 = jnp.maximum(h1 @ w2 + b2, 0.0)
    ref = h2 @ w3 + b3
    ref = jax.block_until_ready(ref)

    assert out.shape == (B, D_OUT), out.shape
    assert jnp.allclose(out, ref, atol=1e-3, rtol=1e-3), float(
        jnp.max(jnp.abs(out - ref))
    )
    print("KERNEL_OK")
</pallas_src>

<mosaic_0001>
module attributes {stable_mosaic.version = 11 : i64} {
  func.func @_decode3_kernel(%arg0: i32, %arg1: memref<2x250xf32, #tpu.memory_space<vmem>>, %arg2: memref<250x8192xf32, #tpu.memory_space<vmem>>, %arg3: memref<1x8192xf32, #tpu.memory_space<vmem>>, %arg4: memref<2x8192xf32, #tpu.memory_space<vmem>>) attributes {dimension_semantics = [#tpu.dimension_semantics<parallel>], iteration_bounds = array<i64: 27>, scalar_prefetch = 0 : i64, scratch_operands = 0 : i64, tpu.core_type = #tpu.core_type<tc>, window_params = [{pipeline_mode = #tpu.pipeline_mode<synchronous>, transform_indices = @transform_0, window_bounds = array<i64: 2, 250>}, {transform_indices = @transform_1, window_bounds = array<i64: 250, 8192>}, {transform_indices = @transform_2, window_bounds = array<i64: 1, 8192>}, {transform_indices = @transform_3, window_bounds = array<i64: 2, 8192>}]} {
    %c0 = arith.constant 0 : index
    %c0_0 = arith.constant 0 : index
    %0 = vector.load %arg1[%c0, %c0_0] : memref<2x250xf32, #tpu.memory_space<vmem>>, vector<2x250xf32>
    %c0_1 = arith.constant 0 : index
    %c0_2 = arith.constant 0 : index
    %1 = vector.load %arg2[%c0_1, %c0_2] : memref<250x8192xf32, #tpu.memory_space<vmem>>, vector<250x8192xf32>
    %cst = arith.constant dense<0.000000e+00> : vector<2x8192xf32>
    %2 = tpu.matmul %0, %1, %cst {dimension_numbers = #tpu.dot_dimension_numbers<[1], [0], [0], [1], [0, 0, 1, 1], [], []>} : vector<2x250xf32>, vector<250x8192xf32>, vector<2x8192xf32> -> vector<2x8192xf32>
    %c0_3 = arith.constant 0 : index
    %c0_4 = arith.constant 0 : index
    %3 = vector.load %arg3[%c0_3, %c0_4] : memref<1x8192xf32, #tpu.memory_space<vmem>>, vector<1x8192xf32>
    %4 = vector.broadcast %3 : vector<1x8192xf32> to vector<2x8192xf32>
    %5 = arith.addf %2, %4 : vector<2x8192xf32>
    %c0_5 = arith.constant 0 : index
    %c0_6 = arith.constant 0 : index
    %6 = vector.load %arg4[%c0_5, %c0_6] : memref<2x8192xf32, #tpu.memory_space<vmem>>, vector<2x8192xf32>
    tpu.vector_store %arg4[%c0_5, %c0_6], %5 {strides = array<i32>} : memref<2x8192xf32, #tpu.memory_space<vmem>>, vector<2x8192xf32>,
    return
  }
  func.func @transform_0(%arg0: i32) -> (i32, i32) {
    %c0_i32 = arith.constant 0 : i32
    %c0_i32_0 = arith.constant 0 : i32
    %c0_i32_1 = arith.constant 0 : i32
    return %c0_i32, %c0_i32_0 : i32, i32
  }
  func.func @transform_1(%arg0: i32) -> (i32, i32) {
    %c0_i32 = arith.constant 0 : i32
    %c0_i32_0 = arith.constant 0 : i32
    return %c0_i32, %arg0 : i32, i32
  }
  func.func @transform_2(%arg0: i32) -> (i32, i32) {
    %c0_i32 = arith.constant 0 : i32
    %c0_i32_0 = arith.constant 0 : i32
    return %c0_i32, %arg0 : i32, i32
  }
  func.func @transform_3(%arg0: i32) -> (i32, i32) {
    %c0_i32 = arith.constant 0 : i32
    %c0_i32_0 = arith.constant 0 : i32
    return %c0_i32, %arg0 : i32, i32
  }
}

</mosaic_0001>

<bundles_post_ra>
// kernel: complex_var_decoder.1
= control target key start
LH: loop header
LB: loop body
LE: loop exit
PB: predicated region body
PF: predicated region fallthrough
CT: control target
= control target key end

     0   :  { %8 = vsyncpa [#allocation3], 0  ;;  %s10699_s0 = inlined_call_operand.vmem [shape: f32[2,250], index: 0, kind: input, shape index: {}]   ;;  %s10700_s1 = inlined_call_operand.hbm [shape: f32[250,220500], index: 1, kind: input, shape index: {}]   ;;  %s10701_s2 = inlined_call_operand.vmem [shape: f32[1,220500], index: 2, kind: input, shape index: {}]   ;;  %s10702_s3 = inlined_call_operand.hbm [shape: f32[2,220500], index: 3, kind: output, shape index: {}]  }
   0x1   :  { %10 = vsyncpa [#allocation3 + $0x1], 0 }
   0x2   :  { %11 = vsyncpa [#allocation4], 0 }
   0x3   :  { %13 = vsyncpa [#allocation4 + $0x1], 0  ;;  %s7985_s12 = smov 0   ;;  %s7987_s13 = smov 0  }
   0x4   :  { %s7989_s14 = smov 0   ;;  %s7991_s15 = smov 0  }
   0x5 LB: > { %s8006_s16 = sadd.s32 4294967295, %s7957_s15   ;;  %s5576_s17 = sadd.s32 4294967294, %s7957_s15   ;;  %s7957_s15 = sphi %s7991_s15, %s10712_s15   ;;  %s7953_s14 = sphi %s7989_s14, %s10711_s14   ;;  %s7949_s13 = sphi %s7987_s13, %s10710_s13   ;;  %s7945_s12 = sphi %s7985_s12, %s10709_s12  }
   0x6   : > { %s8010_s18 = sadd.s32 1, %s7957_s15   ;;  %s47_s19 = sadd.s32 1, %s7953_s14 }
   0x7   : > { %s44_s20 = ssub.s32 %s7957_s15, %s8010_s18  ;;  %p54_p0 = scmp.ne.s32.totalorder %s7953_s14, %s7949_s13 }
   0x8   : > { %p45_p1 = scmp.eq.s32.totalorder %s44_s20, 0  ;;  %p55_p2 = scmp.eq.s32.totalorder %s7957_s15, 0 }
   0x9   : > { %p60_p3 = scmp.ne.s32.totalorder %s7949_s13, %s7945_s12  ;;  %p61_p4 = scmp.eq.s32.totalorder %s8006_s16, 0 }
   0xa   : > { %s8022_s21 = scalar_select %p45_p1, %s7953_s14, %s47_s19  }
   0xb   : > { %p56_p5 = por %p55_p2, %p54_p0  ;;  %p8024_p6 = por %p61_p4, %p60_p3 }
   0xc   : > { %p110_p7 = scmp.eq.s32.totalorder %s8006_s16, 26  ;;  %p116_p8 = scmp.eq.s32.totalorder %s5576_s17, 26 }
   0xd   : > { %p5578_p11 = scmp.ge.s32.totalorder %s7957_s15, 27 }
   0xe   : > { %p8029_p9 = por %p110_p7, %p54_p0  ;;  %p8033_p10 = por %p116_p8, %p60_p3 }
   0xf   : > { %135 = sbr.rel (%p5578_p11) target bundleno = 57 (0x39), region = 20 }
  0x10   : > { %s10705_s24 = scalar_select %p8033_p10, 1, 0 }
  0x16   : > { %138 = sbr.rel (!%p56_p5) target bundleno = 57 (0x39), region = 24  ;;  %s139_s25 = sand.u32 (%p56_p5), 1, %s7953_s14  }
  0x17   : > { %s5580_s26 = sshll.u32 (%p56_p5), %s7957_s15, 6  ;;  %s5579_s27 = sshll.u32 (%p56_p5), %s139_s25, 14 }
  0x18   : > { %s145_s28 = ssub.s32 (%p56_p5), 1723, %s5580_s26  ;;  %s8046_s4 = scalar_lea.sflag (%p56_p5), [#allocation3], %s139_s25 }
  0x19   : > { %p146_p12 = scmp.lt.s32.totalorder (%p56_p5), %s145_s28, 64  ;;  %s143_s5 = scalar_lea.vmem (%p56_p5), [#allocation2], %s5579_s27 }
  0x1d   : > { %s10714_s28 = smov (!%p146_p12, %s145_s28), 64 }
  0x1e   : > { %s8043_s29 = sshll.u32 %s10714_s28, 12 }
  0x1f   : > { %s150_s30 = ssub.s32 262144, %s8043_s29 }
  0x20   : > { %151 = vsyncadd %s8046_s4, %s150_s30  ;;  %p5582_p13 = scmp.ne.s32.totalorder %s8043_s29, 0  ;;  %s5697_s6 = sshll.u32 %s7957_s15, 13 }
  0x21   : > { %s8054_s9 = scalar_lea.hbm %s10700_s1, %s5697_s6  ;;  %s5584_s10 = sshll.u32 %s10714_s28, 3 }
  0x22   : > { %s157_s11 = sshll.u32 %s143_s5, 4  ;;  %s7863_s17 = scalar_lea.hbm %s8054_s9, %s8043_s29  ;;  %s8057_s11 = int_to_ptr.vmem [resolvable:$true] %s157_s11 }
  0x23   : > { %p7864_p0 = scmp.ne.s32.totalorder %s8054_s9, %s7863_s17  ;;  %s7867_s25 = scalar_lea.hbm %s10700_s1, 7057408 }
  0x24   : > { %p7868_p3 = scmp.lt.u32.totalorder %s8054_s9, %s10700_s1  ;;  %p7869_p4 = scmp.lt.u32.totalorder %s7867_s25, %s7863_s17 }
  0x25   : > { %p7865_p1 = pnand %p7864_p0, %p5582_p13  ;;  %p7871_p7 = scmp.lt.u32.totalorder %s7863_s17, %s8054_s9 }
  0x26   : > { %p7870_p5 = por %p7869_p4, %p7868_p3 }
  0x27   : > { %p7866_p2 = pneg %p7865_p1 }
  0x28   : > { %p7872_p8 = por %p7871_p7, %p7870_p5 }
  0x2a   : > { %p7873_p11 = pnand %p7872_p8, %p7866_p2 }
  0x2c   : > { %7876 = shalt.err (!%p7873_p11)
}
  0x2d   : > { %s7877_s30 = scalar_lea.vmem %s8057_s11, %s8043_s29  ;;  %s7959_s5 = smov [#allocation2]  }
  0x2e   : > { %p7878_p12 = scmp.ne.s32.totalorder %s8057_s11, %s7877_s30  ;;  %s7881_s6 = sshll.u32 %s7959_s5, 4  ;;  %s7882_s6 = int_to_ptr.vmem [resolvable:$false] %s7881_s6 }
  0x2f   : > { %s7883_s7 = scalar_lea.vmem %s7882_s6, 524288  ;;  %p7884_p10 = scmp.lt.s32.totalorder %s8057_s11, %s7882_s6 }
  0x30   : > { %p7879_p0 = pnand %p7878_p12, %p5582_p13  ;;  %p7885_p3 = scmp.lt.s32.totalorder %s7883_s7, %s7877_s30 }
  0x32   : > { %p7880_p1 = pneg %p7879_p0  ;;  %p7886_p4 = por %p7885_p3, %p7884_p10 }
  0x34   : > { %p7887_p5 = pnand %p7886_p4, %p7880_p1 }
  0x36   : > { %7890 = shalt.err (!%p7887_p5)
}
  0x37   : > { %s7960_s8 = smov 220544   ;;  %s7961_s17 = smov 8192  }
  0x38   : > { %163 = dma.hbm_to_vmem [thread:$0]  (%p5582_p13), %s8054_s9, %s8043_s29, %s8057_s11, %s8046_s4, %s7960_s8, %s7961_s17, %s5584_s10  }
  0x39 PF: > { %p5587_p2 = scmp.ge.s32.totalorder %s7957_s15, 1  ;;  %p181_p7 = scmp.lt.s32.totalorder %s7957_s15, 28 }
  0x3b   : > { %p182_p10 = pnand %p5587_p2, %p181_p7 }
  0x3c   : > { %s8089_s19 = sand.u32 (!%p182_p10), 1, %s7949_s13  }
  0x3d   : > { %185 = sbr.rel (%p182_p10) target bundleno = 1347 (0x543), region = 32  ;;  %s5588_s20 = sshll.u32 (!%p182_p10), %s8089_s19, 14 }
  0x3e   : > { %s188_s25 = scalar_lea.sflag (!%p182_p10), [#allocation3], %s8089_s19  ;;  %s8093_s26 = scalar_lea.vmem (!%p182_p10), [#allocation2], %s5588_s20 }
  0x44   : > { %7936 = dma.done.wait (%p8024_p6), %s188_s25, 262144  }
  0x45   : > { %7938 = vsyncadd (%p8024_p6), %s188_s25, 4294705152  ;;  %v247_v0 = vld [vmem:[%s8093_s26 + $0x8] sm:$0xff]  ;;  %v249_v2 = vld [vmem:[%s8093_s26 + $0x18] sm:$0xff]  ;;  %vm2640_vm0 = vcmask 998400   ;;  %vm2643_vm1 = vcmask 1041408   ;;  %vm7962_vm2 = vmmov 1  }
  0x46   : > { %v311_v1 = vld [vmem:[%s8093_s26 + $0x208] sm:$0xff]  ;;  %v313_v4 = vld [vmem:[%s8093_s26 + $0x218] sm:$0xff]  ;;  %v246_v5 = vld [vmem:[%s8093_s26] sm:$0xff]  ;;  %s8702_s9 = sshll.u32 %s8006_s16, 6  ;;  %s5589_s5 = sshll.u32 %s8089_s19, 7 }
  0x47   : > { %v5701_v3 = vpack.c.bf16 %v311_v1, %v247_v0  ;;  %v310_v6 = vld [vmem:[%s8093_s26 + $0x200] sm:$0xff]  ;;  %v5767_v7 = vpack.c.bf16 %v313_v4, %v249_v2  ;;  %v248_v9 = vld [vmem:[%s8093_s26 + $0x10] sm:$0xff]  ;;  %v375_v11 = vld [vmem:[%s8093_s26 + $0x408] sm:$0xff]  ;;  %p232_p6 = scmp.lt.s32.totalorder %s8702_s9, 1722  ;;  %s8808_s6 = scalar_lea.vmem [#allocation5], %s5589_s5 }
  0x48   : > { %v5703_v8 = vpack.c.bf16 %v310_v6, %v246_v5  ;;  %v312_v10 = vld [vmem:[%s8093_s26 + $0x210] sm:$0xff]  ;;  %v439_v13 = vld [vmem:[%s8093_s26 + $0x608] sm:$0xff]  ;;  %v377_v14 = vld [vmem:[%s8093_s26 + $0x418] sm:$0xff] }
  0x49   : > { %5702 = vmatprep.subr.bf16.mxu0 %v5701_v3  ;;  %v5769_v12 = vpack.c.bf16 %v312_v10, %v248_v9  ;;  %v441_v15 = vld [vmem:[%s8093_s26 + $0x618] sm:$0xff]  ;;  %5768 = vmatprep.subr.bf16.mxu1 %v5767_v7  ;;  %v5705_v16 = vpack.c.bf16 %v439_v13, %v375_v11  ;;  %v374_v18 = vld [vmem:[%s8093_s26 + $0x400] sm:$0xff]  ;;  %v376_v20 = vld [vmem:[%s8093_s26 + $0x410] sm:$0xff]  ;;  %s233_s10 = scalar_select %p232_p6, %s8702_s9, 1722 }
  0x4a   : > { %5704 = vmatpush1.bf16.msra.mxu0 %v5703_v8  ;;  %v5771_v17 = vpack.c.bf16 %v441_v15, %v377_v14  ;;  %v438_v19 = vld [vmem:[%s8093_s26 + $0x600] sm:$0xff]  ;;  %v440_v22 = vld [vmem:[%s8093_s26 + $0x610] sm:$0xff]  ;;  %v503_v23 = vld [vmem:[%s8093_s26 + $0x808] sm:$0xff] }
  0x4b   : > { %5770 = vmatpush1.bf16.msra.mxu1 %v5769_v12  ;;  %v5707_v21 = vpack.c.bf16 %v438_v19, %v374_v18  ;;  %v567_v24 = vld [vmem:[%s8093_s26 + $0xa08] sm:$0xff]  ;;  %5706 = vmatprep.subr.bf16.mxu0 %v5705_v16  ;;  %v5773_v25 = vpack.c.bf16 %v440_v22, %v376_v20  ;;  %v505_v27 = vld [vmem:[%s8093_s26 + $0x818] sm:$0xff]  ;;  %v502_v29 = vld [vmem:[%s8093_s26 + $0x800] sm:$0xff]  ;;  %s8740_s30 = scalar_lea.vmem %s10701_s2, %s233_s10 }
  0x4c   : > { %5772 = vmatprep.subr.bf16.mxu1 %v5771_v17  ;;  %v5709_v26 = vpack.c.bf16 %v567_v24, %v503_v23  ;;  %v569_v28 = vld [vmem:[%s8093_s26 + $0xa18] sm:$0xff]  ;;  %v566_v31 = vld [vmem:[%s8093_s26 + $0xa00] sm:$0xff]  ;;  %v504_v32 = vld [vmem:[%s8093_s26 + $0x810] sm:$0xff] }
  0x4d   : > { %v5775_v30 = vpack.c.bf16 %v569_v28, %v505_v27  ;;  %v568_v33 = vld [vmem:[%s8093_s26 + $0xa10] sm:$0xff]  ;;  %v5711_v34 = vpack.c.bf16 %v566_v31, %v502_v29  ;;  %v631_v35 = vld [vmem:[%s8093_s26 + $0xc08] sm:$0xff]  ;;  %v633_v37 = vld [vmem:[%s8093_s26 + $0xc18] sm:$0xff] }
  0x4e   : > { %5708 = vmatpush1.bf16.msra.mxu0 %v5707_v21  ;;  %v695_v36 = vld [vmem:[%s8093_s26 + $0xe08] sm:$0xff]  ;;  %v5777_v38 = vpack.c.bf16 %v568_v33, %v504_v32  ;;  %v697_v40 = vld [vmem:[%s8093_s26 + $0xe18] sm:$0xff]  ;;  %v630_v41 = vld [vmem:[%s8093_s26 + $0xc00] sm:$0xff] }
  0x4f   : > { %5774 = vmatpush1.bf16.msra.mxu1 %v5773_v25  ;;  %5710 = vmatprep.subr.bf16.mxu0 %v5709_v26  ;;  %v5713_v39 = vpack.c.bf16 %v695_v36, %v631_v35  ;;  %v694_v42 = vld [vmem:[%s8093_s26 + $0xe00] sm:$0xff]  ;;  %v5779_v43 = vpack.c.bf16 %v697_v40, %v633_v37  ;;  %v632_v44 = vld [vmem:[%s8093_s26 + $0xc10] sm:$0xff]  ;;  %v759_v46 = vld [vmem:[%s8093_s26 + $0x1008] sm:$0xff] }
  0x50   : > { %5776 = vmatprep.subr.bf16.mxu1 %v5775_v30  ;;  %v696_v45 = vld [vmem:[%s8093_s26 + $0xe10] sm:$0xff]  ;;  %v823_v47 = vld [vmem:[%s8093_s26 + $0x1208] sm:$0xff]  ;;  %v761_v48 = vld [vmem:[%s8093_s26 + $0x1018] sm:$0xff]  ;;  %v5715_v50 = vpack.c.bf16 %v694_v42, %v630_v41 }
  0x51   : > { %v825_v49 = vld [vmem:[%s8093_s26 + $0x1218] sm:$0xff]  ;;  %v5781_v51 = vpack.c.bf16 %v696_v45, %v632_v44  ;;  %v5717_v52 = vpack.c.bf16 %v823_v47, %v759_v46  ;;  %v758_v53 = vld [vmem:[%s8093_s26 + $0x1000] sm:$0xff]  ;;  %v760_v55 = vld [vmem:[%s8093_s26 + $0x1010] sm:$0xff] }
  0x52   : > { %5712 = vmatpush1.bf16.msra.mxu0 %v5711_v34  ;;  %v822_v54 = vld [vmem:[%s8093_s26 + $0x1200] sm:$0xff]  ;;  %v5783_v56 = vpack.c.bf16 %v825_v49, %v761_v48  ;;  %v824_v57 = vld [vmem:[%s8093_s26 + $0x1210] sm:$0xff]  ;;  %v887_v58 = vld [vmem:[%s8093_s26 + $0x1408] sm:$0xff] }
  0x53   : > { %5778 = vmatpush1.bf16.msra.mxu1 %v5777_v38  ;;  %5714 = vmatprep.subr.bf16.mxu0 %v5713_v39  ;;  %v951_v59 = vld [vmem:[%s8093_s26 + $0x1608] sm:$0xff]  ;;  %v889_v60 = vld [vmem:[%s8093_s26 + $0x1418] sm:$0xff]  ;;  %v5719_v62 = vpack.c.bf16 %v822_v54, %v758_v53  ;;  %v5785_v63 = vpack.c.bf16 %v824_v57, %v760_v55  ;;  %v886_v1 = vld [vmem:[%s8093_s26 + $0x1400] sm:$0xff] }
  0x54   : > { %5780 = vmatprep.subr.bf16.mxu1 %v5779_v43  ;;  %v953_v61 = vld [vmem:[%s8093_s26 + $0x1618] sm:$0xff]  ;;  %v5721_v0 = vpack.c.bf16 %v951_v59, %v887_v58  ;;  %v950_v2 = vld [vmem:[%s8093_s26 + $0x1600] sm:$0xff]  ;;  %v888_v3 = vld [vmem:[%s8093_s26 + $0x1410] sm:$0xff] }
  0x55   : > { %v5787_v4 = vpack.c.bf16 %v953_v61, %v889_v60  ;;  %v952_v5 = vld [vmem:[%s8093_s26 + $0x1610] sm:$0xff]  ;;  %v1015_v6 = vld [vmem:[%s8093_s26 + $0x1808] sm:$0xff]  ;;  %v1017_v8 = vld [vmem:[%s8093_s26 + $0x1818] sm:$0xff]  ;;  %v5723_v10 = vpack.c.bf16 %v950_v2, %v886_v1 }
  0x56   : > { %5716 = vmatpush1.bf16.msra.mxu0 %v5715_v50  ;;  %v1079_v7 = vld [vmem:[%s8093_s26 + $0x1a08] sm:$0xff]  ;;  %v1081_v9 = vld [vmem:[%s8093_s26 + $0x1a18] sm:$0xff]  ;;  %v5789_v11 = vpack.c.bf16 %v952_v5, %v888_v3  ;;  %v1014_v13 = vld [vmem:[%s8093_s26 + $0x1800] sm:$0xff] }
  0x57   : > { %5782 = vmatpush1.bf16.msra.mxu1 %v5781_v51  ;;  %5718 = vmatprep.subr.bf16.mxu0 %v5717_v52  ;;  %v5725_v12 = vpack.c.bf16 %v1079_v7, %v1015_v6  ;;  %v1078_v14 = vld [vmem:[%s8093_s26 + $0x1a00] sm:$0xff]  ;;  %v1016_v15 = vld [vmem:[%s8093_s26 + $0x1810] sm:$0xff]  ;;  %v5791_v16 = vpack.c.bf16 %v1081_v9, %v1017_v8  ;;  %v1143_v18 = vld [vmem:[%s8093_s26 + $0x1c08] sm:$0xff] }
  0x58   : > { %5784 = vmatprep.subr.bf16.mxu1 %v5783_v56  ;;  %v1080_v17 = vld [vmem:[%s8093_s26 + $0x1a10] sm:$0xff]  ;;  %v1207_v19 = vld [vmem:[%s8093_s26 + $0x1e08] sm:$0xff]  ;;  %v1145_v20 = vld [vmem:[%s8093_s26 + $0x1c18] sm:$0xff]  ;;  %v5727_v22 = vpack.c.bf16 %v1078_v14, %v1014_v13 }
  0x59   : > { %v1209_v21 = vld [vmem:[%s8093_s26 + $0x1e18] sm:$0xff]  ;;  %v5793_v23 = vpack.c.bf16 %v1080_v17, %v1016_v15  ;;  %v5729_v24 = vpack.c.bf16 %v1207_v19, %v1143_v18  ;;  %v1142_v25 = vld [vmem:[%s8093_s26 + $0x1c00] sm:$0xff]  ;;  %v1144_v27 = vld [vmem:[%s8093_s26 + $0x1c10] sm:$0xff] }
  0x5a   : > { %5720 = vmatpush1.bf16.msra.mxu0 %v5719_v62  ;;  %v1206_v26 = vld [vmem:[%s8093_s26 + $0x1e00] sm:$0xff]  ;;  %v5795_v28 = vpack.c.bf16 %v1209_v21, %v1145_v20  ;;  %v1208_v29 = vld [vmem:[%s8093_s26 + $0x1e10] sm:$0xff]  ;;  %v1271_v30 = vld [vmem:[%s8093_s26 + $0x2008] sm:$0xff] }
  0x5b   : > { %5786 = vmatpush1.bf16.msra.mxu1 %v5785_v63  ;;  %5722 = vmatprep.subr.bf16.mxu0 %v5721_v0  ;;  %v1335_v31 = vld [vmem:[%s8093_s26 + $0x2208] sm:$0xff]  ;;  %v1273_v32 = vld [vmem:[%s8093_s26 + $0x2018] sm:$0xff]  ;;  %v5731_v34 = vpack.c.bf16 %v1206_v26, %v1142_v25  ;;  %v5797_v35 = vpack.c.bf16 %v1208_v29, %v1144_v27  ;;  %v1270_v37 = vld [vmem:[%s8093_s26 + $0x2000] sm:$0xff] }
  0x5c   : > { %5788 = vmatprep.subr.bf16.mxu1 %v5787_v4  ;;  %v1337_v33 = vld [vmem:[%s8093_s26 + $0x2218] sm:$0xff]  ;;  %v5733_v36 = vpack.c.bf16 %v1335_v31, %v1271_v30  ;;  %v1334_v38 = vld [vmem:[%s8093_s26 + $0x2200] sm:$0xff]  ;;  %v1272_v39 = vld [vmem:[%s8093_s26 + $0x2010] sm:$0xff] }
  0x5d   : > { %v5799_v40 = vpack.c.bf16 %v1337_v33, %v1273_v32  ;;  %v1336_v41 = vld [vmem:[%s8093_s26 + $0x2210] sm:$0xff]  ;;  %v1399_v42 = vld [vmem:[%s8093_s26 + $0x2408] sm:$0xff]  ;;  %v1401_v44 = vld [vmem:[%s8093_s26 + $0x2418] sm:$0xff]  ;;  %v5735_v46 = vpack.c.bf16 %v1334_v38, %v1270_v37 }
  0x5e   : > { %5724 = vmatpush1.bf16.msra.mxu0 %v5723_v10  ;;  %v1463_v43 = vld [vmem:[%s8093_s26 + $0x2608] sm:$0xff]  ;;  %v1465_v45 = vld [vmem:[%s8093_s26 + $0x2618] sm:$0xff]  ;;  %v5801_v47 = vpack.c.bf16 %v1336_v41, %v1272_v39  ;;  %v1398_v49 = vld [vmem:[%s8093_s26 + $0x2400] sm:$0xff] }
  0x5f   : > { %5790 = vmatpush1.bf16.msra.mxu1 %v5789_v11  ;;  %5726 = vmatprep.subr.bf16.mxu0 %v5725_v12  ;;  %v5737_v48 = vpack.c.bf16 %v1463_v43, %v1399_v42  ;;  %v1462_v50 = vld [vmem:[%s8093_s26 + $0x2600] sm:$0xff]  ;;  %v1400_v51 = vld [vmem:[%s8093_s26 + $0x2410] sm:$0xff]  ;;  %v5803_v52 = vpack.c.bf16 %v1465_v45, %v1401_v44  ;;  %v1527_v54 = vld [vmem:[%s8093_s26 + $0x2808] sm:$0xff] }
  0x60   : > { %5792 = vmatprep.subr.bf16.mxu1 %v5791_v16  ;;  %v1464_v53 = vld [vmem:[%s8093_s26 + $0x2610] sm:$0xff]  ;;  %v1591_v55 = vld [vmem:[%s8093_s26 + $0x2a08] sm:$0xff]  ;;  %v1529_v56 = vld [vmem:[%s8093_s26 + $0x2818] sm:$0xff]  ;;  %v5739_v58 = vpack.c.bf16 %v1462_v50, %v1398_v49 }
  0x61   : > { %v1593_v57 = vld [vmem:[%s8093_s26 + $0x2a18] sm:$0xff]  ;;  %v5805_v59 = vpack.c.bf16 %v1464_v53, %v1400_v51  ;;  %v5741_v60 = vpack.c.bf16 %v1591_v55, %v1527_v54  ;;  %v1526_v61 = vld [vmem:[%s8093_s26 + $0x2800] sm:$0xff]  ;;  %v1528_v63 = vld [vmem:[%s8093_s26 + $0x2810] sm:$0xff] }
  0x62   : > { %5728 = vmatpush1.bf16.msra.mxu0 %v5727_v22  ;;  %v1590_v62 = vld [vmem:[%s8093_s26 + $0x2a00] sm:$0xff]  ;;  %v5807_v0 = vpack.c.bf16 %v1593_v57, %v1529_v56  ;;  %v1592_v1 = vld [vmem:[%s8093_s26 + $0x2a10] sm:$0xff]  ;;  %v1655_v2 = vld [vmem:[%s8093_s26 + $0x2c08] sm:$0xff] }
  0x63   : > { %5794 = vmatpush1.bf16.msra.mxu1 %v5793_v23  ;;  %5730 = vmatprep.subr.bf16.mxu0 %v5729_v24  ;;  %v1719_v3 = vld [vmem:[%s8093_s26 + $0x2e08] sm:$0xff]  ;;  %v1657_v4 = vld [vmem:[%s8093_s26 + $0x2c18] sm:$0xff]  ;;  %v5743_v6 = vpack.c.bf16 %v1590_v62, %v1526_v61  ;;  %v5809_v7 = vpack.c.bf16 %v1592_v1, %v1528_v63  ;;  %v1654_v9 = vld [vmem:[%s8093_s26 + $0x2c00] sm:$0xff] }
  0x64   : > { %5796 = vmatprep.subr.bf16.mxu1 %v5795_v28  ;;  %v1721_v5 = vld [vmem:[%s8093_s26 + $0x2e18] sm:$0xff]  ;;  %v5745_v8 = vpack.c.bf16 %v1719_v3, %v1655_v2  ;;  %v1718_v10 = vld [vmem:[%s8093_s26 + $0x2e00] sm:$0xff]  ;;  %v1656_v11 = vld [vmem:[%s8093_s26 + $0x2c10] sm:$0xff] }
  0x65   : > { %v5811_v12 = vpack.c.bf16 %v1721_v5, %v1657_v4  ;;  %v1720_v13 = vld [vmem:[%s8093_s26 + $0x2e10] sm:$0xff]  ;;  %v1783_v14 = vld [vmem:[%s8093_s26 + $0x3008] sm:$0xff]  ;;  %v1785_v16 = vld [vmem:[%s8093_s26 + $0x3018] sm:$0xff]  ;;  %v5747_v19 = vpack.c.bf16 %v1718_v10, %v1654_v9 }
  0x66   : > { %5732 = vmatpush1.bf16.msra.mxu0 %v5731_v34  ;;  %v1847_v15 = vld [vmem:[%s8093_s26 + $0x3208] sm:$0xff]  ;;  %v1849_v17 = vld [vmem:[%s8093_s26 + $0x3218] sm:$0xff]  ;;  %v8202_v18 = vld.sshfl [vmem:[%s10699_s0] sm:$0x33 pattern:$0x76325410]  ;;  %v5813_v21 = vpack.c.bf16 %v1720_v13, %v1656_v11 }
  0x67   : > { %5798 = vmatpush1.bf16.msra.mxu1 %v5797_v35  ;;  %5734 = vmatprep.subr.bf16.mxu0 %v5733_v36  ;;  %v8206_v20 = vcombine.high %v8202_v18, %v8202_v18  ;;  %v5749_v22 = vpack.c.bf16 %v1847_v15, %v1783_v14  ;;  %v1782_v23 = vld [vmem:[%s8093_s26 + $0x3000] sm:$0xff]  ;;  %v1784_v25 = vld [vmem:[%s8093_s26 + $0x3010] sm:$0xff]  ;;  %v5815_v26 = vpack.c.bf16 %v1849_v17, %v1785_v16  ;;  %v1911_v28 = vld [vmem:[%s8093_s26 + $0x3408] sm:$0xff] }
  0x68   : > { %5800 = vmatprep.subr.bf16.mxu1 %v5799_v40  ;;  %v1846_v24 = vld [vmem:[%s8093_s26 + $0x3200] sm:$0xff]  ;;  %v1848_v27 = vld [vmem:[%s8093_s26 + $0x3210] sm:$0xff]  ;;  %v1975_v29 = vld [vmem:[%s8093_s26 + $0x3608] sm:$0xff] }
  0x69   : > { %5594 = vmatprep.mubr.msk.f32.mxu0 %vm2640_vm0, %v8206_v20  ;;  %v1913_v30 = vld [vmem:[%s8093_s26 + $0x3418] sm:$0xff]  ;;  %5597 = vmatprep.mubr.msk.f32.mxu1 %vm2640_vm0, %v8206_v20  ;;  %v5751_v32 = vpack.c.bf16 %v1846_v24, %v1782_v23  ;;  %v5817_v33 = vpack.c.bf16 %v1848_v27, %v1784_v25  ;;  %v5753_v34 = vpack.c.bf16 %v1975_v29, %v1911_v28  ;;  %v1910_v35 = vld [vmem:[%s8093_s26 + $0x3400] sm:$0xff]  ;;  %v1912_v37 = vld [vmem:[%s8093_s26 + $0x3410] sm:$0xff] }
  0x6a   : > { %5736 = vmatpush1.bf16.msra.mxu0 %v5735_v46  ;;  %v1977_v31 = vld [vmem:[%s8093_s26 + $0x3618] sm:$0xff]  ;;  %v1974_v36 = vld [vmem:[%s8093_s26 + $0x3600] sm:$0xff]  ;;  %v1976_v39 = vld [vmem:[%s8093_s26 + $0x3610] sm:$0xff] }
  0x6b   : > { %5802 = vmatpush1.bf16.msra.mxu1 %v5801_v47  ;;  %5738 = vmatprep.subr.bf16.mxu0 %v5737_v48  ;;  %v5819_v38 = vpack.c.bf16 %v1977_v31, %v1913_v30  ;;  %v2039_v40 = vld [vmem:[%s8093_s26 + $0x3808] sm:$0xff]  ;;  %v2041_v42 = vld [vmem:[%s8093_s26 + $0x3818] sm:$0xff]  ;;  %v5755_v44 = vpack.c.bf16 %v1974_v36, %v1910_v35  ;;  %v5821_v45 = vpack.c.bf16 %v1976_v39, %v1912_v37  ;;  %v2038_v47 = vld [vmem:[%s8093_s26 + $0x3800] sm:$0xff] }
  0x6c   : > { %5804 = vmatprep.subr.bf16.mxu1 %v5803_v52  ;;  %v2103_v41 = vld [vmem:[%s8093_s26 + $0x3a08] sm:$0xff]  ;;  %v2105_v43 = vld [vmem:[%s8093_s26 + $0x3a18] sm:$0xff]  ;;  %v2102_v48 = vld [vmem:[%s8093_s26 + $0x3a00] sm:$0xff] }
  0x6d   : > { %v5757_v46 = vpack.c.bf16 %v2103_v41, %v2039_v40  ;;  %v2040_v49 = vld [vmem:[%s8093_s26 + $0x3810] sm:$0xff]  ;;  %v5823_v50 = vpack.c.bf16 %v2105_v43, %v2041_v42  ;;  %v2167_v52 = vld [vmem:[%s8093_s26 + $0x3c08] sm:$0xff]  ;;  %v2169_v54 = vld [vmem:[%s8093_s26 + $0x3c18] sm:$0xff]  ;;  %v5759_v56 = vpack.c.bf16 %v2102_v48, %v2038_v47 }
  0x6e   : > { %5740 = vmatpush1.bf16.msra.mxu0 %v5739_v58  ;;  %v2104_v51 = vld [vmem:[%s8093_s26 + $0x3a10] sm:$0xff]  ;;  %v2231_v53 = vld [vmem:[%s8093_s26 + $0x3e08] sm:$0x3]  ;;  %v2233_v55 = vld [vmem:[%s8093_s26 + $0x3e18] sm:$0x3] }
  0x6f   : > { %5806 = vmatpush1.bf16.msra.mxu1 %v5805_v59  ;;  %5742 = vmatprep.subr.bf16.mxu0 %v5741_v60  ;;  %vm8236_vm3 = vmpackc.low %vm2643_vm1, %vm7962_vm2  ;;  %v5825_v58 = vpack.c.bf16 %v2104_v51, %v2040_v49  ;;  %v5761_v59 = vpack.c.bf16 %v2231_v53, %v2167_v52  ;;  %v2166_v60 = vld [vmem:[%s8093_s26 + $0x3c00] sm:$0xff]  ;;  %v2168_v62 = vld [vmem:[%s8093_s26 + $0x3c10] sm:$0xff]  ;;  %v5827_v63 = vpack.c.bf16 %v2233_v55, %v2169_v54 }
  0x70   : > { %5808 = vmatprep.subr.bf16.mxu1 %v5807_v0  ;;  %v2230_v61 = vld [vmem:[%s8093_s26 + $0x3e00] sm:$0x3]  ;;  %v2232_v0 = vld [vmem:[%s8093_s26 + $0x3e10] sm:$0x3]  ;;  %v251_v1 = vld [vmem:[%s8093_s26 + $0x28] sm:$0xff] }
  0x71   : > { %v315_v2 = vld [vmem:[%s8093_s26 + $0x228] sm:$0xff]  ;;  %v253_v3 = vld [vmem:[%s8093_s26 + $0x38] sm:$0xff]  ;;  %v5764_v5 = vpack.c.bf16 %v2230_v61, %v2166_v60  ;;  %v314_v9 = vld [vmem:[%s8093_s26 + $0x220] sm:$0xff] }
  0x72   : > { %5744 = vmatpush1.bf16.msra.mxu0 %v5743_v6  ;;  %v317_v4 = vld [vmem:[%s8093_s26 + $0x238] sm:$0xff]  ;;  %v5830_v6 = vpack.c.bf16 %v2232_v0, %v2168_v62  ;;  %v252_v10 = vld [vmem:[%s8093_s26 + $0x30] sm:$0xff]  ;;  %v379_v13 = vld [vmem:[%s8093_s26 + $0x428] sm:$0xff] }
  0x73   : > { %5810 = vmatpush1.bf16.msra.mxu1 %v5809_v7  ;;  %5746 = vmatprep.subr.bf16.mxu0 %v5745_v8  ;;  %v5833_v7 = vpack.c.bf16 %v315_v2, %v251_v1  ;;  %v250_v8 = vld [vmem:[%s8093_s26 + $0x20] sm:$0xff]  ;;  %v5899_v11 = vpack.c.bf16 %v317_v4, %v253_v3  ;;  %v443_v14 = vld [vmem:[%s8093_s26 + $0x628] sm:$0xff]  ;;  %v381_v15 = vld [vmem:[%s8093_s26 + $0x438] sm:$0xff] }
  0x74   : > { %5812 = vmatprep.subr.bf16.mxu1 %v5811_v12  ;;  %v316_v12 = vld [vmem:[%s8093_s26 + $0x230] sm:$0xff]  ;;  %v445_v16 = vld [vmem:[%s8093_s26 + $0x638] sm:$0xff]  ;;  %v5835_v17 = vpack.c.bf16 %v314_v9, %v250_v8  ;;  %v442_v23 = vld [vmem:[%s8093_s26 + $0x620] sm:$0xff] }
  0x75   : > { %v380_v24 = vld [vmem:[%s8093_s26 + $0x430] sm:$0xff]  ;;  %v5903_v25 = vpack.c.bf16 %v445_v16, %v381_v15  ;;  %v507_v27 = vld [vmem:[%s8093_s26 + $0x828] sm:$0xff]  ;;  %v509_v29 = vld [vmem:[%s8093_s26 + $0x838] sm:$0xff] }
  0x76   : > { %5748 = vmatpush1.bf16.msra.mxu0 %v5747_v19  ;;  %v5901_v19 = vpack.c.bf16 %v316_v12, %v252_v10  ;;  %v571_v28 = vld [vmem:[%s8093_s26 + $0xa28] sm:$0xff]  ;;  %v573_v30 = vld [vmem:[%s8093_s26 + $0xa38] sm:$0xff]  ;;  %v570_v35 = vld [vmem:[%s8093_s26 + $0xa20] sm:$0xff] }
  0x77   : > { %5814 = vmatpush1.bf16.msra.mxu1 %v5813_v21  ;;  %5750 = vmatprep.subr.bf16.mxu0 %v5749_v22  ;;  %v5837_v21 = vpack.c.bf16 %v443_v14, %v379_v13  ;;  %v378_v22 = vld [vmem:[%s8093_s26 + $0x420] sm:$0xff]  ;;  %v508_v36 = vld [vmem:[%s8093_s26 + $0x830] sm:$0xff]  ;;  %v5907_v37 = vpack.c.bf16 %v573_v30, %v509_v29  ;;  %v635_v39 = vld [vmem:[%s8093_s26 + $0xc28] sm:$0xff] }
  0x78   : > { %5816 = vmatprep.subr.bf16.mxu1 %v5815_v26  ;;  %v444_v26 = vld [vmem:[%s8093_s26 + $0x630] sm:$0xff]  ;;  %v5839_v31 = vpack.c.bf16 %v442_v23, %v378_v22  ;;  %v699_v40 = vld [vmem:[%s8093_s26 + $0xe28] sm:$0xff]  ;;  %v637_v41 = vld [vmem:[%s8093_s26 + $0xc38] sm:$0xff] }
  0x79   : > { %v701_v42 = vld [vmem:[%s8093_s26 + $0xe38] sm:$0xff]  ;;  %v698_v47 = vld [vmem:[%s8093_s26 + $0xe20] sm:$0xff]  ;;  %v636_v48 = vld [vmem:[%s8093_s26 + $0xc30] sm:$0xff] }
  0x7a   : > { %5752 = vmatpush1.bf16.msra.mxu0 %v5751_v32  ;;  %v5905_v32 = vpack.c.bf16 %v444_v26, %v380_v24  ;;  %v5911_v49 = vpack.c.bf16 %v701_v42, %v637_v41  ;;  %v763_v51 = vld [vmem:[%s8093_s26 + $0x1028] sm:$0xff]  ;;  %v765_v53 = vld [vmem:[%s8093_s26 + $0x1038] sm:$0xff]  ;;  %v826_v60 = vld [vmem:[%s8093_s26 + $0x1220] sm:$0xff] }
  0x7b   : > { %5818 = vmatpush1.bf16.msra.mxu1 %v5817_v33  ;;  %5754 = vmatprep.subr.bf16.mxu0 %v5753_v34  ;;  %v5841_v33 = vpack.c.bf16 %v571_v28, %v507_v27  ;;  %v506_v34 = vld [vmem:[%s8093_s26 + $0x820] sm:$0xff]  ;;  %v827_v52 = vld [vmem:[%s8093_s26 + $0x1228] sm:$0xff]  ;;  %v829_v54 = vld [vmem:[%s8093_s26 + $0x1238] sm:$0xff] }
  0x7c   : > { %5820 = vmatprep.subr.bf16.mxu1 %v5819_v38  ;;  %v572_v38 = vld [vmem:[%s8093_s26 + $0xa30] sm:$0xff]  ;;  %v5843_v43 = vpack.c.bf16 %v570_v35, %v506_v34  ;;  %v5915_v62 = vpack.c.bf16 %v829_v54, %v765_v53  ;;  %v891_v0 = vld [vmem:[%s8093_s26 + $0x1428] sm:$0xff]  ;;  %v893_v2 = vld [vmem:[%s8093_s26 + $0x1438] sm:$0xff] }
  0x7d   : > { %v764_v61 = vld [vmem:[%s8093_s26 + $0x1030] sm:$0xff]  ;;  %v955_v1 = vld [vmem:[%s8093_s26 + $0x1628] sm:$0xff]  ;;  %v957_v3 = vld [vmem:[%s8093_s26 + $0x1638] sm:$0xff] }
  0x7e   : > { %5756 = vmatpush1.bf16.msra.mxu0 %v5755_v44  ;;  %v5909_v44 = vpack.c.bf16 %v572_v38, %v508_v36  ;;  %v954_v8 = vld [vmem:[%s8093_s26 + $0x1620] sm:$0xff]  ;;  %v892_v9 = vld [vmem:[%s8093_s26 + $0x1430] sm:$0xff]  ;;  %v5919_v10 = vpack.c.bf16 %v957_v3, %v893_v2  ;;  %v1019_v12 = vld [vmem:[%s8093_s26 + $0x1828] sm:$0xff] }
  0x7f   : > { %5822 = vmatpush1.bf16.msra.mxu1 %v5821_v45  ;;  %5758 = vmatprep.subr.bf16.mxu0 %v5757_v46  ;;  %v5845_v45 = vpack.c.bf16 %v699_v40, %v635_v39  ;;  %v634_v46 = vld [vmem:[%s8093_s26 + $0xc20] sm:$0xff]  ;;  %v1083_v13 = vld [vmem:[%s8093_s26 + $0x1a28] sm:$0xff]  ;;  %v1021_v14 = vld [vmem:[%s8093_s26 + $0x1838] sm:$0xff] }
  0x80   : > { %5824 = vmatprep.subr.bf16.mxu1 %v5823_v50  ;;  %v700_v50 = vld [vmem:[%s8093_s26 + $0xe30] sm:$0xff]  ;;  %v5847_v55 = vpack.c.bf16 %v698_v47, %v634_v46  ;;  %v1085_v15 = vld [vmem:[%s8093_s26 + $0x1a38] sm:$0xff]  ;;  %v1082_v22 = vld [vmem:[%s8093_s26 + $0x1a20] sm:$0xff] }
  0x81   : > { %v1020_v23 = vld [vmem:[%s8093_s26 + $0x1830] sm:$0xff]  ;;  %v5923_v24 = vpack.c.bf16 %v1085_v15, %v1021_v14  ;;  %v1147_v26 = vld [vmem:[%s8093_s26 + $0x1c28] sm:$0xff]  ;;  %v1149_v28 = vld [vmem:[%s8093_s26 + $0x1c38] sm:$0xff] }
  0x82   : > { %5760 = vmatpush1.bf16.msra.mxu0 %v5759_v56  ;;  %v5913_v56 = vpack.c.bf16 %v700_v50, %v636_v48  ;;  %v1211_v27 = vld [vmem:[%s8093_s26 + $0x1e28] sm:$0xff]  ;;  %v1213_v29 = vld [vmem:[%s8093_s26 + $0x1e38] sm:$0xff]  ;;  %v1210_v34 = vld [vmem:[%s8093_s26 + $0x1e20] sm:$0xff] }
  0x83   : > { %5826 = vmatpush1.bf16.msra.mxu1 %v5825_v58  ;;  %5763 = vmatprep.subr.msk.bf16.mxu0 %vm8236_vm3, %v5761_v59  ;;  %v5849_v58 = vpack.c.bf16 %v827_v52, %v763_v51  ;;  %v762_v59 = vld [vmem:[%s8093_s26 + $0x1020] sm:$0xff]  ;;  %v1148_v35 = vld [vmem:[%s8093_s26 + $0x1c30] sm:$0xff]  ;;  %v5927_v36 = vpack.c.bf16 %v1213_v29, %v1149_v28  ;;  %v1275_v38 = vld [vmem:[%s8093_s26 + $0x2028] sm:$0xff] }
  0x84   : > { %5829 = vmatprep.subr.msk.bf16.mxu1 %vm8236_vm3, %v5827_v63  ;;  %v828_v63 = vld [vmem:[%s8093_s26 + $0x1230] sm:$0xff]  ;;  %v5851_v4 = vpack.c.bf16 %v826_v60, %v762_v59  ;;  %v1339_v39 = vld [vmem:[%s8093_s26 + $0x2228] sm:$0xff]  ;;  %v1277_v40 = vld [vmem:[%s8093_s26 + $0x2038] sm:$0xff] }
  0x85   : > { %v1341_v41 = vld [vmem:[%s8093_s26 + $0x2238] sm:$0xff]  ;;  %v1338_v46 = vld [vmem:[%s8093_s26 + $0x2220] sm:$0xff]  ;;  %v1276_v47 = vld [vmem:[%s8093_s26 + $0x2030] sm:$0xff] }
  0x86   : > { %5766 = vmatpush1.bf16.msk.msra.mxu0 %vm8236_vm3, %v5764_v5  ;;  %v5917_v5 = vpack.c.bf16 %v828_v63, %v764_v61  ;;  %v5931_v48 = vpack.c.bf16 %v1341_v41, %v1277_v40  ;;  %v1403_v50 = vld [vmem:[%s8093_s26 + $0x2428] sm:$0xff]  ;;  %v1405_v52 = vld [vmem:[%s8093_s26 + $0x2438] sm:$0xff]  ;;  %v1466_v59 = vld [vmem:[%s8093_s26 + $0x2620] sm:$0xff] }
  0x87   : > { %5832 = vmatpush1.bf16.msk.msra.mxu1 %vm8236_vm3, %v5830_v6  ;;  %5834 = vmatprep.subr.bf16.mxu0 %v5833_v7  ;;  %v5853_v6 = vpack.c.bf16 %v955_v1, %v891_v0  ;;  %v890_v7 = vld [vmem:[%s8093_s26 + $0x1420] sm:$0xff]  ;;  %v1467_v51 = vld [vmem:[%s8093_s26 + $0x2628] sm:$0xff]  ;;  %v1469_v53 = vld [vmem:[%s8093_s26 + $0x2638] sm:$0xff] }
  0x88   : > { %5900 = vmatprep.subr.bf16.mxu1 %v5899_v11  ;;  %v956_v11 = vld [vmem:[%s8093_s26 + $0x1630] sm:$0xff]  ;;  %v5855_v16 = vpack.c.bf16 %v954_v8, %v890_v7  ;;  %v5935_v61 = vpack.c.bf16 %v1469_v53, %v1405_v52  ;;  %v1531_v63 = vld [vmem:[%s8093_s26 + $0x2828] sm:$0xff]  ;;  %v1533_v1 = vld [vmem:[%s8093_s26 + $0x2838] sm:$0xff] }
  0x89   : > { %2901 = vmatmul.mubr.f32.vlgmr.msra.gmra.mrb[0].mxu0 %v8202_v18  ;;  %v1404_v60 = vld [vmem:[%s8093_s26 + $0x2430] sm:$0xff]  ;;  %v1595_v0 = vld [vmem:[%s8093_s26 + $0x2a28] sm:$0xff]  ;;  %v1597_v2 = vld [vmem:[%s8093_s26 + $0x2a38] sm:$0xff] }
  0x8a   : > { %2972 = vmatmul.mubr.f32.vlgmr.msra.gmra.mrb[0].mxu1 %v8202_v18  ;;  %5836 = vmatpush1.bf16.msra.mxu0 %v5835_v17  ;;  %v5921_v17 = vpack.c.bf16 %v956_v11, %v892_v9  ;;  %v1594_v7 = vld [vmem:[%s8093_s26 + $0x2a20] sm:$0xff]  ;;  %v1532_v8 = vld [vmem:[%s8093_s26 + $0x2830] sm:$0xff]  ;;  %v5939_v9 = vpack.c.bf16 %v1597_v2, %v1533_v1  ;;  %v1659_v11 = vld [vmem:[%s8093_s26 + $0x2c28] sm:$0xff] }
  0x8b   : > { %5902 = vmatpush1.bf16.msra.mxu1 %v5901_v19  ;;  %5838 = vmatprep.subr.bf16.mxu0 %v5837_v21  ;;  %v5857_v19 = vpack.c.bf16 %v1083_v13, %v1019_v12  ;;  %v1018_v21 = vld [vmem:[%s8093_s26 + $0x1820] sm:$0xff]  ;;  %v1723_v12 = vld [vmem:[%s8093_s26 + $0x2e28] sm:$0xff]  ;;  %v1661_v13 = vld [vmem:[%s8093_s26 + $0x2c38] sm:$0xff] }
  0x8c   : > { %5904 = vmatprep.subr.bf16.mxu1 %v5903_v25  ;;  %5600 = vmatprep.mubr.msk.f32.mxu0 %vm2640_vm0, %v8206_v20  ;;  %v1084_v25 = vld [vmem:[%s8093_s26 + $0x1a30] sm:$0xff]  ;;  %v5859_v30 = vpack.c.bf16 %v1082_v22, %v1018_v21  ;;  %v1725_v14 = vld [vmem:[%s8093_s26 + $0x2e38] sm:$0xff]  ;;  %v1722_v21 = vld [vmem:[%s8093_s26 + $0x2e20] sm:$0xff] }
  0x8d   : > { %5603 = vmatprep.mubr.msk.f32.mxu1 %vm2640_vm0, %v8206_v20  ;;  %v1660_v22 = vld [vmem:[%s8093_s26 + $0x2c30] sm:$0xff]  ;;  %v1853_v28 = vld [vmem:[%s8093_s26 + $0x3238] sm:$0xff] }
  0x8e   : > { %5840 = vmatpush1.bf16.msra.mxu0 %v5839_v31  ;;  %v5925_v31 = vpack.c.bf16 %v1084_v25, %v1020_v23  ;;  %v5943_v23 = vpack.c.bf16 %v1725_v14, %v1661_v13  ;;  %v1787_v25 = vld [vmem:[%s8093_s26 + $0x3028] sm:$0xff]  ;;  %v1981_v40 = vld [vmem:[%s8093_s26 + $0x3638] sm:$0xff] }
  0x8f   : > { %5906 = vmatpush1.bf16.msra.mxu1 %v5905_v32  ;;  %5842 = vmatprep.subr.bf16.mxu0 %v5841_v33  ;;  %v5861_v32 = vpack.c.bf16 %v1211_v27, %v1147_v26  ;;  %v1146_v33 = vld [vmem:[%s8093_s26 + $0x1c20] sm:$0xff]  ;;  %v1851_v26 = vld [vmem:[%s8093_s26 + $0x3228] sm:$0xff]  ;;  %v1789_v27 = vld [vmem:[%s8093_s26 + $0x3038] sm:$0xff] }
  0x90   : > { %5908 = vmatprep.subr.bf16.mxu1 %v5907_v37  ;;  %v1212_v37 = vld [vmem:[%s8093_s26 + $0x1e30] sm:$0xff]  ;;  %v5863_v42 = vpack.c.bf16 %v1210_v34, %v1146_v33  ;;  %v1850_v33 = vld [vmem:[%s8093_s26 + $0x3220] sm:$0xff]  ;;  %v2109_v52 = vld [vmem:[%s8093_s26 + $0x3a38] sm:$0xff] }
  0x91   : > { %v1788_v34 = vld [vmem:[%s8093_s26 + $0x3030] sm:$0xff]  ;;  %v2237_v1 = vld [vmem:[%s8093_s26 + $0x3e38] sm:$0x3] }
  0x92   : > { %5844 = vmatpush1.bf16.msra.mxu0 %v5843_v43  ;;  %v5929_v43 = vpack.c.bf16 %v1212_v37, %v1148_v35  ;;  %v5947_v35 = vpack.c.bf16 %v1853_v28, %v1789_v27  ;;  %v1915_v37 = vld [vmem:[%s8093_s26 + $0x3428] sm:$0xff]  ;;  %v321_v13 = vld [vmem:[%s8093_s26 + $0x258] sm:$0xff] }
  0x93   : > { %5910 = vmatpush1.bf16.msra.mxu1 %v5909_v44  ;;  %5846 = vmatprep.subr.bf16.mxu0 %v5845_v45  ;;  %v5865_v44 = vpack.c.bf16 %v1339_v39, %v1275_v38  ;;  %v1274_v45 = vld [vmem:[%s8093_s26 + $0x2020] sm:$0xff]  ;;  %v1979_v38 = vld [vmem:[%s8093_s26 + $0x3628] sm:$0xff]  ;;  %v1917_v39 = vld [vmem:[%s8093_s26 + $0x3438] sm:$0xff] }
  0x94   : > { %5912 = vmatprep.subr.bf16.mxu1 %v5911_v49  ;;  %v1340_v49 = vld [vmem:[%s8093_s26 + $0x2230] sm:$0xff]  ;;  %v5867_v54 = vpack.c.bf16 %v1338_v46, %v1274_v45  ;;  %v1978_v45 = vld [vmem:[%s8093_s26 + $0x3620] sm:$0xff]  ;;  %v449_v27 = vld [vmem:[%s8093_s26 + $0x658] sm:$0xff] }
  0x95   : > { %v1916_v46 = vld [vmem:[%s8093_s26 + $0x3430] sm:$0xff] }
  0x96   : > { %5848 = vmatpush1.bf16.msra.mxu0 %v5847_v55  ;;  %v5933_v55 = vpack.c.bf16 %v1340_v49, %v1276_v47  ;;  %v5951_v47 = vpack.c.bf16 %v1981_v40, %v1917_v39  ;;  %v2043_v49 = vld [vmem:[%s8093_s26 + $0x3828] sm:$0xff]  ;;  %v577_v39 = vld [vmem:[%s8093_s26 + $0xa58] sm:$0xff] }
  0x97   : > { %5914 = vmatpush1.bf16.msra.mxu1 %v5913_v56  ;;  %5850 = vmatprep.subr.bf16.mxu0 %v5849_v58  ;;  %v5869_v56 = vpack.c.bf16 %v1467_v51, %v1403_v50  ;;  %v1402_v58 = vld [vmem:[%s8093_s26 + $0x2420] sm:$0xff]  ;;  %v2107_v50 = vld [vmem:[%s8093_s26 + $0x3a28] sm:$0xff]  ;;  %v2045_v51 = vld [vmem:[%s8093_s26 + $0x3838] sm:$0xff] }
  0x98   : > { %5916 = vmatprep.subr.bf16.mxu1 %v5915_v62  ;;  %v1468_v62 = vld [vmem:[%s8093_s26 + $0x2630] sm:$0xff]  ;;  %v5871_v3 = vpack.c.bf16 %v1466_v59, %v1402_v58  ;;  %v2106_v58 = vld [vmem:[%s8093_s26 + $0x3a20] sm:$0xff] }
  0x99   : > { %v2044_v59 = vld [vmem:[%s8093_s26 + $0x3830] sm:$0xff] }
  0x9a   : > { %5852 = vmatpush1.bf16.msra.mxu0 %v5851_v4  ;;  %v5937_v4 = vpack.c.bf16 %v1468_v62, %v1404_v60  ;;  %v5955_v60 = vpack.c.bf16 %v2109_v52, %v2045_v51  ;;  %v2171_v62 = vld [vmem:[%s8093_s26 + $0x3c28] sm:$0xff] }
  0x9b   : > { %5918 = vmatpush1.bf16.msra.mxu1 %v5917_v5  ;;  %5854 = vmatprep.subr.bf16.mxu0 %v5853_v6  ;;  %v5873_v5 = vpack.c.bf16 %v1595_v0, %v1531_v63  ;;  %v1530_v6 = vld [vmem:[%s8093_s26 + $0x2820] sm:$0xff]  ;;  %v2235_v63 = vld [vmem:[%s8093_s26 + $0x3e28] sm:$0x3]  ;;  %v2173_v0 = vld [vmem:[%s8093_s26 + $0x3c38] sm:$0xff] }
  0x9c   : > { %5920 = vmatprep.subr.bf16.mxu1 %v5919_v10  ;;  %v1596_v10 = vld [vmem:[%s8093_s26 + $0x2a30] sm:$0xff]  ;;  %v5875_v15 = vpack.c.bf16 %v1594_v7, %v1530_v6  ;;  %v2234_v6 = vld [vmem:[%s8093_s26 + $0x3e20] sm:$0x3] }
  0x9d   : > { %v2172_v7 = vld [vmem:[%s8093_s26 + $0x3c30] sm:$0xff] }
  0x9e   : > { %5856 = vmatpush1.bf16.msra.mxu0 %v5855_v16  ;;  %v5941_v16 = vpack.c.bf16 %v1596_v10, %v1532_v8  ;;  %v5959_v8 = vpack.c.bf16 %v2237_v1, %v2173_v0  ;;  %v255_v10 = vld [vmem:[%s8093_s26 + $0x48] sm:$0xff] }
  0x9f   : > { %5922 = vmatpush1.bf16.msra.mxu1 %v5921_v17  ;;  %5858 = vmatprep.subr.bf16.mxu0 %v5857_v19  ;;  %v5877_v17 = vpack.c.bf16 %v1723_v12, %v1659_v11  ;;  %v1658_v19 = vld [vmem:[%s8093_s26 + $0x2c20] sm:$0xff]  ;;  %v319_v11 = vld [vmem:[%s8093_s26 + $0x248] sm:$0xff]  ;;  %v257_v12 = vld [vmem:[%s8093_s26 + $0x58] sm:$0xff] }
  0xa0   : > { %5924 = vmatprep.subr.bf16.mxu1 %v5923_v24  ;;  %v1724_v24 = vld [vmem:[%s8093_s26 + $0x2e30] sm:$0xff]  ;;  %v5879_v29 = vpack.c.bf16 %v1722_v21, %v1658_v19  ;;  %v318_v19 = vld [vmem:[%s8093_s26 + $0x240] sm:$0xff] }
  0xa1   : > { %v256_v21 = vld [vmem:[%s8093_s26 + $0x50] sm:$0xff] }
  0xa2   : > { %5860 = vmatpush1.bf16.msra.mxu0 %v5859_v30  ;;  %v5945_v30 = vpack.c.bf16 %v1724_v24, %v1660_v22  ;;  %v6031_v22 = vpack.c.bf16 %v321_v13, %v257_v12  ;;  %v383_v24 = vld [vmem:[%s8093_s26 + $0x448] sm:$0xff] }
  0xa3   : > { %5926 = vmatpush1.bf16.msra.mxu1 %v5925_v31  ;;  %5862 = vmatprep.subr.bf16.mxu0 %v5861_v32  ;;  %v5881_v31 = vpack.c.bf16 %v1851_v26, %v1787_v25  ;;  %v1786_v32 = vld [vmem:[%s8093_s26 + $0x3020] sm:$0xff]  ;;  %v447_v25 = vld [vmem:[%s8093_s26 + $0x648] sm:$0xff]  ;;  %v385_v26 = vld [vmem:[%s8093_s26 + $0x458] sm:$0xff] }
  0xa4   : > { %5928 = vmatprep.subr.bf16.mxu1 %v5927_v36  ;;  %v1852_v36 = vld [vmem:[%s8093_s26 + $0x3230] sm:$0xff]  ;;  %v5883_v41 = vpack.c.bf16 %v1850_v33, %v1786_v32  ;;  %v446_v32 = vld [vmem:[%s8093_s26 + $0x640] sm:$0xff] }
  0xa5   : > { %v384_v33 = vld [vmem:[%s8093_s26 + $0x450] sm:$0xff] }
  0xa6   : > { %5864 = vmatpush1.bf16.msra.mxu0 %v5863_v42  ;;  %v5949_v42 = vpack.c.bf16 %v1852_v36, %v1788_v34  ;;  %v6035_v34 = vpack.c.bf16 %v449_v27, %v385_v26  ;;  %v511_v36 = vld [vmem:[%s8093_s26 + $0x848] sm:$0xff] }
  0xa7   : > { %5930 = vmatpush1.bf16.msra.mxu1 %v5929_v43  ;;  %5866 = vmatprep.subr.bf16.mxu0 %v5865_v44  ;;  %v5885_v43 = vpack.c.bf16 %v1979_v38, %v1915_v37  ;;  %v1914_v44 = vld [vmem:[%s8093_s26 + $0x3420] sm:$0xff]  ;;  %v575_v37 = vld [vmem:[%s8093_s26 + $0xa48] sm:$0xff]  ;;  %v513_v38 = vld [vmem:[%s8093_s26 + $0x858] sm:$0xff] }
  0xa8   : > { %5932 = vmatprep.subr.bf16.mxu1 %v5931_v48  ;;  %v1980_v48 = vld [vmem:[%s8093_s26 + $0x3630] sm:$0xff]  ;;  %v5887_v53 = vpack.c.bf16 %v1978_v45, %v1914_v44  ;;  %v574_v44 = vld [vmem:[%s8093_s26 + $0xa40] sm:$0xff] }
  0xa9   : > { %v512_v45 = vld [vmem:[%s8093_s26 + $0x850] sm:$0xff] }
  0xaa   : > { %5868 = vmatpush1.bf16.msra.mxu0 %v5867_v54  ;;  %v5953_v54 = vpack.c.bf16 %v1980_v48, %v1916_v46  ;;  %v6039_v46 = vpack.c.bf16 %v577_v39, %v513_v38  ;;  %v639_v48 = vld [vmem:[%s8093_s26 + $0xc48] sm:$0xff] }
  0xab   : > { %5934 = vmatpush1.bf16.msra.mxu1 %v5933_v55  ;;  %5870 = vmatprep.subr.bf16.mxu0 %v5869_v56  ;;  %v5889_v55 = vpack.c.bf16 %v2107_v50, %v2043_v49  ;;  %v2042_v56 = vld [vmem:[%s8093_s26 + $0x3820] sm:$0xff]  ;;  %v703_v49 = vld [vmem:[%s8093_s26 + $0xe48] sm:$0xff]  ;;  %v705_v50 = vld [vmem:[%s8093_s26 + $0xe58] sm:$0xff] }
  0xac   : > { %5936 = vmatprep.subr.bf16.mxu1 %v5935_v61  ;;  %v2108_v61 = vld [vmem:[%s8093_s26 + $0x3a30] sm:$0xff]  ;;  %v5891_v2 = vpack.c.bf16 %v2106_v58, %v2042_v56 }
  0xad   : > { %v640_v56 = vld [vmem:[%s8093_s26 + $0xc50] sm:$0xff] }
  0xae   : > { %5872 = vmatpush1.bf16.msra.mxu0 %v5871_v3  ;;  %v5957_v3 = vpack.c.bf16 %v2108_v61, %v2044_v59  ;;  %v704_v59 = vld [vmem:[%s8093_s26 + $0xe50] sm:$0xff]  ;;  %v831_v61 = vld [vmem:[%s8093_s26 + $0x1248] sm:$0xff] }
  0xaf   : > { %5938 = vmatpush1.bf16.msra.mxu1 %v5937_v4  ;;  %5874 = vmatprep.subr.bf16.mxu0 %v5873_v5  ;;  %v5893_v4 = vpack.c.bf16 %v2235_v63, %v2171_v62  ;;  %v2170_v5 = vld [vmem:[%s8093_s26 + $0x3c20] sm:$0xff]  ;;  %v769_v62 = vld [vmem:[%s8093_s26 + $0x1058] sm:$0xff]  ;;  %v6045_v1 = vpack.c.bf16 %v704_v59, %v640_v56  ;;  %v1344_v56 = vld [vmem:[%s8093_s26 + $0x2250] sm:$0xff] }
  0xb0   : > { %5940 = vmatprep.subr.bf16.mxu1 %v5939_v9  ;;  %v2236_v9 = vld [vmem:[%s8093_s26 + $0x3e30] sm:$0x3]  ;;  %v5896_v14 = vpack.c.bf16 %v2234_v6, %v2170_v5  ;;  %v833_v63 = vld [vmem:[%s8093_s26 + $0x1258] sm:$0xff]  ;;  %v1471_v59 = vld [vmem:[%s8093_s26 + $0x2648] sm:$0xff] }
  0xb1   : > { %v768_v5 = vld [vmem:[%s8093_s26 + $0x1050] sm:$0xff]  ;;  %v6047_v6 = vpack.c.bf16 %v833_v63, %v769_v62 }
  0xb2   : > { %5876 = vmatpush1.bf16.msra.mxu0 %v5875_v15  ;;  %v5962_v15 = vpack.c.bf16 %v2236_v9, %v2172_v7  ;;  %v832_v7 = vld [vmem:[%s8093_s26 + $0x1250] sm:$0xff]  ;;  %v959_v9 = vld [vmem:[%s8093_s26 + $0x1648] sm:$0xff] }
  0xb3   : > { %5942 = vmatpush1.bf16.msra.mxu1 %v5941_v16  ;;  %5878 = vmatprep.subr.bf16.mxu0 %v5877_v17  ;;  %v5965_v16 = vpack.c.bf16 %v319_v11, %v255_v10  ;;  %v254_v17 = vld [vmem:[%s8093_s26 + $0x40] sm:$0xff]  ;;  %v897_v10 = vld [vmem:[%s8093_s26 + $0x1458] sm:$0xff]  ;;  %v6049_v13 = vpack.c.bf16 %v832_v7, %v768_v5  ;;  %v1472_v5 = vld [vmem:[%s8093_s26 + $0x2650] sm:$0xff] }
  0xb4   : > { %5944 = vmatprep.subr.bf16.mxu1 %v5943_v23  ;;  %v320_v23 = vld [vmem:[%s8093_s26 + $0x250] sm:$0xff]  ;;  %v5967_v28 = vpack.c.bf16 %v318_v19, %v254_v17  ;;  %v961_v11 = vld [vmem:[%s8093_s26 + $0x1658] sm:$0xff]  ;;  %v1599_v7 = vld [vmem:[%s8093_s26 + $0x2a48] sm:$0xff] }
  0xb5   : > { %v896_v17 = vld [vmem:[%s8093_s26 + $0x1450] sm:$0xff]  ;;  %v6051_v19 = vpack.c.bf16 %v961_v11, %v897_v10 }
  0xb6   : > { %5880 = vmatpush1.bf16.msra.mxu0 %v5879_v29  ;;  %v6033_v29 = vpack.c.bf16 %v320_v23, %v256_v21  ;;  %v960_v21 = vld [vmem:[%s8093_s26 + $0x1650] sm:$0xff]  ;;  %v1087_v23 = vld [vmem:[%s8093_s26 + $0x1a48] sm:$0xff] }
  0xb7   : > { %5946 = vmatpush1.bf16.msra.mxu1 %v5945_v30  ;;  %5882 = vmatprep.subr.bf16.mxu0 %v5881_v31  ;;  %v5969_v30 = vpack.c.bf16 %v447_v25, %v383_v24  ;;  %v382_v31 = vld [vmem:[%s8093_s26 + $0x440] sm:$0xff]  ;;  %v1025_v24 = vld [vmem:[%s8093_s26 + $0x1858] sm:$0xff]  ;;  %v6053_v27 = vpack.c.bf16 %v960_v21, %v896_v17  ;;  %v1600_v17 = vld [vmem:[%s8093_s26 + $0x2a50] sm:$0xff] }
  0xb8   : > { %5948 = vmatprep.subr.bf16.mxu1 %v5947_v35  ;;  %v448_v35 = vld [vmem:[%s8093_s26 + $0x650] sm:$0xff]  ;;  %v5971_v40 = vpack.c.bf16 %v446_v32, %v382_v31  ;;  %v1089_v25 = vld [vmem:[%s8093_s26 + $0x1a58] sm:$0xff]  ;;  %v1727_v21 = vld [vmem:[%s8093_s26 + $0x2e48] sm:$0xff] }
  0xb9   : > { %v1024_v31 = vld [vmem:[%s8093_s26 + $0x1850] sm:$0xff]  ;;  %v6055_v32 = vpack.c.bf16 %v1089_v25, %v1025_v24 }
  0xba   : > { %5884 = vmatpush1.bf16.msra.mxu0 %v5883_v41  ;;  %v6037_v41 = vpack.c.bf16 %v448_v35, %v384_v33  ;;  %v1088_v33 = vld [vmem:[%s8093_s26 + $0x1a50] sm:$0xff]  ;;  %v1215_v35 = vld [vmem:[%s8093_s26 + $0x1e48] sm:$0xff] }
  0xbb   : > { %5950 = vmatpush1.bf16.msra.mxu1 %v5949_v42  ;;  %5886 = vmatprep.subr.bf16.mxu0 %v5885_v43  ;;  %v5973_v42 = vpack.c.bf16 %v575_v37, %v511_v36  ;;  %v510_v43 = vld [vmem:[%s8093_s26 + $0x840] sm:$0xff]  ;;  %v1153_v36 = vld [vmem:[%s8093_s26 + $0x1c58] sm:$0xff]  ;;  %v6057_v39 = vpack.c.bf16 %v1088_v33, %v1024_v31  ;;  %v1728_v31 = vld [vmem:[%s8093_s26 + $0x2e50] sm:$0xff] }
  0xbc   : > { %5952 = vmatprep.subr.bf16.mxu1 %v5951_v47  ;;  %v576_v47 = vld [vmem:[%s8093_s26 + $0xa50] sm:$0xff]  ;;  %v5975_v51 = vpack.c.bf16 %v574_v44, %v510_v43  ;;  %v1217_v37 = vld [vmem:[%s8093_s26 + $0x1e58] sm:$0xff]  ;;  %v1855_v33 = vld [vmem:[%s8093_s26 + $0x3248] sm:$0xff] }
  0xbd   : > { %v6041_v52 = vpack.c.bf16 %v576_v47, %v512_v45  ;;  %v1152_v43 = vld [vmem:[%s8093_s26 + $0x1c50] sm:$0xff]  ;;  %v6059_v44 = vpack.c.bf16 %v1217_v37, %v1153_v36  ;;  %v1343_v47 = vld [vmem:[%s8093_s26 + $0x2248] sm:$0xff] }
  0xbe   : > { %5888 = vmatpush1.bf16.msra.mxu0 %v5887_v53  ;;  %v5977_v53 = vpack.c.bf16 %v703_v49, %v639_v48  ;;  %v1216_v45 = vld [vmem:[%s8093_s26 + $0x1e50] sm:$0xff]  ;;  %v1281_v48 = vld [vmem:[%s8093_s26 + $0x2058] sm:$0xff] }
  0xbf   : > { %5954 = vmatpush1.bf16.msra.mxu1 %v5953_v54  ;;  %5890 = vmatprep.subr.bf16.mxu0 %v5889_v55  ;;  %v638_v54 = vld [vmem:[%s8093_s26 + $0xc40] sm:$0xff]  ;;  %v1345_v49 = vld [vmem:[%s8093_s26 + $0x2258] sm:$0xff] }
  0xc0   : > { %5956 = vmatprep.subr.bf16.mxu1 %v5955_v60  ;;  %v702_v55 = vld [vmem:[%s8093_s26 + $0xe40] sm:$0xff]  ;;  %v767_v60 = vld [vmem:[%s8093_s26 + $0x1048] sm:$0xff] }
  0xc1   : > { %v5979_v0 = vpack.c.bf16 %v702_v55, %v638_v54  ;;  %v1280_v54 = vld [vmem:[%s8093_s26 + $0x2050] sm:$0xff]  ;;  %v6063_v55 = vpack.c.bf16 %v1345_v49, %v1281_v48 }
  0xc2   : > { %5892 = vmatpush1.bf16.msra.mxu0 %v5891_v2  ;;  %v5981_v2 = vpack.c.bf16 %v831_v61, %v767_v60  ;;  %v1409_v60 = vld [vmem:[%s8093_s26 + $0x2458] sm:$0xff]  ;;  %v6065_v63 = vpack.c.bf16 %v1344_v56, %v1280_v54  ;;  %v1984_v54 = vld [vmem:[%s8093_s26 + $0x3650] sm:$0xff]  ;;  %v2111_v56 = vld [vmem:[%s8093_s26 + $0x3a48] sm:$0xff] }
  0xc3   : > { %5958 = vmatpush1.bf16.msra.mxu1 %v5957_v3  ;;  %5895 = vmatprep.subr.msk.bf16.mxu0 %vm8236_vm3, %v5893_v4  ;;  %v766_v3 = vld [vmem:[%s8093_s26 + $0x1040] sm:$0xff]  ;;  %v1473_v61 = vld [vmem:[%s8093_s26 + $0x2658] sm:$0xff] }
  0xc4   : > { %5961 = vmatprep.subr.msk.bf16.mxu1 %vm8236_vm3, %v5959_v8  ;;  %v830_v4 = vld [vmem:[%s8093_s26 + $0x1240] sm:$0xff]  ;;  %v895_v8 = vld [vmem:[%s8093_s26 + $0x1448] sm:$0xff] }
  0xc5   : > { %v5983_v12 = vpack.c.bf16 %v830_v4, %v766_v3  ;;  %v1408_v3 = vld [vmem:[%s8093_s26 + $0x2450] sm:$0xff]  ;;  %v6067_v4 = vpack.c.bf16 %v1473_v61, %v1409_v60 }
  0xc6   : > { %5898 = vmatpush1.bf16.msk.msra.mxu0 %vm8236_vm3, %v5896_v14  ;;  %v5985_v14 = vpack.c.bf16 %v959_v9, %v895_v8  ;;  %v1537_v8 = vld [vmem:[%s8093_s26 + $0x2858] sm:$0xff]  ;;  %v6069_v11 = vpack.c.bf16 %v1472_v5, %v1408_v3  ;;  %v2112_v3 = vld [vmem:[%s8093_s26 + $0x3a50] sm:$0xff]  ;;  %v2239_v5 = vld [vmem:[%s8093_s26 + $0x3e48] sm:$0x3] }
  0xc7   : > { %5964 = vmatpush1.bf16.msk.msra.mxu1 %vm8236_vm3, %v5962_v15  ;;  %5966 = vmatprep.subr.bf16.mxu0 %v5965_v16  ;;  %v894_v15 = vld [vmem:[%s8093_s26 + $0x1440] sm:$0xff]  ;;  %v1601_v9 = vld [vmem:[%s8093_s26 + $0x2a58] sm:$0xff] }
  0xc8   : > { %6032 = vmatprep.subr.bf16.mxu1 %v6031_v22  ;;  %v958_v16 = vld [vmem:[%s8093_s26 + $0x1640] sm:$0xff]  ;;  %v1023_v22 = vld [vmem:[%s8093_s26 + $0x1848] sm:$0xff] }
  0xc9   : > { %3043 = vmatmul.mubr.f32.vlgmr.msra.gmra.mrb[2].mxu0 %v8202_v18  ;;  %v5987_v26 = vpack.c.bf16 %v958_v16, %v894_v15  ;;  %v1536_v15 = vld [vmem:[%s8093_s26 + $0x2850] sm:$0xff]  ;;  %v6071_v16 = vpack.c.bf16 %v1601_v9, %v1537_v8 }
  0xca   : > { %3114 = vmatmul.mubr.f32.vlgmr.msra.gmra.mrb[2].mxu1 %v8202_v18  ;;  %5968 = vmatpush1.bf16.msra.mxu0 %v5967_v28  ;;  %v641_v18 = vld [vmem:[%s8093_s26 + $0xc58] sm:$0xff]  ;;  %v5989_v28 = vpack.c.bf16 %v1087_v23, %v1023_v22  ;;  %v6073_v25 = vpack.c.bf16 %v1600_v17, %v1536_v15  ;;  %v2240_v15 = vld [vmem:[%s8093_s26 + $0x3e50] sm:$0x3]  ;;  %v323_v17 = vld [vmem:[%s8093_s26 + $0x268] sm:$0xff] }
  0xcb   : > { %6034 = vmatpush1.bf16.msra.mxu1 %v6033_v29  ;;  %5970 = vmatprep.subr.bf16.mxu0 %v5969_v30  ;;  %v6043_v58 = vpack.c.bf16 %v705_v50, %v641_v18  ;;  %v1022_v29 = vld [vmem:[%s8093_s26 + $0x1840] sm:$0xff]  ;;  %v6061_v50 = vpack.c.bf16 %v1216_v45, %v1152_v43  ;;  %v1665_v22 = vld [vmem:[%s8093_s26 + $0x2c58] sm:$0xff]  ;;  %v1856_v43 = vld [vmem:[%s8093_s26 + $0x3250] sm:$0xff] }
  0xcc   : > { %6036 = vmatprep.subr.bf16.mxu1 %v6035_v34  ;;  %5606 = vmatprep.mubr.msk.f32.mxu0 %vm2640_vm0, %v8206_v20  ;;  %v1086_v30 = vld [vmem:[%s8093_s26 + $0x1a40] sm:$0xff]  ;;  %v1151_v34 = vld [vmem:[%s8093_s26 + $0x1c48] sm:$0xff]  ;;  %v1729_v23 = vld [vmem:[%s8093_s26 + $0x2e58] sm:$0xff] }
  0xcd   : > { %5609 = vmatprep.mubr.msk.f32.mxu1 %vm2640_vm0, %v8206_v20  ;;  %v5991_v38 = vpack.c.bf16 %v1086_v30, %v1022_v29  ;;  %v1664_v29 = vld [vmem:[%s8093_s26 + $0x2c50] sm:$0xff]  ;;  %v6075_v30 = vpack.c.bf16 %v1729_v23, %v1665_v22  ;;  %v1983_v45 = vld [vmem:[%s8093_s26 + $0x3648] sm:$0xff] }
  0xce   : > { %5972 = vmatpush1.bf16.msra.mxu0 %v5971_v40  ;;  %v5993_v40 = vpack.c.bf16 %v1215_v35, %v1151_v34  ;;  %v1793_v34 = vld [vmem:[%s8093_s26 + $0x3058] sm:$0xff]  ;;  %v6077_v37 = vpack.c.bf16 %v1728_v31, %v1664_v29  ;;  %v324_v29 = vld [vmem:[%s8093_s26 + $0x270] sm:$0xff]  ;;  %v451_v31 = vld [vmem:[%s8093_s26 + $0x668] sm:$0xff] }
  0xcf   : > { %6038 = vmatpush1.bf16.msra.mxu1 %v6037_v41  ;;  %5974 = vmatprep.subr.bf16.mxu0 %v5973_v42  ;;  %v1150_v41 = vld [vmem:[%s8093_s26 + $0x1c40] sm:$0xff]  ;;  %v1857_v35 = vld [vmem:[%s8093_s26 + $0x3258] sm:$0xff] }
  0xd0   : > { %6040 = vmatprep.subr.bf16.mxu1 %v6039_v46  ;;  %v1214_v42 = vld [vmem:[%s8093_s26 + $0x1e40] sm:$0xff]  ;;  %v1279_v46 = vld [vmem:[%s8093_s26 + $0x2048] sm:$0xff] }
  0xd1   : > { %v5995_v18 = vpack.c.bf16 %v1214_v42, %v1150_v41  ;;  %v1792_v41 = vld [vmem:[%s8093_s26 + $0x3050] sm:$0xff]  ;;  %v6079_v42 = vpack.c.bf16 %v1857_v35, %v1793_v34 }
  0xd2   : > { %5976 = vmatpush1.bf16.msra.mxu0 %v5975_v51  ;;  %v5997_v51 = vpack.c.bf16 %v1343_v47, %v1279_v46  ;;  %v1921_v46 = vld [vmem:[%s8093_s26 + $0x3458] sm:$0xff]  ;;  %v6081_v49 = vpack.c.bf16 %v1856_v43, %v1792_v41  ;;  %v452_v41 = vld [vmem:[%s8093_s26 + $0x670] sm:$0xff]  ;;  %v579_v43 = vld [vmem:[%s8093_s26 + $0xa68] sm:$0xff] }
  0xd3   : > { %6042 = vmatpush1.bf16.msra.mxu1 %v6041_v52  ;;  %5978 = vmatprep.subr.bf16.mxu0 %v5977_v53  ;;  %v1278_v52 = vld [vmem:[%s8093_s26 + $0x2040] sm:$0xff]  ;;  %v1985_v47 = vld [vmem:[%s8093_s26 + $0x3658] sm:$0xff] }
  0xd4   : > { %6044 = vmatprep.subr.bf16.mxu1 %v6043_v58  ;;  %v1342_v53 = vld [vmem:[%s8093_s26 + $0x2240] sm:$0xff]  ;;  %v1407_v58 = vld [vmem:[%s8093_s26 + $0x2448] sm:$0xff] }
  0xd5   : > { %v5999_v62 = vpack.c.bf16 %v1342_v53, %v1278_v52  ;;  %v1920_v52 = vld [vmem:[%s8093_s26 + $0x3450] sm:$0xff]  ;;  %v6083_v53 = vpack.c.bf16 %v1985_v47, %v1921_v46  ;;  %v581_v46 = vld [vmem:[%s8093_s26 + $0xa78] sm:$0xff] }
  0xd6   : > { %5980 = vmatpush1.bf16.msra.mxu0 %v5979_v0  ;;  %v6001_v0 = vpack.c.bf16 %v1471_v59, %v1407_v58  ;;  %v2049_v58 = vld [vmem:[%s8093_s26 + $0x3858] sm:$0xff]  ;;  %v6085_v61 = vpack.c.bf16 %v1984_v54, %v1920_v52  ;;  %v643_v54 = vld [vmem:[%s8093_s26 + $0xc68] sm:$0xff] }
  0xd7   : > { %6046 = vmatpush1.bf16.msra.mxu1 %v6045_v1  ;;  %5982 = vmatprep.subr.bf16.mxu0 %v5981_v2  ;;  %v1406_v1 = vld [vmem:[%s8093_s26 + $0x2440] sm:$0xff]  ;;  %v2113_v59 = vld [vmem:[%s8093_s26 + $0x3a58] sm:$0xff] }
  0xd8   : > { %6048 = vmatprep.subr.bf16.mxu1 %v6047_v6  ;;  %v1470_v2 = vld [vmem:[%s8093_s26 + $0x2640] sm:$0xff]  ;;  %v1535_v6 = vld [vmem:[%s8093_s26 + $0x2848] sm:$0xff] }
  0xd9   : > { %v6003_v10 = vpack.c.bf16 %v1470_v2, %v1406_v1  ;;  %v2048_v1 = vld [vmem:[%s8093_s26 + $0x3850] sm:$0xff]  ;;  %v6087_v2 = vpack.c.bf16 %v2113_v59, %v2049_v58  ;;  %v709_v58 = vld [vmem:[%s8093_s26 + $0xe78] sm:$0xff] }
  0xda   : > { %5984 = vmatpush1.bf16.msra.mxu0 %v5983_v12  ;;  %v6005_v12 = vpack.c.bf16 %v1599_v7, %v1535_v6  ;;  %v2177_v6 = vld [vmem:[%s8093_s26 + $0x3c58] sm:$0xff]  ;;  %v6089_v9 = vpack.c.bf16 %v2112_v3, %v2048_v1  ;;  %v771_v3 = vld [vmem:[%s8093_s26 + $0x1068] sm:$0xff] }
  0xdb   : > { %6050 = vmatpush1.bf16.msra.mxu1 %v6049_v13  ;;  %5986 = vmatprep.subr.bf16.mxu0 %v5985_v14  ;;  %v1534_v13 = vld [vmem:[%s8093_s26 + $0x2840] sm:$0xff]  ;;  %v2241_v7 = vld [vmem:[%s8093_s26 + $0x3e58] sm:$0x3] }
  0xdc   : > { %6052 = vmatprep.subr.bf16.mxu1 %v6051_v19  ;;  %v1598_v14 = vld [vmem:[%s8093_s26 + $0x2a40] sm:$0xff]  ;;  %v1663_v19 = vld [vmem:[%s8093_s26 + $0x2c48] sm:$0xff] }
  0xdd   : > { %v6007_v24 = vpack.c.bf16 %v1598_v14, %v1534_v13  ;;  %v2176_v13 = vld [vmem:[%s8093_s26 + $0x3c50] sm:$0xff]  ;;  %v6091_v14 = vpack.c.bf16 %v2241_v7, %v2177_v6  ;;  %v837_v6 = vld [vmem:[%s8093_s26 + $0x1278] sm:$0xff] }
  0xde   : > { %5988 = vmatpush1.bf16.msra.mxu0 %v5987_v26  ;;  %v6009_v26 = vpack.c.bf16 %v1727_v21, %v1663_v19  ;;  %v261_v19 = vld [vmem:[%s8093_s26 + $0x78] sm:$0xff]  ;;  %v6094_v23 = vpack.c.bf16 %v2240_v15, %v2176_v13  ;;  %v899_v15 = vld [vmem:[%s8093_s26 + $0x1468] sm:$0xff] }
  0xdf   : > { %6054 = vmatpush1.bf16.msra.mxu1 %v6053_v27  ;;  %5990 = vmatprep.subr.bf16.mxu0 %v5989_v28  ;;  %v1662_v27 = vld [vmem:[%s8093_s26 + $0x2c40] sm:$0xff]  ;;  %v325_v21 = vld [vmem:[%s8093_s26 + $0x278] sm:$0xff] }
  0xe0   : > { %6056 = vmatprep.subr.bf16.mxu1 %v6055_v32  ;;  %v1726_v28 = vld [vmem:[%s8093_s26 + $0x2e40] sm:$0xff]  ;;  %v1791_v32 = vld [vmem:[%s8093_s26 + $0x3048] sm:$0xff] }
  0xe1   : > { %v6011_v36 = vpack.c.bf16 %v1726_v28, %v1662_v27  ;;  %v260_v27 = vld [vmem:[%s8093_s26 + $0x70] sm:$0xff]  ;;  %v6163_v28 = vpack.c.bf16 %v325_v21, %v261_v19  ;;  %v965_v19 = vld [vmem:[%s8093_s26 + $0x1678] sm:$0xff] }
  0xe2   : > { %5992 = vmatpush1.bf16.msra.mxu0 %v5991_v38  ;;  %v6013_v38 = vpack.c.bf16 %v1855_v33, %v1791_v32  ;;  %v389_v32 = vld [vmem:[%s8093_s26 + $0x478] sm:$0xff]  ;;  %v6165_v35 = vpack.c.bf16 %v324_v29, %v260_v27  ;;  %v1027_v29 = vld [vmem:[%s8093_s26 + $0x1868] sm:$0xff] }
  0xe3   : > { %6058 = vmatpush1.bf16.msra.mxu1 %v6057_v39  ;;  %5994 = vmatprep.subr.bf16.mxu0 %v5993_v40  ;;  %v1790_v39 = vld [vmem:[%s8093_s26 + $0x3040] sm:$0xff]  ;;  %v453_v33 = vld [vmem:[%s8093_s26 + $0x678] sm:$0xff] }
  0xe4   : > { %6060 = vmatprep.subr.bf16.mxu1 %v6059_v44  ;;  %v1854_v40 = vld [vmem:[%s8093_s26 + $0x3240] sm:$0xff]  ;;  %v1919_v44 = vld [vmem:[%s8093_s26 + $0x3448] sm:$0xff] }
  0xe5   : > { %v6015_v48 = vpack.c.bf16 %v1854_v40, %v1790_v39  ;;  %v388_v39 = vld [vmem:[%s8093_s26 + $0x470] sm:$0xff]  ;;  %v6167_v40 = vpack.c.bf16 %v453_v33, %v389_v32  ;;  %v1093_v32 = vld [vmem:[%s8093_s26 + $0x1a78] sm:$0xff] }
  0xe6   : > { %5996 = vmatpush1.bf16.msra.mxu0 %v5995_v18  ;;  %v6017_v18 = vpack.c.bf16 %v1983_v45, %v1919_v44  ;;  %v8557_v44 = vld.sshfl [vmem:[%s10699_s0] sm:$0x33 pattern:$0x76325410]  ;;  %v517_v45 = vld [vmem:[%s8093_s26 + $0x878] sm:$0xff] }
  0xe7   : > { %6062 = vmatpush1.bf16.msra.mxu1 %v6061_v50  ;;  %5998 = vmatprep.subr.bf16.mxu0 %v5997_v51  ;;  %v1918_v50 = vld [vmem:[%s8093_s26 + $0x3440] sm:$0xff]  ;;  %v6171_v52 = vpack.c.bf16 %v581_v46, %v517_v45  ;;  %v1221_v45 = vld [vmem:[%s8093_s26 + $0x1e78] sm:$0xff] }
  0xe8   : > { %6064 = vmatprep.subr.bf16.mxu1 %v6063_v55  ;;  %v1982_v51 = vld [vmem:[%s8093_s26 + $0x3640] sm:$0xff]  ;;  %v2047_v55 = vld [vmem:[%s8093_s26 + $0x3848] sm:$0xff] }
  0xe9   : > { %v6019_v60 = vpack.c.bf16 %v1982_v51, %v1918_v50  ;;  %v578_v50 = vld [vmem:[%s8093_s26 + $0xa60] sm:$0xff]  ;;  %v516_v51 = vld [vmem:[%s8093_s26 + $0x870] sm:$0xff] }
  0xea   : > { %6000 = vmatpush1.bf16.msra.mxu0 %v5999_v62  ;;  %v6021_v62 = vpack.c.bf16 %v2111_v56, %v2047_v55  ;;  %v707_v55 = vld [vmem:[%s8093_s26 + $0xe68] sm:$0xff]  ;;  %v645_v56 = vld [vmem:[%s8093_s26 + $0xc78] sm:$0xff] }
  0xeb   : > { %6066 = vmatpush1.bf16.msra.mxu1 %v6065_v63  ;;  %6002 = vmatprep.subr.bf16.mxu0 %v6001_v0  ;;  %v2046_v63 = vld [vmem:[%s8093_s26 + $0x3840] sm:$0xff]  ;;  %v6175_v1 = vpack.c.bf16 %v709_v58, %v645_v56  ;;  %v1349_v56 = vld [vmem:[%s8093_s26 + $0x2278] sm:$0xff] }
  0xec   : > { %6068 = vmatprep.subr.bf16.mxu1 %v6067_v4  ;;  %v2110_v0 = vld [vmem:[%s8093_s26 + $0x3a40] sm:$0xff]  ;;  %v2175_v4 = vld [vmem:[%s8093_s26 + $0x3c48] sm:$0xff] }
  0xed   : > { %v6023_v8 = vpack.c.bf16 %v2110_v0, %v2046_v63  ;;  %v706_v63 = vld [vmem:[%s8093_s26 + $0xe60] sm:$0xff]  ;;  %v644_v0 = vld [vmem:[%s8093_s26 + $0xc70] sm:$0xff] }
  0xee   : > { %6004 = vmatpush1.bf16.msra.mxu0 %v6003_v10  ;;  %v6025_v10 = vpack.c.bf16 %v2239_v5, %v2175_v4  ;;  %v835_v4 = vld [vmem:[%s8093_s26 + $0x1268] sm:$0xff]  ;;  %v773_v5 = vld [vmem:[%s8093_s26 + $0x1078] sm:$0xff] }
  0xef   : > { %6070 = vmatpush1.bf16.msra.mxu1 %v6069_v11  ;;  %6006 = vmatprep.subr.bf16.mxu0 %v6005_v12  ;;  %v2174_v11 = vld [vmem:[%s8093_s26 + $0x3c40] sm:$0xff]  ;;  %v6179_v13 = vpack.c.bf16 %v837_v6, %v773_v5  ;;  %v1477_v5 = vld [vmem:[%s8093_s26 + $0x2678] sm:$0xff] }
  0xf0   : > { %6072 = vmatprep.subr.bf16.mxu1 %v6071_v16  ;;  %v2238_v12 = vld [vmem:[%s8093_s26 + $0x3e40] sm:$0x3]  ;;  %v259_v16 = vld [vmem:[%s8093_s26 + $0x68] sm:$0xff] }
  0xf1   : > { %v6028_v22 = vpack.c.bf16 %v2238_v12, %v2174_v11  ;;  %v834_v11 = vld [vmem:[%s8093_s26 + $0x1260] sm:$0xff]  ;;  %v772_v12 = vld [vmem:[%s8093_s26 + $0x1070] sm:$0xff] }
  0xf2   : > { %6008 = vmatpush1.bf16.msra.mxu0 %v6007_v24  ;;  %v6097_v24 = vpack.c.bf16 %v323_v17, %v259_v16  ;;  %v963_v16 = vld [vmem:[%s8093_s26 + $0x1668] sm:$0xff]  ;;  %v901_v17 = vld [vmem:[%s8093_s26 + $0x1478] sm:$0xff] }
  0xf3   : > { %6074 = vmatpush1.bf16.msra.mxu1 %v6073_v25  ;;  %6010 = vmatprep.subr.bf16.mxu0 %v6009_v26  ;;  %v258_v25 = vld [vmem:[%s8093_s26 + $0x60] sm:$0xff]  ;;  %v6183_v27 = vpack.c.bf16 %v965_v19, %v901_v17  ;;  %v1605_v17 = vld [vmem:[%s8093_s26 + $0x2a78] sm:$0xff] }
  0xf4   : > { %6076 = vmatprep.subr.bf16.mxu1 %v6075_v30  ;;  %v322_v26 = vld [vmem:[%s8093_s26 + $0x260] sm:$0xff]  ;;  %v387_v30 = vld [vmem:[%s8093_s26 + $0x468] sm:$0xff] }
  0xf5   : > { %v6099_v34 = vpack.c.bf16 %v322_v26, %v258_v25  ;;  %v962_v25 = vld [vmem:[%s8093_s26 + $0x1660] sm:$0xff]  ;;  %v900_v26 = vld [vmem:[%s8093_s26 + $0x1470] sm:$0xff] }
  0xf6   : > { %6012 = vmatpush1.bf16.msra.mxu0 %v6011_v36  ;;  %v6101_v36 = vpack.c.bf16 %v451_v31, %v387_v30  ;;  %v1091_v30 = vld [vmem:[%s8093_s26 + $0x1a68] sm:$0xff]  ;;  %v1029_v31 = vld [vmem:[%s8093_s26 + $0x1878] sm:$0xff] }
  0xf7   : > { %6078 = vmatpush1.bf16.msra.mxu1 %v6077_v37  ;;  %6014 = vmatprep.subr.bf16.mxu0 %v6013_v38  ;;  %v386_v37 = vld [vmem:[%s8093_s26 + $0x460] sm:$0xff] }
  0xf8   : > { %6080 = vmatprep.subr.bf16.mxu1 %v6079_v42  ;;  %v450_v38 = vld [vmem:[%s8093_s26 + $0x660] sm:$0xff]  ;;  %v515_v42 = vld [vmem:[%s8093_s26 + $0x868] sm:$0xff] }
  0xf9   : > { %v6103_v47 = vpack.c.bf16 %v450_v38, %v386_v37  ;;  %v1090_v37 = vld [vmem:[%s8093_s26 + $0x1a60] sm:$0xff]  ;;  %v1028_v38 = vld [vmem:[%s8093_s26 + $0x1870] sm:$0xff] }
  0xfa   : > { %6016 = vmatpush1.bf16.msra.mxu0 %v6015_v48  ;;  %v6169_v48 = vpack.c.bf16 %v452_v41, %v388_v39  ;;  %v6187_v39 = vpack.c.bf16 %v1093_v32, %v1029_v31  ;;  %v1155_v41 = vld [vmem:[%s8093_s26 + $0x1c68] sm:$0xff]  ;;  %v1733_v31 = vld [vmem:[%s8093_s26 + $0x2e78] sm:$0xff] }
  0xfb   : > { %6082 = vmatpush1.bf16.msra.mxu1 %v6081_v49  ;;  %6018 = vmatprep.subr.bf16.mxu0 %v6017_v18  ;;  %v6105_v49 = vpack.c.bf16 %v579_v43, %v515_v42  ;;  %v514_v18 = vld [vmem:[%s8093_s26 + $0x860] sm:$0xff]  ;;  %v1219_v42 = vld [vmem:[%s8093_s26 + $0x1e68] sm:$0xff]  ;;  %v1157_v43 = vld [vmem:[%s8093_s26 + $0x1c78] sm:$0xff] }
  0xfc   : > { %6084 = vmatprep.subr.bf16.mxu1 %v6083_v53  ;;  %v580_v53 = vld [vmem:[%s8093_s26 + $0xa70] sm:$0xff]  ;;  %v6107_v59 = vpack.c.bf16 %v578_v50, %v514_v18  ;;  %v1218_v18 = vld [vmem:[%s8093_s26 + $0x1e60] sm:$0xff] }
  0xfd   : > { %v1156_v50 = vld [vmem:[%s8093_s26 + $0x1c70] sm:$0xff] }
  0xfe   : > { %6020 = vmatpush1.bf16.msra.mxu0 %v6019_v60  ;;  %v6173_v60 = vpack.c.bf16 %v580_v53, %v516_v51  ;;  %v6191_v51 = vpack.c.bf16 %v1221_v45, %v1157_v43  ;;  %v1283_v53 = vld [vmem:[%s8093_s26 + $0x2068] sm:$0xff]  ;;  %v1861_v43 = vld [vmem:[%s8093_s26 + $0x3278] sm:$0xff] }
  0xff   : > { %6086 = vmatpush1.bf16.msra.mxu1 %v6085_v61  ;;  %6022 = vmatprep.subr.bf16.mxu0 %v6021_v62  ;;  %v6109_v61 = vpack.c.bf16 %v707_v55, %v643_v54  ;;  %v642_v62 = vld [vmem:[%s8093_s26 + $0xc60] sm:$0xff]  ;;  %v1347_v54 = vld [vmem:[%s8093_s26 + $0x2268] sm:$0xff]  ;;  %v1285_v55 = vld [vmem:[%s8093_s26 + $0x2078] sm:$0xff] }
 0x100   : > { %6088 = vmatprep.subr.bf16.mxu1 %v6087_v2  ;;  %v708_v2 = vld [vmem:[%s8093_s26 + $0xe70] sm:$0xff]  ;;  %v6111_v7 = vpack.c.bf16 %v706_v63, %v642_v62  ;;  %v1346_v62 = vld [vmem:[%s8093_s26 + $0x2260] sm:$0xff] }
 0x101   : > { %v1284_v63 = vld [vmem:[%s8093_s26 + $0x2070] sm:$0xff] }
 0x102   : > { %6024 = vmatpush1.bf16.msra.mxu0 %v6023_v8  ;;  %v6177_v8 = vpack.c.bf16 %v708_v2, %v644_v0  ;;  %v6195_v0 = vpack.c.bf16 %v1349_v56, %v1285_v55  ;;  %v1411_v2 = vld [vmem:[%s8093_s26 + $0x2468] sm:$0xff]  ;;  %v1989_v55 = vld [vmem:[%s8093_s26 + $0x3678] sm:$0xff] }
 0x103   : > { %6090 = vmatpush1.bf16.msra.mxu1 %v6089_v9  ;;  %6027 = vmatprep.subr.msk.bf16.mxu0 %vm8236_vm3, %v6025_v10  ;;  %v6113_v9 = vpack.c.bf16 %v835_v4, %v771_v3  ;;  %v770_v10 = vld [vmem:[%s8093_s26 + $0x1060] sm:$0xff]  ;;  %v1475_v3 = vld [vmem:[%s8093_s26 + $0x2668] sm:$0xff]  ;;  %v1413_v4 = vld [vmem:[%s8093_s26 + $0x2478] sm:$0xff] }
 0x104   : > { %6093 = vmatprep.subr.msk.bf16.mxu1 %vm8236_vm3, %v6091_v14  ;;  %v836_v14 = vld [vmem:[%s8093_s26 + $0x1270] sm:$0xff]  ;;  %v6115_v21 = vpack.c.bf16 %v834_v11, %v770_v10  ;;  %v1474_v10 = vld [vmem:[%s8093_s26 + $0x2660] sm:$0xff] }
 0x105   : > { %v1412_v11 = vld [vmem:[%s8093_s26 + $0x2470] sm:$0xff] }
 0x106   : > { %6030 = vmatpush1.bf16.msk.msra.mxu0 %vm8236_vm3, %v6028_v22  ;;  %v6181_v22 = vpack.c.bf16 %v836_v14, %v772_v12  ;;  %v6199_v12 = vpack.c.bf16 %v1477_v5, %v1413_v4  ;;  %v1539_v14 = vld [vmem:[%s8093_s26 + $0x2868] sm:$0xff]  ;;  %v2117_v4 = vld [vmem:[%s8093_s26 + $0x3a78] sm:$0xff] }
 0x107   : > { %6096 = vmatpush1.bf16.msk.msra.mxu1 %vm8236_vm3, %v6094_v23  ;;  %6098 = vmatprep.subr.bf16.mxu0 %v6097_v24  ;;  %v6117_v23 = vpack.c.bf16 %v963_v16, %v899_v15  ;;  %v898_v24 = vld [vmem:[%s8093_s26 + $0x1460] sm:$0xff]  ;;  %v1603_v15 = vld [vmem:[%s8093_s26 + $0x2a68] sm:$0xff]  ;;  %v1541_v16 = vld [vmem:[%s8093_s26 + $0x2878] sm:$0xff] }
 0x108   : > { %6164 = vmatprep.subr.bf16.mxu1 %v6163_v28  ;;  %v964_v28 = vld [vmem:[%s8093_s26 + $0x1670] sm:$0xff]  ;;  %v6119_v33 = vpack.c.bf16 %v962_v25, %v898_v24  ;;  %v1602_v24 = vld [vmem:[%s8093_s26 + $0x2a60] sm:$0xff] }
 0x109   : > { %3185 = vmatmul.mubr.f32.vlgmr.msra.gmra.mrb[4].mxu0 %v8557_v44  ;;  %v1540_v25 = vld [vmem:[%s8093_s26 + $0x2870] sm:$0xff] }
 0x10a   : > { %3256 = vmatmul.mubr.f32.vlgmr.msra.gmra.mrb[4].mxu1 %v8557_v44  ;;  %6100 = vmatpush1.bf16.msra.mxu0 %v6099_v34  ;;  %v6185_v34 = vpack.c.bf16 %v964_v28, %v900_v26  ;;  %v6203_v26 = vpack.c.bf16 %v1605_v17, %v1541_v16  ;;  %v1667_v28 = vld [vmem:[%s8093_s26 + $0x2c68] sm:$0xff]  ;;  %v2245_v16 = vld [vmem:[%s8093_s26 + $0x3e78] sm:$0x3] }
 0x10b   : > { %6166 = vmatpush1.bf16.msra.mxu1 %v6165_v35  ;;  %6102 = vmatprep.subr.bf16.mxu0 %v6101_v36  ;;  %v6121_v35 = vpack.c.bf16 %v1091_v30, %v1027_v29  ;;  %v1026_v36 = vld [vmem:[%s8093_s26 + $0x1860] sm:$0xff]  ;;  %v1731_v29 = vld [vmem:[%s8093_s26 + $0x2e68] sm:$0xff]  ;;  %v1669_v30 = vld [vmem:[%s8093_s26 + $0x2c78] sm:$0xff] }
 0x10c   : > { %6168 = vmatprep.subr.bf16.mxu1 %v6167_v40  ;;  %5612 = vmatprep.mubr.msk.f32.mxu0 %vm2640_vm0, %v8206_v20  ;;  %v1092_v40 = vld [vmem:[%s8093_s26 + $0x1a70] sm:$0xff]  ;;  %v6123_v46 = vpack.c.bf16 %v1090_v37, %v1026_v36  ;;  %v1730_v36 = vld [vmem:[%s8093_s26 + $0x2e60] sm:$0xff] }
 0x10d   : > { %5615 = vmatprep.mubr.msk.f32.mxu1 %vm2640_vm0, %v8206_v20  ;;  %v1668_v37 = vld [vmem:[%s8093_s26 + $0x2c70] sm:$0xff] }
 0x10e   : > { %6104 = vmatpush1.bf16.msra.mxu0 %v6103_v47  ;;  %v6189_v47 = vpack.c.bf16 %v1092_v40, %v1028_v38  ;;  %v6207_v38 = vpack.c.bf16 %v1733_v31, %v1669_v30  ;;  %v1795_v40 = vld [vmem:[%s8093_s26 + $0x3068] sm:$0xff]  ;;  %v329_v30 = vld [vmem:[%s8093_s26 + $0x298] sm:$0xff] }
 0x10f   : > { %6170 = vmatpush1.bf16.msra.mxu1 %v6169_v48  ;;  %6106 = vmatprep.subr.bf16.mxu0 %v6105_v49  ;;  %v6125_v48 = vpack.c.bf16 %v1219_v42, %v1155_v41  ;;  %v1154_v49 = vld [vmem:[%s8093_s26 + $0x1c60] sm:$0xff]  ;;  %v1859_v41 = vld [vmem:[%s8093_s26 + $0x3268] sm:$0xff]  ;;  %v1797_v42 = vld [vmem:[%s8093_s26 + $0x3078] sm:$0xff] }
 0x110   : > { %6172 = vmatprep.subr.bf16.mxu1 %v6171_v52  ;;  %v1220_v52 = vld [vmem:[%s8093_s26 + $0x1e70] sm:$0xff]  ;;  %v6127_v58 = vpack.c.bf16 %v1218_v18, %v1154_v49  ;;  %v1858_v49 = vld [vmem:[%s8093_s26 + $0x3260] sm:$0xff] }
 0x111   : > { %v1796_v18 = vld [vmem:[%s8093_s26 + $0x3070] sm:$0xff] }
 0x112   : > { %6108 = vmatpush1.bf16.msra.mxu0 %v6107_v59  ;;  %v6193_v59 = vpack.c.bf16 %v1220_v52, %v1156_v50  ;;  %v6211_v50 = vpack.c.bf16 %v1861_v43, %v1797_v42  ;;  %v1923_v52 = vld [vmem:[%s8093_s26 + $0x3468] sm:$0xff]  ;;  %v457_v42 = vld [vmem:[%s8093_s26 + $0x698] sm:$0xff] }
 0x113   : > { %6174 = vmatpush1.bf16.msra.mxu1 %v6173_v60  ;;  %6110 = vmatprep.subr.bf16.mxu0 %v6109_v61  ;;  %v6129_v60 = vpack.c.bf16 %v1347_v54, %v1283_v53  ;;  %v1282_v61 = vld [vmem:[%s8093_s26 + $0x2060] sm:$0xff]  ;;  %v1987_v53 = vld [vmem:[%s8093_s26 + $0x3668] sm:$0xff]  ;;  %v1925_v54 = vld [vmem:[%s8093_s26 + $0x3478] sm:$0xff] }
 0x114   : > { %6176 = vmatprep.subr.bf16.mxu1 %v6175_v1  ;;  %v1348_v1 = vld [vmem:[%s8093_s26 + $0x2270] sm:$0xff]  ;;  %v6131_v6 = vpack.c.bf16 %v1346_v62, %v1282_v61  ;;  %v1986_v61 = vld [vmem:[%s8093_s26 + $0x3660] sm:$0xff] }
 0x115   : > { %v1924_v62 = vld [vmem:[%s8093_s26 + $0x3470] sm:$0xff] }
 0x116   : > { %6112 = vmatpush1.bf16.msra.mxu0 %v6111_v7  ;;  %v6197_v7 = vpack.c.bf16 %v1348_v1, %v1284_v63  ;;  %v6215_v63 = vpack.c.bf16 %v1989_v55, %v1925_v54  ;;  %v2051_v1 = vld [vmem:[%s8093_s26 + $0x3868] sm:$0xff]  ;;  %v585_v54 = vld [vmem:[%s8093_s26 + $0xa98] sm:$0xff] }
 0x117   : > { %6178 = vmatpush1.bf16.msra.mxu1 %v6177_v8  ;;  %6114 = vmatprep.subr.bf16.mxu0 %v6113_v9  ;;  %v6133_v8 = vpack.c.bf16 %v1475_v3, %v1411_v2  ;;  %v1410_v9 = vld [vmem:[%s8093_s26 + $0x2460] sm:$0xff]  ;;  %v2115_v2 = vld [vmem:[%s8093_s26 + $0x3a68] sm:$0xff]  ;;  %v2053_v3 = vld [vmem:[%s8093_s26 + $0x3878] sm:$0xff] }
 0x118   : > { %6180 = vmatprep.subr.bf16.mxu1 %v6179_v13  ;;  %v1476_v13 = vld [vmem:[%s8093_s26 + $0x2670] sm:$0xff]  ;;  %v6135_v19 = vpack.c.bf16 %v1474_v10, %v1410_v9  ;;  %v2114_v9 = vld [vmem:[%s8093_s26 + $0x3a60] sm:$0xff] }
 0x119   : > { %v2052_v10 = vld [vmem:[%s8093_s26 + $0x3870] sm:$0xff] }
 0x11a   : > { %6116 = vmatpush1.bf16.msra.mxu0 %v6115_v21  ;;  %v6201_v21 = vpack.c.bf16 %v1476_v13, %v1412_v11  ;;  %v6219_v11 = vpack.c.bf16 %v2117_v4, %v2053_v3  ;;  %v2179_v13 = vld [vmem:[%s8093_s26 + $0x3c68] sm:$0xff]  ;;  %v2310_v3 = vlaneseq }
 0x11b   : > { %6182 = vmatpush1.bf16.msra.mxu1 %v6181_v22  ;;  %6118 = vmatprep.subr.bf16.mxu0 %v6117_v23  ;;  %v6137_v22 = vpack.c.bf16 %v1603_v15, %v1539_v14  ;;  %v1538_v23 = vld [vmem:[%s8093_s26 + $0x2860] sm:$0xff]  ;;  %v2243_v14 = vld [vmem:[%s8093_s26 + $0x3e68] sm:$0x3]  ;;  %v2181_v15 = vld [vmem:[%s8093_s26 + $0x3c78] sm:$0xff] }
 0x11c   : > { %6184 = vmatprep.subr.bf16.mxu1 %v6183_v27  ;;  %v1604_v27 = vld [vmem:[%s8093_s26 + $0x2a70] sm:$0xff]  ;;  %v6139_v32 = vpack.c.bf16 %v1602_v24, %v1538_v23  ;;  %v2242_v23 = vld [vmem:[%s8093_s26 + $0x3e60] sm:$0x3] }
 0x11d   : > { %v2180_v24 = vld [vmem:[%s8093_s26 + $0x3c70] sm:$0xff] }
 0x11e   : > { %6120 = vmatpush1.bf16.msra.mxu0 %v6119_v33  ;;  %v6205_v33 = vpack.c.bf16 %v1604_v27, %v1540_v25  ;;  %v6223_v25 = vpack.c.bf16 %v2245_v16, %v2181_v15  ;;  %v263_v27 = vld [vmem:[%s8093_s26 + $0x88] sm:$0xff]  ;;  %v841_v15 = vld [vmem:[%s8093_s26 + $0x1298] sm:$0xff]  ;;  %v8732_v16 = vshrl.u32 %v2310_v3, 7 }
 0x11f   : > { %6186 = vmatpush1.bf16.msra.mxu1 %v6185_v34  ;;  %6122 = vmatprep.subr.bf16.mxu0 %v6121_v35  ;;  %v6141_v34 = vpack.c.bf16 %v1731_v29, %v1667_v28  ;;  %v1666_v35 = vld [vmem:[%s8093_s26 + $0x2c60] sm:$0xff]  ;;  %v327_v28 = vld [vmem:[%s8093_s26 + $0x288] sm:$0xff]  ;;  %v265_v29 = vld [vmem:[%s8093_s26 + $0x98] sm:$0xff] }
 0x120   : > { %6188 = vmatprep.subr.bf16.mxu1 %v6187_v39  ;;  %v1732_v39 = vld [vmem:[%s8093_s26 + $0x2e70] sm:$0xff]  ;;  %v6143_v45 = vpack.c.bf16 %v1730_v36, %v1666_v35  ;;  %v326_v35 = vld [vmem:[%s8093_s26 + $0x280] sm:$0xff] }
 0x121   : > { %v264_v36 = vld [vmem:[%s8093_s26 + $0x90] sm:$0xff] }
 0x122   : > { %6124 = vmatpush1.bf16.msra.mxu0 %v6123_v46  ;;  %v6209_v46 = vpack.c.bf16 %v1732_v39, %v1668_v37  ;;  %v6295_v37 = vpack.c.bf16 %v329_v30, %v265_v29  ;;  %v391_v39 = vld [vmem:[%s8093_s26 + $0x488] sm:$0xff]  ;;  %v8746_v29 = vsub.s32 0, %v8732_v16  ;;  %v905_v30 = vld [vmem:[%s8093_s26 + $0x1498] sm:$0xff] }
 0x123   : > { %6190 = vmatpush1.bf16.msra.mxu1 %v6189_v47  ;;  %6126 = vmatprep.subr.bf16.mxu0 %v6125_v48  ;;  %v6145_v47 = vpack.c.bf16 %v1859_v41, %v1795_v40  ;;  %v1794_v48 = vld [vmem:[%s8093_s26 + $0x3060] sm:$0xff]  ;;  %v455_v40 = vld [vmem:[%s8093_s26 + $0x688] sm:$0xff]  ;;  %v393_v41 = vld [vmem:[%s8093_s26 + $0x498] sm:$0xff] }
 0x124   : > { %6192 = vmatprep.subr.bf16.mxu1 %v6191_v51  ;;  %v1860_v51 = vld [vmem:[%s8093_s26 + $0x3270] sm:$0xff]  ;;  %v6147_v56 = vpack.c.bf16 %v1858_v49, %v1794_v48  ;;  %v454_v48 = vld [vmem:[%s8093_s26 + $0x680] sm:$0xff] }
 0x125   : > { %v392_v49 = vld [vmem:[%s8093_s26 + $0x490] sm:$0xff] }
 0x126   : > { %6128 = vmatpush1.bf16.msra.mxu0 %v6127_v58  ;;  %v6213_v58 = vpack.c.bf16 %v1860_v51, %v1796_v18  ;;  %v6299_v18 = vpack.c.bf16 %v457_v42, %v393_v41  ;;  %v519_v51 = vld [vmem:[%s8093_s26 + $0x888] sm:$0xff]  ;;  %v902_v41 = vld [vmem:[%s8093_s26 + $0x1480] sm:$0xff] }
 0x127   : > { %6194 = vmatpush1.bf16.msra.mxu1 %v6193_v59  ;;  %6130 = vmatprep.subr.bf16.mxu0 %v6129_v60  ;;  %v6149_v59 = vpack.c.bf16 %v1987_v53, %v1923_v52  ;;  %v1922_v60 = vld [vmem:[%s8093_s26 + $0x3460] sm:$0xff]  ;;  %v583_v52 = vld [vmem:[%s8093_s26 + $0xa88] sm:$0xff]  ;;  %v521_v53 = vld [vmem:[%s8093_s26 + $0x898] sm:$0xff] }
 0x128   : > { %6196 = vmatprep.subr.bf16.mxu1 %v6195_v0  ;;  %v1988_v0 = vld [vmem:[%s8093_s26 + $0x3670] sm:$0xff]  ;;  %v6151_v5 = vpack.c.bf16 %v1986_v61, %v1922_v60  ;;  %v582_v60 = vld [vmem:[%s8093_s26 + $0xa80] sm:$0xff] }
 0x129   : > { %v520_v61 = vld [vmem:[%s8093_s26 + $0x890] sm:$0xff]  ;;  %v966_v42 = vld [vmem:[%s8093_s26 + $0x1680] sm:$0xff] }
 0x12a   : > { %6132 = vmatpush1.bf16.msra.mxu0 %v6131_v6  ;;  %v6217_v6 = vpack.c.bf16 %v1988_v0, %v1924_v62  ;;  %v6303_v62 = vpack.c.bf16 %v585_v54, %v521_v53  ;;  %v647_v0 = vld [vmem:[%s8093_s26 + $0xc88] sm:$0xff]  ;;  %v6251_v54 = vpack.c.bf16 %v966_v42, %v902_v41  ;;  %v1288_v41 = vld [vmem:[%s8093_s26 + $0x2090] sm:$0xff] }
 0x12b   : > { %6198 = vmatpush1.bf16.msra.mxu1 %v6197_v7  ;;  %6134 = vmatprep.subr.bf16.mxu0 %v6133_v8  ;;  %v6153_v7 = vpack.c.bf16 %v2115_v2, %v2051_v1  ;;  %v2050_v8 = vld [vmem:[%s8093_s26 + $0x3860] sm:$0xff]  ;;  %v649_v1 = vld [vmem:[%s8093_s26 + $0xc98] sm:$0xff] }
 0x12c   : > { %6200 = vmatprep.subr.bf16.mxu1 %v6199_v12  ;;  %v2116_v12 = vld [vmem:[%s8093_s26 + $0x3a70] sm:$0xff]  ;;  %v6155_v17 = vpack.c.bf16 %v2114_v9, %v2050_v8  ;;  %v713_v2 = vld [vmem:[%s8093_s26 + $0xe98] sm:$0xff]  ;;  %v710_v8 = vld [vmem:[%s8093_s26 + $0xe80] sm:$0xff] }
 0x12d   : > { %v648_v9 = vld [vmem:[%s8093_s26 + $0xc90] sm:$0xff] }
 0x12e   : > { %6136 = vmatpush1.bf16.msra.mxu0 %v6135_v19  ;;  %v6221_v19 = vpack.c.bf16 %v2116_v12, %v2052_v10  ;;  %v6307_v10 = vpack.c.bf16 %v713_v2, %v649_v1  ;;  %v775_v12 = vld [vmem:[%s8093_s26 + $0x1088] sm:$0xff] }
 0x12f   : > { %6202 = vmatpush1.bf16.msra.mxu1 %v6201_v21  ;;  %6138 = vmatprep.subr.bf16.mxu0 %v6137_v22  ;;  %v6157_v21 = vpack.c.bf16 %v2243_v14, %v2179_v13  ;;  %v2178_v22 = vld [vmem:[%s8093_s26 + $0x3c60] sm:$0xff]  ;;  %v839_v13 = vld [vmem:[%s8093_s26 + $0x1288] sm:$0xff]  ;;  %v777_v14 = vld [vmem:[%s8093_s26 + $0x1098] sm:$0xff] }
 0x130   : > { %6204 = vmatprep.subr.bf16.mxu1 %v6203_v26  ;;  %v2244_v26 = vld [vmem:[%s8093_s26 + $0x3e70] sm:$0x3]  ;;  %v6160_v31 = vpack.c.bf16 %v2242_v23, %v2178_v22  ;;  %v774_v22 = vld [vmem:[%s8093_s26 + $0x1080] sm:$0xff]  ;;  %v1223_v1 = vld [vmem:[%s8093_s26 + $0x1e88] sm:$0xff] }
 0x131   : > { %v838_v23 = vld [vmem:[%s8093_s26 + $0x1280] sm:$0xff] }
 0x132   : > { %6140 = vmatpush1.bf16.msra.mxu0 %v6139_v32  ;;  %v6226_v32 = vpack.c.bf16 %v2244_v26, %v2180_v24  ;;  %v776_v24 = vld [vmem:[%s8093_s26 + $0x1090] sm:$0xff] }
 0x133   : > { %6206 = vmatpush1.bf16.msra.mxu1 %v6205_v33  ;;  %6142 = vmatprep.subr.bf16.mxu0 %v6141_v34  ;;  %v6229_v33 = vpack.c.bf16 %v327_v28, %v263_v27  ;;  %v262_v34 = vld [vmem:[%s8093_s26 + $0x80] sm:$0xff]  ;;  %v840_v26 = vld [vmem:[%s8093_s26 + $0x1290] sm:$0xff]  ;;  %v903_v27 = vld [vmem:[%s8093_s26 + $0x1488] sm:$0xff] }
 0x134   : > { %6208 = vmatprep.subr.bf16.mxu1 %v6207_v38  ;;  %v328_v38 = vld [vmem:[%s8093_s26 + $0x290] sm:$0xff]  ;;  %v6231_v43 = vpack.c.bf16 %v326_v35, %v262_v34  ;;  %v967_v28 = vld [vmem:[%s8093_s26 + $0x1688] sm:$0xff]  ;;  %v8754_v34 = vsub.s32 2, %v8732_v16  ;;  %v8757_v35 = vsub.s32 1, %v8732_v16 }
 0x136   : > { %6144 = vmatpush1.bf16.msra.mxu0 %v6143_v45  ;;  %v6297_v45 = vpack.c.bf16 %v328_v38, %v264_v36  ;;  %v7963_v36 = vmov 1983009808   ;;  %v6313_v38 = vpack.c.bf16 %v840_v26, %v776_v24  ;;  %v1287_v24 = vld [vmem:[%s8093_s26 + $0x2088] sm:$0xff] }
 0x137   : > { %6210 = vmatpush1.bf16.msra.mxu1 %v6209_v46  ;;  %6146 = vmatprep.subr.bf16.mxu0 %v6145_v47  ;;  %v6233_v46 = vpack.c.bf16 %v455_v40, %v391_v39  ;;  %v390_v47 = vld [vmem:[%s8093_s26 + $0x480] sm:$0xff]  ;;  %v8760_v39 = vsub.s32 3, %v8732_v16  ;;  %v6249_v40 = vpack.c.bf16 %v967_v28, %v903_v27  ;;  %v1289_v27 = vld [vmem:[%s8093_s26 + $0x2098] sm:$0xff] }
 0x138   : > { %6212 = vmatprep.subr.bf16.mxu1 %v6211_v50  ;;  %v456_v50 = vld [vmem:[%s8093_s26 + $0x690] sm:$0xff]  ;;  %v6235_v55 = vpack.c.bf16 %v454_v48, %v390_v47  ;;  %v1031_v47 = vld [vmem:[%s8093_s26 + $0x1888] sm:$0xff]  ;;  %v1353_v28 = vld [vmem:[%s8093_s26 + $0x2298] sm:$0xff] }
 0x139   : > { %v1095_v48 = vld [vmem:[%s8093_s26 + $0x1a88] sm:$0xff]  ;;  %v6327_v42 = vpack.c.bf16 %v1353_v28, %v1289_v27  ;;  %v1798_v28 = vld [vmem:[%s8093_s26 + $0x3080] sm:$0xff] }
 0x13a   : > { %6148 = vmatpush1.bf16.msra.mxu0 %v6147_v56  ;;  %v6301_v56 = vpack.c.bf16 %v456_v50, %v392_v49  ;;  %v1097_v50 = vld [vmem:[%s8093_s26 + $0x1a98] sm:$0xff] }
 0x13b   : > { %6214 = vmatpush1.bf16.msra.mxu1 %v6213_v58  ;;  %6150 = vmatprep.subr.bf16.mxu0 %v6149_v59  ;;  %v6237_v58 = vpack.c.bf16 %v583_v52, %v519_v51  ;;  %v518_v59 = vld [vmem:[%s8093_s26 + $0x880] sm:$0xff] }
 0x13c   : > { %6216 = vmatprep.subr.bf16.mxu1 %v6215_v63  ;;  %v584_v63 = vld [vmem:[%s8093_s26 + $0xa90] sm:$0xff]  ;;  %v6239_v4 = vpack.c.bf16 %v582_v60, %v518_v59  ;;  %v1030_v59 = vld [vmem:[%s8093_s26 + $0x1880] sm:$0xff] }
 0x13d   : > { %v1094_v60 = vld [vmem:[%s8093_s26 + $0x1a80] sm:$0xff] }
 0x13e   : > { %6152 = vmatpush1.bf16.msra.mxu0 %v6151_v5  ;;  %v6305_v5 = vpack.c.bf16 %v584_v63, %v520_v61  ;;  %v1032_v61 = vld [vmem:[%s8093_s26 + $0x1890] sm:$0xff] }
 0x13f   : > { %6218 = vmatpush1.bf16.msra.mxu1 %v6217_v6  ;;  %6154 = vmatprep.subr.bf16.mxu0 %v6153_v7  ;;  %v646_v7 = vld [vmem:[%s8093_s26 + $0xc80] sm:$0xff] }
 0x140   : > { %6220 = vmatprep.subr.bf16.mxu1 %v6219_v11  ;;  %v712_v11 = vld [vmem:[%s8093_s26 + $0xe90] sm:$0xff] }
 0x142   : > { %6156 = vmatpush1.bf16.msra.mxu0 %v6155_v17  ;;  %v6243_v17 = vpack.c.bf16 %v710_v8, %v646_v7 }
 0x143   : > { %6222 = vmatpush1.bf16.msra.mxu1 %v6221_v19  ;;  %6159 = vmatprep.subr.msk.bf16.mxu0 %vm8236_vm3, %v6157_v21  ;;  %v6309_v19 = vpack.c.bf16 %v712_v11, %v648_v9  ;;  %v6245_v21 = vpack.c.bf16 %v839_v13, %v775_v12  ;;  %v6255_v11 = vpack.c.bf16 %v1094_v60, %v1030_v59  ;;  %v1607_v59 = vld [vmem:[%s8093_s26 + $0x2a88] sm:$0xff]  ;;  %v1545_v60 = vld [vmem:[%s8093_s26 + $0x2898] sm:$0xff] }
 0x144   : > { %6225 = vmatprep.subr.msk.bf16.mxu1 %vm8236_vm3, %v6223_v25  ;;  %v6311_v25 = vpack.c.bf16 %v841_v15, %v777_v14  ;;  %v1158_v15 = vld [vmem:[%s8093_s26 + $0x1c80] sm:$0xff] }
 0x146   : > { %6162 = vmatpush1.bf16.msk.msra.mxu0 %vm8236_vm3, %v6160_v31  ;;  %v969_v31 = vld [vmem:[%s8093_s26 + $0x1698] sm:$0xff] }
 0x147   : > { %6228 = vmatpush1.bf16.msk.msra.mxu1 %vm8236_vm3, %v6226_v32  ;;  %6230 = vmatprep.subr.bf16.mxu0 %v6229_v33  ;;  %v6247_v32 = vpack.c.bf16 %v838_v23, %v774_v22  ;;  %v8751_v33 = vld [vmem:[%s8740_s30] sm:$0xff]  ;;  %v1224_v23 = vld [vmem:[%s8093_s26 + $0x1e90] sm:$0xff] }
 0x148   : > { %6296 = vmatprep.subr.bf16.mxu1 %v6295_v37  ;;  %v5175_v37 = vunpack.c.l.s4 %v7963_v36  ;;  %v2313_v49 = vrot.slane %v8751_v33, %v8746_v29  ;;  %v2321_v51 = vrot.slane %v8751_v33, %v8754_v34  ;;  %v2317_v52 = vrot.slane %v8751_v33, %v8757_v35 }
 0x149   : > { %3327 = vmatmul.mubr.f32.vlgmr.msra.gmra.mrb[6].mxu0 %v8557_v44 }
 0x14a   : > { %3398 = vmatmul.mubr.f32.vlgmr.msra.gmra.mrb[6].mxu1 %v8557_v44  ;;  %6232 = vmatpush1.bf16.msra.mxu0 %v6231_v43  ;;  %v711_v44 = vld [vmem:[%s8093_s26 + $0xe88] sm:$0xff]  ;;  %v904_v43 = vld [vmem:[%s8093_s26 + $0x1490] sm:$0xff]  ;;  %v5176_v53 = vunpack.c.0.s8 %v5175_v37 }
 0x14b   : > { %6298 = vmatpush1.bf16.msra.mxu1 %v6297_v45  ;;  %6234 = vmatprep.subr.bf16.mxu0 %v6233_v46  ;;  %v6241_v6 = vpack.c.bf16 %v711_v44, %v647_v0  ;;  %v6315_v45 = vpack.c.bf16 %v969_v31, %v905_v30  ;;  %v968_v46 = vld [vmem:[%s8093_s26 + $0x1690] sm:$0xff]  ;;  %v1159_v44 = vld [vmem:[%s8093_s26 + $0x1c88] sm:$0xff] }
 0x14c   : > { %6300 = vmatprep.subr.bf16.mxu1 %v6299_v18  ;;  %5618 = vmatprep.mubr.msk.f32.mxu0 %vm2640_vm0, %v8206_v20  ;;  %v1033_v18 = vld [vmem:[%s8093_s26 + $0x1898] sm:$0xff]  ;;  %v1096_v0 = vld [vmem:[%s8093_s26 + $0x1a90] sm:$0xff]  ;;  %v8787_v9 = vsub.s32 %v5176_v53, %v8732_v16  ;;  %v6257_v14 = vpack.c.bf16 %v1223_v1, %v1159_v44  ;;  %v1478_v53 = vld [vmem:[%s8093_s26 + $0x2680] sm:$0xff] }
 0x14d   : > { %5621 = vmatprep.mubr.msk.f32.mxu1 %vm2640_vm0, %v8206_v20  ;;  %v6319_v63 = vpack.c.bf16 %v1097_v50, %v1033_v18  ;;  %v6321_v13 = vpack.c.bf16 %v1096_v0, %v1032_v61  ;;  %v1609_v61 = vld [vmem:[%s8093_s26 + $0x2a98] sm:$0xff]  ;;  %v1542_v44 = vld [vmem:[%s8093_s26 + $0x2880] sm:$0xff] }
 0x14e   : > { %6236 = vmatpush1.bf16.msra.mxu0 %v6235_v55  ;;  %v2325_v55 = vrot.slane %v8751_v33, %v8760_v39  ;;  %v1606_v1 = vld [vmem:[%s8093_s26 + $0x2a80] sm:$0xff] }
 0x14f   : > { %6302 = vmatpush1.bf16.msra.mxu1 %v6301_v56  ;;  %6238 = vmatprep.subr.bf16.mxu0 %v6237_v58  ;;  %v6317_v56 = vpack.c.bf16 %v968_v46, %v904_v43  ;;  %v6253_v58 = vpack.c.bf16 %v1095_v48, %v1031_v47  ;;  %v1352_v43 = vld [vmem:[%s8093_s26 + $0x2290] sm:$0xff]  ;;  %v1479_v46 = vld [vmem:[%s8093_s26 + $0x2688] sm:$0xff]  ;;  %v1417_v48 = vld [vmem:[%s8093_s26 + $0x2498] sm:$0xff] }
 0x150   : > { %6304 = vmatprep.subr.bf16.mxu1 %v6303_v62  ;;  %v6329_v50 = vpack.c.bf16 %v1352_v43, %v1288_v41  ;;  %v1993_v41 = vld [vmem:[%s8093_s26 + $0x3698] sm:$0xff] }
 0x152   : > { %6240 = vmatpush1.bf16.msra.mxu0 %v6239_v4 }
 0x153   : > { %6306 = vmatpush1.bf16.msra.mxu1 %v6305_v5  ;;  %6242 = vmatprep.subr.bf16.mxu0 %v6241_v6  ;;  %v1161_v5 = vld [vmem:[%s8093_s26 + $0x1c98] sm:$0xff] }
 0x154   : > { %6308 = vmatprep.subr.bf16.mxu1 %v6307_v10  ;;  %v1225_v6 = vld [vmem:[%s8093_s26 + $0x1e98] sm:$0xff] }
 0x155   : > { %v6323_v22 = vpack.c.bf16 %v1225_v6, %v1161_v5  ;;  %v1671_v5 = vld [vmem:[%s8093_s26 + $0x2c88] sm:$0xff] }
 0x156   : > { %6244 = vmatpush1.bf16.msra.mxu0 %v6243_v17  ;;  %v1222_v17 = vld [vmem:[%s8093_s26 + $0x1e80] sm:$0xff]  ;;  %v1735_v6 = vld [vmem:[%s8093_s26 + $0x2e88] sm:$0xff] }
 0x157   : > { %6310 = vmatpush1.bf16.msra.mxu1 %v6309_v19  ;;  %6246 = vmatprep.subr.bf16.mxu0 %v6245_v21  ;;  %v1160_v19 = vld [vmem:[%s8093_s26 + $0x1c90] sm:$0xff]  ;;  %v6259_v31 = vpack.c.bf16 %v1222_v17, %v1158_v15 }
 0x158   : > { %6312 = vmatprep.subr.bf16.mxu1 %v6311_v25  ;;  %v1351_v25 = vld [vmem:[%s8093_s26 + $0x2288] sm:$0xff]  ;;  %v6325_v36 = vpack.c.bf16 %v1224_v23, %v1160_v19  ;;  %v1672_v15 = vld [vmem:[%s8093_s26 + $0x2c90] sm:$0xff]  ;;  %v1801_v23 = vld [vmem:[%s8093_s26 + $0x3098] sm:$0xff] }
 0x159   : > { %v6261_v37 = vpack.c.bf16 %v1351_v25, %v1287_v24  ;;  %v1736_v19 = vld [vmem:[%s8093_s26 + $0x2e90] sm:$0xff]  ;;  %v1865_v24 = vld [vmem:[%s8093_s26 + $0x3298] sm:$0xff] }
 0x15a   : > { %6248 = vmatpush1.bf16.msra.mxu0 %v6247_v32 }
 0x15b   : > { %6314 = vmatpush1.bf16.msra.mxu1 %v6313_v38  ;;  %6250 = vmatprep.subr.bf16.mxu0 %v6249_v40  ;;  %v1286_v38 = vld [vmem:[%s8093_s26 + $0x2080] sm:$0xff] }
 0x15c   : > { %v2902_v62 = vpop.f32.mrb[0].mxu0  ;;  %6316 = vmatprep.subr.bf16.mxu1 %v6315_v45  ;;  %v1350_v40 = vld [vmem:[%s8093_s26 + $0x2280] sm:$0xff]  ;;  %v1415_v45 = vld [vmem:[%s8093_s26 + $0x2488] sm:$0xff] }
 0x15d   : > { %v2903_v2 = vadd.f32 %v2902_v62, %v2313_v49  ;;  %v2973_v3 = vpop.f32.mrb[0].mxu1  ;;  %v2904_v4 = vpop.f32.mrb[1].mxu0  ;;  %v1481_v49 = vld [vmem:[%s8093_s26 + $0x2698] sm:$0xff]  ;;  %v6263_v18 = vpack.c.bf16 %v1350_v40, %v1286_v38  ;;  %v1991_v38 = vld [vmem:[%s8093_s26 + $0x3688] sm:$0xff] }
 0x15e   : > { %v2974_v7 = vadd.f32 %v2973_v3, %v2321_v51  ;;  %v2905_v8 = vadd.f32 %v2904_v4, %v2317_v52  ;;  %v2975_v10 = vpop.f32.mrb[1].mxu1  ;;  %6252 = vmatpush1.bf16.msra.mxu0 %v6251_v54  ;;  %v6265_v51 = vpack.c.bf16 %v1479_v46, %v1415_v45  ;;  %v1414_v52 = vld [vmem:[%s8093_s26 + $0x2480] sm:$0xff]  ;;  %v1416_v54 = vld [vmem:[%s8093_s26 + $0x2490] sm:$0xff]  ;;  %v6335_v3 = vpack.c.bf16 %v1609_v61, %v1545_v60  ;;  %v1929_v40 = vld [vmem:[%s8093_s26 + $0x3498] sm:$0xff] }
 0x15f   : > { %v2976_v12 = vadd.f32 %v2975_v10, %v2325_v55  ;;  %6318 = vmatpush1.bf16.msra.mxu1 %v6317_v56  ;;  %6254 = vmatprep.subr.bf16.mxu0 %v6253_v58  ;;  %v6331_v55 = vpack.c.bf16 %v1481_v49, %v1417_v48  ;;  %v1480_v56 = vld [vmem:[%s8093_s26 + $0x2690] sm:$0xff]  ;;  %v1543_v58 = vld [vmem:[%s8093_s26 + $0x2888] sm:$0xff]  ;;  %v6267_v62 = vpack.c.bf16 %v1478_v53, %v1414_v52  ;;  %v1926_v46 = vld [vmem:[%s8093_s26 + $0x3480] sm:$0xff] }
 0x160   : > { %v5172_v21 = vcombine.low %v2903_v2, %v2905_v8  ;;  %6320 = vmatprep.subr.bf16.mxu1 %v6319_v63  ;;  %v6333_v63 = vpack.c.bf16 %v1480_v56, %v1416_v54  ;;  %v6269_v0 = vpack.c.bf16 %v1607_v59, %v1543_v58  ;;  %v1544_v2 = vld [vmem:[%s8093_s26 + $0x2890] sm:$0xff]  ;;  %v1737_v8 = vld [vmem:[%s8093_s26 + $0x2e98] sm:$0xff]  ;;  %v6271_v10 = vpack.c.bf16 %v1606_v1, %v1542_v44  ;;  %v2054_v58 = vld [vmem:[%s8093_s26 + $0x3880] sm:$0xff] }
 0x161   : > { %v5173_v26 = vcombine.low %v2974_v7, %v2976_v12  ;;  %v1608_v4 = vld [vmem:[%s8093_s26 + $0x2a90] sm:$0xff]  ;;  %v1673_v7 = vld [vmem:[%s8093_s26 + $0x2c98] sm:$0xff]  ;;  %v6273_v12 = vpack.c.bf16 %v1735_v6, %v1671_v5  ;;  %v6347_v49 = vpack.c.bf16 %v1993_v41, %v1929_v40  ;;  %v2118_v59 = vld [vmem:[%s8093_s26 + $0x3a80] sm:$0xff] }
 0x162   : > { %v5180_v30 = vrot.slane %v5172_v21, %v8787_v9  ;;  %6256 = vmatpush1.bf16.msra.mxu0 %v6255_v11  ;;  %v6337_v11 = vpack.c.bf16 %v1608_v4, %v1544_v2  ;;  %v6339_v17 = vpack.c.bf16 %v1737_v8, %v1673_v7  ;;  %v1799_v21 = vld [vmem:[%s8093_s26 + $0x3088] sm:$0xff]  ;;  %v1928_v48 = vld [vmem:[%s8093_s26 + $0x3490] sm:$0xff]  ;;  %v2057_v52 = vld [vmem:[%s8093_s26 + $0x3898] sm:$0xff]  ;;  %v6287_v2 = vpack.c.bf16 %v2118_v59, %v2054_v58 }
 0x163   : > { %v5187_v32 = vrot.slane %v5173_v26, %v8787_v9  ;;  %6322 = vmatpush1.bf16.msra.mxu1 %v6321_v13  ;;  %6258 = vmatprep.subr.bf16.mxu0 %v6257_v14  ;;  %v1670_v13 = vld [vmem:[%s8093_s26 + $0x2c80] sm:$0xff]  ;;  %v6341_v26 = vpack.c.bf16 %v1736_v19, %v1672_v15  ;;  %v2121_v53 = vld [vmem:[%s8093_s26 + $0x3a98] sm:$0xff]  ;;  %v2056_v60 = vld [vmem:[%s8093_s26 + $0x3890] sm:$0xff] }
 0x164   : > { %6324 = vmatprep.subr.bf16.mxu1 %v6323_v22  ;;  %v1734_v14 = vld [vmem:[%s8093_s26 + $0x2e80] sm:$0xff]  ;;  %v1863_v22 = vld [vmem:[%s8093_s26 + $0x3288] sm:$0xff]  ;;  %v6351_v61 = vpack.c.bf16 %v2121_v53, %v2057_v52  ;;  %v2185_v44 = vld [vmem:[%s8093_s26 + $0x3c98] sm:$0xff] }
 0x165   : > { %v5188_v47 = vcombine.low %v5180_v30, %v5187_v32  ;;  %v6275_v25 = vpack.c.bf16 %v1734_v14, %v1670_v13  ;;  %v6277_v27 = vpack.c.bf16 %v1863_v22, %v1799_v21  ;;  %v1862_v30 = vld [vmem:[%s8093_s26 + $0x3280] sm:$0xff]  ;;  %v6343_v32 = vpack.c.bf16 %v1865_v24, %v1801_v23  ;;  %v2249_v1 = vld [vmem:[%s8093_s26 + $0x3e98] sm:$0x3]  ;;  %v2184_v7 = vld [vmem:[%s8093_s26 + $0x3c90] sm:$0xff] }
 0x166   : > { %6260 = vmatpush1.bf16.msra.mxu0 %v6259_v31  ;;  %v1800_v31 = vld [vmem:[%s8093_s26 + $0x3090] sm:$0xff]  ;;  %v2182_v5 = vld [vmem:[%s8093_s26 + $0x3c80] sm:$0xff]  ;;  %v6355_v8 = vpack.c.bf16 %v2249_v1, %v2185_v44  ;;  %v269_v13 = vld [vmem:[%s8093_s26 + $0xb8] sm:$0xff] }
 0x167   : > { %5460 = vst [vmem:[%s8808_s6] sm:$0xff] %v5188_v47  ;;  %6326 = vmatpush1.bf16.msra.mxu1 %v6325_v36  ;;  %6262 = vmatprep.subr.bf16.mxu0 %v6261_v37  ;;  %v1864_v36 = vld [vmem:[%s8093_s26 + $0x3290] sm:$0xff]  ;;  %v1927_v37 = vld [vmem:[%s8093_s26 + $0x3488] sm:$0xff]  ;;  %v1990_v47 = vld [vmem:[%s8093_s26 + $0x3680] sm:$0xff] }
 0x168   : > { %6328 = vmatprep.subr.bf16.mxu1 %v6327_v42  ;;  %v6279_v42 = vpack.c.bf16 %v1862_v30, %v1798_v28  ;;  %v6345_v43 = vpack.c.bf16 %v1864_v36, %v1800_v31  ;;  %v6281_v45 = vpack.c.bf16 %v1991_v38, %v1927_v37  ;;  %v6283_v54 = vpack.c.bf16 %v1990_v47, %v1926_v46  ;;  %v2246_v6 = vld [vmem:[%s8093_s26 + $0x3e80] sm:$0x3]  ;;  %v333_v14 = vld [vmem:[%s8093_s26 + $0x2b8] sm:$0xff]  ;;  %v268_v23 = vld [vmem:[%s8093_s26 + $0xb0] sm:$0xff] }
 0x169   : > { %v6292_v15 = vpack.c.bf16 %v2246_v6, %v2182_v5  ;;  %v266_v21 = vld [vmem:[%s8093_s26 + $0xa0] sm:$0xff]  ;;  %v6427_v24 = vpack.c.bf16 %v333_v14, %v269_v13  ;;  %v397_v28 = vld [vmem:[%s8093_s26 + $0x4b8] sm:$0xff]  ;;  %v396_v40 = vld [vmem:[%s8093_s26 + $0x4b0] sm:$0xff] }
 0x16a   : > { %6264 = vmatpush1.bf16.msra.mxu0 %v6263_v18  ;;  %v1992_v18 = vld [vmem:[%s8093_s26 + $0x3690] sm:$0xff]  ;;  %v330_v22 = vld [vmem:[%s8093_s26 + $0x2a0] sm:$0xff]  ;;  %v461_v30 = vld [vmem:[%s8093_s26 + $0x6b8] sm:$0xff] }
 0x16b   : > { %6330 = vmatpush1.bf16.msra.mxu1 %v6329_v50  ;;  %6266 = vmatprep.subr.bf16.mxu0 %v6265_v51  ;;  %v2055_v50 = vld [vmem:[%s8093_s26 + $0x3888] sm:$0xff]  ;;  %v6363_v31 = vpack.c.bf16 %v330_v22, %v266_v21  ;;  %v394_v37 = vld [vmem:[%s8093_s26 + $0x4a0] sm:$0xff]  ;;  %v6431_v41 = vpack.c.bf16 %v461_v30, %v397_v28  ;;  %v525_v47 = vld [vmem:[%s8093_s26 + $0x8b8] sm:$0xff]  ;;  %v8925_v22 = vsub.s32 4, %v8732_v16  ;;  %v8936_v30 = vsub.s32 7, %v8732_v16 }
 0x16c   : > { %6332 = vmatprep.subr.bf16.mxu1 %v6331_v55  ;;  %v2119_v51 = vld [vmem:[%s8093_s26 + $0x3a88] sm:$0xff]  ;;  %v6349_v55 = vpack.c.bf16 %v1992_v18, %v1928_v48  ;;  %v458_v38 = vld [vmem:[%s8093_s26 + $0x6a0] sm:$0xff]  ;;  %v589_v48 = vld [vmem:[%s8093_s26 + $0xab8] sm:$0xff] }
 0x16d   : > { %v6285_v56 = vpack.c.bf16 %v2119_v51, %v2055_v50  ;;  %v8892_v46 = vld.sshfl [vmem:[%s10699_s0] sm:$0x33 pattern:$0x76325410]  ;;  %v524_v53 = vld [vmem:[%s8093_s26 + $0x8b0] sm:$0xff]  ;;  %v715_v58 = vld [vmem:[%s8093_s26 + $0xea8] sm:$0xff] }
 0x16e   : > { %6268 = vmatpush1.bf16.msra.mxu0 %v6267_v62  ;;  %v2120_v62 = vld [vmem:[%s8093_s26 + $0x3a90] sm:$0xff]  ;;  %v522_v51 = vld [vmem:[%s8093_s26 + $0x8a0] sm:$0xff]  ;;  %v653_v59 = vld [vmem:[%s8093_s26 + $0xcb8] sm:$0xff] }
 0x16f   : > { %6334 = vmatpush1.bf16.msra.mxu1 %v6333_v63  ;;  %6270 = vmatprep.subr.bf16.mxu0 %v6269_v0  ;;  %v2183_v63 = vld [vmem:[%s8093_s26 + $0x3c88] sm:$0xff]  ;;  %v586_v52 = vld [vmem:[%s8093_s26 + $0xaa0] sm:$0xff]  ;;  %v652_v1 = vld [vmem:[%s8093_s26 + $0xcb0] sm:$0xff] }
 0x170   : > { %6336 = vmatprep.subr.bf16.mxu1 %v6335_v3  ;;  %v2247_v0 = vld [vmem:[%s8093_s26 + $0x3e88] sm:$0x3]  ;;  %v6353_v3 = vpack.c.bf16 %v2120_v62, %v2056_v60  ;;  %v717_v60 = vld [vmem:[%s8093_s26 + $0xeb8] sm:$0xff]  ;;  %v714_v44 = vld [vmem:[%s8093_s26 + $0xea0] sm:$0xff] }
 0x171   : > { %v6289_v4 = vpack.c.bf16 %v2247_v0, %v2183_v63  ;;  %v650_v0 = vld [vmem:[%s8093_s26 + $0xca0] sm:$0xff]  ;;  %v843_v5 = vld [vmem:[%s8093_s26 + $0x12a8] sm:$0xff]  ;;  %v781_v6 = vld [vmem:[%s8093_s26 + $0x10b8] sm:$0xff] }
 0x172   : > { %6272 = vmatpush1.bf16.msra.mxu0 %v6271_v10  ;;  %v2248_v10 = vld [vmem:[%s8093_s26 + $0x3e90] sm:$0x3]  ;;  %v842_v13 = vld [vmem:[%s8093_s26 + $0x12a0] sm:$0xff]  ;;  %v971_v21 = vld [vmem:[%s8093_s26 + $0x16a8] sm:$0xff] }
 0x173   : > { %6338 = vmatpush1.bf16.msra.mxu1 %v6337_v11  ;;  %6274 = vmatprep.subr.bf16.mxu0 %v6273_v12  ;;  %v267_v11 = vld [vmem:[%s8093_s26 + $0xa8] sm:$0xff]  ;;  %v780_v14 = vld [vmem:[%s8093_s26 + $0x10b0] sm:$0xff] }
 0x174   : > { %6340 = vmatprep.subr.bf16.mxu1 %v6339_v17  ;;  %v331_v12 = vld [vmem:[%s8093_s26 + $0x2a8] sm:$0xff]  ;;  %v6358_v17 = vpack.c.bf16 %v2248_v10, %v2184_v7  ;;  %v845_v7 = vld [vmem:[%s8093_s26 + $0x12b8] sm:$0xff] }
 0x175   : > { %v6361_v19 = vpack.c.bf16 %v331_v12, %v267_v11  ;;  %v778_v12 = vld [vmem:[%s8093_s26 + $0x10a0] sm:$0xff] }
 0x176   : > { %6276 = vmatpush1.bf16.msra.mxu0 %v6275_v25  ;;  %v332_v25 = vld [vmem:[%s8093_s26 + $0x2b0] sm:$0xff] }
 0x177   : > { %6342 = vmatpush1.bf16.msra.mxu1 %v6341_v26  ;;  %6278 = vmatprep.subr.bf16.mxu0 %v6277_v27  ;;  %v395_v26 = vld [vmem:[%s8093_s26 + $0x4a8] sm:$0xff] }
 0x178   : > { %6344 = vmatprep.subr.bf16.mxu1 %v6343_v32  ;;  %v459_v27 = vld [vmem:[%s8093_s26 + $0x6a8] sm:$0xff]  ;;  %v6429_v32 = vpack.c.bf16 %v332_v25, %v268_v23  ;;  %v909_v23 = vld [vmem:[%s8093_s26 + $0x14b8] sm:$0xff]  ;;  %v6379_v25 = vpack.c.bf16 %v842_v13, %v778_v12  ;;  %v1228_v13 = vld [vmem:[%s8093_s26 + $0x1eb0] sm:$0xff] }
 0x179   : > { %v6365_v36 = vpack.c.bf16 %v459_v27, %v395_v26  ;;  %v8930_v26 = vsub.s32 6, %v8732_v16  ;;  %v8933_v27 = vsub.s32 5, %v8732_v16 }
 0x17a   : > { %6280 = vmatpush1.bf16.msra.mxu0 %v6279_v42  ;;  %v460_v42 = vld [vmem:[%s8093_s26 + $0x6b0] sm:$0xff] }
 0x17b   : > { %6346 = vmatpush1.bf16.msra.mxu1 %v6345_v43  ;;  %6282 = vmatprep.subr.bf16.mxu0 %v6281_v45  ;;  %v523_v43 = vld [vmem:[%s8093_s26 + $0x8a8] sm:$0xff]  ;;  %v6433_v18 = vpack.c.bf16 %v460_v42, %v396_v40  ;;  %v972_v40 = vld [vmem:[%s8093_s26 + $0x16b0] sm:$0xff]  ;;  %v2337_v16 = vrot.slane %v8751_v33, %v8930_v26 }
 0x17c   : > { %6348 = vmatprep.subr.bf16.mxu1 %v6347_v49  ;;  %v587_v45 = vld [vmem:[%s8093_s26 + $0xaa8] sm:$0xff]  ;;  %v6367_v49 = vpack.c.bf16 %v458_v38, %v394_v37  ;;  %v908_v37 = vld [vmem:[%s8093_s26 + $0x14b0] sm:$0xff] }
 0x17d   : > { %v6369_v50 = vpack.c.bf16 %v587_v45, %v523_v43  ;;  %v1099_v42 = vld [vmem:[%s8093_s26 + $0x1aa8] sm:$0xff]  ;;  %v2329_v43 = vrot.slane %v8751_v33, %v8925_v22  ;;  %v1037_v45 = vld [vmem:[%s8093_s26 + $0x18b8] sm:$0xff] }
 0x17e   : > { %6284 = vmatpush1.bf16.msra.mxu0 %v6283_v54  ;;  %v6435_v54 = vpack.c.bf16 %v589_v48, %v525_v47  ;;  %v1101_v47 = vld [vmem:[%s8093_s26 + $0x1ab8] sm:$0xff]  ;;  %v2333_v48 = vrot.slane %v8751_v33, %v8933_v27 }
 0x17f   : > { %6350 = vmatpush1.bf16.msra.mxu1 %v6349_v55  ;;  %6286 = vmatprep.subr.bf16.mxu0 %v6285_v56  ;;  %v588_v55 = vld [vmem:[%s8093_s26 + $0xab0] sm:$0xff]  ;;  %v651_v56 = vld [vmem:[%s8093_s26 + $0xca8] sm:$0xff] }
 0x180   : > { %6352 = vmatprep.subr.bf16.mxu1 %v6351_v61  ;;  %v6371_v61 = vpack.c.bf16 %v586_v52, %v522_v51  ;;  %v6437_v62 = vpack.c.bf16 %v588_v55, %v524_v53  ;;  %v6373_v63 = vpack.c.bf16 %v715_v58, %v651_v56  ;;  %v1034_v52 = vld [vmem:[%s8093_s26 + $0x18a0] sm:$0xff]  ;;  %v6451_v56 = vpack.c.bf16 %v1101_v47, %v1037_v45  ;;  %v1100_v58 = vld [vmem:[%s8093_s26 + $0x1ab0] sm:$0xff]  ;;  %v1421_v45 = vld [vmem:[%s8093_s26 + $0x24b8] sm:$0xff] }
 0x181   : > { %v1098_v53 = vld [vmem:[%s8093_s26 + $0x1aa0] sm:$0xff]  ;;  %v1485_v47 = vld [vmem:[%s8093_s26 + $0x26b8] sm:$0xff] }
 0x182   : > { %6288 = vmatpush1.bf16.msra.mxu0 %v6287_v2  ;;  %v6439_v2 = vpack.c.bf16 %v717_v60, %v653_v59  ;;  %v1163_v59 = vld [vmem:[%s8093_s26 + $0x1ca8] sm:$0xff] }
 0x183   : > { %6354 = vmatpush1.bf16.msra.mxu1 %v6353_v3  ;;  %6291 = vmatprep.subr.msk.bf16.mxu0 %vm8236_vm3, %v6289_v4  ;;  %v716_v3 = vld [vmem:[%s8093_s26 + $0xeb0] sm:$0xff]  ;;  %v779_v4 = vld [vmem:[%s8093_s26 + $0x10a8] sm:$0xff] }
 0x184   : > { %6357 = vmatprep.subr.msk.bf16.mxu1 %vm8236_vm3, %v6355_v8  ;;  %v6375_v8 = vpack.c.bf16 %v714_v44, %v650_v0  ;;  %v6441_v10 = vpack.c.bf16 %v716_v3, %v652_v1  ;;  %v6377_v11 = vpack.c.bf16 %v843_v5, %v779_v4  ;;  %v1227_v60 = vld [vmem:[%s8093_s26 + $0x1ea8] sm:$0xff]  ;;  %v1229_v0 = vld [vmem:[%s8093_s26 + $0x1eb8] sm:$0xff]  ;;  %v6387_v3 = vpack.c.bf16 %v1098_v53, %v1034_v52  ;;  %v1484_v53 = vld [vmem:[%s8093_s26 + $0x26b0] sm:$0xff] }
 0x185   : > { %v6463_v52 = vpack.c.bf16 %v1485_v47, %v1421_v45  ;;  %v1930_v47 = vld [vmem:[%s8093_s26 + $0x34a0] sm:$0xff] }
 0x186   : > { %6294 = vmatpush1.bf16.msk.msra.mxu0 %vm8236_vm3, %v6292_v15  ;;  %v6443_v15 = vpack.c.bf16 %v845_v7, %v781_v6  ;;  %v6389_v6 = vpack.c.bf16 %v1227_v60, %v1163_v59  ;;  %v1162_v7 = vld [vmem:[%s8093_s26 + $0x1ca0] sm:$0xff] }
 0x187   : > { %6360 = vmatpush1.bf16.msk.msra.mxu1 %vm8236_vm3, %v6358_v17  ;;  %6362 = vmatprep.subr.bf16.mxu0 %v6361_v19  ;;  %v844_v17 = vld [vmem:[%s8093_s26 + $0x12b0] sm:$0xff]  ;;  %v907_v19 = vld [vmem:[%s8093_s26 + $0x14a8] sm:$0xff] }
 0x188   : > { %6428 = vmatprep.subr.bf16.mxu1 %v6427_v24  ;;  %v973_v24 = vld [vmem:[%s8093_s26 + $0x16b8] sm:$0xff]  ;;  %v6445_v28 = vpack.c.bf16 %v844_v17, %v780_v14  ;;  %v1291_v14 = vld [vmem:[%s8093_s26 + $0x20a8] sm:$0xff] }
 0x189   : > { %3469 = vmatmul.mubr.f32.vlgmr.msra.gmra.mrb[8].mxu0 %v8892_v46  ;;  %v6447_v38 = vpack.c.bf16 %v973_v24, %v909_v23 }
 0x18a   : > { %3540 = vmatmul.mubr.f32.vlgmr.msra.gmra.mrb[8].mxu1 %v8892_v46  ;;  %6364 = vmatpush1.bf16.msra.mxu0 %v6363_v31  ;;  %v6381_v31 = vpack.c.bf16 %v971_v21, %v907_v19  ;;  %v1293_v19 = vld [vmem:[%s8093_s26 + $0x20b8] sm:$0xff] }
 0x18b   : > { %6430 = vmatpush1.bf16.msra.mxu1 %v6429_v32  ;;  %6366 = vmatprep.subr.bf16.mxu0 %v6365_v36  ;;  %v906_v32 = vld [vmem:[%s8093_s26 + $0x14a0] sm:$0xff]  ;;  %v1357_v21 = vld [vmem:[%s8093_s26 + $0x22b8] sm:$0xff] }
 0x18c   : > { %6432 = vmatprep.subr.bf16.mxu1 %v6431_v41  ;;  %5624 = vmatprep.mubr.msk.f32.mxu0 %vm2640_vm0, %v8206_v20  ;;  %v970_v36 = vld [vmem:[%s8093_s26 + $0x16a0] sm:$0xff]  ;;  %v1035_v41 = vld [vmem:[%s8093_s26 + $0x18a8] sm:$0xff] }
 0x18d   : > { %5627 = vmatprep.mubr.msk.f32.mxu1 %vm2640_vm0, %v8206_v20  ;;  %v6385_v51 = vpack.c.bf16 %v1099_v42, %v1035_v41  ;;  %v1419_v41 = vld [vmem:[%s8093_s26 + $0x24a8] sm:$0xff] }
 0x18e   : > { %6368 = vmatpush1.bf16.msra.mxu0 %v6367_v49  ;;  %v6383_v49 = vpack.c.bf16 %v970_v36, %v906_v32  ;;  %v1290_v32 = vld [vmem:[%s8093_s26 + $0x20a0] sm:$0xff]  ;;  %v1483_v42 = vld [vmem:[%s8093_s26 + $0x26a8] sm:$0xff] }
 0x18f   : > { %6434 = vmatpush1.bf16.msra.mxu1 %v6433_v18  ;;  %6370 = vmatprep.subr.bf16.mxu0 %v6369_v50  ;;  %v2341_v18 = vrot.slane %v8751_v33, %v8936_v30  ;;  %v6449_v50 = vpack.c.bf16 %v972_v40, %v908_v37  ;;  %v1354_v36 = vld [vmem:[%s8093_s26 + $0x22a0] sm:$0xff]  ;;  %v1292_v37 = vld [vmem:[%s8093_s26 + $0x20b0] sm:$0xff] }
 0x190   : > { %6436 = vmatprep.subr.bf16.mxu1 %v6435_v54  ;;  %v1036_v54 = vld [vmem:[%s8093_s26 + $0x18b0] sm:$0xff] }
 0x191   : > { %v6453_v5 = vpack.c.bf16 %v1100_v58, %v1036_v54  ;;  %v1356_v40 = vld [vmem:[%s8093_s26 + $0x22b0] sm:$0xff]  ;;  %v1547_v54 = vld [vmem:[%s8093_s26 + $0x28a8] sm:$0xff]  ;;  %v1613_v58 = vld [vmem:[%s8093_s26 + $0x2ab8] sm:$0xff] }
 0x192   : > { %6372 = vmatpush1.bf16.msra.mxu0 %v6371_v61 }
 0x193   : > { %6438 = vmatpush1.bf16.msra.mxu1 %v6437_v62  ;;  %6374 = vmatprep.subr.bf16.mxu0 %v6373_v63  ;;  %v1165_v63 = vld [vmem:[%s8093_s26 + $0x1cb8] sm:$0xff] }
 0x194   : > { %6440 = vmatprep.subr.bf16.mxu1 %v6439_v2  ;;  %v6455_v12 = vpack.c.bf16 %v1229_v0, %v1165_v63  ;;  %v1548_v63 = vld [vmem:[%s8093_s26 + $0x28b0] sm:$0xff] }
 0x196   : > { %6376 = vmatpush1.bf16.msra.mxu0 %v6375_v8  ;;  %v1226_v8 = vld [vmem:[%s8093_s26 + $0x1ea0] sm:$0xff] }
 0x197   : > { %6442 = vmatpush1.bf16.msra.mxu1 %v6441_v10  ;;  %6378 = vmatprep.subr.bf16.mxu0 %v6377_v11  ;;  %v1164_v10 = vld [vmem:[%s8093_s26 + $0x1cb0] sm:$0xff]  ;;  %v6391_v24 = vpack.c.bf16 %v1226_v8, %v1162_v7  ;;  %v1674_v8 = vld [vmem:[%s8093_s26 + $0x2ca0] sm:$0xff] }
 0x198   : > { %6444 = vmatprep.subr.bf16.mxu1 %v6443_v15  ;;  %v1355_v15 = vld [vmem:[%s8093_s26 + $0x22a8] sm:$0xff] }
 0x19a   : > { %6380 = vmatpush1.bf16.msra.mxu0 %v6379_v25 }
 0x19b   : > { %6446 = vmatpush1.bf16.msra.mxu1 %v6445_v28  ;;  %6382 = vmatprep.subr.bf16.mxu0 %v6381_v31  ;;  %v6457_v28 = vpack.c.bf16 %v1228_v13, %v1164_v10  ;;  %v6393_v31 = vpack.c.bf16 %v1355_v15, %v1291_v14  ;;  %v1738_v10 = vld [vmem:[%s8093_s26 + $0x2ea0] sm:$0xff]  ;;  %v1740_v13 = vld [vmem:[%s8093_s26 + $0x2eb0] sm:$0xff]  ;;  %v1803_v14 = vld [vmem:[%s8093_s26 + $0x30a8] sm:$0xff] }
 0x19c   : > { %v3044_v55 = vpop.f32.mrb[2].mxu0  ;;  %6448 = vmatprep.subr.bf16.mxu1 %v6447_v38  ;;  %v6459_v38 = vpack.c.bf16 %v1357_v21, %v1293_v19  ;;  %v1867_v15 = vld [vmem:[%s8093_s26 + $0x32a8] sm:$0xff]  ;;  %v1869_v19 = vld [vmem:[%s8093_s26 + $0x32b8] sm:$0xff]  ;;  %v6407_v21 = vpack.c.bf16 %v1738_v10, %v1674_v8  ;;  %v2252_v8 = vld [vmem:[%s8093_s26 + $0x3eb0] sm:$0x3] }
 0x19d   : > { %v3045_v61 = vadd.f32 %v3044_v55, %v2329_v43  ;;  %v3115_v62 = vpop.f32.mrb[2].mxu1  ;;  %v3046_v33 = vpop.f32.mrb[3].mxu0  ;;  %v1611_v55 = vld [vmem:[%s8093_s26 + $0x2aa8] sm:$0xff] }
 0x19e   : > { %v3116_v44 = vadd.f32 %v3115_v62, %v2337_v16  ;;  %v3047_v1 = vadd.f32 %v3046_v33, %v2333_v48  ;;  %v3117_v2 = vpop.f32.mrb[3].mxu1  ;;  %6384 = vmatpush1.bf16.msra.mxu0 %v6383_v49  ;;  %v6395_v16 = vpack.c.bf16 %v1354_v36, %v1290_v32  ;;  %v6461_v48 = vpack.c.bf16 %v1356_v40, %v1292_v37  ;;  %v1546_v62 = vld [vmem:[%s8093_s26 + $0x28a0] sm:$0xff]  ;;  %v1868_v36 = vld [vmem:[%s8093_s26 + $0x32b0] sm:$0xff]  ;;  %v1931_v37 = vld [vmem:[%s8093_s26 + $0x34a8] sm:$0xff] }
 0x19f   : > { %v3118_v4 = vadd.f32 %v3117_v2, %v2341_v18  ;;  %6450 = vmatpush1.bf16.msra.mxu1 %v6449_v50  ;;  %6386 = vmatprep.subr.bf16.mxu0 %v6385_v51  ;;  %v6397_v49 = vpack.c.bf16 %v1483_v42, %v1419_v41  ;;  %v1418_v18 = vld [vmem:[%s8093_s26 + $0x24a0] sm:$0xff]  ;;  %v1420_v51 = vld [vmem:[%s8093_s26 + $0x24b0] sm:$0xff]  ;;  %v1739_v2 = vld [vmem:[%s8093_s26 + $0x2ea8] sm:$0xff] }
 0x1a0   : > { %v5189_v11 = vcombine.low %v3045_v61, %v3047_v1  ;;  %6452 = vmatprep.subr.bf16.mxu1 %v6451_v56  ;;  %v1482_v50 = vld [vmem:[%s8093_s26 + $0x26a0] sm:$0xff]  ;;  %v1549_v56 = vld [vmem:[%s8093_s26 + $0x28b8] sm:$0xff]  ;;  %v6465_v60 = vpack.c.bf16 %v1484_v53, %v1420_v51  ;;  %v6401_v61 = vpack.c.bf16 %v1611_v55, %v1547_v54  ;;  %v1675_v1 = vld [vmem:[%s8093_s26 + $0x2ca8] sm:$0xff] }
 0x1a1   : > { %v5190_v17 = vcombine.low %v3116_v44, %v3118_v4  ;;  %v6399_v59 = vpack.c.bf16 %v1482_v50, %v1418_v18  ;;  %v1610_v33 = vld [vmem:[%s8093_s26 + $0x2aa0] sm:$0xff]  ;;  %v6467_v0 = vpack.c.bf16 %v1613_v58, %v1549_v56  ;;  %v1612_v44 = vld [vmem:[%s8093_s26 + $0x2ab0] sm:$0xff]  ;;  %v1741_v4 = vld [vmem:[%s8093_s26 + $0x2eb8] sm:$0xff]  ;;  %v6405_v7 = vpack.c.bf16 %v1739_v2, %v1675_v1 }
 0x1a2   : > { %v5197_v23 = vrot.slane %v5189_v11, %v8787_v9  ;;  %6388 = vmatpush1.bf16.msra.mxu0 %v6387_v3  ;;  %v1677_v3 = vld [vmem:[%s8093_s26 + $0x2cb8] sm:$0xff]  ;;  %v1676_v11 = vld [vmem:[%s8093_s26 + $0x2cb0] sm:$0xff]  ;;  %v2059_v50 = vld [vmem:[%s8093_s26 + $0x38a8] sm:$0xff] }
 0x1a3   : > { %v5204_v25 = vrot.slane %v5190_v17, %v8787_v9  ;;  %6454 = vmatpush1.bf16.msra.mxu1 %v6453_v5  ;;  %6390 = vmatprep.subr.bf16.mxu0 %v6389_v6  ;;  %v6403_v5 = vpack.c.bf16 %v1610_v33, %v1546_v62  ;;  %v6469_v6 = vpack.c.bf16 %v1612_v44, %v1548_v63  ;;  %v1805_v17 = vld [vmem:[%s8093_s26 + $0x30b8] sm:$0xff]  ;;  %v1996_v18 = vld [vmem:[%s8093_s26 + $0x36b0] sm:$0xff]  ;;  %v2123_v51 = vld [vmem:[%s8093_s26 + $0x3aa8] sm:$0xff] }
 0x1a4   : > { %6456 = vmatprep.subr.bf16.mxu1 %v6455_v12  ;;  %v6471_v12 = vpack.c.bf16 %v1741_v4, %v1677_v3  ;;  %v6475_v32 = vpack.c.bf16 %v1869_v19, %v1805_v17  ;;  %v1933_v40 = vld [vmem:[%s8093_s26 + $0x34b8] sm:$0xff]  ;;  %v6417_v56 = vpack.c.bf16 %v2123_v51, %v2059_v50  ;;  %v2058_v58 = vld [vmem:[%s8093_s26 + $0x38a0] sm:$0xff]  ;;  %v2124_v62 = vld [vmem:[%s8093_s26 + $0x3ab0] sm:$0xff] }
 0x1a5   : > { %v5205_v43 = vcombine.low %v5197_v23, %v5204_v25  ;;  %v6473_v23 = vpack.c.bf16 %v1740_v13, %v1676_v11  ;;  %v1802_v25 = vld [vmem:[%s8093_s26 + $0x30a0] sm:$0xff]  ;;  %v1997_v41 = vld [vmem:[%s8093_s26 + $0x36b8] sm:$0xff]  ;;  %v2187_v33 = vld [vmem:[%s8093_s26 + $0x3ca8] sm:$0xff] }
 0x1a6   : > { %6392 = vmatpush1.bf16.msra.mxu0 %v6391_v24  ;;  %v6409_v24 = vpack.c.bf16 %v1867_v15, %v1803_v14  ;;  %v2125_v53 = vld [vmem:[%s8093_s26 + $0x3ab8] sm:$0xff]  ;;  %v2251_v63 = vld [vmem:[%s8093_s26 + $0x3ea8] sm:$0x3]  ;;  %v2186_v4 = vld [vmem:[%s8093_s26 + $0x3ca0] sm:$0xff] }
 0x1a7   : > { %5461 = vst [vmem:[%s8808_s6 + $0x8] sm:$0xff] %v5205_v43  ;;  %6458 = vmatpush1.bf16.msra.mxu1 %v6457_v28  ;;  %6394 = vmatprep.subr.bf16.mxu0 %v6393_v31  ;;  %v1866_v28 = vld [vmem:[%s8093_s26 + $0x32a0] sm:$0xff]  ;;  %v1804_v31 = vld [vmem:[%s8093_s26 + $0x30b0] sm:$0xff]  ;;  %v2253_v44 = vld [vmem:[%s8093_s26 + $0x3eb8] sm:$0x3]  ;;  %v6421_v3 = vpack.c.bf16 %v2251_v63, %v2187_v33 }
 0x1a8   : > { %6460 = vmatprep.subr.bf16.mxu1 %v6459_v38  ;;  %v1995_v38 = vld [vmem:[%s8093_s26 + $0x36a8] sm:$0xff]  ;;  %v6411_v42 = vpack.c.bf16 %v1866_v28, %v1802_v25  ;;  %v6477_v43 = vpack.c.bf16 %v1868_v36, %v1804_v31  ;;  %v337_v13 = vld [vmem:[%s8093_s26 + $0x2d8] sm:$0xff]  ;;  %v270_v19 = vld [vmem:[%s8093_s26 + $0xc0] sm:$0xff] }
 0x1a9   : > { %v6413_v45 = vpack.c.bf16 %v1995_v38, %v1931_v37  ;;  %v271_v10 = vld [vmem:[%s8093_s26 + $0xc8] sm:$0xff]  ;;  %v336_v25 = vld [vmem:[%s8093_s26 + $0x2d0] sm:$0xff]  ;;  %v465_v36 = vld [vmem:[%s8093_s26 + $0x6d8] sm:$0xff] }
 0x1aa   : > { %6396 = vmatpush1.bf16.msra.mxu0 %v6395_v16  ;;  %v1994_v16 = vld [vmem:[%s8093_s26 + $0x36a0] sm:$0xff]  ;;  %v335_v11 = vld [vmem:[%s8093_s26 + $0x2c8] sm:$0xff] }
 0x1ab   : > { %6462 = vmatpush1.bf16.msra.mxu1 %v6461_v48  ;;  %6398 = vmatprep.subr.bf16.mxu0 %v6397_v49  ;;  %v1932_v48 = vld [vmem:[%s8093_s26 + $0x34b0] sm:$0xff]  ;;  %v6479_v49 = vpack.c.bf16 %v1997_v41, %v1933_v40  ;;  %v6415_v54 = vpack.c.bf16 %v1994_v16, %v1930_v47  ;;  %v6493_v17 = vpack.c.bf16 %v335_v11, %v271_v10  ;;  %v399_v28 = vld [vmem:[%s8093_s26 + $0x4c8] sm:$0xff]  ;;  %v398_v41 = vld [vmem:[%s8093_s26 + $0x4c0] sm:$0xff] }
 0x1ac   : > { %6464 = vmatprep.subr.bf16.mxu1 %v6463_v52  ;;  %v2061_v52 = vld [vmem:[%s8093_s26 + $0x38b8] sm:$0xff]  ;;  %v6481_v55 = vpack.c.bf16 %v1996_v18, %v1932_v48  ;;  %v463_v31 = vld [vmem:[%s8093_s26 + $0x6c8] sm:$0xff]  ;;  %v464_v47 = vld [vmem:[%s8093_s26 + $0x6d0] sm:$0xff] }
 0x1ad   : > { %v6497_v40 = vpack.c.bf16 %v463_v31, %v399_v28  ;;  %v527_v16 = vld [vmem:[%s8093_s26 + $0x8c8] sm:$0xff]  ;;  %v593_v18 = vld [vmem:[%s8093_s26 + $0xad8] sm:$0xff] }
 0x1ae   : > { %6400 = vmatpush1.bf16.msra.mxu0 %v6399_v59  ;;  %v2122_v59 = vld [vmem:[%s8093_s26 + $0x3aa0] sm:$0xff]  ;;  %v591_v48 = vld [vmem:[%s8093_s26 + $0xac8] sm:$0xff] }
 0x1af   : > { %6466 = vmatpush1.bf16.msra.mxu1 %v6465_v60  ;;  %6402 = vmatprep.subr.bf16.mxu0 %v6401_v61  ;;  %v2060_v60 = vld [vmem:[%s8093_s26 + $0x38b0] sm:$0xff]  ;;  %v6483_v61 = vpack.c.bf16 %v2125_v53, %v2061_v52  ;;  %v6419_v1 = vpack.c.bf16 %v2122_v59, %v2058_v58  ;;  %v6501_v52 = vpack.c.bf16 %v591_v48, %v527_v16  ;;  %v526_v53 = vld [vmem:[%s8093_s26 + $0x8c0] sm:$0xff]  ;;  %v655_v59 = vld [vmem:[%s8093_s26 + $0xcc8] sm:$0xff] }
 0x1b0   : > { %6468 = vmatprep.subr.bf16.mxu1 %v6467_v0  ;;  %v2189_v0 = vld [vmem:[%s8093_s26 + $0x3cb8] sm:$0xff]  ;;  %v6485_v2 = vpack.c.bf16 %v2124_v62, %v2060_v60  ;;  %v592_v58 = vld [vmem:[%s8093_s26 + $0xad0] sm:$0xff]  ;;  %v719_v60 = vld [vmem:[%s8093_s26 + $0xec8] sm:$0xff] }
 0x1b1   : > { %v6505_v63 = vpack.c.bf16 %v719_v60, %v655_v59  ;;  %v9092_v28 = vld [vmem:[%s8740_s30 + $0x8] sm:$0xff]  ;;  %v1105_v16 = vld [vmem:[%s8093_s26 + $0x1ad8] sm:$0xff]  ;;  %v1104_v59 = vld [vmem:[%s8093_s26 + $0x1ad0] sm:$0xff] }
 0x1b2   : > { %6404 = vmatpush1.bf16.msra.mxu0 %v6403_v5  ;;  %v2250_v5 = vld [vmem:[%s8093_s26 + $0x3ea0] sm:$0x3]  ;;  %v2353_v48 = vrot.slane %v9092_v28, %v8754_v34  ;;  %v1167_v60 = vld [vmem:[%s8093_s26 + $0x1cc8] sm:$0xff] }
 0x1b3   : > { %6470 = vmatpush1.bf16.msra.mxu1 %v6469_v6  ;;  %6406 = vmatprep.subr.bf16.mxu0 %v6405_v7  ;;  %v2188_v6 = vld [vmem:[%s8093_s26 + $0x3cb0] sm:$0xff]  ;;  %v6487_v7 = vpack.c.bf16 %v2253_v44, %v2189_v0  ;;  %v6424_v14 = vpack.c.bf16 %v2250_v5, %v2186_v4  ;;  %v654_v0 = vld [vmem:[%s8093_s26 + $0xcc0] sm:$0xff]  ;;  %v783_v4 = vld [vmem:[%s8093_s26 + $0x10c8] sm:$0xff] }
 0x1b4   : > { %6472 = vmatprep.subr.bf16.mxu1 %v6471_v12  ;;  %v273_v12 = vld [vmem:[%s8093_s26 + $0xd8] sm:$0xff]  ;;  %v6490_v15 = vpack.c.bf16 %v2252_v8, %v2188_v6  ;;  %v718_v44 = vld [vmem:[%s8093_s26 + $0xec0] sm:$0xff]  ;;  %v847_v5 = vld [vmem:[%s8093_s26 + $0x12c8] sm:$0xff] }
 0x1b5   : > { %v785_v6 = vld [vmem:[%s8093_s26 + $0x10d8] sm:$0xff]  ;;  %v6507_v8 = vpack.c.bf16 %v718_v44, %v654_v0  ;;  %v6509_v11 = vpack.c.bf16 %v847_v5, %v783_v4 }
 0x1b6   : > { %6408 = vmatpush1.bf16.msra.mxu0 %v6407_v21  ;;  %v334_v21 = vld [vmem:[%s8093_s26 + $0x2c0] sm:$0xff]  ;;  %v1233_v0 = vld [vmem:[%s8093_s26 + $0x1ed8] sm:$0xff] }
 0x1b7   : > { %6474 = vmatpush1.bf16.msra.mxu1 %v6473_v23  ;;  %6410 = vmatprep.subr.bf16.mxu0 %v6409_v24  ;;  %v272_v23 = vld [vmem:[%s8093_s26 + $0xd0] sm:$0xff]  ;;  %v6559_v24 = vpack.c.bf16 %v337_v13, %v273_v12  ;;  %v6495_v37 = vpack.c.bf16 %v334_v21, %v270_v19  ;;  %v782_v12 = vld [vmem:[%s8093_s26 + $0x10c0] sm:$0xff]  ;;  %v911_v19 = vld [vmem:[%s8093_s26 + $0x14c8] sm:$0xff] }
 0x1b8   : > { %6476 = vmatprep.subr.bf16.mxu1 %v6475_v32  ;;  %v401_v32 = vld [vmem:[%s8093_s26 + $0x4d8] sm:$0xff]  ;;  %v6561_v38 = vpack.c.bf16 %v336_v25, %v272_v23  ;;  %v846_v13 = vld [vmem:[%s8093_s26 + $0x12c0] sm:$0xff]  ;;  %v975_v21 = vld [vmem:[%s8093_s26 + $0x16c8] sm:$0xff] }
 0x1b9   : > { %v913_v23 = vld [vmem:[%s8093_s26 + $0x14d8] sm:$0xff]  ;;  %v6511_v25 = vpack.c.bf16 %v846_v13, %v782_v12  ;;  %v1232_v13 = vld [vmem:[%s8093_s26 + $0x1ed0] sm:$0xff] }
 0x1ba   : > { %6412 = vmatpush1.bf16.msra.mxu0 %v6411_v42  ;;  %v462_v42 = vld [vmem:[%s8093_s26 + $0x6c0] sm:$0xff] }
 0x1bb   : > { %6478 = vmatpush1.bf16.msra.mxu1 %v6477_v43  ;;  %6414 = vmatprep.subr.bf16.mxu0 %v6413_v45  ;;  %v400_v43 = vld [vmem:[%s8093_s26 + $0x4d0] sm:$0xff]  ;;  %v6563_v45 = vpack.c.bf16 %v465_v36, %v401_v32  ;;  %v6499_v50 = vpack.c.bf16 %v462_v42, %v398_v41  ;;  %v6513_v32 = vpack.c.bf16 %v975_v21, %v911_v19  ;;  %v910_v36 = vld [vmem:[%s8093_s26 + $0x14c0] sm:$0xff]  ;;  %v1039_v42 = vld [vmem:[%s8093_s26 + $0x18c8] sm:$0xff] }
 0x1bc   : > { %6480 = vmatprep.subr.bf16.mxu1 %v6479_v49  ;;  %v529_v49 = vld [vmem:[%s8093_s26 + $0x8d8] sm:$0xff]  ;;  %v6565_v51 = vpack.c.bf16 %v464_v47, %v400_v43  ;;  %v976_v41 = vld [vmem:[%s8093_s26 + $0x16d0] sm:$0xff]  ;;  %v1103_v43 = vld [vmem:[%s8093_s26 + $0x1ac8] sm:$0xff] }
 0x1bd   : > { %v1041_v47 = vld [vmem:[%s8093_s26 + $0x18d8] sm:$0xff] }
 0x1be   : > { %6416 = vmatpush1.bf16.msra.mxu0 %v6415_v54  ;;  %v590_v54 = vld [vmem:[%s8093_s26 + $0xac0] sm:$0xff]  ;;  %v1297_v19 = vld [vmem:[%s8093_s26 + $0x20d8] sm:$0xff] }
 0x1bf   : > { %6482 = vmatpush1.bf16.msra.mxu1 %v6481_v55  ;;  %6418 = vmatprep.subr.bf16.mxu0 %v6417_v56  ;;  %v528_v55 = vld [vmem:[%s8093_s26 + $0x8d0] sm:$0xff]  ;;  %v6567_v56 = vpack.c.bf16 %v593_v18, %v529_v49  ;;  %v6503_v62 = vpack.c.bf16 %v590_v54, %v526_v53  ;;  %v2349_v49 = vrot.slane %v9092_v28, %v8757_v35  ;;  %v1038_v53 = vld [vmem:[%s8093_s26 + $0x18c0] sm:$0xff]  ;;  %v1361_v21 = vld [vmem:[%s8093_s26 + $0x22d8] sm:$0xff] }
 0x1c0   : > { %6484 = vmatprep.subr.bf16.mxu1 %v6483_v61  ;;  %v721_v61 = vld [vmem:[%s8093_s26 + $0xed8] sm:$0xff]  ;;  %v6569_v33 = vpack.c.bf16 %v592_v58, %v528_v55  ;;  %v1102_v54 = vld [vmem:[%s8093_s26 + $0x1ac0] sm:$0xff]  ;;  %v1040_v55 = vld [vmem:[%s8093_s26 + $0x18d0] sm:$0xff]  ;;  %v6583_v58 = vpack.c.bf16 %v1105_v16, %v1041_v47 }
 0x1c1   : > { %v6585_v5 = vpack.c.bf16 %v1104_v59, %v1040_v55  ;;  %v1425_v47 = vld [vmem:[%s8093_s26 + $0x24d8] sm:$0xff]  ;;  %v1551_v55 = vld [vmem:[%s8093_s26 + $0x28c8] sm:$0xff] }
 0x1c2   : > { %6420 = vmatpush1.bf16.msra.mxu0 %v6419_v1  ;;  %v656_v1 = vld [vmem:[%s8093_s26 + $0xcd0] sm:$0xff]  ;;  %v1489_v16 = vld [vmem:[%s8093_s26 + $0x26d8] sm:$0xff] }
 0x1c3   : > { %6486 = vmatpush1.bf16.msra.mxu1 %v6485_v2  ;;  %6423 = vmatprep.subr.msk.bf16.mxu0 %vm8236_vm3, %v6421_v3  ;;  %v720_v3 = vld [vmem:[%s8093_s26 + $0xed0] sm:$0xff]  ;;  %v1617_v59 = vld [vmem:[%s8093_s26 + $0x2ad8] sm:$0xff] }
 0x1c4   : > { %6489 = vmatprep.subr.msk.bf16.mxu1 %vm8236_vm3, %v6487_v7  ;;  %v849_v7 = vld [vmem:[%s8093_s26 + $0x12d8] sm:$0xff]  ;;  %v6573_v10 = vpack.c.bf16 %v720_v3, %v656_v1  ;;  %v6519_v3 = vpack.c.bf16 %v1102_v54, %v1038_v53  ;;  %v6595_v53 = vpack.c.bf16 %v1489_v16, %v1425_v47  ;;  %v1488_v54 = vld [vmem:[%s8093_s26 + $0x26d0] sm:$0xff]  ;;  %v1934_v16 = vld [vmem:[%s8093_s26 + $0x34c0] sm:$0xff] }
 0x1c6   : > { %6426 = vmatpush1.bf16.msk.msra.mxu0 %vm8236_vm3, %v6424_v14  ;;  %v784_v14 = vld [vmem:[%s8093_s26 + $0x10d0] sm:$0xff] }
 0x1c7   : > { %6492 = vmatpush1.bf16.msk.msra.mxu1 %vm8236_vm3, %v6490_v15  ;;  %6494 = vmatprep.subr.bf16.mxu0 %v6493_v17  ;;  %v6575_v15 = vpack.c.bf16 %v849_v7, %v785_v6  ;;  %v848_v17 = vld [vmem:[%s8093_s26 + $0x12d0] sm:$0xff]  ;;  %v1166_v7 = vld [vmem:[%s8093_s26 + $0x1cc0] sm:$0xff] }
 0x1c8   : > { %6560 = vmatprep.subr.bf16.mxu1 %v6559_v24  ;;  %v977_v24 = vld [vmem:[%s8093_s26 + $0x16d8] sm:$0xff]  ;;  %v6577_v31 = vpack.c.bf16 %v848_v17, %v784_v14  ;;  %v1295_v14 = vld [vmem:[%s8093_s26 + $0x20c8] sm:$0xff] }
 0x1c9   : > { %3611 = vmatmul.mubr.f32.vlgmr.msra.gmra.mrb[10].mxu0 %v8892_v46 }
 0x1ca   : > { %3682 = vmatmul.mubr.f32.vlgmr.msra.gmra.mrb[10].mxu1 %v8892_v46  ;;  %6496 = vmatpush1.bf16.msra.mxu0 %v6495_v37  ;;  %v657_v46 = vld [vmem:[%s8093_s26 + $0xcd8] sm:$0xff]  ;;  %v974_v37 = vld [vmem:[%s8093_s26 + $0x16c0] sm:$0xff] }
 0x1cb   : > { %6562 = vmatpush1.bf16.msra.mxu1 %v6561_v38  ;;  %6498 = vmatprep.subr.bf16.mxu0 %v6497_v40  ;;  %v6571_v2 = vpack.c.bf16 %v721_v61, %v657_v46  ;;  %v912_v38 = vld [vmem:[%s8093_s26 + $0x14d0] sm:$0xff]  ;;  %v6579_v40 = vpack.c.bf16 %v977_v24, %v913_v23  ;;  %v6515_v18 = vpack.c.bf16 %v974_v37, %v910_v36  ;;  %v1231_v46 = vld [vmem:[%s8093_s26 + $0x1ec8] sm:$0xff]  ;;  %v1294_v36 = vld [vmem:[%s8093_s26 + $0x20c0] sm:$0xff] }
 0x1cc   : > { %6564 = vmatprep.subr.bf16.mxu1 %v6563_v45  ;;  %5630 = vmatprep.mubr.msk.f32.mxu0 %vm2640_vm0, %v8206_v20  ;;  %v2345_v45 = vrot.slane %v9092_v28, %v8746_v29  ;;  %v6521_v6 = vpack.c.bf16 %v1231_v46, %v1167_v60  ;;  %v1358_v37 = vld [vmem:[%s8093_s26 + $0x22c0] sm:$0xff] }
 0x1cd   : > { %5633 = vmatprep.mubr.msk.f32.mxu1 %vm2640_vm0, %v8206_v20 }
 0x1ce   : > { %6500 = vmatpush1.bf16.msra.mxu0 %v6499_v50  ;;  %v2357_v50 = vrot.slane %v9092_v28, %v8760_v39 }
 0x1cf   : > { %6566 = vmatpush1.bf16.msra.mxu1 %v6565_v51  ;;  %6502 = vmatprep.subr.bf16.mxu0 %v6501_v52  ;;  %v6581_v51 = vpack.c.bf16 %v976_v41, %v912_v38  ;;  %v6517_v52 = vpack.c.bf16 %v1103_v43, %v1039_v42  ;;  %v1296_v38 = vld [vmem:[%s8093_s26 + $0x20d0] sm:$0xff]  ;;  %v1423_v42 = vld [vmem:[%s8093_s26 + $0x24c8] sm:$0xff] }
 0x1d0   : > { %6568 = vmatprep.subr.bf16.mxu1 %v6567_v56  ;;  %v1360_v41 = vld [vmem:[%s8093_s26 + $0x22d0] sm:$0xff]  ;;  %v1487_v43 = vld [vmem:[%s8093_s26 + $0x26c8] sm:$0xff] }
 0x1d2   : > { %6504 = vmatpush1.bf16.msra.mxu0 %v6503_v62 }
 0x1d3   : > { %6570 = vmatpush1.bf16.msra.mxu1 %v6569_v33  ;;  %6506 = vmatprep.subr.bf16.mxu0 %v6505_v63  ;;  %v1169_v63 = vld [vmem:[%s8093_s26 + $0x1cd8] sm:$0xff] }
 0x1d4   : > { %6572 = vmatprep.subr.bf16.mxu1 %v6571_v2  ;;  %v6587_v12 = vpack.c.bf16 %v1233_v0, %v1169_v63  ;;  %v1552_v63 = vld [vmem:[%s8093_s26 + $0x28d0] sm:$0xff] }
 0x1d6   : > { %6508 = vmatpush1.bf16.msra.mxu0 %v6507_v8  ;;  %v1230_v8 = vld [vmem:[%s8093_s26 + $0x1ec0] sm:$0xff] }
 0x1d7   : > { %6574 = vmatpush1.bf16.msra.mxu1 %v6573_v10  ;;  %6510 = vmatprep.subr.bf16.mxu0 %v6509_v11  ;;  %v1168_v10 = vld [vmem:[%s8093_s26 + $0x1cd0] sm:$0xff]  ;;  %v6523_v24 = vpack.c.bf16 %v1230_v8, %v1166_v7  ;;  %v1678_v8 = vld [vmem:[%s8093_s26 + $0x2cc0] sm:$0xff] }
 0x1d8   : > { %6576 = vmatprep.subr.bf16.mxu1 %v6575_v15  ;;  %v1359_v15 = vld [vmem:[%s8093_s26 + $0x22c8] sm:$0xff] }
 0x1da   : > { %6512 = vmatpush1.bf16.msra.mxu0 %v6511_v25 }
 0x1db   : > { %6578 = vmatpush1.bf16.msra.mxu1 %v6577_v31  ;;  %6514 = vmatprep.subr.bf16.mxu0 %v6513_v32  ;;  %v6589_v31 = vpack.c.bf16 %v1232_v13, %v1168_v10  ;;  %v6525_v32 = vpack.c.bf16 %v1359_v15, %v1295_v14  ;;  %v1742_v10 = vld [vmem:[%s8093_s26 + $0x2ec0] sm:$0xff]  ;;  %v1744_v13 = vld [vmem:[%s8093_s26 + $0x2ed0] sm:$0xff]  ;;  %v1807_v14 = vld [vmem:[%s8093_s26 + $0x30c8] sm:$0xff] }
 0x1dc   : > { %v3186_v56 = vpop.f32.mrb[4].mxu0  ;;  %6580 = vmatprep.subr.bf16.mxu1 %v6579_v40  ;;  %v6591_v40 = vpack.c.bf16 %v1361_v21, %v1297_v19  ;;  %v1871_v15 = vld [vmem:[%s8093_s26 + $0x32c8] sm:$0xff]  ;;  %v1873_v19 = vld [vmem:[%s8093_s26 + $0x32d8] sm:$0xff]  ;;  %v6539_v21 = vpack.c.bf16 %v1742_v10, %v1678_v8  ;;  %v2256_v8 = vld [vmem:[%s8093_s26 + $0x3ed0] sm:$0x3] }
 0x1dd   : > { %v3187_v61 = vadd.f32 %v3186_v56, %v2345_v45  ;;  %v3257_v62 = vpop.f32.mrb[4].mxu1  ;;  %v3188_v33 = vpop.f32.mrb[5].mxu0  ;;  %v1615_v56 = vld [vmem:[%s8093_s26 + $0x2ac8] sm:$0xff] }
 0x1de   : > { %v3258_v44 = vadd.f32 %v3257_v62, %v2353_v48  ;;  %v3189_v1 = vadd.f32 %v3188_v33, %v2349_v49  ;;  %v3259_v2 = vpop.f32.mrb[5].mxu1  ;;  %6516 = vmatpush1.bf16.msra.mxu0 %v6515_v18  ;;  %v6527_v48 = vpack.c.bf16 %v1358_v37, %v1294_v36  ;;  %v6593_v49 = vpack.c.bf16 %v1360_v41, %v1296_v38  ;;  %v1550_v62 = vld [vmem:[%s8093_s26 + $0x28c0] sm:$0xff]  ;;  %v1872_v37 = vld [vmem:[%s8093_s26 + $0x32d0] sm:$0xff]  ;;  %v1935_v38 = vld [vmem:[%s8093_s26 + $0x34c8] sm:$0xff] }
 0x1df   : > { %v3260_v4 = vadd.f32 %v3259_v2, %v2357_v50  ;;  %6582 = vmatpush1.bf16.msra.mxu1 %v6581_v51  ;;  %6518 = vmatprep.subr.bf16.mxu0 %v6517_v52  ;;  %v6529_v18 = vpack.c.bf16 %v1487_v43, %v1423_v42  ;;  %v1422_v50 = vld [vmem:[%s8093_s26 + $0x24c0] sm:$0xff]  ;;  %v1424_v52 = vld [vmem:[%s8093_s26 + $0x24d0] sm:$0xff]  ;;  %v1743_v2 = vld [vmem:[%s8093_s26 + $0x2ec8] sm:$0xff] }
 0x1e0   : > { %v5206_v11 = vcombine.low %v3187_v61, %v3189_v1  ;;  %6584 = vmatprep.subr.bf16.mxu1 %v6583_v58  ;;  %v1486_v51 = vld [vmem:[%s8093_s26 + $0x26c0] sm:$0xff]  ;;  %v1553_v58 = vld [vmem:[%s8093_s26 + $0x28d8] sm:$0xff]  ;;  %v6597_v46 = vpack.c.bf16 %v1488_v54, %v1424_v52  ;;  %v6533_v61 = vpack.c.bf16 %v1615_v56, %v1551_v55  ;;  %v1679_v1 = vld [vmem:[%s8093_s26 + $0x2cc8] sm:$0xff] }
 0x1e1   : > { %v5207_v17 = vcombine.low %v3258_v44, %v3260_v4  ;;  %v6531_v60 = vpack.c.bf16 %v1486_v51, %v1422_v50  ;;  %v1614_v33 = vld [vmem:[%s8093_s26 + $0x2ac0] sm:$0xff]  ;;  %v6599_v0 = vpack.c.bf16 %v1617_v59, %v1553_v58  ;;  %v1616_v44 = vld [vmem:[%s8093_s26 + $0x2ad0] sm:$0xff]  ;;  %v1745_v4 = vld [vmem:[%s8093_s26 + $0x2ed8] sm:$0xff]  ;;  %v6537_v7 = vpack.c.bf16 %v1743_v2, %v1679_v1 }
 0x1e2   : > { %v5214_v23 = vrot.slane %v5206_v11, %v8787_v9  ;;  %6520 = vmatpush1.bf16.msra.mxu0 %v6519_v3  ;;  %v1681_v3 = vld [vmem:[%s8093_s26 + $0x2cd8] sm:$0xff]  ;;  %v1680_v11 = vld [vmem:[%s8093_s26 + $0x2cd0] sm:$0xff]  ;;  %v2063_v51 = vld [vmem:[%s8093_s26 + $0x38c8] sm:$0xff] }
 0x1e3   : > { %v5221_v25 = vrot.slane %v5207_v17, %v8787_v9  ;;  %6586 = vmatpush1.bf16.msra.mxu1 %v6585_v5  ;;  %6522 = vmatprep.subr.bf16.mxu0 %v6521_v6  ;;  %v6535_v5 = vpack.c.bf16 %v1614_v33, %v1550_v62  ;;  %v6601_v6 = vpack.c.bf16 %v1616_v44, %v1552_v63  ;;  %v1809_v17 = vld [vmem:[%s8093_s26 + $0x30d8] sm:$0xff]  ;;  %v2000_v50 = vld [vmem:[%s8093_s26 + $0x36d0] sm:$0xff]  ;;  %v2127_v52 = vld [vmem:[%s8093_s26 + $0x3ac8] sm:$0xff] }
 0x1e4   : > { %6588 = vmatprep.subr.bf16.mxu1 %v6587_v12  ;;  %v6603_v12 = vpack.c.bf16 %v1745_v4, %v1681_v3  ;;  %v6607_v36 = vpack.c.bf16 %v1873_v19, %v1809_v17  ;;  %v1937_v41 = vld [vmem:[%s8093_s26 + $0x34d8] sm:$0xff]  ;;  %v6549_v58 = vpack.c.bf16 %v2127_v52, %v2063_v51  ;;  %v2062_v59 = vld [vmem:[%s8093_s26 + $0x38c0] sm:$0xff]  ;;  %v2128_v62 = vld [vmem:[%s8093_s26 + $0x3ad0] sm:$0xff] }
 0x1e5   : > { %v5222_v45 = vcombine.low %v5214_v23, %v5221_v25  ;;  %v6605_v23 = vpack.c.bf16 %v1744_v13, %v1680_v11  ;;  %v1806_v25 = vld [vmem:[%s8093_s26 + $0x30c0] sm:$0xff]  ;;  %v2001_v42 = vld [vmem:[%s8093_s26 + $0x36d8] sm:$0xff]  ;;  %v2191_v33 = vld [vmem:[%s8093_s26 + $0x3cc8] sm:$0xff] }
 0x1e6   : > { %6524 = vmatpush1.bf16.msra.mxu0 %v6523_v24  ;;  %v6541_v24 = vpack.c.bf16 %v1871_v15, %v1807_v14  ;;  %v2129_v54 = vld [vmem:[%s8093_s26 + $0x3ad8] sm:$0xff]  ;;  %v2255_v63 = vld [vmem:[%s8093_s26 + $0x3ec8] sm:$0x3]  ;;  %v2190_v4 = vld [vmem:[%s8093_s26 + $0x3cc0] sm:$0xff] }
 0x1e7   : > { %5462 = vst [vmem:[%s8808_s6 + $0x10] sm:$0xff] %v5222_v45  ;;  %6590 = vmatpush1.bf16.msra.mxu1 %v6589_v31  ;;  %6526 = vmatprep.subr.bf16.mxu0 %v6525_v32  ;;  %v1870_v31 = vld [vmem:[%s8093_s26 + $0x32c0] sm:$0xff]  ;;  %v1808_v32 = vld [vmem:[%s8093_s26 + $0x30d0] sm:$0xff]  ;;  %v2257_v44 = vld [vmem:[%s8093_s26 + $0x3ed8] sm:$0x3]  ;;  %v6553_v3 = vpack.c.bf16 %v2255_v63, %v2191_v33 }
 0x1e8   : > { %6592 = vmatprep.subr.bf16.mxu1 %v6591_v40  ;;  %v1999_v40 = vld [vmem:[%s8093_s26 + $0x36c8] sm:$0xff]  ;;  %v6543_v43 = vpack.c.bf16 %v1870_v31, %v1806_v25  ;;  %v6609_v45 = vpack.c.bf16 %v1872_v37, %v1808_v32  ;;  %v341_v13 = vld [vmem:[%s8093_s26 + $0x2f8] sm:$0xff]  ;;  %v274_v19 = vld [vmem:[%s8093_s26 + $0xe0] sm:$0xff] }
 0x1e9   : > { %v6545_v47 = vpack.c.bf16 %v1999_v40, %v1935_v38  ;;  %v275_v10 = vld [vmem:[%s8093_s26 + $0xe8] sm:$0xff]  ;;  %v340_v25 = vld [vmem:[%s8093_s26 + $0x2f0] sm:$0xff]  ;;  %v469_v37 = vld [vmem:[%s8093_s26 + $0x6f8] sm:$0xff] }
 0x1ea   : > { %6528 = vmatpush1.bf16.msra.mxu0 %v6527_v48  ;;  %v1998_v48 = vld [vmem:[%s8093_s26 + $0x36c0] sm:$0xff]  ;;  %v339_v11 = vld [vmem:[%s8093_s26 + $0x2e8] sm:$0xff]  ;;  %v597_v51 = vld [vmem:[%s8093_s26 + $0xaf8] sm:$0xff] }
 0x1eb   : > { %6594 = vmatpush1.bf16.msra.mxu1 %v6593_v49  ;;  %6530 = vmatprep.subr.bf16.mxu0 %v6529_v18  ;;  %v1936_v49 = vld [vmem:[%s8093_s26 + $0x34d0] sm:$0xff]  ;;  %v6611_v18 = vpack.c.bf16 %v2001_v42, %v1937_v41  ;;  %v6547_v55 = vpack.c.bf16 %v1998_v48, %v1934_v16  ;;  %v6625_v17 = vpack.c.bf16 %v339_v11, %v275_v10  ;;  %v403_v31 = vld [vmem:[%s8093_s26 + $0x4e8] sm:$0xff]  ;;  %v402_v42 = vld [vmem:[%s8093_s26 + $0x4e0] sm:$0xff] }
 0x1ec   : > { %6596 = vmatprep.subr.bf16.mxu1 %v6595_v53  ;;  %v2065_v53 = vld [vmem:[%s8093_s26 + $0x38d8] sm:$0xff]  ;;  %v6613_v56 = vpack.c.bf16 %v2000_v50, %v1936_v49  ;;  %v467_v32 = vld [vmem:[%s8093_s26 + $0x6e8] sm:$0xff]  ;;  %v468_v16 = vld [vmem:[%s8093_s26 + $0x6f0] sm:$0xff] }
 0x1ed   : > { %v6629_v41 = vpack.c.bf16 %v467_v32, %v403_v31  ;;  %v531_v48 = vld [vmem:[%s8093_s26 + $0x8e8] sm:$0xff]  ;;  %v533_v50 = vld [vmem:[%s8093_s26 + $0x8f8] sm:$0xff] }
 0x1ee   : > { %6532 = vmatpush1.bf16.msra.mxu0 %v6531_v60  ;;  %v2126_v60 = vld [vmem:[%s8093_s26 + $0x3ac0] sm:$0xff]  ;;  %v595_v49 = vld [vmem:[%s8093_s26 + $0xae8] sm:$0xff]  ;;  %v725_v33 = vld [vmem:[%s8093_s26 + $0xef8] sm:$0xff] }
 0x1ef   : > { %6598 = vmatpush1.bf16.msra.mxu1 %v6597_v46  ;;  %6534 = vmatprep.subr.bf16.mxu0 %v6533_v61  ;;  %v2064_v46 = vld [vmem:[%s8093_s26 + $0x38d0] sm:$0xff]  ;;  %v6615_v61 = vpack.c.bf16 %v2129_v54, %v2065_v53  ;;  %v6551_v1 = vpack.c.bf16 %v2126_v60, %v2062_v59  ;;  %v6633_v54 = vpack.c.bf16 %v595_v49, %v531_v48  ;;  %v853_v10 = vld [vmem:[%s8093_s26 + $0x12f8] sm:$0xff] }
 0x1f0   : > { %6600 = vmatprep.subr.bf16.mxu1 %v6599_v0  ;;  %v2193_v0 = vld [vmem:[%s8093_s26 + $0x3cd8] sm:$0xff]  ;;  %v6617_v2 = vpack.c.bf16 %v2128_v62, %v2064_v46  ;;  %v6699_v59 = vpack.c.bf16 %v597_v51, %v533_v50  ;;  %v596_v60 = vld [vmem:[%s8093_s26 + $0xaf0] sm:$0xff]  ;;  %v659_v46 = vld [vmem:[%s8093_s26 + $0xce8] sm:$0xff]  ;;  %v2369_v50 = vrot.slane %v9092_v28, %v8930_v26  ;;  %v2365_v51 = vrot.slane %v9092_v28, %v8933_v27 }
 0x1f1   : > { %v661_v62 = vld [vmem:[%s8093_s26 + $0xcf8] sm:$0xff] }
 0x1f2   : > { %6536 = vmatpush1.bf16.msra.mxu0 %v6535_v5  ;;  %v2254_v5 = vld [vmem:[%s8093_s26 + $0x3ec0] sm:$0x3]  ;;  %v981_v31 = vld [vmem:[%s8093_s26 + $0x16f8] sm:$0xff] }
 0x1f3   : > { %6602 = vmatpush1.bf16.msra.mxu1 %v6601_v6  ;;  %6538 = vmatprep.subr.bf16.mxu0 %v6537_v7  ;;  %v2192_v6 = vld [vmem:[%s8093_s26 + $0x3cd0] sm:$0xff]  ;;  %v6619_v7 = vpack.c.bf16 %v2257_v44, %v2193_v0  ;;  %v6556_v14 = vpack.c.bf16 %v2254_v5, %v2190_v4  ;;  %v6703_v4 = vpack.c.bf16 %v725_v33, %v661_v62  ;;  %v1045_v48 = vld [vmem:[%s8093_s26 + $0x18f8] sm:$0xff]  ;;  %v1171_v62 = vld [vmem:[%s8093_s26 + $0x1ce8] sm:$0xff] }
 0x1f4   : > { %6604 = vmatprep.subr.bf16.mxu1 %v6603_v12  ;;  %v277_v12 = vld [vmem:[%s8093_s26 + $0xf8] sm:$0xff]  ;;  %v6622_v15 = vpack.c.bf16 %v2256_v8, %v2192_v6  ;;  %v724_v5 = vld [vmem:[%s8093_s26 + $0xef0] sm:$0xff]  ;;  %v787_v6 = vld [vmem:[%s8093_s26 + $0x10e8] sm:$0xff] }
 0x1f5   : > { %v789_v8 = vld [vmem:[%s8093_s26 + $0x10f8] sm:$0xff]  ;;  %v1235_v33 = vld [vmem:[%s8093_s26 + $0x1ee8] sm:$0xff] }
 0x1f6   : > { %6540 = vmatpush1.bf16.msra.mxu0 %v6539_v21  ;;  %v338_v21 = vld [vmem:[%s8093_s26 + $0x2e0] sm:$0xff]  ;;  %v1109_v49 = vld [vmem:[%s8093_s26 + $0x1af8] sm:$0xff] }
 0x1f7   : > { %6606 = vmatpush1.bf16.msra.mxu1 %v6605_v23  ;;  %6542 = vmatprep.subr.bf16.mxu0 %v6541_v24  ;;  %v276_v23 = vld [vmem:[%s8093_s26 + $0xf0] sm:$0xff]  ;;  %v6691_v24 = vpack.c.bf16 %v341_v13, %v277_v12  ;;  %v6627_v38 = vpack.c.bf16 %v338_v21, %v274_v19  ;;  %v6707_v19 = vpack.c.bf16 %v853_v10, %v789_v8  ;;  %v1170_v10 = vld [vmem:[%s8093_s26 + $0x1ce0] sm:$0xff] }
 0x1f8   : > { %6608 = vmatprep.subr.bf16.mxu1 %v6607_v36  ;;  %v405_v36 = vld [vmem:[%s8093_s26 + $0x4f8] sm:$0xff]  ;;  %v6693_v40 = vpack.c.bf16 %v340_v25, %v276_v23  ;;  %v852_v21 = vld [vmem:[%s8093_s26 + $0x12f0] sm:$0xff]  ;;  %v915_v23 = vld [vmem:[%s8093_s26 + $0x14e8] sm:$0xff]  ;;  %v6653_v8 = vpack.c.bf16 %v1235_v33, %v1171_v62 }
 0x1f9   : > { %v917_v25 = vld [vmem:[%s8093_s26 + $0x14f8] sm:$0xff] }
 0x1fa   : > { %6544 = vmatpush1.bf16.msra.mxu0 %v6543_v43  ;;  %v466_v43 = vld [vmem:[%s8093_s26 + $0x6e0] sm:$0xff] }
 0x1fb   : > { %6610 = vmatpush1.bf16.msra.mxu1 %v6609_v45  ;;  %6546 = vmatprep.subr.bf16.mxu0 %v6545_v47  ;;  %v404_v45 = vld [vmem:[%s8093_s26 + $0x4f0] sm:$0xff]  ;;  %v6695_v47 = vpack.c.bf16 %v469_v37, %v405_v36  ;;  %v6631_v52 = vpack.c.bf16 %v466_v43, %v402_v42  ;;  %v6711_v42 = vpack.c.bf16 %v981_v31, %v917_v25 }
 0x1fc   : > { %6612 = vmatprep.subr.bf16.mxu1 %v6611_v18  ;;  %v9218_v18 = vld.sshfl [vmem:[%s10699_s0] sm:$0x33 pattern:$0x76325410]  ;;  %v6697_v53 = vpack.c.bf16 %v468_v16, %v404_v45  ;;  %v980_v43 = vld [vmem:[%s8093_s26 + $0x16f0] sm:$0xff]  ;;  %v1043_v45 = vld [vmem:[%s8093_s26 + $0x18e8] sm:$0xff]  ;;  %v2361_v16 = vrot.slane %v9092_v28, %v8925_v22 }
 0x1fe   : > { %6548 = vmatpush1.bf16.msra.mxu0 %v6547_v55  ;;  %v530_v55 = vld [vmem:[%s8093_s26 + $0x8e0] sm:$0xff] }
 0x1ff   : > { %6614 = vmatpush1.bf16.msra.mxu1 %v6613_v56  ;;  %6550 = vmatprep.subr.bf16.mxu0 %v6549_v58  ;;  %v594_v56 = vld [vmem:[%s8093_s26 + $0xae0] sm:$0xff]  ;;  %v532_v58 = vld [vmem:[%s8093_s26 + $0x8f0] sm:$0xff] }
 0x200   : > { %6616 = vmatprep.subr.bf16.mxu1 %v6615_v61  ;;  %v723_v61 = vld [vmem:[%s8093_s26 + $0xee8] sm:$0xff]  ;;  %v6635_v63 = vpack.c.bf16 %v594_v56, %v530_v55  ;;  %v6701_v0 = vpack.c.bf16 %v596_v60, %v532_v58  ;;  %v1042_v56 = vld [vmem:[%s8093_s26 + $0x18e0] sm:$0xff] }
 0x201   : > { %v6637_v44 = vpack.c.bf16 %v723_v61, %v659_v46  ;;  %v1106_v58 = vld [vmem:[%s8093_s26 + $0x1ae0] sm:$0xff]  ;;  %v6715_v46 = vpack.c.bf16 %v1109_v49, %v1045_v48  ;;  %v1108_v61 = vld [vmem:[%s8093_s26 + $0x1af0] sm:$0xff]  ;;  %v1429_v48 = vld [vmem:[%s8093_s26 + $0x24f8] sm:$0xff] }
 0x202   : > { %6552 = vmatpush1.bf16.msra.mxu0 %v6551_v1  ;;  %v658_v1 = vld [vmem:[%s8093_s26 + $0xce0] sm:$0xff]  ;;  %v1493_v49 = vld [vmem:[%s8093_s26 + $0x26f8] sm:$0xff] }
 0x203   : > { %6618 = vmatpush1.bf16.msra.mxu1 %v6617_v2  ;;  %6555 = vmatprep.subr.msk.bf16.mxu0 %vm8236_vm3, %v6553_v3  ;;  %v722_v2 = vld [vmem:[%s8093_s26 + $0xee0] sm:$0xff]  ;;  %v660_v3 = vld [vmem:[%s8093_s26 + $0xcf0] sm:$0xff] }
 0x204   : > { %6621 = vmatprep.subr.msk.bf16.mxu1 %vm8236_vm3, %v6619_v7  ;;  %v851_v7 = vld [vmem:[%s8093_s26 + $0x12e8] sm:$0xff]  ;;  %v6639_v11 = vpack.c.bf16 %v722_v2, %v658_v1  ;;  %v6705_v12 = vpack.c.bf16 %v724_v5, %v660_v3  ;;  %v1237_v1 = vld [vmem:[%s8093_s26 + $0x1ef8] sm:$0xff]  ;;  %v6651_v5 = vpack.c.bf16 %v1106_v58, %v1042_v56  ;;  %v6727_v56 = vpack.c.bf16 %v1493_v49, %v1429_v48  ;;  %v1492_v58 = vld [vmem:[%s8093_s26 + $0x26f0] sm:$0xff] }
 0x205   : > { %v6641_v13 = vpack.c.bf16 %v851_v7, %v787_v6  ;;  %v1938_v49 = vld [vmem:[%s8093_s26 + $0x34e0] sm:$0xff] }
 0x206   : > { %6558 = vmatpush1.bf16.msk.msra.mxu0 %vm8236_vm3, %v6556_v14  ;;  %v786_v14 = vld [vmem:[%s8093_s26 + $0x10e0] sm:$0xff] }
 0x207   : > { %6624 = vmatpush1.bf16.msk.msra.mxu1 %vm8236_vm3, %v6622_v15  ;;  %6626 = vmatprep.subr.bf16.mxu0 %v6625_v17  ;;  %v850_v15 = vld [vmem:[%s8093_s26 + $0x12e0] sm:$0xff]  ;;  %v788_v17 = vld [vmem:[%s8093_s26 + $0x10f0] sm:$0xff] }
 0x208   : > { %6692 = vmatprep.subr.bf16.mxu1 %v6691_v24  ;;  %v979_v24 = vld [vmem:[%s8093_s26 + $0x16e8] sm:$0xff]  ;;  %v6643_v32 = vpack.c.bf16 %v850_v15, %v786_v14  ;;  %v6709_v36 = vpack.c.bf16 %v852_v21, %v788_v17  ;;  %v1236_v15 = vld [vmem:[%s8093_s26 + $0x1ef0] sm:$0xff] }
 0x209   : > { %3753 = vmatmul.mubr.f32.vlgmr.msra.gmra.mrb[12].mxu0 %v9218_v18  ;;  %v6645_v37 = vpack.c.bf16 %v979_v24, %v915_v23  ;;  %v1299_v17 = vld [vmem:[%s8093_s26 + $0x20e8] sm:$0xff]  ;;  %v1301_v23 = vld [vmem:[%s8093_s26 + $0x20f8] sm:$0xff] }
 0x20a   : > { %3824 = vmatmul.mubr.f32.vlgmr.msra.gmra.mrb[12].mxu1 %v9218_v18  ;;  %6628 = vmatpush1.bf16.msra.mxu0 %v6627_v38  ;;  %v914_v38 = vld [vmem:[%s8093_s26 + $0x14e0] sm:$0xff]  ;;  %v1365_v24 = vld [vmem:[%s8093_s26 + $0x22f8] sm:$0xff] }
 0x20b   : > { %6694 = vmatpush1.bf16.msra.mxu1 %v6693_v40  ;;  %6630 = vmatprep.subr.bf16.mxu0 %v6629_v41  ;;  %v978_v40 = vld [vmem:[%s8093_s26 + $0x16e0] sm:$0xff]  ;;  %v916_v41 = vld [vmem:[%s8093_s26 + $0x14f0] sm:$0xff] }
 0x20c   : > { %6696 = vmatprep.subr.bf16.mxu1 %v6695_v47  ;;  %5636 = vmatprep.mubr.msk.f32.mxu0 %vm2640_vm0, %v8206_v20  ;;  %v1107_v47 = vld [vmem:[%s8093_s26 + $0x1ae8] sm:$0xff] }
 0x20d   : > { %5639 = vmatprep.mubr.msk.f32.mxu1 %vm2640_vm0, %v8206_v20  ;;  %v6649_v55 = vpack.c.bf16 %v1107_v47, %v1043_v45  ;;  %v1427_v45 = vld [vmem:[%s8093_s26 + $0x24e8] sm:$0xff] }
 0x20e   : > { %6632 = vmatpush1.bf16.msra.mxu0 %v6631_v52  ;;  %v6647_v52 = vpack.c.bf16 %v978_v40, %v914_v38  ;;  %v1298_v38 = vld [vmem:[%s8093_s26 + $0x20e0] sm:$0xff]  ;;  %v1491_v47 = vld [vmem:[%s8093_s26 + $0x26e8] sm:$0xff] }
 0x20f   : > { %6698 = vmatpush1.bf16.msra.mxu1 %v6697_v53  ;;  %6634 = vmatprep.subr.bf16.mxu0 %v6633_v54  ;;  %v2373_v53 = vrot.slane %v9092_v28, %v8936_v30  ;;  %v6713_v54 = vpack.c.bf16 %v980_v43, %v916_v41  ;;  %v1362_v40 = vld [vmem:[%s8093_s26 + $0x22e0] sm:$0xff]  ;;  %v1300_v41 = vld [vmem:[%s8093_s26 + $0x20f0] sm:$0xff] }
 0x210   : > { %6700 = vmatprep.subr.bf16.mxu1 %v6699_v59  ;;  %v1044_v59 = vld [vmem:[%s8093_s26 + $0x18f0] sm:$0xff] }
 0x211   : > { %v6717_v7 = vpack.c.bf16 %v1108_v61, %v1044_v59  ;;  %v1364_v43 = vld [vmem:[%s8093_s26 + $0x22f0] sm:$0xff]  ;;  %v1555_v59 = vld [vmem:[%s8093_s26 + $0x28e8] sm:$0xff]  ;;  %v1621_v61 = vld [vmem:[%s8093_s26 + $0x2af8] sm:$0xff] }
 0x212   : > { %6636 = vmatpush1.bf16.msra.mxu0 %v6635_v63 }
 0x213   : > { %6702 = vmatpush1.bf16.msra.mxu1 %v6701_v0  ;;  %6638 = vmatprep.subr.bf16.mxu0 %v6637_v44  ;;  %v1173_v44 = vld [vmem:[%s8093_s26 + $0x1cf8] sm:$0xff] }
 0x214   : > { %6704 = vmatprep.subr.bf16.mxu1 %v6703_v4  ;;  %v6719_v14 = vpack.c.bf16 %v1237_v1, %v1173_v44  ;;  %v1556_v44 = vld [vmem:[%s8093_s26 + $0x28f0] sm:$0xff] }
 0x216   : > { %6640 = vmatpush1.bf16.msra.mxu0 %v6639_v11  ;;  %v1234_v11 = vld [vmem:[%s8093_s26 + $0x1ee0] sm:$0xff] }
 0x217   : > { %6706 = vmatpush1.bf16.msra.mxu1 %v6705_v12  ;;  %6642 = vmatprep.subr.bf16.mxu0 %v6641_v13  ;;  %v1172_v12 = vld [vmem:[%s8093_s26 + $0x1cf0] sm:$0xff]  ;;  %v6655_v31 = vpack.c.bf16 %v1234_v11, %v1170_v10  ;;  %v1682_v11 = vld [vmem:[%s8093_s26 + $0x2ce0] sm:$0xff] }
 0x218   : > { %6708 = vmatprep.subr.bf16.mxu1 %v6707_v19  ;;  %v1363_v19 = vld [vmem:[%s8093_s26 + $0x22e8] sm:$0xff] }
 0x21a   : > { %6644 = vmatpush1.bf16.msra.mxu0 %v6643_v32 }
 0x21b   : > { %6710 = vmatpush1.bf16.msra.mxu1 %v6709_v36  ;;  %6646 = vmatprep.subr.bf16.mxu0 %v6645_v37  ;;  %v6721_v36 = vpack.c.bf16 %v1236_v15, %v1172_v12  ;;  %v6657_v37 = vpack.c.bf16 %v1363_v19, %v1299_v17  ;;  %v1746_v12 = vld [vmem:[%s8093_s26 + $0x2ee0] sm:$0xff]  ;;  %v1748_v15 = vld [vmem:[%s8093_s26 + $0x2ef0] sm:$0xff]  ;;  %v1811_v17 = vld [vmem:[%s8093_s26 + $0x30e8] sm:$0xff] }
 0x21c   : > { %v3328_v60 = vpop.f32.mrb[6].mxu0  ;;  %6712 = vmatprep.subr.bf16.mxu1 %v6711_v42  ;;  %v6723_v42 = vpack.c.bf16 %v1365_v24, %v1301_v23  ;;  %v1875_v19 = vld [vmem:[%s8093_s26 + $0x32e8] sm:$0xff]  ;;  %v1877_v23 = vld [vmem:[%s8093_s26 + $0x32f8] sm:$0xff]  ;;  %v6671_v24 = vpack.c.bf16 %v1746_v12, %v1682_v11  ;;  %v2260_v11 = vld [vmem:[%s8093_s26 + $0x3ef0] sm:$0x3] }
 0x21d   : > { %v3329_v63 = vadd.f32 %v3328_v60, %v2361_v16  ;;  %v3399_v0 = vpop.f32.mrb[6].mxu1  ;;  %v3330_v28 = vpop.f32.mrb[7].mxu0  ;;  %v1619_v60 = vld [vmem:[%s8093_s26 + $0x2ae8] sm:$0xff] }
 0x21e   : > { %v3400_v2 = vadd.f32 %v3399_v0, %v2369_v50  ;;  %v3331_v3 = vadd.f32 %v3330_v28, %v2365_v51  ;;  %v3401_v4 = vpop.f32.mrb[7].mxu1  ;;  %6648 = vmatpush1.bf16.msra.mxu0 %v6647_v52  ;;  %v6659_v50 = vpack.c.bf16 %v1362_v40, %v1298_v38  ;;  %v6725_v51 = vpack.c.bf16 %v1364_v43, %v1300_v41  ;;  %v1554_v0 = vld [vmem:[%s8093_s26 + $0x28e0] sm:$0xff]  ;;  %v1876_v40 = vld [vmem:[%s8093_s26 + $0x32f0] sm:$0xff]  ;;  %v1939_v41 = vld [vmem:[%s8093_s26 + $0x34e8] sm:$0xff] }
 0x21f   : > { %v3402_v6 = vadd.f32 %v3401_v4, %v2373_v53  ;;  %6714 = vmatpush1.bf16.msra.mxu1 %v6713_v54  ;;  %6650 = vmatprep.subr.bf16.mxu0 %v6649_v55  ;;  %v6661_v52 = vpack.c.bf16 %v1491_v47, %v1427_v45  ;;  %v1426_v53 = vld [vmem:[%s8093_s26 + $0x24e0] sm:$0xff]  ;;  %v1428_v55 = vld [vmem:[%s8093_s26 + $0x24f0] sm:$0xff]  ;;  %v1747_v4 = vld [vmem:[%s8093_s26 + $0x2ee8] sm:$0xff] }
 0x220   : > { %v5223_v13 = vcombine.low %v3329_v63, %v3331_v3  ;;  %6716 = vmatprep.subr.bf16.mxu1 %v6715_v46  ;;  %v1490_v54 = vld [vmem:[%s8093_s26 + $0x26e0] sm:$0xff]  ;;  %v1557_v46 = vld [vmem:[%s8093_s26 + $0x28f8] sm:$0xff]  ;;  %v6729_v33 = vpack.c.bf16 %v1492_v58, %v1428_v55  ;;  %v6665_v63 = vpack.c.bf16 %v1619_v60, %v1555_v59  ;;  %v1683_v3 = vld [vmem:[%s8093_s26 + $0x2ce8] sm:$0xff] }
 0x221   : > { %v5224_v21 = vcombine.low %v3400_v2, %v3402_v6  ;;  %v6663_v62 = vpack.c.bf16 %v1490_v54, %v1426_v53  ;;  %v1618_v28 = vld [vmem:[%s8093_s26 + $0x2ae0] sm:$0xff]  ;;  %v6731_v1 = vpack.c.bf16 %v1621_v61, %v1557_v46  ;;  %v1620_v2 = vld [vmem:[%s8093_s26 + $0x2af0] sm:$0xff]  ;;  %v1749_v6 = vld [vmem:[%s8093_s26 + $0x2ef8] sm:$0xff]  ;;  %v6669_v10 = vpack.c.bf16 %v1747_v4, %v1683_v3 }
 0x222   : > { %v5231_v25 = vrot.slane %v5223_v13, %v8787_v9  ;;  %6652 = vmatpush1.bf16.msra.mxu0 %v6651_v5  ;;  %v1685_v5 = vld [vmem:[%s8093_s26 + $0x2cf8] sm:$0xff]  ;;  %v1684_v13 = vld [vmem:[%s8093_s26 + $0x2cf0] sm:$0xff]  ;;  %v2067_v54 = vld [vmem:[%s8093_s26 + $0x38e8] sm:$0xff] }
 0x223   : > { %v5238_v32 = vrot.slane %v5224_v21, %v8787_v9  ;;  %6718 = vmatpush1.bf16.msra.mxu1 %v6717_v7  ;;  %6654 = vmatprep.subr.bf16.mxu0 %v6653_v8  ;;  %v6667_v7 = vpack.c.bf16 %v1618_v28, %v1554_v0  ;;  %v6733_v8 = vpack.c.bf16 %v1620_v2, %v1556_v44  ;;  %v1813_v21 = vld [vmem:[%s8093_s26 + $0x30f8] sm:$0xff]  ;;  %v2004_v53 = vld [vmem:[%s8093_s26 + $0x36f0] sm:$0xff]  ;;  %v2131_v55 = vld [vmem:[%s8093_s26 + $0x3ae8] sm:$0xff] }
 0x224   : > { %6720 = vmatprep.subr.bf16.mxu1 %v6719_v14  ;;  %v6735_v14 = vpack.c.bf16 %v1749_v6, %v1685_v5  ;;  %v6739_v38 = vpack.c.bf16 %v1877_v23, %v1813_v21  ;;  %v1941_v43 = vld [vmem:[%s8093_s26 + $0x34f8] sm:$0xff]  ;;  %v6681_v46 = vpack.c.bf16 %v2131_v55, %v2067_v54  ;;  %v2066_v61 = vld [vmem:[%s8093_s26 + $0x38e0] sm:$0xff]  ;;  %v2132_v0 = vld [vmem:[%s8093_s26 + $0x3af0] sm:$0xff] }
 0x225   : > { %v5239_v16 = vcombine.low %v5231_v25, %v5238_v32  ;;  %v6737_v25 = vpack.c.bf16 %v1748_v15, %v1684_v13  ;;  %v1810_v32 = vld [vmem:[%s8093_s26 + $0x30e0] sm:$0xff]  ;;  %v2005_v45 = vld [vmem:[%s8093_s26 + $0x36f8] sm:$0xff]  ;;  %v2195_v28 = vld [vmem:[%s8093_s26 + $0x3ce8] sm:$0xff] }
 0x226   : > { %6656 = vmatpush1.bf16.msra.mxu0 %v6655_v31  ;;  %v6673_v31 = vpack.c.bf16 %v1875_v19, %v1811_v17  ;;  %v2133_v58 = vld [vmem:[%s8093_s26 + $0x3af8] sm:$0xff]  ;;  %v2259_v44 = vld [vmem:[%s8093_s26 + $0x3ee8] sm:$0x3]  ;;  %v2194_v6 = vld [vmem:[%s8093_s26 + $0x3ce0] sm:$0xff] }
 0x227   : > { %5463 = vst [vmem:[%s8808_s6 + $0x18] sm:$0xff] %v5239_v16  ;;  %6722 = vmatpush1.bf16.msra.mxu1 %v6721_v36  ;;  %6658 = vmatprep.subr.bf16.mxu0 %v6657_v37  ;;  %v1874_v36 = vld [vmem:[%s8093_s26 + $0x32e0] sm:$0xff]  ;;  %v1812_v37 = vld [vmem:[%s8093_s26 + $0x30f0] sm:$0xff]  ;;  %v2261_v2 = vld [vmem:[%s8093_s26 + $0x3ef8] sm:$0x3]  ;;  %v6685_v5 = vpack.c.bf16 %v2259_v44, %v2195_v28 }
 0x228   : > { %6724 = vmatprep.subr.bf16.mxu1 %v6723_v42  ;;  %v2003_v42 = vld [vmem:[%s8093_s26 + $0x36e8] sm:$0xff]  ;;  %v6675_v47 = vpack.c.bf16 %v1874_v36, %v1810_v32  ;;  %v6741_v16 = vpack.c.bf16 %v1876_v40, %v1812_v37  ;;  %v345_v15 = vld [vmem:[%s8093_s26 + $0x318] sm:$0xff]  ;;  %v278_v23 = vld [vmem:[%s8093_s26 + $0x100] sm:$0xff] }
 0x229   : > { %v6677_v48 = vpack.c.bf16 %v2003_v42, %v1939_v41  ;;  %v279_v12 = vld [vmem:[%s8093_s26 + $0x108] sm:$0xff]  ;;  %v344_v32 = vld [vmem:[%s8093_s26 + $0x310] sm:$0xff]  ;;  %v473_v40 = vld [vmem:[%s8093_s26 + $0x718] sm:$0xff] }
 0x22a   : > { %6660 = vmatpush1.bf16.msra.mxu0 %v6659_v50  ;;  %v2002_v50 = vld [vmem:[%s8093_s26 + $0x36e0] sm:$0xff]  ;;  %v343_v13 = vld [vmem:[%s8093_s26 + $0x308] sm:$0xff] }
 0x22b   : > { %6726 = vmatpush1.bf16.msra.mxu1 %v6725_v51  ;;  %6662 = vmatprep.subr.bf16.mxu0 %v6661_v52  ;;  %v1940_v51 = vld [vmem:[%s8093_s26 + $0x34f0] sm:$0xff]  ;;  %v6743_v52 = vpack.c.bf16 %v2005_v45, %v1941_v43  ;;  %v6679_v59 = vpack.c.bf16 %v2002_v50, %v1938_v49  ;;  %v6757_v21 = vpack.c.bf16 %v343_v13, %v279_v12  ;;  %v407_v36 = vld [vmem:[%s8093_s26 + $0x508] sm:$0xff]  ;;  %v406_v45 = vld [vmem:[%s8093_s26 + $0x500] sm:$0xff] }
 0x22c   : > { %6728 = vmatprep.subr.bf16.mxu1 %v6727_v56  ;;  %v2069_v56 = vld [vmem:[%s8093_s26 + $0x38f8] sm:$0xff]  ;;  %v6745_v60 = vpack.c.bf16 %v2004_v53, %v1940_v51  ;;  %v471_v37 = vld [vmem:[%s8093_s26 + $0x708] sm:$0xff]  ;;  %v472_v49 = vld [vmem:[%s8093_s26 + $0x710] sm:$0xff] }
 0x22d   : > { %v6761_v43 = vpack.c.bf16 %v471_v37, %v407_v36  ;;  %v535_v50 = vld [vmem:[%s8093_s26 + $0x908] sm:$0xff]  ;;  %v601_v53 = vld [vmem:[%s8093_s26 + $0xb18] sm:$0xff]  ;;  %v9406_v36 = vld [vmem:[%s8740_s30 + $0x10] sm:$0xff] }
 0x22e   : > { %6664 = vmatpush1.bf16.msra.mxu0 %v6663_v62  ;;  %v2130_v62 = vld [vmem:[%s8093_s26 + $0x3ae0] sm:$0xff]  ;;  %v599_v51 = vld [vmem:[%s8093_s26 + $0xb08] sm:$0xff] }
 0x22f   : > { %6730 = vmatpush1.bf16.msra.mxu1 %v6729_v33  ;;  %6666 = vmatprep.subr.bf16.mxu0 %v6665_v63  ;;  %v2068_v33 = vld [vmem:[%s8093_s26 + $0x38f0] sm:$0xff]  ;;  %v6747_v63 = vpack.c.bf16 %v2133_v58, %v2069_v56  ;;  %v6683_v3 = vpack.c.bf16 %v2130_v62, %v2066_v61  ;;  %v6765_v56 = vpack.c.bf16 %v599_v51, %v535_v50  ;;  %v534_v58 = vld [vmem:[%s8093_s26 + $0x900] sm:$0xff]  ;;  %v663_v62 = vld [vmem:[%s8093_s26 + $0xd08] sm:$0xff] }
 0x230   : > { %6732 = vmatprep.subr.bf16.mxu1 %v6731_v1  ;;  %v2197_v1 = vld [vmem:[%s8093_s26 + $0x3cf8] sm:$0xff]  ;;  %v6749_v4 = vpack.c.bf16 %v2132_v0, %v2068_v33  ;;  %v600_v61 = vld [vmem:[%s8093_s26 + $0xb10] sm:$0xff]  ;;  %v727_v33 = vld [vmem:[%s8093_s26 + $0xf08] sm:$0xff]  ;;  %v2385_v51 = vrot.slane %v9406_v36, %v8754_v34 }
 0x231   : > { %v6769_v44 = vpack.c.bf16 %v727_v33, %v663_v62  ;;  %v1113_v50 = vld [vmem:[%s8093_s26 + $0x1b18] sm:$0xff]  ;;  %v1112_v62 = vld [vmem:[%s8093_s26 + $0x1b10] sm:$0xff]  ;;  %v1175_v33 = vld [vmem:[%s8093_s26 + $0x1d08] sm:$0xff] }
 0x232   : > { %6668 = vmatpush1.bf16.msra.mxu0 %v6667_v7  ;;  %v2258_v7 = vld [vmem:[%s8093_s26 + $0x3ee0] sm:$0x3] }
 0x233   : > { %6734 = vmatpush1.bf16.msra.mxu1 %v6733_v8  ;;  %6670 = vmatprep.subr.bf16.mxu0 %v6669_v10  ;;  %v2196_v8 = vld [vmem:[%s8093_s26 + $0x3cf0] sm:$0xff]  ;;  %v6751_v10 = vpack.c.bf16 %v2261_v2, %v2197_v1  ;;  %v6688_v17 = vpack.c.bf16 %v2258_v7, %v2194_v6  ;;  %v662_v1 = vld [vmem:[%s8093_s26 + $0xd00] sm:$0xff]  ;;  %v791_v6 = vld [vmem:[%s8093_s26 + $0x1108] sm:$0xff] }
 0x234   : > { %6736 = vmatprep.subr.bf16.mxu1 %v6735_v14  ;;  %v281_v14 = vld [vmem:[%s8093_s26 + $0x118] sm:$0xff]  ;;  %v6754_v19 = vpack.c.bf16 %v2260_v11, %v2196_v8  ;;  %v726_v2 = vld [vmem:[%s8093_s26 + $0xf00] sm:$0xff]  ;;  %v855_v7 = vld [vmem:[%s8093_s26 + $0x1308] sm:$0xff] }
 0x235   : > { %v793_v8 = vld [vmem:[%s8093_s26 + $0x1118] sm:$0xff]  ;;  %v6771_v11 = vpack.c.bf16 %v726_v2, %v662_v1  ;;  %v6773_v13 = vpack.c.bf16 %v855_v7, %v791_v6 }
 0x236   : > { %6672 = vmatpush1.bf16.msra.mxu0 %v6671_v24  ;;  %v342_v24 = vld [vmem:[%s8093_s26 + $0x300] sm:$0xff]  ;;  %v1241_v1 = vld [vmem:[%s8093_s26 + $0x1f18] sm:$0xff] }
 0x237   : > { %6738 = vmatpush1.bf16.msra.mxu1 %v6737_v25  ;;  %6674 = vmatprep.subr.bf16.mxu0 %v6673_v31  ;;  %v280_v25 = vld [vmem:[%s8093_s26 + $0x110] sm:$0xff]  ;;  %v6823_v31 = vpack.c.bf16 %v345_v15, %v281_v14  ;;  %v6759_v41 = vpack.c.bf16 %v342_v24, %v278_v23  ;;  %v790_v14 = vld [vmem:[%s8093_s26 + $0x1100] sm:$0xff]  ;;  %v919_v23 = vld [vmem:[%s8093_s26 + $0x1508] sm:$0xff] }
 0x238   : > { %6740 = vmatprep.subr.bf16.mxu1 %v6739_v38  ;;  %v409_v38 = vld [vmem:[%s8093_s26 + $0x518] sm:$0xff]  ;;  %v6825_v42 = vpack.c.bf16 %v344_v32, %v280_v25  ;;  %v854_v15 = vld [vmem:[%s8093_s26 + $0x1300] sm:$0xff]  ;;  %v983_v24 = vld [vmem:[%s8093_s26 + $0x1708] sm:$0xff] }
 0x239   : > { %v921_v25 = vld [vmem:[%s8093_s26 + $0x1518] sm:$0xff]  ;;  %v6775_v32 = vpack.c.bf16 %v854_v15, %v790_v14  ;;  %v1240_v15 = vld [vmem:[%s8093_s26 + $0x1f10] sm:$0xff] }
 0x23a   : > { %6676 = vmatpush1.bf16.msra.mxu0 %v6675_v47  ;;  %v470_v47 = vld [vmem:[%s8093_s26 + $0x700] sm:$0xff] }
 0x23b   : > { %6742 = vmatpush1.bf16.msra.mxu1 %v6741_v16  ;;  %6678 = vmatprep.subr.bf16.mxu0 %v6677_v48  ;;  %v408_v16 = vld [vmem:[%s8093_s26 + $0x510] sm:$0xff]  ;;  %v6827_v48 = vpack.c.bf16 %v473_v40, %v409_v38  ;;  %v6763_v54 = vpack.c.bf16 %v470_v47, %v406_v45  ;;  %v6777_v38 = vpack.c.bf16 %v983_v24, %v919_v23  ;;  %v918_v40 = vld [vmem:[%s8093_s26 + $0x1500] sm:$0xff]  ;;  %v1047_v47 = vld [vmem:[%s8093_s26 + $0x1908] sm:$0xff] }
 0x23c   : > { %6744 = vmatprep.subr.bf16.mxu1 %v6743_v52  ;;  %v537_v52 = vld [vmem:[%s8093_s26 + $0x918] sm:$0xff]  ;;  %v6829_v55 = vpack.c.bf16 %v472_v49, %v408_v16  ;;  %v984_v45 = vld [vmem:[%s8093_s26 + $0x1710] sm:$0xff]  ;;  %v1111_v16 = vld [vmem:[%s8093_s26 + $0x1b08] sm:$0xff] }
 0x23d   : > { %v1049_v49 = vld [vmem:[%s8093_s26 + $0x1918] sm:$0xff] }
 0x23e   : > { %6680 = vmatpush1.bf16.msra.mxu0 %v6679_v59  ;;  %v598_v59 = vld [vmem:[%s8093_s26 + $0xb00] sm:$0xff]  ;;  %v1305_v23 = vld [vmem:[%s8093_s26 + $0x2118] sm:$0xff] }
 0x23f   : > { %6746 = vmatpush1.bf16.msra.mxu1 %v6745_v60  ;;  %6682 = vmatprep.subr.bf16.mxu0 %v6681_v46  ;;  %v536_v60 = vld [vmem:[%s8093_s26 + $0x910] sm:$0xff]  ;;  %v6831_v46 = vpack.c.bf16 %v601_v53, %v537_v52  ;;  %v6767_v0 = vpack.c.bf16 %v598_v59, %v534_v58  ;;  %v2381_v52 = vrot.slane %v9406_v36, %v8757_v35  ;;  %v1046_v58 = vld [vmem:[%s8093_s26 + $0x1900] sm:$0xff]  ;;  %v1369_v24 = vld [vmem:[%s8093_s26 + $0x2318] sm:$0xff] }
 0x240   : > { %6748 = vmatprep.subr.bf16.mxu1 %v6747_v63  ;;  %v729_v63 = vld [vmem:[%s8093_s26 + $0xf18] sm:$0xff]  ;;  %v6833_v28 = vpack.c.bf16 %v600_v61, %v536_v60  ;;  %v1110_v59 = vld [vmem:[%s8093_s26 + $0x1b00] sm:$0xff]  ;;  %v1048_v60 = vld [vmem:[%s8093_s26 + $0x1910] sm:$0xff]  ;;  %v6847_v61 = vpack.c.bf16 %v1113_v50, %v1049_v49 }
 0x241   : > { %v6849_v7 = vpack.c.bf16 %v1112_v62, %v1048_v60  ;;  %v1433_v49 = vld [vmem:[%s8093_s26 + $0x2518] sm:$0xff]  ;;  %v1559_v60 = vld [vmem:[%s8093_s26 + $0x2908] sm:$0xff] }
 0x242   : > { %6684 = vmatpush1.bf16.msra.mxu0 %v6683_v3  ;;  %v664_v3 = vld [vmem:[%s8093_s26 + $0xd10] sm:$0xff]  ;;  %v1497_v50 = vld [vmem:[%s8093_s26 + $0x2718] sm:$0xff] }
 0x243   : > { %6750 = vmatpush1.bf16.msra.mxu1 %v6749_v4  ;;  %6687 = vmatprep.subr.msk.bf16.mxu0 %vm8236_vm3, %v6685_v5  ;;  %v728_v5 = vld [vmem:[%s8093_s26 + $0xf10] sm:$0xff]  ;;  %v1625_v62 = vld [vmem:[%s8093_s26 + $0x2b18] sm:$0xff] }
 0x244   : > { %6753 = vmatprep.subr.msk.bf16.mxu1 %vm8236_vm3, %v6751_v10  ;;  %v857_v10 = vld [vmem:[%s8093_s26 + $0x1318] sm:$0xff]  ;;  %v6837_v12 = vpack.c.bf16 %v728_v5, %v664_v3  ;;  %v6783_v5 = vpack.c.bf16 %v1110_v59, %v1046_v58  ;;  %v6859_v58 = vpack.c.bf16 %v1497_v50, %v1433_v49  ;;  %v1496_v59 = vld [vmem:[%s8093_s26 + $0x2710] sm:$0xff]  ;;  %v1942_v50 = vld [vmem:[%s8093_s26 + $0x3500] sm:$0xff] }
 0x246   : > { %6690 = vmatpush1.bf16.msk.msra.mxu0 %vm8236_vm3, %v6688_v17  ;;  %v792_v17 = vld [vmem:[%s8093_s26 + $0x1110] sm:$0xff] }
 0x247   : > { %6756 = vmatpush1.bf16.msk.msra.mxu1 %vm8236_vm3, %v6754_v19  ;;  %6758 = vmatprep.subr.bf16.mxu0 %v6757_v21  ;;  %v6839_v19 = vpack.c.bf16 %v857_v10, %v793_v8  ;;  %v856_v21 = vld [vmem:[%s8093_s26 + $0x1310] sm:$0xff]  ;;  %v1174_v10 = vld [vmem:[%s8093_s26 + $0x1d00] sm:$0xff] }
 0x248   : > { %6824 = vmatprep.subr.bf16.mxu1 %v6823_v31  ;;  %v985_v31 = vld [vmem:[%s8093_s26 + $0x1718] sm:$0xff]  ;;  %v6841_v37 = vpack.c.bf16 %v856_v21, %v792_v17  ;;  %v1303_v17 = vld [vmem:[%s8093_s26 + $0x2108] sm:$0xff] }
 0x249   : > { %3895 = vmatmul.mubr.f32.vlgmr.msra.gmra.mrb[14].mxu0 %v9218_v18 }
 0x24a   : > { %3966 = vmatmul.mubr.f32.vlgmr.msra.gmra.mrb[14].mxu1 %v9218_v18  ;;  %6760 = vmatpush1.bf16.msra.mxu0 %v6759_v41  ;;  %v665_v18 = vld [vmem:[%s8093_s26 + $0xd18] sm:$0xff]  ;;  %v982_v41 = vld [vmem:[%s8093_s26 + $0x1700] sm:$0xff] }
 0x24b   : > { %6826 = vmatpush1.bf16.msra.mxu1 %v6825_v42  ;;  %6762 = vmatprep.subr.bf16.mxu0 %v6761_v43  ;;  %v6835_v4 = vpack.c.bf16 %v729_v63, %v665_v18  ;;  %v920_v42 = vld [vmem:[%s8093_s26 + $0x1510] sm:$0xff]  ;;  %v6843_v43 = vpack.c.bf16 %v985_v31, %v921_v25  ;;  %v6779_v53 = vpack.c.bf16 %v982_v41, %v918_v40  ;;  %v1239_v18 = vld [vmem:[%s8093_s26 + $0x1f08] sm:$0xff]  ;;  %v1302_v40 = vld [vmem:[%s8093_s26 + $0x2100] sm:$0xff] }
 0x24c   : > { %6828 = vmatprep.subr.bf16.mxu1 %v6827_v48  ;;  %5642 = vmatprep.mubr.msk.f32.mxu0 %vm2640_vm0, %v8206_v20  ;;  %v2377_v48 = vrot.slane %v9406_v36, %v8746_v29  ;;  %v6785_v8 = vpack.c.bf16 %v1239_v18, %v1175_v33  ;;  %v1366_v41 = vld [vmem:[%s8093_s26 + $0x2300] sm:$0xff] }
 0x24d   : > { %5645 = vmatprep.mubr.msk.f32.mxu1 %vm2640_vm0, %v8206_v20 }
 0x24e   : > { %6764 = vmatpush1.bf16.msra.mxu0 %v6763_v54  ;;  %v2389_v54 = vrot.slane %v9406_v36, %v8760_v39 }
 0x24f   : > { %6830 = vmatpush1.bf16.msra.mxu1 %v6829_v55  ;;  %6766 = vmatprep.subr.bf16.mxu0 %v6765_v56  ;;  %v6845_v55 = vpack.c.bf16 %v984_v45, %v920_v42  ;;  %v6781_v56 = vpack.c.bf16 %v1111_v16, %v1047_v47  ;;  %v1304_v42 = vld [vmem:[%s8093_s26 + $0x2110] sm:$0xff]  ;;  %v1431_v47 = vld [vmem:[%s8093_s26 + $0x2508] sm:$0xff] }
 0x250   : > { %6832 = vmatprep.subr.bf16.mxu1 %v6831_v46  ;;  %v1368_v45 = vld [vmem:[%s8093_s26 + $0x2310] sm:$0xff]  ;;  %v1495_v16 = vld [vmem:[%s8093_s26 + $0x2708] sm:$0xff] }
 0x252   : > { %6768 = vmatpush1.bf16.msra.mxu0 %v6767_v0 }
 0x253   : > { %6834 = vmatpush1.bf16.msra.mxu1 %v6833_v28  ;;  %6770 = vmatprep.subr.bf16.mxu0 %v6769_v44  ;;  %v1177_v44 = vld [vmem:[%s8093_s26 + $0x1d18] sm:$0xff] }
 0x254   : > { %6836 = vmatprep.subr.bf16.mxu1 %v6835_v4  ;;  %v6851_v14 = vpack.c.bf16 %v1241_v1, %v1177_v44  ;;  %v1560_v44 = vld [vmem:[%s8093_s26 + $0x2910] sm:$0xff] }
 0x256   : > { %6772 = vmatpush1.bf16.msra.mxu0 %v6771_v11  ;;  %v1238_v11 = vld [vmem:[%s8093_s26 + $0x1f00] sm:$0xff] }
 0x257   : > { %6838 = vmatpush1.bf16.msra.mxu1 %v6837_v12  ;;  %6774 = vmatprep.subr.bf16.mxu0 %v6773_v13  ;;  %v1176_v12 = vld [vmem:[%s8093_s26 + $0x1d10] sm:$0xff]  ;;  %v6787_v31 = vpack.c.bf16 %v1238_v11, %v1174_v10  ;;  %v1686_v11 = vld [vmem:[%s8093_s26 + $0x2d00] sm:$0xff] }
 0x258   : > { %6840 = vmatprep.subr.bf16.mxu1 %v6839_v19  ;;  %v1367_v19 = vld [vmem:[%s8093_s26 + $0x2308] sm:$0xff] }
 0x25a   : > { %6776 = vmatpush1.bf16.msra.mxu0 %v6775_v32 }
 0x25b   : > { %6842 = vmatpush1.bf16.msra.mxu1 %v6841_v37  ;;  %6778 = vmatprep.subr.bf16.mxu0 %v6777_v38  ;;  %v6853_v37 = vpack.c.bf16 %v1240_v15, %v1176_v12  ;;  %v6789_v38 = vpack.c.bf16 %v1367_v19, %v1303_v17  ;;  %v1750_v12 = vld [vmem:[%s8093_s26 + $0x2f00] sm:$0xff]  ;;  %v1752_v15 = vld [vmem:[%s8093_s26 + $0x2f10] sm:$0xff]  ;;  %v1815_v17 = vld [vmem:[%s8093_s26 + $0x3108] sm:$0xff] }
 0x25c   : > { %v3470_v46 = vpop.f32.mrb[8].mxu0  ;;  %6844 = vmatprep.subr.bf16.mxu1 %v6843_v43  ;;  %v6855_v43 = vpack.c.bf16 %v1369_v24, %v1305_v23  ;;  %v1879_v19 = vld [vmem:[%s8093_s26 + $0x3308] sm:$0xff]  ;;  %v1881_v23 = vld [vmem:[%s8093_s26 + $0x3318] sm:$0xff]  ;;  %v6803_v24 = vpack.c.bf16 %v1750_v12, %v1686_v11  ;;  %v2264_v11 = vld [vmem:[%s8093_s26 + $0x3f10] sm:$0x3] }
 0x25d   : > { %v3471_v63 = vadd.f32 %v3470_v46, %v2377_v48  ;;  %v3541_v0 = vpop.f32.mrb[8].mxu1  ;;  %v3472_v28 = vpop.f32.mrb[9].mxu0  ;;  %v1623_v46 = vld [vmem:[%s8093_s26 + $0x2b08] sm:$0xff] }
 0x25e   : > { %v3542_v2 = vadd.f32 %v3541_v0, %v2385_v51  ;;  %v3473_v3 = vadd.f32 %v3472_v28, %v2381_v52  ;;  %v3543_v4 = vpop.f32.mrb[9].mxu1  ;;  %6780 = vmatpush1.bf16.msra.mxu0 %v6779_v53  ;;  %v6791_v51 = vpack.c.bf16 %v1366_v41, %v1302_v40  ;;  %v6857_v52 = vpack.c.bf16 %v1368_v45, %v1304_v42  ;;  %v1558_v0 = vld [vmem:[%s8093_s26 + $0x2900] sm:$0xff]  ;;  %v1880_v41 = vld [vmem:[%s8093_s26 + $0x3310] sm:$0xff]  ;;  %v1943_v42 = vld [vmem:[%s8093_s26 + $0x3508] sm:$0xff] }
 0x25f   : > { %v3544_v6 = vadd.f32 %v3543_v4, %v2389_v54  ;;  %6846 = vmatpush1.bf16.msra.mxu1 %v6845_v55  ;;  %6782 = vmatprep.subr.bf16.mxu0 %v6781_v56  ;;  %v6793_v53 = vpack.c.bf16 %v1495_v16, %v1431_v47  ;;  %v1430_v54 = vld [vmem:[%s8093_s26 + $0x2500] sm:$0xff]  ;;  %v1432_v56 = vld [vmem:[%s8093_s26 + $0x2510] sm:$0xff]  ;;  %v1751_v4 = vld [vmem:[%s8093_s26 + $0x2f08] sm:$0xff] }
 0x260   : > { %v5240_v13 = vcombine.low %v3471_v63, %v3473_v3  ;;  %6848 = vmatprep.subr.bf16.mxu1 %v6847_v61  ;;  %v1494_v55 = vld [vmem:[%s8093_s26 + $0x2700] sm:$0xff]  ;;  %v1561_v61 = vld [vmem:[%s8093_s26 + $0x2918] sm:$0xff]  ;;  %v6861_v18 = vpack.c.bf16 %v1496_v59, %v1432_v56  ;;  %v6797_v63 = vpack.c.bf16 %v1623_v46, %v1559_v60  ;;  %v1687_v3 = vld [vmem:[%s8093_s26 + $0x2d08] sm:$0xff] }
 0x261   : > { %v5241_v21 = vcombine.low %v3542_v2, %v3544_v6  ;;  %v6795_v33 = vpack.c.bf16 %v1494_v55, %v1430_v54  ;;  %v1622_v28 = vld [vmem:[%s8093_s26 + $0x2b00] sm:$0xff]  ;;  %v6863_v1 = vpack.c.bf16 %v1625_v62, %v1561_v61  ;;  %v1624_v2 = vld [vmem:[%s8093_s26 + $0x2b10] sm:$0xff]  ;;  %v1753_v6 = vld [vmem:[%s8093_s26 + $0x2f18] sm:$0xff]  ;;  %v6801_v10 = vpack.c.bf16 %v1751_v4, %v1687_v3 }
 0x262   : > { %v5248_v25 = vrot.slane %v5240_v13, %v8787_v9  ;;  %6784 = vmatpush1.bf16.msra.mxu0 %v6783_v5  ;;  %v1689_v5 = vld [vmem:[%s8093_s26 + $0x2d18] sm:$0xff]  ;;  %v1688_v13 = vld [vmem:[%s8093_s26 + $0x2d10] sm:$0xff]  ;;  %v2071_v55 = vld [vmem:[%s8093_s26 + $0x3908] sm:$0xff] }
 0x263   : > { %v5255_v32 = vrot.slane %v5241_v21, %v8787_v9  ;;  %6850 = vmatpush1.bf16.msra.mxu1 %v6849_v7  ;;  %6786 = vmatprep.subr.bf16.mxu0 %v6785_v8  ;;  %v6799_v7 = vpack.c.bf16 %v1622_v28, %v1558_v0  ;;  %v6865_v8 = vpack.c.bf16 %v1624_v2, %v1560_v44  ;;  %v1817_v21 = vld [vmem:[%s8093_s26 + $0x3118] sm:$0xff]  ;;  %v2008_v54 = vld [vmem:[%s8093_s26 + $0x3710] sm:$0xff]  ;;  %v2135_v56 = vld [vmem:[%s8093_s26 + $0x3b08] sm:$0xff] }
 0x264   : > { %6852 = vmatprep.subr.bf16.mxu1 %v6851_v14  ;;  %v6867_v14 = vpack.c.bf16 %v1753_v6, %v1689_v5  ;;  %v6871_v40 = vpack.c.bf16 %v1881_v23, %v1817_v21  ;;  %v1945_v45 = vld [vmem:[%s8093_s26 + $0x3518] sm:$0xff]  ;;  %v6813_v61 = vpack.c.bf16 %v2135_v56, %v2071_v55  ;;  %v2070_v62 = vld [vmem:[%s8093_s26 + $0x3900] sm:$0xff]  ;;  %v2136_v0 = vld [vmem:[%s8093_s26 + $0x3b10] sm:$0xff] }
 0x265   : > { %v5256_v48 = vcombine.low %v5248_v25, %v5255_v32  ;;  %v6869_v25 = vpack.c.bf16 %v1752_v15, %v1688_v13  ;;  %v1814_v32 = vld [vmem:[%s8093_s26 + $0x3100] sm:$0xff]  ;;  %v2009_v47 = vld [vmem:[%s8093_s26 + $0x3718] sm:$0xff]  ;;  %v2199_v28 = vld [vmem:[%s8093_s26 + $0x3d08] sm:$0xff] }
 0x266   : > { %6788 = vmatpush1.bf16.msra.mxu0 %v6787_v31  ;;  %v6805_v31 = vpack.c.bf16 %v1879_v19, %v1815_v17  ;;  %v2137_v59 = vld [vmem:[%s8093_s26 + $0x3b18] sm:$0xff]  ;;  %v2263_v44 = vld [vmem:[%s8093_s26 + $0x3f08] sm:$0x3]  ;;  %v2198_v6 = vld [vmem:[%s8093_s26 + $0x3d00] sm:$0xff] }
 0x267   : > { %5464 = vst [vmem:[%s8808_s6 + $0x20] sm:$0xff] %v5256_v48  ;;  %6854 = vmatpush1.bf16.msra.mxu1 %v6853_v37  ;;  %6790 = vmatprep.subr.bf16.mxu0 %v6789_v38  ;;  %v1878_v37 = vld [vmem:[%s8093_s26 + $0x3300] sm:$0xff]  ;;  %v1816_v38 = vld [vmem:[%s8093_s26 + $0x3110] sm:$0xff]  ;;  %v2265_v2 = vld [vmem:[%s8093_s26 + $0x3f18] sm:$0x3]  ;;  %v6817_v5 = vpack.c.bf16 %v2263_v44, %v2199_v28 }
 0x268   : > { %6856 = vmatprep.subr.bf16.mxu1 %v6855_v43  ;;  %v2007_v43 = vld [vmem:[%s8093_s26 + $0x3708] sm:$0xff]  ;;  %v6807_v16 = vpack.c.bf16 %v1878_v37, %v1814_v32  ;;  %v6873_v48 = vpack.c.bf16 %v1880_v41, %v1816_v38  ;;  %v349_v15 = vld [vmem:[%s8093_s26 + $0x338] sm:$0xff]  ;;  %v282_v23 = vld [vmem:[%s8093_s26 + $0x120] sm:$0xff] }
 0x269   : > { %v6809_v49 = vpack.c.bf16 %v2007_v43, %v1943_v42  ;;  %v283_v12 = vld [vmem:[%s8093_s26 + $0x128] sm:$0xff]  ;;  %v348_v32 = vld [vmem:[%s8093_s26 + $0x330] sm:$0xff]  ;;  %v477_v41 = vld [vmem:[%s8093_s26 + $0x738] sm:$0xff] }
 0x26a   : > { %6792 = vmatpush1.bf16.msra.mxu0 %v6791_v51  ;;  %v2006_v51 = vld [vmem:[%s8093_s26 + $0x3700] sm:$0xff]  ;;  %v347_v13 = vld [vmem:[%s8093_s26 + $0x328] sm:$0xff]  ;;  %v605_v55 = vld [vmem:[%s8093_s26 + $0xb38] sm:$0xff] }
 0x26b   : > { %6858 = vmatpush1.bf16.msra.mxu1 %v6857_v52  ;;  %6794 = vmatprep.subr.bf16.mxu0 %v6793_v53  ;;  %v1944_v52 = vld [vmem:[%s8093_s26 + $0x3510] sm:$0xff]  ;;  %v6875_v53 = vpack.c.bf16 %v2009_v47, %v1945_v45  ;;  %v6811_v60 = vpack.c.bf16 %v2006_v51, %v1942_v50  ;;  %v6889_v21 = vpack.c.bf16 %v347_v13, %v283_v12  ;;  %v411_v37 = vld [vmem:[%s8093_s26 + $0x528] sm:$0xff]  ;;  %v410_v47 = vld [vmem:[%s8093_s26 + $0x520] sm:$0xff] }
 0x26c   : > { %6860 = vmatprep.subr.bf16.mxu1 %v6859_v58  ;;  %v2073_v58 = vld [vmem:[%s8093_s26 + $0x3918] sm:$0xff]  ;;  %v6877_v46 = vpack.c.bf16 %v2008_v54, %v1944_v52  ;;  %v475_v38 = vld [vmem:[%s8093_s26 + $0x728] sm:$0xff]  ;;  %v476_v50 = vld [vmem:[%s8093_s26 + $0x730] sm:$0xff] }
 0x26d   : > { %v6893_v45 = vpack.c.bf16 %v475_v38, %v411_v37  ;;  %v539_v51 = vld [vmem:[%s8093_s26 + $0x928] sm:$0xff]  ;;  %v541_v54 = vld [vmem:[%s8093_s26 + $0x938] sm:$0xff] }
 0x26e   : > { %6796 = vmatpush1.bf16.msra.mxu0 %v6795_v33  ;;  %v2134_v33 = vld [vmem:[%s8093_s26 + $0x3b00] sm:$0xff]  ;;  %v603_v52 = vld [vmem:[%s8093_s26 + $0xb28] sm:$0xff]  ;;  %v733_v28 = vld [vmem:[%s8093_s26 + $0xf38] sm:$0xff] }
 0x26f   : > { %6862 = vmatpush1.bf16.msra.mxu1 %v6861_v18  ;;  %6798 = vmatprep.subr.bf16.mxu0 %v6797_v63  ;;  %v2072_v18 = vld [vmem:[%s8093_s26 + $0x3910] sm:$0xff]  ;;  %v6879_v63 = vpack.c.bf16 %v2137_v59, %v2073_v58  ;;  %v6815_v3 = vpack.c.bf16 %v2134_v33, %v2070_v62  ;;  %v6897_v59 = vpack.c.bf16 %v603_v52, %v539_v51  ;;  %v861_v12 = vld [vmem:[%s8093_s26 + $0x1338] sm:$0xff] }
 0x270   : > { %6864 = vmatprep.subr.bf16.mxu1 %v6863_v1  ;;  %v2201_v1 = vld [vmem:[%s8093_s26 + $0x3d18] sm:$0xff]  ;;  %v6881_v4 = vpack.c.bf16 %v2136_v0, %v2072_v18  ;;  %v6963_v62 = vpack.c.bf16 %v605_v55, %v541_v54  ;;  %v604_v33 = vld [vmem:[%s8093_s26 + $0xb30] sm:$0xff]  ;;  %v667_v18 = vld [vmem:[%s8093_s26 + $0xd28] sm:$0xff]  ;;  %v2401_v54 = vrot.slane %v9406_v36, %v8930_v26  ;;  %v2397_v55 = vrot.slane %v9406_v36, %v8933_v27 }
 0x271   : > { %v669_v0 = vld [vmem:[%s8093_s26 + $0xd38] sm:$0xff] }
 0x272   : > { %6800 = vmatpush1.bf16.msra.mxu0 %v6799_v7  ;;  %v2262_v7 = vld [vmem:[%s8093_s26 + $0x3f00] sm:$0x3]  ;;  %v989_v37 = vld [vmem:[%s8093_s26 + $0x1738] sm:$0xff] }
 0x273   : > { %6866 = vmatpush1.bf16.msra.mxu1 %v6865_v8  ;;  %6802 = vmatprep.subr.bf16.mxu0 %v6801_v10  ;;  %v2200_v8 = vld [vmem:[%s8093_s26 + $0x3d10] sm:$0xff]  ;;  %v6883_v10 = vpack.c.bf16 %v2265_v2, %v2201_v1  ;;  %v6820_v17 = vpack.c.bf16 %v2262_v7, %v2198_v6  ;;  %v6967_v6 = vpack.c.bf16 %v733_v28, %v669_v0  ;;  %v1053_v51 = vld [vmem:[%s8093_s26 + $0x1938] sm:$0xff]  ;;  %v1179_v0 = vld [vmem:[%s8093_s26 + $0x1d28] sm:$0xff] }
 0x274   : > { %6868 = vmatprep.subr.bf16.mxu1 %v6867_v14  ;;  %v285_v14 = vld [vmem:[%s8093_s26 + $0x138] sm:$0xff]  ;;  %v6886_v19 = vpack.c.bf16 %v2264_v11, %v2200_v8  ;;  %v732_v7 = vld [vmem:[%s8093_s26 + $0xf30] sm:$0xff]  ;;  %v795_v8 = vld [vmem:[%s8093_s26 + $0x1128] sm:$0xff] }
 0x275   : > { %v797_v11 = vld [vmem:[%s8093_s26 + $0x1138] sm:$0xff]  ;;  %v1243_v28 = vld [vmem:[%s8093_s26 + $0x1f28] sm:$0xff] }
 0x276   : > { %6804 = vmatpush1.bf16.msra.mxu0 %v6803_v24  ;;  %v346_v24 = vld [vmem:[%s8093_s26 + $0x320] sm:$0xff]  ;;  %v1117_v52 = vld [vmem:[%s8093_s26 + $0x1b38] sm:$0xff] }
 0x277   : > { %6870 = vmatpush1.bf16.msra.mxu1 %v6869_v25  ;;  %6806 = vmatprep.subr.bf16.mxu0 %v6805_v31  ;;  %v284_v25 = vld [vmem:[%s8093_s26 + $0x130] sm:$0xff]  ;;  %v6955_v31 = vpack.c.bf16 %v349_v15, %v285_v14  ;;  %v6891_v42 = vpack.c.bf16 %v346_v24, %v282_v23  ;;  %v6971_v23 = vpack.c.bf16 %v861_v12, %v797_v11  ;;  %v1178_v12 = vld [vmem:[%s8093_s26 + $0x1d20] sm:$0xff] }
 0x278   : > { %6872 = vmatprep.subr.bf16.mxu1 %v6871_v40  ;;  %v413_v40 = vld [vmem:[%s8093_s26 + $0x538] sm:$0xff]  ;;  %v6957_v43 = vpack.c.bf16 %v348_v32, %v284_v25  ;;  %v860_v24 = vld [vmem:[%s8093_s26 + $0x1330] sm:$0xff]  ;;  %v923_v25 = vld [vmem:[%s8093_s26 + $0x1528] sm:$0xff]  ;;  %v6917_v11 = vpack.c.bf16 %v1243_v28, %v1179_v0 }
 0x279   : > { %v925_v32 = vld [vmem:[%s8093_s26 + $0x1538] sm:$0xff] }
 0x27a   : > { %6808 = vmatpush1.bf16.msra.mxu0 %v6807_v16  ;;  %v474_v16 = vld [vmem:[%s8093_s26 + $0x720] sm:$0xff] }
 0x27b   : > { %6874 = vmatpush1.bf16.msra.mxu1 %v6873_v48  ;;  %6810 = vmatprep.subr.bf16.mxu0 %v6809_v49  ;;  %v412_v48 = vld [vmem:[%s8093_s26 + $0x530] sm:$0xff]  ;;  %v6959_v49 = vpack.c.bf16 %v477_v41, %v413_v40  ;;  %v6895_v56 = vpack.c.bf16 %v474_v16, %v410_v47  ;;  %v6975_v47 = vpack.c.bf16 %v989_v37, %v925_v32 }
 0x27c   : > { %6876 = vmatprep.subr.bf16.mxu1 %v6875_v53  ;;  %v9532_v53 = vld.sshfl [vmem:[%s10699_s0] sm:$0x33 pattern:$0x76325410]  ;;  %v6961_v58 = vpack.c.bf16 %v476_v50, %v412_v48  ;;  %v988_v16 = vld [vmem:[%s8093_s26 + $0x1730] sm:$0xff]  ;;  %v1051_v48 = vld [vmem:[%s8093_s26 + $0x1928] sm:$0xff]  ;;  %v2393_v50 = vrot.slane %v9406_v36, %v8925_v22 }
 0x27e   : > { %6812 = vmatpush1.bf16.msra.mxu0 %v6811_v60  ;;  %v538_v60 = vld [vmem:[%s8093_s26 + $0x920] sm:$0xff] }
 0x27f   : > { %6878 = vmatpush1.bf16.msra.mxu1 %v6877_v46  ;;  %6814 = vmatprep.subr.bf16.mxu0 %v6813_v61  ;;  %v602_v46 = vld [vmem:[%s8093_s26 + $0xb20] sm:$0xff]  ;;  %v540_v61 = vld [vmem:[%s8093_s26 + $0x930] sm:$0xff] }
 0x280   : > { %6880 = vmatprep.subr.bf16.mxu1 %v6879_v63  ;;  %v731_v63 = vld [vmem:[%s8093_s26 + $0xf28] sm:$0xff]  ;;  %v6899_v44 = vpack.c.bf16 %v602_v46, %v538_v60  ;;  %v6965_v1 = vpack.c.bf16 %v604_v33, %v540_v61  ;;  %v1050_v46 = vld [vmem:[%s8093_s26 + $0x1920] sm:$0xff] }
 0x281   : > { %v6901_v2 = vpack.c.bf16 %v731_v63, %v667_v18  ;;  %v1114_v61 = vld [vmem:[%s8093_s26 + $0x1b20] sm:$0xff]  ;;  %v6979_v18 = vpack.c.bf16 %v1117_v52, %v1053_v51  ;;  %v1116_v63 = vld [vmem:[%s8093_s26 + $0x1b30] sm:$0xff]  ;;  %v1437_v51 = vld [vmem:[%s8093_s26 + $0x2538] sm:$0xff] }
 0x282   : > { %6816 = vmatpush1.bf16.msra.mxu0 %v6815_v3  ;;  %v666_v3 = vld [vmem:[%s8093_s26 + $0xd20] sm:$0xff]  ;;  %v1501_v52 = vld [vmem:[%s8093_s26 + $0x2738] sm:$0xff] }
 0x283   : > { %6882 = vmatpush1.bf16.msra.mxu1 %v6881_v4  ;;  %6819 = vmatprep.subr.msk.bf16.mxu0 %vm8236_vm3, %v6817_v5  ;;  %v730_v4 = vld [vmem:[%s8093_s26 + $0xf20] sm:$0xff]  ;;  %v668_v5 = vld [vmem:[%s8093_s26 + $0xd30] sm:$0xff] }
 0x284   : > { %6885 = vmatprep.subr.msk.bf16.mxu1 %vm8236_vm3, %v6883_v10  ;;  %v859_v10 = vld [vmem:[%s8093_s26 + $0x1328] sm:$0xff]  ;;  %v6903_v13 = vpack.c.bf16 %v730_v4, %v666_v3  ;;  %v6969_v14 = vpack.c.bf16 %v732_v7, %v668_v5  ;;  %v1245_v3 = vld [vmem:[%s8093_s26 + $0x1f38] sm:$0xff]  ;;  %v6915_v7 = vpack.c.bf16 %v1114_v61, %v1050_v46  ;;  %v6991_v46 = vpack.c.bf16 %v1501_v52, %v1437_v51  ;;  %v1500_v61 = vld [vmem:[%s8093_s26 + $0x2730] sm:$0xff] }
 0x285   : > { %v6905_v15 = vpack.c.bf16 %v859_v10, %v795_v8  ;;  %v1946_v52 = vld [vmem:[%s8093_s26 + $0x3520] sm:$0xff] }
 0x286   : > { %6822 = vmatpush1.bf16.msk.msra.mxu0 %vm8236_vm3, %v6820_v17  ;;  %v794_v17 = vld [vmem:[%s8093_s26 + $0x1120] sm:$0xff] }
 0x287   : > { %6888 = vmatpush1.bf16.msk.msra.mxu1 %vm8236_vm3, %v6886_v19  ;;  %6890 = vmatprep.subr.bf16.mxu0 %v6889_v21  ;;  %v858_v19 = vld [vmem:[%s8093_s26 + $0x1320] sm:$0xff]  ;;  %v796_v21 = vld [vmem:[%s8093_s26 + $0x1130] sm:$0xff] }
 0x288   : > { %6956 = vmatprep.subr.bf16.mxu1 %v6955_v31  ;;  %v987_v31 = vld [vmem:[%s8093_s26 + $0x1728] sm:$0xff]  ;;  %v6907_v38 = vpack.c.bf16 %v858_v19, %v794_v17  ;;  %v6973_v40 = vpack.c.bf16 %v860_v24, %v796_v21  ;;  %v1244_v19 = vld [vmem:[%s8093_s26 + $0x1f30] sm:$0xff] }
 0x289   : > { %4037 = vmatmul.mubr.f32.vlgmr.msra.gmra.mrb[16].mxu0 %v9532_v53  ;;  %v6909_v41 = vpack.c.bf16 %v987_v31, %v923_v25  ;;  %v1307_v21 = vld [vmem:[%s8093_s26 + $0x2128] sm:$0xff]  ;;  %v1309_v25 = vld [vmem:[%s8093_s26 + $0x2138] sm:$0xff] }
 0x28a   : > { %4108 = vmatmul.mubr.f32.vlgmr.msra.gmra.mrb[16].mxu1 %v9532_v53  ;;  %6892 = vmatpush1.bf16.msra.mxu0 %v6891_v42  ;;  %v922_v42 = vld [vmem:[%s8093_s26 + $0x1520] sm:$0xff]  ;;  %v1373_v31 = vld [vmem:[%s8093_s26 + $0x2338] sm:$0xff] }
 0x28b   : > { %6958 = vmatpush1.bf16.msra.mxu1 %v6957_v43  ;;  %6894 = vmatprep.subr.bf16.mxu0 %v6893_v45  ;;  %v986_v43 = vld [vmem:[%s8093_s26 + $0x1720] sm:$0xff]  ;;  %v924_v45 = vld [vmem:[%s8093_s26 + $0x1530] sm:$0xff] }
 0x28c   : > { %6960 = vmatprep.subr.bf16.mxu1 %v6959_v49  ;;  %5648 = vmatprep.mubr.msk.f32.mxu0 %vm2640_vm0, %v8206_v20  ;;  %v1115_v49 = vld [vmem:[%s8093_s26 + $0x1b28] sm:$0xff] }
 0x28d   : > { %5651 = vmatprep.mubr.msk.f32.mxu1 %vm2640_vm0, %v8206_v20  ;;  %v6913_v60 = vpack.c.bf16 %v1115_v49, %v1051_v48  ;;  %v1435_v48 = vld [vmem:[%s8093_s26 + $0x2528] sm:$0xff] }
 0x28e   : > { %6896 = vmatpush1.bf16.msra.mxu0 %v6895_v56  ;;  %v6911_v56 = vpack.c.bf16 %v986_v43, %v922_v42  ;;  %v1306_v42 = vld [vmem:[%s8093_s26 + $0x2120] sm:$0xff]  ;;  %v1499_v49 = vld [vmem:[%s8093_s26 + $0x2728] sm:$0xff] }
 0x28f   : > { %6962 = vmatpush1.bf16.msra.mxu1 %v6961_v58  ;;  %6898 = vmatprep.subr.bf16.mxu0 %v6897_v59  ;;  %v2405_v58 = vrot.slane %v9406_v36, %v8936_v30  ;;  %v6977_v59 = vpack.c.bf16 %v988_v16, %v924_v45  ;;  %v1370_v43 = vld [vmem:[%s8093_s26 + $0x2320] sm:$0xff]  ;;  %v1308_v45 = vld [vmem:[%s8093_s26 + $0x2130] sm:$0xff] }
 0x290   : > { %6964 = vmatprep.subr.bf16.mxu1 %v6963_v62  ;;  %v1052_v62 = vld [vmem:[%s8093_s26 + $0x1930] sm:$0xff] }
 0x291   : > { %v6981_v10 = vpack.c.bf16 %v1116_v63, %v1052_v62  ;;  %v1372_v16 = vld [vmem:[%s8093_s26 + $0x2330] sm:$0xff]  ;;  %v1563_v62 = vld [vmem:[%s8093_s26 + $0x2928] sm:$0xff]  ;;  %v1629_v63 = vld [vmem:[%s8093_s26 + $0x2b38] sm:$0xff] }
 0x292   : > { %6900 = vmatpush1.bf16.msra.mxu0 %v6899_v44 }
 0x293   : > { %6966 = vmatpush1.bf16.msra.mxu1 %v6965_v1  ;;  %6902 = vmatprep.subr.bf16.mxu0 %v6901_v2  ;;  %v1181_v2 = vld [vmem:[%s8093_s26 + $0x1d38] sm:$0xff] }
 0x294   : > { %6968 = vmatprep.subr.bf16.mxu1 %v6967_v6  ;;  %v6983_v17 = vpack.c.bf16 %v1245_v3, %v1181_v2  ;;  %v1564_v2 = vld [vmem:[%s8093_s26 + $0x2930] sm:$0xff] }
 0x296   : > { %6904 = vmatpush1.bf16.msra.mxu0 %v6903_v13  ;;  %v1242_v13 = vld [vmem:[%s8093_s26 + $0x1f20] sm:$0xff] }
 0x297   : > { %6970 = vmatpush1.bf16.msra.mxu1 %v6969_v14  ;;  %6906 = vmatprep.subr.bf16.mxu0 %v6905_v15  ;;  %v1180_v14 = vld [vmem:[%s8093_s26 + $0x1d30] sm:$0xff]  ;;  %v6919_v37 = vpack.c.bf16 %v1242_v13, %v1178_v12  ;;  %v1690_v13 = vld [vmem:[%s8093_s26 + $0x2d20] sm:$0xff] }
 0x298   : > { %6972 = vmatprep.subr.bf16.mxu1 %v6971_v23  ;;  %v1371_v23 = vld [vmem:[%s8093_s26 + $0x2328] sm:$0xff] }
 0x29a   : > { %6908 = vmatpush1.bf16.msra.mxu0 %v6907_v38 }
 0x29b   : > { %6974 = vmatpush1.bf16.msra.mxu1 %v6973_v40  ;;  %6910 = vmatprep.subr.bf16.mxu0 %v6909_v41  ;;  %v6985_v40 = vpack.c.bf16 %v1244_v19, %v1180_v14  ;;  %v6921_v41 = vpack.c.bf16 %v1371_v23, %v1307_v21  ;;  %v1754_v14 = vld [vmem:[%s8093_s26 + $0x2f20] sm:$0xff]  ;;  %v1756_v19 = vld [vmem:[%s8093_s26 + $0x2f30] sm:$0xff]  ;;  %v1819_v21 = vld [vmem:[%s8093_s26 + $0x3128] sm:$0xff] }
 0x29c   : > { %v3612_v33 = vpop.f32.mrb[10].mxu0  ;;  %6976 = vmatprep.subr.bf16.mxu1 %v6975_v47  ;;  %v6987_v47 = vpack.c.bf16 %v1373_v31, %v1309_v25  ;;  %v1883_v23 = vld [vmem:[%s8093_s26 + $0x3328] sm:$0xff]  ;;  %v1885_v25 = vld [vmem:[%s8093_s26 + $0x3338] sm:$0xff]  ;;  %v6935_v31 = vpack.c.bf16 %v1754_v14, %v1690_v13  ;;  %v2268_v13 = vld [vmem:[%s8093_s26 + $0x3f30] sm:$0x3] }
 0x29d   : > { %v3613_v44 = vadd.f32 %v3612_v33, %v2393_v50  ;;  %v3683_v1 = vpop.f32.mrb[10].mxu1  ;;  %v3614_v36 = vpop.f32.mrb[11].mxu0  ;;  %v1627_v33 = vld [vmem:[%s8093_s26 + $0x2b28] sm:$0xff] }
 0x29e   : > { %v3684_v4 = vadd.f32 %v3683_v1, %v2401_v54  ;;  %v3615_v5 = vadd.f32 %v3614_v36, %v2397_v55  ;;  %v3685_v6 = vpop.f32.mrb[11].mxu1  ;;  %6912 = vmatpush1.bf16.msra.mxu0 %v6911_v56  ;;  %v6923_v54 = vpack.c.bf16 %v1370_v43, %v1306_v42  ;;  %v6989_v55 = vpack.c.bf16 %v1372_v16, %v1308_v45  ;;  %v1562_v1 = vld [vmem:[%s8093_s26 + $0x2920] sm:$0xff]  ;;  %v1884_v43 = vld [vmem:[%s8093_s26 + $0x3330] sm:$0xff]  ;;  %v1947_v45 = vld [vmem:[%s8093_s26 + $0x3528] sm:$0xff] }
 0x29f   : > { %v3686_v8 = vadd.f32 %v3685_v6, %v2405_v58  ;;  %6978 = vmatpush1.bf16.msra.mxu1 %v6977_v59  ;;  %6914 = vmatprep.subr.bf16.mxu0 %v6913_v60  ;;  %v6925_v56 = vpack.c.bf16 %v1499_v49, %v1435_v48  ;;  %v1434_v58 = vld [vmem:[%s8093_s26 + $0x2520] sm:$0xff]  ;;  %v1436_v60 = vld [vmem:[%s8093_s26 + $0x2530] sm:$0xff]  ;;  %v1755_v6 = vld [vmem:[%s8093_s26 + $0x2f28] sm:$0xff] }
 0x2a0   : > { %v5257_v15 = vcombine.low %v3613_v44, %v3615_v5  ;;  %6980 = vmatprep.subr.bf16.mxu1 %v6979_v18  ;;  %v1498_v59 = vld [vmem:[%s8093_s26 + $0x2720] sm:$0xff]  ;;  %v1565_v18 = vld [vmem:[%s8093_s26 + $0x2938] sm:$0xff]  ;;  %v6993_v28 = vpack.c.bf16 %v1500_v61, %v1436_v60  ;;  %v6929_v44 = vpack.c.bf16 %v1627_v33, %v1563_v62  ;;  %v1691_v5 = vld [vmem:[%s8093_s26 + $0x2d28] sm:$0xff] }
 0x2a1   : > { %v5258_v24 = vcombine.low %v3684_v4, %v3686_v8  ;;  %v6927_v0 = vpack.c.bf16 %v1498_v59, %v1434_v58  ;;  %v1626_v36 = vld [vmem:[%s8093_s26 + $0x2b20] sm:$0xff]  ;;  %v6995_v3 = vpack.c.bf16 %v1629_v63, %v1565_v18  ;;  %v1628_v4 = vld [vmem:[%s8093_s26 + $0x2b30] sm:$0xff]  ;;  %v1757_v8 = vld [vmem:[%s8093_s26 + $0x2f38] sm:$0xff]  ;;  %v6933_v12 = vpack.c.bf16 %v1755_v6, %v1691_v5 }
 0x2a2   : > { %v5265_v32 = vrot.slane %v5257_v15, %v8787_v9  ;;  %6916 = vmatpush1.bf16.msra.mxu0 %v6915_v7  ;;  %v1693_v7 = vld [vmem:[%s8093_s26 + $0x2d38] sm:$0xff]  ;;  %v1692_v15 = vld [vmem:[%s8093_s26 + $0x2d30] sm:$0xff]  ;;  %v2075_v59 = vld [vmem:[%s8093_s26 + $0x3928] sm:$0xff] }
 0x2a3   : > { %v5272_v38 = vrot.slane %v5258_v24, %v8787_v9  ;;  %6982 = vmatpush1.bf16.msra.mxu1 %v6981_v10  ;;  %6918 = vmatprep.subr.bf16.mxu0 %v6917_v11  ;;  %v6931_v10 = vpack.c.bf16 %v1626_v36, %v1562_v1  ;;  %v6997_v11 = vpack.c.bf16 %v1628_v4, %v1564_v2  ;;  %v1821_v24 = vld [vmem:[%s8093_s26 + $0x3138] sm:$0xff]  ;;  %v2012_v58 = vld [vmem:[%s8093_s26 + $0x3730] sm:$0xff]  ;;  %v2139_v60 = vld [vmem:[%s8093_s26 + $0x3b28] sm:$0xff] }
 0x2a4   : > { %6984 = vmatprep.subr.bf16.mxu1 %v6983_v17  ;;  %v6999_v17 = vpack.c.bf16 %v1757_v8, %v1693_v7  ;;  %v7003_v42 = vpack.c.bf16 %v1885_v25, %v1821_v24  ;;  %v1949_v16 = vld [vmem:[%s8093_s26 + $0x3538] sm:$0xff]  ;;  %v6945_v18 = vpack.c.bf16 %v2139_v60, %v2075_v59  ;;  %v2074_v63 = vld [vmem:[%s8093_s26 + $0x3920] sm:$0xff]  ;;  %v2140_v1 = vld [vmem:[%s8093_s26 + $0x3b30] sm:$0xff] }
 0x2a5   : > { %v5273_v50 = vcombine.low %v5265_v32, %v5272_v38  ;;  %v7001_v32 = vpack.c.bf16 %v1756_v19, %v1692_v15  ;;  %v1818_v38 = vld [vmem:[%s8093_s26 + $0x3120] sm:$0xff]  ;;  %v2013_v48 = vld [vmem:[%s8093_s26 + $0x3738] sm:$0xff]  ;;  %v2203_v36 = vld [vmem:[%s8093_s26 + $0x3d28] sm:$0xff] }
 0x2a6   : > { %6920 = vmatpush1.bf16.msra.mxu0 %v6919_v37  ;;  %v6937_v37 = vpack.c.bf16 %v1883_v23, %v1819_v21  ;;  %v2141_v61 = vld [vmem:[%s8093_s26 + $0x3b38] sm:$0xff]  ;;  %v2267_v2 = vld [vmem:[%s8093_s26 + $0x3f28] sm:$0x3]  ;;  %v2202_v8 = vld [vmem:[%s8093_s26 + $0x3d20] sm:$0xff] }
 0x2a7   : > { %5465 = vst [vmem:[%s8808_s6 + $0x28] sm:$0xff] %v5273_v50  ;;  %6986 = vmatpush1.bf16.msra.mxu1 %v6985_v40  ;;  %6922 = vmatprep.subr.bf16.mxu0 %v6921_v41  ;;  %v1882_v40 = vld [vmem:[%s8093_s26 + $0x3320] sm:$0xff]  ;;  %v1820_v41 = vld [vmem:[%s8093_s26 + $0x3130] sm:$0xff]  ;;  %v2269_v4 = vld [vmem:[%s8093_s26 + $0x3f38] sm:$0x3]  ;;  %v6949_v7 = vpack.c.bf16 %v2267_v2, %v2203_v36 }
 0x2a8   : > { %6988 = vmatprep.subr.bf16.mxu1 %v6987_v47  ;;  %v2011_v47 = vld [vmem:[%s8093_s26 + $0x3728] sm:$0xff]  ;;  %v6939_v49 = vpack.c.bf16 %v1882_v40, %v1818_v38  ;;  %v7005_v50 = vpack.c.bf16 %v1884_v43, %v1820_v41  ;;  %v353_v19 = vld [vmem:[%s8093_s26 + $0x358] sm:$0xff]  ;;  %v286_v25 = vld [vmem:[%s8093_s26 + $0x140] sm:$0xff] }
 0x2a9   : > { %v6941_v51 = vpack.c.bf16 %v2011_v47, %v1947_v45  ;;  %v287_v14 = vld [vmem:[%s8093_s26 + $0x148] sm:$0xff]  ;;  %v352_v38 = vld [vmem:[%s8093_s26 + $0x350] sm:$0xff]  ;;  %v481_v43 = vld [vmem:[%s8093_s26 + $0x758] sm:$0xff] }
 0x2aa   : > { %6924 = vmatpush1.bf16.msra.mxu0 %v6923_v54  ;;  %v2010_v54 = vld [vmem:[%s8093_s26 + $0x3720] sm:$0xff]  ;;  %v351_v15 = vld [vmem:[%s8093_s26 + $0x348] sm:$0xff] }
 0x2ab   : > { %6990 = vmatpush1.bf16.msra.mxu1 %v6989_v55  ;;  %6926 = vmatprep.subr.bf16.mxu0 %v6925_v56  ;;  %v1948_v55 = vld [vmem:[%s8093_s26 + $0x3530] sm:$0xff]  ;;  %v7007_v56 = vpack.c.bf16 %v2013_v48, %v1949_v16  ;;  %v6943_v62 = vpack.c.bf16 %v2010_v54, %v1946_v52  ;;  %v7021_v24 = vpack.c.bf16 %v351_v15, %v287_v14  ;;  %v415_v40 = vld [vmem:[%s8093_s26 + $0x548] sm:$0xff]  ;;  %v414_v48 = vld [vmem:[%s8093_s26 + $0x540] sm:$0xff] }
 0x2ac   : > { %6992 = vmatprep.subr.bf16.mxu1 %v6991_v46  ;;  %v2077_v46 = vld [vmem:[%s8093_s26 + $0x3938] sm:$0xff]  ;;  %v7009_v33 = vpack.c.bf16 %v2012_v58, %v1948_v55  ;;  %v479_v41 = vld [vmem:[%s8093_s26 + $0x748] sm:$0xff]  ;;  %v480_v52 = vld [vmem:[%s8093_s26 + $0x750] sm:$0xff] }
 0x2ad   : > { %v7025_v16 = vpack.c.bf16 %v479_v41, %v415_v40  ;;  %v543_v54 = vld [vmem:[%s8093_s26 + $0x948] sm:$0xff]  ;;  %v609_v58 = vld [vmem:[%s8093_s26 + $0xb58] sm:$0xff] }
 0x2ae   : > { %6928 = vmatpush1.bf16.msra.mxu0 %v6927_v0  ;;  %v2138_v0 = vld [vmem:[%s8093_s26 + $0x3b20] sm:$0xff]  ;;  %v607_v55 = vld [vmem:[%s8093_s26 + $0xb48] sm:$0xff]  ;;  %v9720_v40 = vld [vmem:[%s8740_s30 + $0x18] sm:$0xff] }
 0x2af   : > { %6994 = vmatpush1.bf16.msra.mxu1 %v6993_v28  ;;  %6930 = vmatprep.subr.bf16.mxu0 %v6929_v44  ;;  %v2076_v28 = vld [vmem:[%s8093_s26 + $0x3930] sm:$0xff]  ;;  %v7011_v44 = vpack.c.bf16 %v2141_v61, %v2077_v46  ;;  %v6947_v5 = vpack.c.bf16 %v2138_v0, %v2074_v63  ;;  %v7029_v46 = vpack.c.bf16 %v607_v55, %v543_v54  ;;  %v542_v61 = vld [vmem:[%s8093_s26 + $0x940] sm:$0xff]  ;;  %v671_v0 = vld [vmem:[%s8093_s26 + $0xd48] sm:$0xff] }
 0x2b0   : > { %6996 = vmatprep.subr.bf16.mxu1 %v6995_v3  ;;  %v2205_v3 = vld [vmem:[%s8093_s26 + $0x3d38] sm:$0xff]  ;;  %v7013_v6 = vpack.c.bf16 %v2140_v1, %v2076_v28  ;;  %v608_v63 = vld [vmem:[%s8093_s26 + $0xb50] sm:$0xff]  ;;  %v735_v28 = vld [vmem:[%s8093_s26 + $0xf48] sm:$0xff]  ;;  %v2417_v55 = vrot.slane %v9720_v40, %v8754_v34 }
 0x2b1   : > { %v7033_v2 = vpack.c.bf16 %v735_v28, %v671_v0  ;;  %v1121_v54 = vld [vmem:[%s8093_s26 + $0x1b58] sm:$0xff]  ;;  %v1120_v0 = vld [vmem:[%s8093_s26 + $0x1b50] sm:$0xff]  ;;  %v1183_v28 = vld [vmem:[%s8093_s26 + $0x1d48] sm:$0xff] }
 0x2b2   : > { %6932 = vmatpush1.bf16.msra.mxu0 %v6931_v10  ;;  %v2266_v10 = vld [vmem:[%s8093_s26 + $0x3f20] sm:$0x3] }
 0x2b3   : > { %6998 = vmatpush1.bf16.msra.mxu1 %v6997_v11  ;;  %6934 = vmatprep.subr.bf16.mxu0 %v6933_v12  ;;  %v2204_v11 = vld [vmem:[%s8093_s26 + $0x3d30] sm:$0xff]  ;;  %v7015_v12 = vpack.c.bf16 %v2269_v4, %v2205_v3  ;;  %v6952_v21 = vpack.c.bf16 %v2266_v10, %v2202_v8  ;;  %v670_v3 = vld [vmem:[%s8093_s26 + $0xd40] sm:$0xff]  ;;  %v799_v8 = vld [vmem:[%s8093_s26 + $0x1148] sm:$0xff] }
 0x2b4   : > { %7000 = vmatprep.subr.bf16.mxu1 %v6999_v17  ;;  %v289_v17 = vld [vmem:[%s8093_s26 + $0x158] sm:$0xff]  ;;  %v7018_v23 = vpack.c.bf16 %v2268_v13, %v2204_v11  ;;  %v734_v4 = vld [vmem:[%s8093_s26 + $0xf40] sm:$0xff]  ;;  %v863_v10 = vld [vmem:[%s8093_s26 + $0x1348] sm:$0xff] }
 0x2b5   : > { %v801_v11 = vld [vmem:[%s8093_s26 + $0x1158] sm:$0xff]  ;;  %v7035_v13 = vpack.c.bf16 %v734_v4, %v670_v3  ;;  %v7037_v15 = vpack.c.bf16 %v863_v10, %v799_v8 }
 0x2b6   : > { %6936 = vmatpush1.bf16.msra.mxu0 %v6935_v31  ;;  %v350_v31 = vld [vmem:[%s8093_s26 + $0x340] sm:$0xff]  ;;  %v1249_v3 = vld [vmem:[%s8093_s26 + $0x1f58] sm:$0xff] }
 0x2b7   : > { %7002 = vmatpush1.bf16.msra.mxu1 %v7001_v32  ;;  %6938 = vmatprep.subr.bf16.mxu0 %v6937_v37  ;;  %v288_v32 = vld [vmem:[%s8093_s26 + $0x150] sm:$0xff]  ;;  %v7087_v37 = vpack.c.bf16 %v353_v19, %v289_v17  ;;  %v7023_v45 = vpack.c.bf16 %v350_v31, %v286_v25  ;;  %v798_v17 = vld [vmem:[%s8093_s26 + $0x1140] sm:$0xff]  ;;  %v927_v25 = vld [vmem:[%s8093_s26 + $0x1548] sm:$0xff] }
 0x2b8   : > { %7004 = vmatprep.subr.bf16.mxu1 %v7003_v42  ;;  %v417_v42 = vld [vmem:[%s8093_s26 + $0x558] sm:$0xff]  ;;  %v7089_v47 = vpack.c.bf16 %v352_v38, %v288_v32  ;;  %v862_v19 = vld [vmem:[%s8093_s26 + $0x1340] sm:$0xff]  ;;  %v991_v31 = vld [vmem:[%s8093_s26 + $0x1748] sm:$0xff] }
 0x2b9   : > { %v929_v32 = vld [vmem:[%s8093_s26 + $0x1558] sm:$0xff]  ;;  %v7039_v38 = vpack.c.bf16 %v862_v19, %v798_v17  ;;  %v1248_v19 = vld [vmem:[%s8093_s26 + $0x1f50] sm:$0xff] }
 0x2ba   : > { %6940 = vmatpush1.bf16.msra.mxu0 %v6939_v49  ;;  %v478_v49 = vld [vmem:[%s8093_s26 + $0x740] sm:$0xff] }
 0x2bb   : > { %7006 = vmatpush1.bf16.msra.mxu1 %v7005_v50  ;;  %6942 = vmatprep.subr.bf16.mxu0 %v6941_v51  ;;  %v416_v50 = vld [vmem:[%s8093_s26 + $0x550] sm:$0xff]  ;;  %v7091_v51 = vpack.c.bf16 %v481_v43, %v417_v42  ;;  %v7027_v59 = vpack.c.bf16 %v478_v49, %v414_v48  ;;  %v7041_v42 = vpack.c.bf16 %v991_v31, %v927_v25  ;;  %v926_v43 = vld [vmem:[%s8093_s26 + $0x1540] sm:$0xff]  ;;  %v1055_v49 = vld [vmem:[%s8093_s26 + $0x1948] sm:$0xff] }
 0x2bc   : > { %7008 = vmatprep.subr.bf16.mxu1 %v7007_v56  ;;  %v545_v56 = vld [vmem:[%s8093_s26 + $0x958] sm:$0xff]  ;;  %v7093_v60 = vpack.c.bf16 %v480_v52, %v416_v50  ;;  %v992_v48 = vld [vmem:[%s8093_s26 + $0x1750] sm:$0xff]  ;;  %v1119_v50 = vld [vmem:[%s8093_s26 + $0x1b48] sm:$0xff] }
 0x2bd   : > { %v1057_v52 = vld [vmem:[%s8093_s26 + $0x1958] sm:$0xff] }
 0x2be   : > { %6944 = vmatpush1.bf16.msra.mxu0 %v6943_v62  ;;  %v606_v62 = vld [vmem:[%s8093_s26 + $0xb40] sm:$0xff]  ;;  %v1313_v25 = vld [vmem:[%s8093_s26 + $0x2158] sm:$0xff] }
 0x2bf   : > { %7010 = vmatpush1.bf16.msra.mxu1 %v7009_v33  ;;  %6946 = vmatprep.subr.bf16.mxu0 %v6945_v18  ;;  %v544_v33 = vld [vmem:[%s8093_s26 + $0x950] sm:$0xff]  ;;  %v7095_v18 = vpack.c.bf16 %v609_v58, %v545_v56  ;;  %v7031_v1 = vpack.c.bf16 %v606_v62, %v542_v61  ;;  %v2413_v56 = vrot.slane %v9720_v40, %v8757_v35  ;;  %v1054_v61 = vld [vmem:[%s8093_s26 + $0x1940] sm:$0xff]  ;;  %v1377_v31 = vld [vmem:[%s8093_s26 + $0x2358] sm:$0xff] }
 0x2c0   : > { %7012 = vmatprep.subr.bf16.mxu1 %v7011_v44  ;;  %v737_v44 = vld [vmem:[%s8093_s26 + $0xf58] sm:$0xff]  ;;  %v7097_v36 = vpack.c.bf16 %v608_v63, %v544_v33  ;;  %v1118_v62 = vld [vmem:[%s8093_s26 + $0x1b40] sm:$0xff]  ;;  %v1056_v33 = vld [vmem:[%s8093_s26 + $0x1950] sm:$0xff]  ;;  %v7111_v63 = vpack.c.bf16 %v1121_v54, %v1057_v52 }
 0x2c1   : > { %v7113_v10 = vpack.c.bf16 %v1120_v0, %v1056_v33  ;;  %v1441_v52 = vld [vmem:[%s8093_s26 + $0x2558] sm:$0xff]  ;;  %v1567_v33 = vld [vmem:[%s8093_s26 + $0x2948] sm:$0xff] }
 0x2c2   : > { %6948 = vmatpush1.bf16.msra.mxu0 %v6947_v5  ;;  %v672_v5 = vld [vmem:[%s8093_s26 + $0xd50] sm:$0xff]  ;;  %v1505_v54 = vld [vmem:[%s8093_s26 + $0x2758] sm:$0xff] }
 0x2c3   : > { %7014 = vmatpush1.bf16.msra.mxu1 %v7013_v6  ;;  %6951 = vmatprep.subr.msk.bf16.mxu0 %vm8236_vm3, %v6949_v7  ;;  %v736_v7 = vld [vmem:[%s8093_s26 + $0xf50] sm:$0xff]  ;;  %v1633_v0 = vld [vmem:[%s8093_s26 + $0x2b58] sm:$0xff] }
 0x2c4   : > { %7017 = vmatprep.subr.msk.bf16.mxu1 %vm8236_vm3, %v7015_v12  ;;  %v865_v12 = vld [vmem:[%s8093_s26 + $0x1358] sm:$0xff]  ;;  %v7101_v14 = vpack.c.bf16 %v736_v7, %v672_v5  ;;  %v7047_v7 = vpack.c.bf16 %v1118_v62, %v1054_v61  ;;  %v7123_v61 = vpack.c.bf16 %v1505_v54, %v1441_v52  ;;  %v1504_v62 = vld [vmem:[%s8093_s26 + $0x2750] sm:$0xff]  ;;  %v1950_v54 = vld [vmem:[%s8093_s26 + $0x3540] sm:$0xff] }
 0x2c6   : > { %6954 = vmatpush1.bf16.msk.msra.mxu0 %vm8236_vm3, %v6952_v21  ;;  %v800_v21 = vld [vmem:[%s8093_s26 + $0x1150] sm:$0xff] }
 0x2c7   : > { %7020 = vmatpush1.bf16.msk.msra.mxu1 %vm8236_vm3, %v7018_v23  ;;  %7022 = vmatprep.subr.bf16.mxu0 %v7021_v24  ;;  %v7103_v23 = vpack.c.bf16 %v865_v12, %v801_v11  ;;  %v864_v24 = vld [vmem:[%s8093_s26 + $0x1350] sm:$0xff]  ;;  %v1182_v12 = vld [vmem:[%s8093_s26 + $0x1d40] sm:$0xff] }
 0x2c8   : > { %7088 = vmatprep.subr.bf16.mxu1 %v7087_v37  ;;  %v993_v37 = vld [vmem:[%s8093_s26 + $0x1758] sm:$0xff]  ;;  %v7105_v41 = vpack.c.bf16 %v864_v24, %v800_v21  ;;  %v1311_v21 = vld [vmem:[%s8093_s26 + $0x2148] sm:$0xff] }
 0x2c9   : > { %4179 = vmatmul.mubr.f32.vlgmr.msra.gmra.mrb[18].mxu0 %v9532_v53 }
 0x2ca   : > { %4250 = vmatmul.mubr.f32.vlgmr.msra.gmra.mrb[18].mxu1 %v9532_v53  ;;  %7024 = vmatpush1.bf16.msra.mxu0 %v7023_v45  ;;  %v673_v53 = vld [vmem:[%s8093_s26 + $0xd58] sm:$0xff]  ;;  %v990_v45 = vld [vmem:[%s8093_s26 + $0x1740] sm:$0xff] }
 0x2cb   : > { %7090 = vmatpush1.bf16.msra.mxu1 %v7089_v47  ;;  %7026 = vmatprep.subr.bf16.mxu0 %v7025_v16  ;;  %v7099_v6 = vpack.c.bf16 %v737_v44, %v673_v53  ;;  %v928_v47 = vld [vmem:[%s8093_s26 + $0x1550] sm:$0xff]  ;;  %v7107_v16 = vpack.c.bf16 %v993_v37, %v929_v32  ;;  %v7043_v58 = vpack.c.bf16 %v990_v45, %v926_v43  ;;  %v1247_v53 = vld [vmem:[%s8093_s26 + $0x1f48] sm:$0xff]  ;;  %v1310_v43 = vld [vmem:[%s8093_s26 + $0x2140] sm:$0xff] }
 0x2cc   : > { %7092 = vmatprep.subr.bf16.mxu1 %v7091_v51  ;;  %5654 = vmatprep.mubr.msk.f32.mxu0 %vm2640_vm0, %v8206_v20  ;;  %v2409_v51 = vrot.slane %v9720_v40, %v8746_v29  ;;  %v7049_v11 = vpack.c.bf16 %v1247_v53, %v1183_v28  ;;  %v1374_v45 = vld [vmem:[%s8093_s26 + $0x2340] sm:$0xff] }
 0x2cd   : > { %5657 = vmatprep.mubr.msk.f32.mxu1 %vm2640_vm0, %v8206_v20 }
 0x2ce   : > { %7028 = vmatpush1.bf16.msra.mxu0 %v7027_v59  ;;  %v2421_v59 = vrot.slane %v9720_v40, %v8760_v39 }
 0x2cf   : > { %7094 = vmatpush1.bf16.msra.mxu1 %v7093_v60  ;;  %7030 = vmatprep.subr.bf16.mxu0 %v7029_v46  ;;  %v7109_v60 = vpack.c.bf16 %v992_v48, %v928_v47  ;;  %v7045_v46 = vpack.c.bf16 %v1119_v50, %v1055_v49  ;;  %v1312_v47 = vld [vmem:[%s8093_s26 + $0x2150] sm:$0xff]  ;;  %v1439_v49 = vld [vmem:[%s8093_s26 + $0x2548] sm:$0xff] }
 0x2d0   : > { %7096 = vmatprep.subr.bf16.mxu1 %v7095_v18  ;;  %v1376_v48 = vld [vmem:[%s8093_s26 + $0x2350] sm:$0xff]  ;;  %v1503_v50 = vld [vmem:[%s8093_s26 + $0x2748] sm:$0xff] }
 0x2d2   : > { %7032 = vmatpush1.bf16.msra.mxu0 %v7031_v1 }
 0x2d3   : > { %7098 = vmatpush1.bf16.msra.mxu1 %v7097_v36  ;;  %7034 = vmatprep.subr.bf16.mxu0 %v7033_v2  ;;  %v1185_v2 = vld [vmem:[%s8093_s26 + $0x1d58] sm:$0xff] }
 0x2d4   : > { %7100 = vmatprep.subr.bf16.mxu1 %v7099_v6  ;;  %v7115_v17 = vpack.c.bf16 %v1249_v3, %v1185_v2  ;;  %v1568_v2 = vld [vmem:[%s8093_s26 + $0x2950] sm:$0xff] }
 0x2d6   : > { %7036 = vmatpush1.bf16.msra.mxu0 %v7035_v13  ;;  %v1246_v13 = vld [vmem:[%s8093_s26 + $0x1f40] sm:$0xff] }
 0x2d7   : > { %7102 = vmatpush1.bf16.msra.mxu1 %v7101_v14  ;;  %7038 = vmatprep.subr.bf16.mxu0 %v7037_v15  ;;  %v1184_v14 = vld [vmem:[%s8093_s26 + $0x1d50] sm:$0xff]  ;;  %v7051_v37 = vpack.c.bf16 %v1246_v13, %v1182_v12  ;;  %v1694_v13 = vld [vmem:[%s8093_s26 + $0x2d40] sm:$0xff] }
 0x2d8   : > { %7104 = vmatprep.subr.bf16.mxu1 %v7103_v23  ;;  %v1375_v23 = vld [vmem:[%s8093_s26 + $0x2348] sm:$0xff] }
 0x2da   : > { %7040 = vmatpush1.bf16.msra.mxu0 %v7039_v38 }
 0x2db   : > { %7106 = vmatpush1.bf16.msra.mxu1 %v7105_v41  ;;  %7042 = vmatprep.subr.bf16.mxu0 %v7041_v42  ;;  %v7117_v41 = vpack.c.bf16 %v1248_v19, %v1184_v14  ;;  %v7053_v42 = vpack.c.bf16 %v1375_v23, %v1311_v21  ;;  %v1758_v14 = vld [vmem:[%s8093_s26 + $0x2f40] sm:$0xff]  ;;  %v1760_v19 = vld [vmem:[%s8093_s26 + $0x2f50] sm:$0xff]  ;;  %v1823_v21 = vld [vmem:[%s8093_s26 + $0x3148] sm:$0xff] }
 0x2dc   : > { %v3754_v18 = vpop.f32.mrb[12].mxu0  ;;  %7108 = vmatprep.subr.bf16.mxu1 %v7107_v16  ;;  %v7119_v16 = vpack.c.bf16 %v1377_v31, %v1313_v25  ;;  %v1887_v23 = vld [vmem:[%s8093_s26 + $0x3348] sm:$0xff]  ;;  %v1889_v25 = vld [vmem:[%s8093_s26 + $0x3358] sm:$0xff]  ;;  %v7067_v31 = vpack.c.bf16 %v1758_v14, %v1694_v13  ;;  %v2272_v13 = vld [vmem:[%s8093_s26 + $0x3f50] sm:$0x3] }
 0x2dd   : > { %v3755_v44 = vadd.f32 %v3754_v18, %v2409_v51  ;;  %v3825_v1 = vpop.f32.mrb[12].mxu1  ;;  %v3756_v36 = vpop.f32.mrb[13].mxu0  ;;  %v1631_v18 = vld [vmem:[%s8093_s26 + $0x2b48] sm:$0xff] }
 0x2de   : > { %v3826_v4 = vadd.f32 %v3825_v1, %v2417_v55  ;;  %v3757_v5 = vadd.f32 %v3756_v36, %v2413_v56  ;;  %v3827_v6 = vpop.f32.mrb[13].mxu1  ;;  %7044 = vmatpush1.bf16.msra.mxu0 %v7043_v58  ;;  %v7055_v55 = vpack.c.bf16 %v1374_v45, %v1310_v43  ;;  %v7121_v56 = vpack.c.bf16 %v1376_v48, %v1312_v47  ;;  %v1566_v1 = vld [vmem:[%s8093_s26 + $0x2940] sm:$0xff]  ;;  %v1888_v45 = vld [vmem:[%s8093_s26 + $0x3350] sm:$0xff]  ;;  %v1951_v47 = vld [vmem:[%s8093_s26 + $0x3548] sm:$0xff] }
 0x2df   : > { %v3828_v8 = vadd.f32 %v3827_v6, %v2421_v59  ;;  %7110 = vmatpush1.bf16.msra.mxu1 %v7109_v60  ;;  %7046 = vmatprep.subr.bf16.mxu0 %v7045_v46  ;;  %v7057_v58 = vpack.c.bf16 %v1503_v50, %v1439_v49  ;;  %v1438_v59 = vld [vmem:[%s8093_s26 + $0x2540] sm:$0xff]  ;;  %v1440_v46 = vld [vmem:[%s8093_s26 + $0x2550] sm:$0xff]  ;;  %v1759_v6 = vld [vmem:[%s8093_s26 + $0x2f48] sm:$0xff] }
 0x2e0   : > { %v5274_v15 = vcombine.low %v3755_v44, %v3757_v5  ;;  %7112 = vmatprep.subr.bf16.mxu1 %v7111_v63  ;;  %v1502_v60 = vld [vmem:[%s8093_s26 + $0x2740] sm:$0xff]  ;;  %v1569_v63 = vld [vmem:[%s8093_s26 + $0x2958] sm:$0xff]  ;;  %v7125_v53 = vpack.c.bf16 %v1504_v62, %v1440_v46  ;;  %v7061_v44 = vpack.c.bf16 %v1631_v18, %v1567_v33  ;;  %v1695_v5 = vld [vmem:[%s8093_s26 + $0x2d48] sm:$0xff] }
 0x2e1   : > { %v5275_v24 = vcombine.low %v3826_v4, %v3828_v8  ;;  %v7059_v28 = vpack.c.bf16 %v1502_v60, %v1438_v59  ;;  %v1630_v36 = vld [vmem:[%s8093_s26 + $0x2b40] sm:$0xff]  ;;  %v7127_v3 = vpack.c.bf16 %v1633_v0, %v1569_v63  ;;  %v1632_v4 = vld [vmem:[%s8093_s26 + $0x2b50] sm:$0xff]  ;;  %v1761_v8 = vld [vmem:[%s8093_s26 + $0x2f58] sm:$0xff]  ;;  %v7065_v12 = vpack.c.bf16 %v1759_v6, %v1695_v5 }
 0x2e2   : > { %v5282_v32 = vrot.slane %v5274_v15, %v8787_v9  ;;  %7048 = vmatpush1.bf16.msra.mxu0 %v7047_v7  ;;  %v1697_v7 = vld [vmem:[%s8093_s26 + $0x2d58] sm:$0xff]  ;;  %v1696_v15 = vld [vmem:[%s8093_s26 + $0x2d50] sm:$0xff]  ;;  %v2079_v60 = vld [vmem:[%s8093_s26 + $0x3948] sm:$0xff] }
 0x2e3   : > { %v5289_v38 = vrot.slane %v5275_v24, %v8787_v9  ;;  %7114 = vmatpush1.bf16.msra.mxu1 %v7113_v10  ;;  %7050 = vmatprep.subr.bf16.mxu0 %v7049_v11  ;;  %v7063_v10 = vpack.c.bf16 %v1630_v36, %v1566_v1  ;;  %v7129_v11 = vpack.c.bf16 %v1632_v4, %v1568_v2  ;;  %v1825_v24 = vld [vmem:[%s8093_s26 + $0x3158] sm:$0xff]  ;;  %v2016_v59 = vld [vmem:[%s8093_s26 + $0x3750] sm:$0xff]  ;;  %v2143_v46 = vld [vmem:[%s8093_s26 + $0x3b48] sm:$0xff] }
 0x2e4   : > { %7116 = vmatprep.subr.bf16.mxu1 %v7115_v17  ;;  %v7131_v17 = vpack.c.bf16 %v1761_v8, %v1697_v7  ;;  %v7135_v43 = vpack.c.bf16 %v1889_v25, %v1825_v24  ;;  %v1953_v48 = vld [vmem:[%s8093_s26 + $0x3558] sm:$0xff]  ;;  %v7077_v63 = vpack.c.bf16 %v2143_v46, %v2079_v60  ;;  %v2078_v0 = vld [vmem:[%s8093_s26 + $0x3940] sm:$0xff]  ;;  %v2144_v1 = vld [vmem:[%s8093_s26 + $0x3b50] sm:$0xff] }
 0x2e5   : > { %v5290_v51 = vcombine.low %v5282_v32, %v5289_v38  ;;  %v7133_v32 = vpack.c.bf16 %v1760_v19, %v1696_v15  ;;  %v1822_v38 = vld [vmem:[%s8093_s26 + $0x3140] sm:$0xff]  ;;  %v2017_v49 = vld [vmem:[%s8093_s26 + $0x3758] sm:$0xff]  ;;  %v2207_v36 = vld [vmem:[%s8093_s26 + $0x3d48] sm:$0xff] }
 0x2e6   : > { %7052 = vmatpush1.bf16.msra.mxu0 %v7051_v37  ;;  %v7069_v37 = vpack.c.bf16 %v1887_v23, %v1823_v21  ;;  %v2145_v62 = vld [vmem:[%s8093_s26 + $0x3b58] sm:$0xff]  ;;  %v2271_v2 = vld [vmem:[%s8093_s26 + $0x3f48] sm:$0x3]  ;;  %v2206_v8 = vld [vmem:[%s8093_s26 + $0x3d40] sm:$0xff] }
 0x2e7   : > { %5466 = vst [vmem:[%s8808_s6 + $0x30] sm:$0xff] %v5290_v51  ;;  %7118 = vmatpush1.bf16.msra.mxu1 %v7117_v41  ;;  %7054 = vmatprep.subr.bf16.mxu0 %v7053_v42  ;;  %v1886_v41 = vld [vmem:[%s8093_s26 + $0x3340] sm:$0xff]  ;;  %v1824_v42 = vld [vmem:[%s8093_s26 + $0x3150] sm:$0xff]  ;;  %v2273_v4 = vld [vmem:[%s8093_s26 + $0x3f58] sm:$0x3]  ;;  %v7081_v7 = vpack.c.bf16 %v2271_v2, %v2207_v36 }
 0x2e8   : > { %7120 = vmatprep.subr.bf16.mxu1 %v7119_v16  ;;  %v2015_v16 = vld [vmem:[%s8093_s26 + $0x3748] sm:$0xff]  ;;  %v7071_v50 = vpack.c.bf16 %v1886_v41, %v1822_v38  ;;  %v7137_v51 = vpack.c.bf16 %v1888_v45, %v1824_v42  ;;  %v357_v19 = vld [vmem:[%s8093_s26 + $0x378] sm:$0xff]  ;;  %v290_v25 = vld [vmem:[%s8093_s26 + $0x160] sm:$0xff] }
 0x2e9   : > { %v7073_v52 = vpack.c.bf16 %v2015_v16, %v1951_v47  ;;  %v291_v14 = vld [vmem:[%s8093_s26 + $0x168] sm:$0xff]  ;;  %v356_v38 = vld [vmem:[%s8093_s26 + $0x370] sm:$0xff]  ;;  %v485_v45 = vld [vmem:[%s8093_s26 + $0x778] sm:$0xff] }
 0x2ea   : > { %7056 = vmatpush1.bf16.msra.mxu0 %v7055_v55  ;;  %v2014_v55 = vld [vmem:[%s8093_s26 + $0x3740] sm:$0xff]  ;;  %v355_v15 = vld [vmem:[%s8093_s26 + $0x368] sm:$0xff]  ;;  %v613_v60 = vld [vmem:[%s8093_s26 + $0xb78] sm:$0xff] }
 0x2eb   : > { %7122 = vmatpush1.bf16.msra.mxu1 %v7121_v56  ;;  %7058 = vmatprep.subr.bf16.mxu0 %v7057_v58  ;;  %v1952_v56 = vld [vmem:[%s8093_s26 + $0x3550] sm:$0xff]  ;;  %v7139_v58 = vpack.c.bf16 %v2017_v49, %v1953_v48  ;;  %v7075_v33 = vpack.c.bf16 %v2014_v55, %v1950_v54  ;;  %v7153_v24 = vpack.c.bf16 %v355_v15, %v291_v14  ;;  %v419_v41 = vld [vmem:[%s8093_s26 + $0x568] sm:$0xff]  ;;  %v418_v49 = vld [vmem:[%s8093_s26 + $0x560] sm:$0xff] }
 0x2ec   : > { %7124 = vmatprep.subr.bf16.mxu1 %v7123_v61  ;;  %v2081_v61 = vld [vmem:[%s8093_s26 + $0x3958] sm:$0xff]  ;;  %v7141_v18 = vpack.c.bf16 %v2016_v59, %v1952_v56  ;;  %v483_v42 = vld [vmem:[%s8093_s26 + $0x768] sm:$0xff]  ;;  %v484_v54 = vld [vmem:[%s8093_s26 + $0x770] sm:$0xff] }
 0x2ed   : > { %v7157_v48 = vpack.c.bf16 %v483_v42, %v419_v41  ;;  %v547_v55 = vld [vmem:[%s8093_s26 + $0x968] sm:$0xff]  ;;  %v549_v59 = vld [vmem:[%s8093_s26 + $0x978] sm:$0xff] }
 0x2ee   : > { %7060 = vmatpush1.bf16.msra.mxu0 %v7059_v28  ;;  %v2142_v28 = vld [vmem:[%s8093_s26 + $0x3b40] sm:$0xff]  ;;  %v611_v56 = vld [vmem:[%s8093_s26 + $0xb68] sm:$0xff]  ;;  %v741_v36 = vld [vmem:[%s8093_s26 + $0xf78] sm:$0xff] }
 0x2ef   : > { %7126 = vmatpush1.bf16.msra.mxu1 %v7125_v53  ;;  %7062 = vmatprep.subr.bf16.mxu0 %v7061_v44  ;;  %v2080_v53 = vld [vmem:[%s8093_s26 + $0x3950] sm:$0xff]  ;;  %v7143_v44 = vpack.c.bf16 %v2145_v62, %v2081_v61  ;;  %v7079_v5 = vpack.c.bf16 %v2142_v28, %v2078_v0  ;;  %v7161_v62 = vpack.c.bf16 %v611_v56, %v547_v55  ;;  %v869_v14 = vld [vmem:[%s8093_s26 + $0x1378] sm:$0xff] }
 0x2f0   : > { %7128 = vmatprep.subr.bf16.mxu1 %v7127_v3  ;;  %v2209_v3 = vld [vmem:[%s8093_s26 + $0x3d58] sm:$0xff]  ;;  %v7145_v6 = vpack.c.bf16 %v2144_v1, %v2080_v53  ;;  %v7227_v0 = vpack.c.bf16 %v613_v60, %v549_v59  ;;  %v612_v28 = vld [vmem:[%s8093_s26 + $0xb70] sm:$0xff]  ;;  %v675_v53 = vld [vmem:[%s8093_s26 + $0xd68] sm:$0xff]  ;;  %v2433_v59 = vrot.slane %v9720_v40, %v8930_v26  ;;  %v2429_v60 = vrot.slane %v9720_v40, %v8933_v27 }
 0x2f1   : > { %v677_v1 = vld [vmem:[%s8093_s26 + $0xd78] sm:$0xff] }
 0x2f2   : > { %7064 = vmatpush1.bf16.msra.mxu0 %v7063_v10  ;;  %v2270_v10 = vld [vmem:[%s8093_s26 + $0x3f40] sm:$0x3]  ;;  %v997_v41 = vld [vmem:[%s8093_s26 + $0x1778] sm:$0xff] }
 0x2f3   : > { %7130 = vmatpush1.bf16.msra.mxu1 %v7129_v11  ;;  %7066 = vmatprep.subr.bf16.mxu0 %v7065_v12  ;;  %v2208_v11 = vld [vmem:[%s8093_s26 + $0x3d50] sm:$0xff]  ;;  %v7147_v12 = vpack.c.bf16 %v2273_v4, %v2209_v3  ;;  %v7084_v21 = vpack.c.bf16 %v2270_v10, %v2206_v8  ;;  %v7231_v8 = vpack.c.bf16 %v741_v36, %v677_v1  ;;  %v1061_v55 = vld [vmem:[%s8093_s26 + $0x1978] sm:$0xff]  ;;  %v1187_v1 = vld [vmem:[%s8093_s26 + $0x1d68] sm:$0xff] }
 0x2f4   : > { %7132 = vmatprep.subr.bf16.mxu1 %v7131_v17  ;;  %v293_v17 = vld [vmem:[%s8093_s26 + $0x178] sm:$0xff]  ;;  %v7150_v23 = vpack.c.bf16 %v2272_v13, %v2208_v11  ;;  %v740_v10 = vld [vmem:[%s8093_s26 + $0xf70] sm:$0xff]  ;;  %v803_v11 = vld [vmem:[%s8093_s26 + $0x1168] sm:$0xff] }
 0x2f5   : > { %v805_v13 = vld [vmem:[%s8093_s26 + $0x1178] sm:$0xff]  ;;  %v1251_v36 = vld [vmem:[%s8093_s26 + $0x1f68] sm:$0xff] }
 0x2f6   : > { %7068 = vmatpush1.bf16.msra.mxu0 %v7067_v31  ;;  %v354_v31 = vld [vmem:[%s8093_s26 + $0x360] sm:$0xff]  ;;  %v1125_v56 = vld [vmem:[%s8093_s26 + $0x1b78] sm:$0xff] }
 0x2f7   : > { %7134 = vmatpush1.bf16.msra.mxu1 %v7133_v32  ;;  %7070 = vmatprep.subr.bf16.mxu0 %v7069_v37  ;;  %v292_v32 = vld [vmem:[%s8093_s26 + $0x170] sm:$0xff]  ;;  %v7219_v37 = vpack.c.bf16 %v357_v19, %v293_v17  ;;  %v7155_v47 = vpack.c.bf16 %v354_v31, %v290_v25  ;;  %v7235_v25 = vpack.c.bf16 %v869_v14, %v805_v13  ;;  %v1186_v14 = vld [vmem:[%s8093_s26 + $0x1d60] sm:$0xff] }
 0x2f8   : > { %7136 = vmatprep.subr.bf16.mxu1 %v7135_v43  ;;  %v421_v43 = vld [vmem:[%s8093_s26 + $0x578] sm:$0xff]  ;;  %v7221_v16 = vpack.c.bf16 %v356_v38, %v292_v32  ;;  %v868_v31 = vld [vmem:[%s8093_s26 + $0x1370] sm:$0xff]  ;;  %v931_v32 = vld [vmem:[%s8093_s26 + $0x1568] sm:$0xff]  ;;  %v7181_v13 = vpack.c.bf16 %v1251_v36, %v1187_v1 }
 0x2f9   : > { %v933_v38 = vld [vmem:[%s8093_s26 + $0x1578] sm:$0xff] }
 0x2fa   : > { %7072 = vmatpush1.bf16.msra.mxu0 %v7071_v50  ;;  %v482_v50 = vld [vmem:[%s8093_s26 + $0x760] sm:$0xff] }
 0x2fb   : > { %7138 = vmatpush1.bf16.msra.mxu1 %v7137_v51  ;;  %7074 = vmatprep.subr.bf16.mxu0 %v7073_v52  ;;  %v420_v51 = vld [vmem:[%s8093_s26 + $0x570] sm:$0xff]  ;;  %v7223_v52 = vpack.c.bf16 %v485_v45, %v421_v43  ;;  %v7159_v46 = vpack.c.bf16 %v482_v50, %v418_v49  ;;  %v7239_v49 = vpack.c.bf16 %v997_v41, %v933_v38 }
 0x2fc   : > { %7140 = vmatprep.subr.bf16.mxu1 %v7139_v58  ;;  %v9846_v58 = vld.sshfl [vmem:[%s10699_s0] sm:$0x33 pattern:$0x76325410]  ;;  %v7225_v61 = vpack.c.bf16 %v484_v54, %v420_v51  ;;  %v996_v50 = vld [vmem:[%s8093_s26 + $0x1770] sm:$0xff]  ;;  %v1059_v51 = vld [vmem:[%s8093_s26 + $0x1968] sm:$0xff]  ;;  %v2425_v54 = vrot.slane %v9720_v40, %v8925_v22 }
 0x2fe   : > { %7076 = vmatpush1.bf16.msra.mxu0 %v7075_v33  ;;  %v546_v33 = vld [vmem:[%s8093_s26 + $0x960] sm:$0xff] }
 0x2ff   : > { %7142 = vmatpush1.bf16.msra.mxu1 %v7141_v18  ;;  %7078 = vmatprep.subr.bf16.mxu0 %v7077_v63  ;;  %v610_v18 = vld [vmem:[%s8093_s26 + $0xb60] sm:$0xff]  ;;  %v548_v63 = vld [vmem:[%s8093_s26 + $0x970] sm:$0xff] }
 0x300   : > { %7144 = vmatprep.subr.bf16.mxu1 %v7143_v44  ;;  %v739_v44 = vld [vmem:[%s8093_s26 + $0xf68] sm:$0xff]  ;;  %v7163_v2 = vpack.c.bf16 %v610_v18, %v546_v33  ;;  %v7229_v3 = vpack.c.bf16 %v612_v28, %v548_v63  ;;  %v1058_v18 = vld [vmem:[%s8093_s26 + $0x1960] sm:$0xff] }
 0x301   : > { %v7165_v4 = vpack.c.bf16 %v739_v44, %v675_v53  ;;  %v1122_v63 = vld [vmem:[%s8093_s26 + $0x1b60] sm:$0xff]  ;;  %v7243_v53 = vpack.c.bf16 %v1125_v56, %v1061_v55  ;;  %v1124_v44 = vld [vmem:[%s8093_s26 + $0x1b70] sm:$0xff]  ;;  %v1445_v55 = vld [vmem:[%s8093_s26 + $0x2578] sm:$0xff] }
 0x302   : > { %7080 = vmatpush1.bf16.msra.mxu0 %v7079_v5  ;;  %v674_v5 = vld [vmem:[%s8093_s26 + $0xd60] sm:$0xff]  ;;  %v1509_v56 = vld [vmem:[%s8093_s26 + $0x2778] sm:$0xff] }
 0x303   : > { %7146 = vmatpush1.bf16.msra.mxu1 %v7145_v6  ;;  %7083 = vmatprep.subr.msk.bf16.mxu0 %vm8236_vm3, %v7081_v7  ;;  %v738_v6 = vld [vmem:[%s8093_s26 + $0xf60] sm:$0xff]  ;;  %v676_v7 = vld [vmem:[%s8093_s26 + $0xd70] sm:$0xff] }
 0x304   : > { %7149 = vmatprep.subr.msk.bf16.mxu1 %vm8236_vm3, %v7147_v12  ;;  %v867_v12 = vld [vmem:[%s8093_s26 + $0x1368] sm:$0xff]  ;;  %v7167_v15 = vpack.c.bf16 %v738_v6, %v674_v5  ;;  %v7233_v17 = vpack.c.bf16 %v740_v10, %v676_v7  ;;  %v1253_v5 = vld [vmem:[%s8093_s26 + $0x1f78] sm:$0xff]  ;;  %v7179_v10 = vpack.c.bf16 %v1122_v63, %v1058_v18  ;;  %v7255_v18 = vpack.c.bf16 %v1509_v56, %v1445_v55  ;;  %v1508_v63 = vld [vmem:[%s8093_s26 + $0x2770] sm:$0xff] }
 0x305   : > { %v7169_v19 = vpack.c.bf16 %v867_v12, %v803_v11  ;;  %v1954_v56 = vld [vmem:[%s8093_s26 + $0x3560] sm:$0xff] }
 0x306   : > { %7086 = vmatpush1.bf16.msk.msra.mxu0 %vm8236_vm3, %v7084_v21  ;;  %v802_v21 = vld [vmem:[%s8093_s26 + $0x1160] sm:$0xff] }
 0x307   : > { %7152 = vmatpush1.bf16.msk.msra.mxu1 %vm8236_vm3, %v7150_v23  ;;  %7154 = vmatprep.subr.bf16.mxu0 %v7153_v24  ;;  %v866_v23 = vld [vmem:[%s8093_s26 + $0x1360] sm:$0xff]  ;;  %v804_v24 = vld [vmem:[%s8093_s26 + $0x1170] sm:$0xff] }
 0x308   : > { %7220 = vmatprep.subr.bf16.mxu1 %v7219_v37  ;;  %v995_v37 = vld [vmem:[%s8093_s26 + $0x1768] sm:$0xff]  ;;  %v7171_v42 = vpack.c.bf16 %v866_v23, %v802_v21  ;;  %v7237_v43 = vpack.c.bf16 %v868_v31, %v804_v24  ;;  %v1252_v23 = vld [vmem:[%s8093_s26 + $0x1f70] sm:$0xff] }
 0x309   : > { %4321 = vmatmul.mubr.f32.vlgmr.msra.gmra.mrb[20].mxu0 %v9846_v58  ;;  %v7173_v45 = vpack.c.bf16 %v995_v37, %v931_v32  ;;  %v1315_v24 = vld [vmem:[%s8093_s26 + $0x2168] sm:$0xff]  ;;  %v1317_v32 = vld [vmem:[%s8093_s26 + $0x2178] sm:$0xff] }
 0x30a   : > { %4392 = vmatmul.mubr.f32.vlgmr.msra.gmra.mrb[20].mxu1 %v9846_v58  ;;  %7156 = vmatpush1.bf16.msra.mxu0 %v7155_v47  ;;  %v930_v47 = vld [vmem:[%s8093_s26 + $0x1560] sm:$0xff]  ;;  %v1381_v37 = vld [vmem:[%s8093_s26 + $0x2378] sm:$0xff] }
 0x30b   : > { %7222 = vmatpush1.bf16.msra.mxu1 %v7221_v16  ;;  %7158 = vmatprep.subr.bf16.mxu0 %v7157_v48  ;;  %v994_v16 = vld [vmem:[%s8093_s26 + $0x1760] sm:$0xff]  ;;  %v932_v48 = vld [vmem:[%s8093_s26 + $0x1570] sm:$0xff] }
 0x30c   : > { %7224 = vmatprep.subr.bf16.mxu1 %v7223_v52  ;;  %5660 = vmatprep.mubr.msk.f32.mxu0 %vm2640_vm0, %v8206_v20  ;;  %v1123_v52 = vld [vmem:[%s8093_s26 + $0x1b68] sm:$0xff] }
 0x30d   : > { %5663 = vmatprep.mubr.msk.f32.mxu1 %vm2640_vm0, %v8206_v20  ;;  %v7177_v33 = vpack.c.bf16 %v1123_v52, %v1059_v51  ;;  %v1443_v51 = vld [vmem:[%s8093_s26 + $0x2568] sm:$0xff] }
 0x30e   : > { %7160 = vmatpush1.bf16.msra.mxu0 %v7159_v46  ;;  %v7175_v46 = vpack.c.bf16 %v994_v16, %v930_v47  ;;  %v1314_v47 = vld [vmem:[%s8093_s26 + $0x2160] sm:$0xff]  ;;  %v1507_v52 = vld [vmem:[%s8093_s26 + $0x2768] sm:$0xff] }
 0x30f   : > { %7226 = vmatpush1.bf16.msra.mxu1 %v7225_v61  ;;  %7162 = vmatprep.subr.bf16.mxu0 %v7161_v62  ;;  %v2437_v61 = vrot.slane %v9720_v40, %v8936_v30  ;;  %v7241_v62 = vpack.c.bf16 %v996_v50, %v932_v48  ;;  %v1378_v16 = vld [vmem:[%s8093_s26 + $0x2360] sm:$0xff]  ;;  %v1316_v48 = vld [vmem:[%s8093_s26 + $0x2170] sm:$0xff] }
 0x310   : > { %7228 = vmatprep.subr.bf16.mxu1 %v7227_v0  ;;  %v1060_v0 = vld [vmem:[%s8093_s26 + $0x1970] sm:$0xff] }
 0x311   : > { %v7245_v12 = vpack.c.bf16 %v1124_v44, %v1060_v0  ;;  %v1380_v50 = vld [vmem:[%s8093_s26 + $0x2370] sm:$0xff]  ;;  %v1571_v0 = vld [vmem:[%s8093_s26 + $0x2968] sm:$0xff]  ;;  %v1637_v44 = vld [vmem:[%s8093_s26 + $0x2b78] sm:$0xff] }
 0x312   : > { %7164 = vmatpush1.bf16.msra.mxu0 %v7163_v2 }
 0x313   : > { %7230 = vmatpush1.bf16.msra.mxu1 %v7229_v3  ;;  %7166 = vmatprep.subr.bf16.mxu0 %v7165_v4  ;;  %v1189_v4 = vld [vmem:[%s8093_s26 + $0x1d78] sm:$0xff] }
 0x314   : > { %7232 = vmatprep.subr.bf16.mxu1 %v7231_v8  ;;  %v7247_v21 = vpack.c.bf16 %v1253_v5, %v1189_v4  ;;  %v1572_v4 = vld [vmem:[%s8093_s26 + $0x2970] sm:$0xff] }
 0x316   : > { %7168 = vmatpush1.bf16.msra.mxu0 %v7167_v15  ;;  %v1250_v15 = vld [vmem:[%s8093_s26 + $0x1f60] sm:$0xff] }
 0x317   : > { %7234 = vmatpush1.bf16.msra.mxu1 %v7233_v17  ;;  %7170 = vmatprep.subr.bf16.mxu0 %v7169_v19  ;;  %v1188_v17 = vld [vmem:[%s8093_s26 + $0x1d70] sm:$0xff]  ;;  %v7183_v41 = vpack.c.bf16 %v1250_v15, %v1186_v14  ;;  %v1698_v15 = vld [vmem:[%s8093_s26 + $0x2d60] sm:$0xff] }
 0x318   : > { %7236 = vmatprep.subr.bf16.mxu1 %v7235_v25  ;;  %v1379_v25 = vld [vmem:[%s8093_s26 + $0x2368] sm:$0xff] }
 0x31a   : > { %7172 = vmatpush1.bf16.msra.mxu0 %v7171_v42 }
 0x31b   : > { %7238 = vmatpush1.bf16.msra.mxu1 %v7237_v43  ;;  %7174 = vmatprep.subr.bf16.mxu0 %v7173_v45  ;;  %v7249_v43 = vpack.c.bf16 %v1252_v23, %v1188_v17  ;;  %v7185_v45 = vpack.c.bf16 %v1379_v25, %v1315_v24  ;;  %v1762_v17 = vld [vmem:[%s8093_s26 + $0x2f60] sm:$0xff]  ;;  %v1764_v23 = vld [vmem:[%s8093_s26 + $0x2f70] sm:$0xff]  ;;  %v1827_v24 = vld [vmem:[%s8093_s26 + $0x3168] sm:$0xff] }
 0x31c   : > { %v3896_v28 = vpop.f32.mrb[14].mxu0  ;;  %7240 = vmatprep.subr.bf16.mxu1 %v7239_v49  ;;  %v7251_v49 = vpack.c.bf16 %v1381_v37, %v1317_v32  ;;  %v1891_v25 = vld [vmem:[%s8093_s26 + $0x3368] sm:$0xff]  ;;  %v1893_v32 = vld [vmem:[%s8093_s26 + $0x3378] sm:$0xff]  ;;  %v7199_v37 = vpack.c.bf16 %v1762_v17, %v1698_v15  ;;  %v2276_v15 = vld [vmem:[%s8093_s26 + $0x3f70] sm:$0x3] }
 0x31d   : > { %v3897_v2 = vadd.f32 %v3896_v28, %v2425_v54  ;;  %v3967_v3 = vpop.f32.mrb[14].mxu1  ;;  %v3898_v40 = vpop.f32.mrb[15].mxu0  ;;  %v1635_v28 = vld [vmem:[%s8093_s26 + $0x2b68] sm:$0xff] }
 0x31e   : > { %v3968_v6 = vadd.f32 %v3967_v3, %v2433_v59  ;;  %v3899_v7 = vadd.f32 %v3898_v40, %v2429_v60  ;;  %v3969_v8 = vpop.f32.mrb[15].mxu1  ;;  %7176 = vmatpush1.bf16.msra.mxu0 %v7175_v46  ;;  %v7187_v59 = vpack.c.bf16 %v1378_v16, %v1314_v47  ;;  %v7253_v60 = vpack.c.bf16 %v1380_v50, %v1316_v48  ;;  %v1570_v3 = vld [vmem:[%s8093_s26 + $0x2960] sm:$0xff]  ;;  %v1892_v16 = vld [vmem:[%s8093_s26 + $0x3370] sm:$0xff]  ;;  %v1955_v48 = vld [vmem:[%s8093_s26 + $0x3568] sm:$0xff] }
 0x31f   : > { %v3970_v11 = vadd.f32 %v3969_v8, %v2437_v61  ;;  %7242 = vmatpush1.bf16.msra.mxu1 %v7241_v62  ;;  %7178 = vmatprep.subr.bf16.mxu0 %v7177_v33  ;;  %v7189_v46 = vpack.c.bf16 %v1507_v52, %v1443_v51  ;;  %v1442_v61 = vld [vmem:[%s8093_s26 + $0x2560] sm:$0xff]  ;;  %v1444_v33 = vld [vmem:[%s8093_s26 + $0x2570] sm:$0xff]  ;;  %v1763_v8 = vld [vmem:[%s8093_s26 + $0x2f68] sm:$0xff] }
 0x320   : > { %v5291_v19 = vcombine.low %v3897_v2, %v3899_v7  ;;  %7244 = vmatprep.subr.bf16.mxu1 %v7243_v53  ;;  %v1506_v62 = vld [vmem:[%s8093_s26 + $0x2760] sm:$0xff]  ;;  %v1573_v53 = vld [vmem:[%s8093_s26 + $0x2978] sm:$0xff]  ;;  %v7257_v36 = vpack.c.bf16 %v1508_v63, %v1444_v33  ;;  %v7193_v2 = vpack.c.bf16 %v1635_v28, %v1571_v0  ;;  %v1699_v7 = vld [vmem:[%s8093_s26 + $0x2d68] sm:$0xff] }
 0x321   : > { %v5292_v31 = vcombine.low %v3968_v6, %v3970_v11  ;;  %v7191_v1 = vpack.c.bf16 %v1506_v62, %v1442_v61  ;;  %v1634_v40 = vld [vmem:[%s8093_s26 + $0x2b60] sm:$0xff]  ;;  %v7259_v5 = vpack.c.bf16 %v1637_v44, %v1573_v53  ;;  %v1636_v6 = vld [vmem:[%s8093_s26 + $0x2b70] sm:$0xff]  ;;  %v1765_v11 = vld [vmem:[%s8093_s26 + $0x2f78] sm:$0xff]  ;;  %v7197_v14 = vpack.c.bf16 %v1763_v8, %v1699_v7 }
 0x322   : > { %v5299_v38 = vrot.slane %v5291_v19, %v8787_v9  ;;  %7180 = vmatpush1.bf16.msra.mxu0 %v7179_v10  ;;  %v1701_v10 = vld [vmem:[%s8093_s26 + $0x2d78] sm:$0xff]  ;;  %v1700_v19 = vld [vmem:[%s8093_s26 + $0x2d70] sm:$0xff]  ;;  %v2083_v62 = vld [vmem:[%s8093_s26 + $0x3968] sm:$0xff] }
 0x323   : > { %v5306_v42 = vrot.slane %v5292_v31, %v8787_v9  ;;  %7246 = vmatpush1.bf16.msra.mxu1 %v7245_v12  ;;  %7182 = vmatprep.subr.bf16.mxu0 %v7181_v13  ;;  %v7195_v12 = vpack.c.bf16 %v1634_v40, %v1570_v3  ;;  %v7261_v13 = vpack.c.bf16 %v1636_v6, %v1572_v4  ;;  %v1829_v31 = vld [vmem:[%s8093_s26 + $0x3178] sm:$0xff]  ;;  %v2020_v61 = vld [vmem:[%s8093_s26 + $0x3770] sm:$0xff]  ;;  %v2147_v33 = vld [vmem:[%s8093_s26 + $0x3b68] sm:$0xff] }
 0x324   : > { %7248 = vmatprep.subr.bf16.mxu1 %v7247_v21  ;;  %v7263_v21 = vpack.c.bf16 %v1765_v11, %v1701_v10  ;;  %v7267_v47 = vpack.c.bf16 %v1893_v32, %v1829_v31  ;;  %v1957_v50 = vld [vmem:[%s8093_s26 + $0x3578] sm:$0xff]  ;;  %v7209_v53 = vpack.c.bf16 %v2147_v33, %v2083_v62  ;;  %v2082_v44 = vld [vmem:[%s8093_s26 + $0x3960] sm:$0xff]  ;;  %v2148_v3 = vld [vmem:[%s8093_s26 + $0x3b70] sm:$0xff] }
 0x325   : > { %v5307_v54 = vcombine.low %v5299_v38, %v5306_v42  ;;  %v7265_v38 = vpack.c.bf16 %v1764_v23, %v1700_v19  ;;  %v1826_v42 = vld [vmem:[%s8093_s26 + $0x3160] sm:$0xff]  ;;  %v2021_v51 = vld [vmem:[%s8093_s26 + $0x3778] sm:$0xff]  ;;  %v2211_v40 = vld [vmem:[%s8093_s26 + $0x3d68] sm:$0xff] }
 0x326   : > { %7184 = vmatpush1.bf16.msra.mxu0 %v7183_v41  ;;  %v7201_v41 = vpack.c.bf16 %v1891_v25, %v1827_v24  ;;  %v2149_v63 = vld [vmem:[%s8093_s26 + $0x3b78] sm:$0xff]  ;;  %v2275_v4 = vld [vmem:[%s8093_s26 + $0x3f68] sm:$0x3]  ;;  %v2210_v11 = vld [vmem:[%s8093_s26 + $0x3d60] sm:$0xff] }
 0x327   : > { %5467 = vst [vmem:[%s8808_s6 + $0x38] sm:$0xff] %v5307_v54  ;;  %7250 = vmatpush1.bf16.msra.mxu1 %v7249_v43  ;;  %7186 = vmatprep.subr.bf16.mxu0 %v7185_v45  ;;  %v1890_v43 = vld [vmem:[%s8093_s26 + $0x3360] sm:$0xff]  ;;  %v1828_v45 = vld [vmem:[%s8093_s26 + $0x3170] sm:$0xff]  ;;  %v2277_v6 = vld [vmem:[%s8093_s26 + $0x3f78] sm:$0x3]  ;;  %v7213_v10 = vpack.c.bf16 %v2275_v4, %v2211_v40 }
 0x328   : > { %7252 = vmatprep.subr.bf16.mxu1 %v7251_v49  ;;  %v2019_v49 = vld [vmem:[%s8093_s26 + $0x3768] sm:$0xff]  ;;  %v7203_v52 = vpack.c.bf16 %v1890_v43, %v1826_v42  ;;  %v7269_v54 = vpack.c.bf16 %v1892_v16, %v1828_v45  ;;  %v361_v23 = vld [vmem:[%s8093_s26 + $0x398] sm:$0xff]  ;;  %v294_v32 = vld [vmem:[%s8093_s26 + $0x180] sm:$0xff] }
 0x329   : > { %v7205_v55 = vpack.c.bf16 %v2019_v49, %v1955_v48  ;;  %v295_v17 = vld [vmem:[%s8093_s26 + $0x188] sm:$0xff]  ;;  %v360_v42 = vld [vmem:[%s8093_s26 + $0x390] sm:$0xff]  ;;  %v489_v16 = vld [vmem:[%s8093_s26 + $0x798] sm:$0xff] }
 0x32a   : > { %7188 = vmatpush1.bf16.msra.mxu0 %v7187_v59  ;;  %v2018_v59 = vld [vmem:[%s8093_s26 + $0x3760] sm:$0xff]  ;;  %v359_v19 = vld [vmem:[%s8093_s26 + $0x388] sm:$0xff] }
 0x32b   : > { %7254 = vmatpush1.bf16.msra.mxu1 %v7253_v60  ;;  %7190 = vmatprep.subr.bf16.mxu0 %v7189_v46  ;;  %v1956_v60 = vld [vmem:[%s8093_s26 + $0x3570] sm:$0xff]  ;;  %v7271_v46 = vpack.c.bf16 %v2021_v51, %v1957_v50  ;;  %v7207_v0 = vpack.c.bf16 %v2018_v59, %v1954_v56  ;;  %v7285_v31 = vpack.c.bf16 %v359_v19, %v295_v17  ;;  %v423_v43 = vld [vmem:[%s8093_s26 + $0x588] sm:$0xff]  ;;  %v422_v51 = vld [vmem:[%s8093_s26 + $0x580] sm:$0xff] }
 0x32c   : > { %7256 = vmatprep.subr.bf16.mxu1 %v7255_v18  ;;  %v2085_v18 = vld [vmem:[%s8093_s26 + $0x3978] sm:$0xff]  ;;  %v7273_v28 = vpack.c.bf16 %v2020_v61, %v1956_v60  ;;  %v487_v45 = vld [vmem:[%s8093_s26 + $0x788] sm:$0xff]  ;;  %v488_v56 = vld [vmem:[%s8093_s26 + $0x790] sm:$0xff] }
 0x32d   : > { %v7289_v50 = vpack.c.bf16 %v487_v45, %v423_v43  ;;  %v551_v59 = vld [vmem:[%s8093_s26 + $0x988] sm:$0xff]  ;;  %v617_v61 = vld [vmem:[%s8093_s26 + $0xb98] sm:$0xff]  ;;  %v10034_v43 = vld [vmem:[%s8740_s30 + $0x20] sm:$0xff] }
 0x32e   : > { %7192 = vmatpush1.bf16.msra.mxu0 %v7191_v1  ;;  %v2146_v1 = vld [vmem:[%s8093_s26 + $0x3b60] sm:$0xff]  ;;  %v615_v60 = vld [vmem:[%s8093_s26 + $0xb88] sm:$0xff] }
 0x32f   : > { %7258 = vmatpush1.bf16.msra.mxu1 %v7257_v36  ;;  %7194 = vmatprep.subr.bf16.mxu0 %v7193_v2  ;;  %v2084_v36 = vld [vmem:[%s8093_s26 + $0x3970] sm:$0xff]  ;;  %v7275_v2 = vpack.c.bf16 %v2149_v63, %v2085_v18  ;;  %v7211_v7 = vpack.c.bf16 %v2146_v1, %v2082_v44  ;;  %v7293_v18 = vpack.c.bf16 %v615_v60, %v551_v59  ;;  %v550_v63 = vld [vmem:[%s8093_s26 + $0x980] sm:$0xff]  ;;  %v679_v1 = vld [vmem:[%s8093_s26 + $0xd88] sm:$0xff] }
 0x330   : > { %7260 = vmatprep.subr.bf16.mxu1 %v7259_v5  ;;  %v2213_v5 = vld [vmem:[%s8093_s26 + $0x3d78] sm:$0xff]  ;;  %v7277_v8 = vpack.c.bf16 %v2148_v3, %v2084_v36  ;;  %v616_v44 = vld [vmem:[%s8093_s26 + $0xb90] sm:$0xff]  ;;  %v743_v36 = vld [vmem:[%s8093_s26 + $0xf88] sm:$0xff]  ;;  %v2449_v60 = vrot.slane %v10034_v43, %v8754_v34 }
 0x331   : > { %v7297_v4 = vpack.c.bf16 %v743_v36, %v679_v1  ;;  %v1129_v59 = vld [vmem:[%s8093_s26 + $0x1b98] sm:$0xff]  ;;  %v1128_v1 = vld [vmem:[%s8093_s26 + $0x1b90] sm:$0xff]  ;;  %v1191_v36 = vld [vmem:[%s8093_s26 + $0x1d88] sm:$0xff] }
 0x332   : > { %7196 = vmatpush1.bf16.msra.mxu0 %v7195_v12  ;;  %v2274_v12 = vld [vmem:[%s8093_s26 + $0x3f60] sm:$0x3] }
 0x333   : > { %7262 = vmatpush1.bf16.msra.mxu1 %v7261_v13  ;;  %7198 = vmatprep.subr.bf16.mxu0 %v7197_v14  ;;  %v2212_v13 = vld [vmem:[%s8093_s26 + $0x3d70] sm:$0xff]  ;;  %v7279_v14 = vpack.c.bf16 %v2277_v6, %v2213_v5  ;;  %v7216_v24 = vpack.c.bf16 %v2274_v12, %v2210_v11  ;;  %v678_v5 = vld [vmem:[%s8093_s26 + $0xd80] sm:$0xff]  ;;  %v807_v11 = vld [vmem:[%s8093_s26 + $0x1188] sm:$0xff] }
 0x334   : > { %7264 = vmatprep.subr.bf16.mxu1 %v7263_v21  ;;  %v297_v21 = vld [vmem:[%s8093_s26 + $0x198] sm:$0xff]  ;;  %v7282_v25 = vpack.c.bf16 %v2276_v15, %v2212_v13  ;;  %v742_v6 = vld [vmem:[%s8093_s26 + $0xf80] sm:$0xff]  ;;  %v871_v12 = vld [vmem:[%s8093_s26 + $0x1388] sm:$0xff] }
 0x335   : > { %v809_v13 = vld [vmem:[%s8093_s26 + $0x1198] sm:$0xff]  ;;  %v7299_v15 = vpack.c.bf16 %v742_v6, %v678_v5  ;;  %v7301_v19 = vpack.c.bf16 %v871_v12, %v807_v11 }
 0x336   : > { %7200 = vmatpush1.bf16.msra.mxu0 %v7199_v37  ;;  %v358_v37 = vld [vmem:[%s8093_s26 + $0x380] sm:$0xff]  ;;  %v1257_v5 = vld [vmem:[%s8093_s26 + $0x1f98] sm:$0xff] }
 0x337   : > { %7266 = vmatpush1.bf16.msra.mxu1 %v7265_v38  ;;  %7202 = vmatprep.subr.bf16.mxu0 %v7201_v41  ;;  %v296_v38 = vld [vmem:[%s8093_s26 + $0x190] sm:$0xff]  ;;  %v7351_v41 = vpack.c.bf16 %v361_v23, %v297_v21  ;;  %v7287_v48 = vpack.c.bf16 %v358_v37, %v294_v32  ;;  %v806_v21 = vld [vmem:[%s8093_s26 + $0x1180] sm:$0xff]  ;;  %v935_v32 = vld [vmem:[%s8093_s26 + $0x1588] sm:$0xff] }
 0x338   : > { %7268 = vmatprep.subr.bf16.mxu1 %v7267_v47  ;;  %v425_v47 = vld [vmem:[%s8093_s26 + $0x598] sm:$0xff]  ;;  %v7353_v49 = vpack.c.bf16 %v360_v42, %v296_v38  ;;  %v870_v23 = vld [vmem:[%s8093_s26 + $0x1380] sm:$0xff]  ;;  %v999_v37 = vld [vmem:[%s8093_s26 + $0x1788] sm:$0xff] }
 0x339   : > { %v937_v38 = vld [vmem:[%s8093_s26 + $0x1598] sm:$0xff]  ;;  %v7303_v42 = vpack.c.bf16 %v870_v23, %v806_v21  ;;  %v1256_v23 = vld [vmem:[%s8093_s26 + $0x1f90] sm:$0xff] }
 0x33a   : > { %7204 = vmatpush1.bf16.msra.mxu0 %v7203_v52  ;;  %v486_v52 = vld [vmem:[%s8093_s26 + $0x780] sm:$0xff] }
 0x33b   : > { %7270 = vmatpush1.bf16.msra.mxu1 %v7269_v54  ;;  %7206 = vmatprep.subr.bf16.mxu0 %v7205_v55  ;;  %v424_v54 = vld [vmem:[%s8093_s26 + $0x590] sm:$0xff]  ;;  %v7355_v55 = vpack.c.bf16 %v489_v16, %v425_v47  ;;  %v7291_v62 = vpack.c.bf16 %v486_v52, %v422_v51  ;;  %v7305_v47 = vpack.c.bf16 %v999_v37, %v935_v32  ;;  %v934_v16 = vld [vmem:[%s8093_s26 + $0x1580] sm:$0xff]  ;;  %v1063_v52 = vld [vmem:[%s8093_s26 + $0x1988] sm:$0xff] }
 0x33c   : > { %7272 = vmatprep.subr.bf16.mxu1 %v7271_v46  ;;  %v553_v46 = vld [vmem:[%s8093_s26 + $0x998] sm:$0xff]  ;;  %v7357_v33 = vpack.c.bf16 %v488_v56, %v424_v54  ;;  %v1000_v51 = vld [vmem:[%s8093_s26 + $0x1790] sm:$0xff]  ;;  %v1127_v54 = vld [vmem:[%s8093_s26 + $0x1b88] sm:$0xff] }
 0x33d   : > { %v1065_v56 = vld [vmem:[%s8093_s26 + $0x1998] sm:$0xff] }
 0x33e   : > { %7208 = vmatpush1.bf16.msra.mxu0 %v7207_v0  ;;  %v614_v0 = vld [vmem:[%s8093_s26 + $0xb80] sm:$0xff]  ;;  %v1321_v32 = vld [vmem:[%s8093_s26 + $0x2198] sm:$0xff] }
 0x33f   : > { %7274 = vmatpush1.bf16.msra.mxu1 %v7273_v28  ;;  %7210 = vmatprep.subr.bf16.mxu0 %v7209_v53  ;;  %v552_v28 = vld [vmem:[%s8093_s26 + $0x990] sm:$0xff]  ;;  %v7359_v53 = vpack.c.bf16 %v617_v61, %v553_v46  ;;  %v7295_v3 = vpack.c.bf16 %v614_v0, %v550_v63  ;;  %v2445_v46 = vrot.slane %v10034_v43, %v8757_v35  ;;  %v1062_v63 = vld [vmem:[%s8093_s26 + $0x1980] sm:$0xff]  ;;  %v1385_v37 = vld [vmem:[%s8093_s26 + $0x2398] sm:$0xff] }
 0x340   : > { %7276 = vmatprep.subr.bf16.mxu1 %v7275_v2  ;;  %v745_v2 = vld [vmem:[%s8093_s26 + $0xf98] sm:$0xff]  ;;  %v7361_v40 = vpack.c.bf16 %v616_v44, %v552_v28  ;;  %v1126_v0 = vld [vmem:[%s8093_s26 + $0x1b80] sm:$0xff]  ;;  %v1064_v28 = vld [vmem:[%s8093_s26 + $0x1990] sm:$0xff]  ;;  %v7375_v44 = vpack.c.bf16 %v1129_v59, %v1065_v56 }
 0x341   : > { %v7377_v12 = vpack.c.bf16 %v1128_v1, %v1064_v28  ;;  %v1449_v56 = vld [vmem:[%s8093_s26 + $0x2598] sm:$0xff]  ;;  %v1575_v28 = vld [vmem:[%s8093_s26 + $0x2988] sm:$0xff] }
 0x342   : > { %7212 = vmatpush1.bf16.msra.mxu0 %v7211_v7  ;;  %v680_v7 = vld [vmem:[%s8093_s26 + $0xd90] sm:$0xff]  ;;  %v1513_v59 = vld [vmem:[%s8093_s26 + $0x2798] sm:$0xff] }
 0x343   : > { %7278 = vmatpush1.bf16.msra.mxu1 %v7277_v8  ;;  %7215 = vmatprep.subr.msk.bf16.mxu0 %vm8236_vm3, %v7213_v10  ;;  %v744_v10 = vld [vmem:[%s8093_s26 + $0xf90] sm:$0xff]  ;;  %v1641_v1 = vld [vmem:[%s8093_s26 + $0x2b98] sm:$0xff] }
 0x344   : > { %7281 = vmatprep.subr.msk.bf16.mxu1 %vm8236_vm3, %v7279_v14  ;;  %v873_v14 = vld [vmem:[%s8093_s26 + $0x1398] sm:$0xff]  ;;  %v7365_v17 = vpack.c.bf16 %v744_v10, %v680_v7  ;;  %v7311_v10 = vpack.c.bf16 %v1126_v0, %v1062_v63  ;;  %v7387_v63 = vpack.c.bf16 %v1513_v59, %v1449_v56  ;;  %v1512_v0 = vld [vmem:[%s8093_s26 + $0x2790] sm:$0xff]  ;;  %v1958_v59 = vld [vmem:[%s8093_s26 + $0x3580] sm:$0xff] }
 0x346   : > { %7218 = vmatpush1.bf16.msk.msra.mxu0 %vm8236_vm3, %v7216_v24  ;;  %v808_v24 = vld [vmem:[%s8093_s26 + $0x1190] sm:$0xff] }
 0x347   : > { %7284 = vmatpush1.bf16.msk.msra.mxu1 %vm8236_vm3, %v7282_v25  ;;  %7286 = vmatprep.subr.bf16.mxu0 %v7285_v31  ;;  %v7367_v25 = vpack.c.bf16 %v873_v14, %v809_v13  ;;  %v872_v31 = vld [vmem:[%s8093_s26 + $0x1390] sm:$0xff]  ;;  %v1190_v14 = vld [vmem:[%s8093_s26 + $0x1d80] sm:$0xff] }
 0x348   : > { %7352 = vmatprep.subr.bf16.mxu1 %v7351_v41  ;;  %v1001_v41 = vld [vmem:[%s8093_s26 + $0x1798] sm:$0xff]  ;;  %v7369_v45 = vpack.c.bf16 %v872_v31, %v808_v24  ;;  %v1319_v24 = vld [vmem:[%s8093_s26 + $0x2188] sm:$0xff] }
 0x349   : > { %4463 = vmatmul.mubr.f32.vlgmr.msra.gmra.mrb[22].mxu0 %v9846_v58 }
 0x34a   : > { %4534 = vmatmul.mubr.f32.vlgmr.msra.gmra.mrb[22].mxu1 %v9846_v58  ;;  %7288 = vmatpush1.bf16.msra.mxu0 %v7287_v48  ;;  %v681_v58 = vld [vmem:[%s8093_s26 + $0xd98] sm:$0xff]  ;;  %v998_v48 = vld [vmem:[%s8093_s26 + $0x1780] sm:$0xff] }
 0x34b   : > { %7354 = vmatpush1.bf16.msra.mxu1 %v7353_v49  ;;  %7290 = vmatprep.subr.bf16.mxu0 %v7289_v50  ;;  %v7363_v8 = vpack.c.bf16 %v745_v2, %v681_v58  ;;  %v936_v49 = vld [vmem:[%s8093_s26 + $0x1590] sm:$0xff]  ;;  %v7371_v50 = vpack.c.bf16 %v1001_v41, %v937_v38  ;;  %v7307_v61 = vpack.c.bf16 %v998_v48, %v934_v16  ;;  %v1255_v58 = vld [vmem:[%s8093_s26 + $0x1f88] sm:$0xff]  ;;  %v1318_v16 = vld [vmem:[%s8093_s26 + $0x2180] sm:$0xff] }
 0x34c   : > { %7356 = vmatprep.subr.bf16.mxu1 %v7355_v55  ;;  %5666 = vmatprep.mubr.msk.f32.mxu0 %vm2640_vm0, %v8206_v20  ;;  %v2441_v55 = vrot.slane %v10034_v43, %v8746_v29  ;;  %v7313_v13 = vpack.c.bf16 %v1255_v58, %v1191_v36  ;;  %v1382_v48 = vld [vmem:[%s8093_s26 + $0x2380] sm:$0xff] }
 0x34d   : > { %5669 = vmatprep.mubr.msk.f32.mxu1 %vm2640_vm0, %v8206_v20 }
 0x34e   : > { %7292 = vmatpush1.bf16.msra.mxu0 %v7291_v62  ;;  %v2453_v62 = vrot.slane %v10034_v43, %v8760_v39 }
 0x34f   : > { %7358 = vmatpush1.bf16.msra.mxu1 %v7357_v33  ;;  %7294 = vmatprep.subr.bf16.mxu0 %v7293_v18  ;;  %v7373_v33 = vpack.c.bf16 %v1000_v51, %v936_v49  ;;  %v7309_v18 = vpack.c.bf16 %v1127_v54, %v1063_v52  ;;  %v1320_v49 = vld [vmem:[%s8093_s26 + $0x2190] sm:$0xff]  ;;  %v1447_v52 = vld [vmem:[%s8093_s26 + $0x2588] sm:$0xff] }
 0x350   : > { %7360 = vmatprep.subr.bf16.mxu1 %v7359_v53  ;;  %v1384_v51 = vld [vmem:[%s8093_s26 + $0x2390] sm:$0xff]  ;;  %v1511_v54 = vld [vmem:[%s8093_s26 + $0x2788] sm:$0xff] }
 0x352   : > { %7296 = vmatpush1.bf16.msra.mxu0 %v7295_v3 }
 0x353   : > { %7362 = vmatpush1.bf16.msra.mxu1 %v7361_v40  ;;  %7298 = vmatprep.subr.bf16.mxu0 %v7297_v4  ;;  %v1193_v4 = vld [vmem:[%s8093_s26 + $0x1d98] sm:$0xff] }
 0x354   : > { %7364 = vmatprep.subr.bf16.mxu1 %v7363_v8  ;;  %v7379_v21 = vpack.c.bf16 %v1257_v5, %v1193_v4  ;;  %v1576_v4 = vld [vmem:[%s8093_s26 + $0x2990] sm:$0xff] }
 0x356   : > { %7300 = vmatpush1.bf16.msra.mxu0 %v7299_v15  ;;  %v1254_v15 = vld [vmem:[%s8093_s26 + $0x1f80] sm:$0xff] }
 0x357   : > { %7366 = vmatpush1.bf16.msra.mxu1 %v7365_v17  ;;  %7302 = vmatprep.subr.bf16.mxu0 %v7301_v19  ;;  %v1192_v17 = vld [vmem:[%s8093_s26 + $0x1d90] sm:$0xff]  ;;  %v7315_v41 = vpack.c.bf16 %v1254_v15, %v1190_v14  ;;  %v1702_v15 = vld [vmem:[%s8093_s26 + $0x2d80] sm:$0xff] }
 0x358   : > { %7368 = vmatprep.subr.bf16.mxu1 %v7367_v25  ;;  %v1383_v25 = vld [vmem:[%s8093_s26 + $0x2388] sm:$0xff] }
 0x35a   : > { %7304 = vmatpush1.bf16.msra.mxu0 %v7303_v42 }
 0x35b   : > { %7370 = vmatpush1.bf16.msra.mxu1 %v7369_v45  ;;  %7306 = vmatprep.subr.bf16.mxu0 %v7305_v47  ;;  %v7381_v45 = vpack.c.bf16 %v1256_v23, %v1192_v17  ;;  %v7317_v47 = vpack.c.bf16 %v1383_v25, %v1319_v24  ;;  %v1766_v17 = vld [vmem:[%s8093_s26 + $0x2f80] sm:$0xff]  ;;  %v1768_v23 = vld [vmem:[%s8093_s26 + $0x2f90] sm:$0xff]  ;;  %v1831_v24 = vld [vmem:[%s8093_s26 + $0x3188] sm:$0xff] }
 0x35c   : > { %v4038_v53 = vpop.f32.mrb[16].mxu0  ;;  %7372 = vmatprep.subr.bf16.mxu1 %v7371_v50  ;;  %v7383_v50 = vpack.c.bf16 %v1385_v37, %v1321_v32  ;;  %v1895_v25 = vld [vmem:[%s8093_s26 + $0x3388] sm:$0xff]  ;;  %v1897_v32 = vld [vmem:[%s8093_s26 + $0x3398] sm:$0xff]  ;;  %v7331_v37 = vpack.c.bf16 %v1766_v17, %v1702_v15  ;;  %v2280_v15 = vld [vmem:[%s8093_s26 + $0x3f90] sm:$0x3] }
 0x35d   : > { %v4039_v2 = vadd.f32 %v4038_v53, %v2441_v55  ;;  %v4109_v3 = vpop.f32.mrb[16].mxu1  ;;  %v4040_v40 = vpop.f32.mrb[17].mxu0  ;;  %v1639_v53 = vld [vmem:[%s8093_s26 + $0x2b88] sm:$0xff] }
 0x35e   : > { %v4110_v6 = vadd.f32 %v4109_v3, %v2449_v60  ;;  %v4041_v7 = vadd.f32 %v4040_v40, %v2445_v46  ;;  %v4111_v8 = vpop.f32.mrb[17].mxu1  ;;  %7308 = vmatpush1.bf16.msra.mxu0 %v7307_v61  ;;  %v7319_v60 = vpack.c.bf16 %v1382_v48, %v1318_v16  ;;  %v7385_v46 = vpack.c.bf16 %v1384_v51, %v1320_v49  ;;  %v1574_v3 = vld [vmem:[%s8093_s26 + $0x2980] sm:$0xff]  ;;  %v1896_v48 = vld [vmem:[%s8093_s26 + $0x3390] sm:$0xff]  ;;  %v1959_v49 = vld [vmem:[%s8093_s26 + $0x3588] sm:$0xff] }
 0x35f   : > { %v4112_v11 = vadd.f32 %v4111_v8, %v2453_v62  ;;  %7374 = vmatpush1.bf16.msra.mxu1 %v7373_v33  ;;  %7310 = vmatprep.subr.bf16.mxu0 %v7309_v18  ;;  %v7321_v61 = vpack.c.bf16 %v1511_v54, %v1447_v52  ;;  %v1446_v62 = vld [vmem:[%s8093_s26 + $0x2580] sm:$0xff]  ;;  %v1448_v18 = vld [vmem:[%s8093_s26 + $0x2590] sm:$0xff]  ;;  %v1767_v8 = vld [vmem:[%s8093_s26 + $0x2f88] sm:$0xff] }
 0x360   : > { %v5308_v19 = vcombine.low %v4039_v2, %v4041_v7  ;;  %7376 = vmatprep.subr.bf16.mxu1 %v7375_v44  ;;  %v1510_v33 = vld [vmem:[%s8093_s26 + $0x2780] sm:$0xff]  ;;  %v1577_v44 = vld [vmem:[%s8093_s26 + $0x2998] sm:$0xff]  ;;  %v7389_v58 = vpack.c.bf16 %v1512_v0, %v1448_v18  ;;  %v7325_v2 = vpack.c.bf16 %v1639_v53, %v1575_v28  ;;  %v1703_v7 = vld [vmem:[%s8093_s26 + $0x2d88] sm:$0xff] }
 0x361   : > { %v5309_v31 = vcombine.low %v4110_v6, %v4112_v11  ;;  %v7323_v36 = vpack.c.bf16 %v1510_v33, %v1446_v62  ;;  %v1638_v40 = vld [vmem:[%s8093_s26 + $0x2b80] sm:$0xff]  ;;  %v7391_v5 = vpack.c.bf16 %v1641_v1, %v1577_v44  ;;  %v1640_v6 = vld [vmem:[%s8093_s26 + $0x2b90] sm:$0xff]  ;;  %v1769_v11 = vld [vmem:[%s8093_s26 + $0x2f98] sm:$0xff]  ;;  %v7329_v14 = vpack.c.bf16 %v1767_v8, %v1703_v7 }
 0x362   : > { %v5316_v38 = vrot.slane %v5308_v19, %v8787_v9  ;;  %7312 = vmatpush1.bf16.msra.mxu0 %v7311_v10  ;;  %v1705_v10 = vld [vmem:[%s8093_s26 + $0x2d98] sm:$0xff]  ;;  %v1704_v19 = vld [vmem:[%s8093_s26 + $0x2d90] sm:$0xff]  ;;  %v2087_v33 = vld [vmem:[%s8093_s26 + $0x3988] sm:$0xff] }
 0x363   : > { %v5323_v42 = vrot.slane %v5309_v31, %v8787_v9  ;;  %7378 = vmatpush1.bf16.msra.mxu1 %v7377_v12  ;;  %7314 = vmatprep.subr.bf16.mxu0 %v7313_v13  ;;  %v7327_v12 = vpack.c.bf16 %v1638_v40, %v1574_v3  ;;  %v7393_v13 = vpack.c.bf16 %v1640_v6, %v1576_v4  ;;  %v1833_v31 = vld [vmem:[%s8093_s26 + $0x3198] sm:$0xff]  ;;  %v2024_v62 = vld [vmem:[%s8093_s26 + $0x3790] sm:$0xff]  ;;  %v2151_v18 = vld [vmem:[%s8093_s26 + $0x3b88] sm:$0xff] }
 0x364   : > { %7380 = vmatprep.subr.bf16.mxu1 %v7379_v21  ;;  %v7395_v21 = vpack.c.bf16 %v1769_v11, %v1705_v10  ;;  %v7399_v16 = vpack.c.bf16 %v1897_v32, %v1833_v31  ;;  %v1961_v51 = vld [vmem:[%s8093_s26 + $0x3598] sm:$0xff]  ;;  %v7341_v44 = vpack.c.bf16 %v2151_v18, %v2087_v33  ;;  %v2086_v1 = vld [vmem:[%s8093_s26 + $0x3980] sm:$0xff]  ;;  %v2152_v3 = vld [vmem:[%s8093_s26 + $0x3b90] sm:$0xff] }
 0x365   : > { %v5324_v55 = vcombine.low %v5316_v38, %v5323_v42  ;;  %v7397_v38 = vpack.c.bf16 %v1768_v23, %v1704_v19  ;;  %v1830_v42 = vld [vmem:[%s8093_s26 + $0x3180] sm:$0xff]  ;;  %v2025_v52 = vld [vmem:[%s8093_s26 + $0x3798] sm:$0xff]  ;;  %v2215_v40 = vld [vmem:[%s8093_s26 + $0x3d88] sm:$0xff] }
 0x366   : > { %7316 = vmatpush1.bf16.msra.mxu0 %v7315_v41  ;;  %v7333_v41 = vpack.c.bf16 %v1895_v25, %v1831_v24  ;;  %v2153_v0 = vld [vmem:[%s8093_s26 + $0x3b98] sm:$0xff]  ;;  %v2279_v4 = vld [vmem:[%s8093_s26 + $0x3f88] sm:$0x3]  ;;  %v2214_v11 = vld [vmem:[%s8093_s26 + $0x3d80] sm:$0xff] }
 0x367   : > { %5468 = vst [vmem:[%s8808_s6 + $0x40] sm:$0xff] %v5324_v55  ;;  %7382 = vmatpush1.bf16.msra.mxu1 %v7381_v45  ;;  %7318 = vmatprep.subr.bf16.mxu0 %v7317_v47  ;;  %v1894_v45 = vld [vmem:[%s8093_s26 + $0x3380] sm:$0xff]  ;;  %v1832_v47 = vld [vmem:[%s8093_s26 + $0x3190] sm:$0xff]  ;;  %v2281_v6 = vld [vmem:[%s8093_s26 + $0x3f98] sm:$0x3]  ;;  %v7345_v10 = vpack.c.bf16 %v2279_v4, %v2215_v40 }
 0x368   : > { %7384 = vmatprep.subr.bf16.mxu1 %v7383_v50  ;;  %v2023_v50 = vld [vmem:[%s8093_s26 + $0x3788] sm:$0xff]  ;;  %v7335_v54 = vpack.c.bf16 %v1894_v45, %v1830_v42  ;;  %v7401_v55 = vpack.c.bf16 %v1896_v48, %v1832_v47  ;;  %v365_v23 = vld [vmem:[%s8093_s26 + $0x3b8] sm:$0xff]  ;;  %v298_v32 = vld [vmem:[%s8093_s26 + $0x1a0] sm:$0xff] }
 0x369   : > { %v7337_v56 = vpack.c.bf16 %v2023_v50, %v1959_v49  ;;  %v299_v17 = vld [vmem:[%s8093_s26 + $0x1a8] sm:$0xff]  ;;  %v364_v42 = vld [vmem:[%s8093_s26 + $0x3b0] sm:$0xff]  ;;  %v493_v48 = vld [vmem:[%s8093_s26 + $0x7b8] sm:$0xff] }
 0x36a   : > { %7320 = vmatpush1.bf16.msra.mxu0 %v7319_v60  ;;  %v2022_v60 = vld [vmem:[%s8093_s26 + $0x3780] sm:$0xff]  ;;  %v363_v19 = vld [vmem:[%s8093_s26 + $0x3a8] sm:$0xff]  ;;  %v621_v33 = vld [vmem:[%s8093_s26 + $0xbb8] sm:$0xff] }
 0x36b   : > { %7386 = vmatpush1.bf16.msra.mxu1 %v7385_v46  ;;  %7322 = vmatprep.subr.bf16.mxu0 %v7321_v61  ;;  %v1960_v46 = vld [vmem:[%s8093_s26 + $0x3590] sm:$0xff]  ;;  %v7403_v61 = vpack.c.bf16 %v2025_v52, %v1961_v51  ;;  %v7339_v28 = vpack.c.bf16 %v2022_v60, %v1958_v59  ;;  %v7417_v31 = vpack.c.bf16 %v363_v19, %v299_v17  ;;  %v427_v45 = vld [vmem:[%s8093_s26 + $0x5a8] sm:$0xff]  ;;  %v426_v52 = vld [vmem:[%s8093_s26 + $0x5a0] sm:$0xff] }
 0x36c   : > { %7388 = vmatprep.subr.bf16.mxu1 %v7387_v63  ;;  %v2089_v63 = vld [vmem:[%s8093_s26 + $0x3998] sm:$0xff]  ;;  %v7405_v53 = vpack.c.bf16 %v2024_v62, %v1960_v46  ;;  %v491_v47 = vld [vmem:[%s8093_s26 + $0x7a8] sm:$0xff]  ;;  %v492_v59 = vld [vmem:[%s8093_s26 + $0x7b0] sm:$0xff] }
 0x36d   : > { %v7421_v51 = vpack.c.bf16 %v491_v47, %v427_v45  ;;  %v555_v60 = vld [vmem:[%s8093_s26 + $0x9a8] sm:$0xff]  ;;  %v557_v62 = vld [vmem:[%s8093_s26 + $0x9b8] sm:$0xff] }
 0x36e   : > { %7324 = vmatpush1.bf16.msra.mxu0 %v7323_v36  ;;  %v2150_v36 = vld [vmem:[%s8093_s26 + $0x3b80] sm:$0xff]  ;;  %v619_v46 = vld [vmem:[%s8093_s26 + $0xba8] sm:$0xff]  ;;  %v749_v40 = vld [vmem:[%s8093_s26 + $0xfb8] sm:$0xff] }
 0x36f   : > { %7390 = vmatpush1.bf16.msra.mxu1 %v7389_v58  ;;  %7326 = vmatprep.subr.bf16.mxu0 %v7325_v2  ;;  %v2088_v58 = vld [vmem:[%s8093_s26 + $0x3990] sm:$0xff]  ;;  %v7407_v2 = vpack.c.bf16 %v2153_v0, %v2089_v63  ;;  %v7343_v7 = vpack.c.bf16 %v2150_v36, %v2086_v1  ;;  %v7425_v0 = vpack.c.bf16 %v619_v46, %v555_v60  ;;  %v877_v17 = vld [vmem:[%s8093_s26 + $0x13b8] sm:$0xff] }
 0x370   : > { %7392 = vmatprep.subr.bf16.mxu1 %v7391_v5  ;;  %v2217_v5 = vld [vmem:[%s8093_s26 + $0x3d98] sm:$0xff]  ;;  %v7409_v8 = vpack.c.bf16 %v2152_v3, %v2088_v58  ;;  %v7491_v1 = vpack.c.bf16 %v621_v33, %v557_v62  ;;  %v620_v36 = vld [vmem:[%s8093_s26 + $0xbb0] sm:$0xff]  ;;  %v683_v58 = vld [vmem:[%s8093_s26 + $0xda8] sm:$0xff]  ;;  %v2465_v62 = vrot.slane %v10034_v43, %v8930_v26  ;;  %v2461_v33 = vrot.slane %v10034_v43, %v8933_v27 }
 0x371   : > { %v685_v3 = vld [vmem:[%s8093_s26 + $0xdb8] sm:$0xff] }
 0x372   : > { %7328 = vmatpush1.bf16.msra.mxu0 %v7327_v12  ;;  %v2278_v12 = vld [vmem:[%s8093_s26 + $0x3f80] sm:$0x3]  ;;  %v1005_v45 = vld [vmem:[%s8093_s26 + $0x17b8] sm:$0xff] }
 0x373   : > { %7394 = vmatpush1.bf16.msra.mxu1 %v7393_v13  ;;  %7330 = vmatprep.subr.bf16.mxu0 %v7329_v14  ;;  %v2216_v13 = vld [vmem:[%s8093_s26 + $0x3d90] sm:$0xff]  ;;  %v7411_v14 = vpack.c.bf16 %v2281_v6, %v2217_v5  ;;  %v7348_v24 = vpack.c.bf16 %v2278_v12, %v2214_v11  ;;  %v7495_v11 = vpack.c.bf16 %v749_v40, %v685_v3  ;;  %v1069_v60 = vld [vmem:[%s8093_s26 + $0x19b8] sm:$0xff]  ;;  %v1195_v3 = vld [vmem:[%s8093_s26 + $0x1da8] sm:$0xff] }
 0x374   : > { %7396 = vmatprep.subr.bf16.mxu1 %v7395_v21  ;;  %v301_v21 = vld [vmem:[%s8093_s26 + $0x1b8] sm:$0xff]  ;;  %v7414_v25 = vpack.c.bf16 %v2280_v15, %v2216_v13  ;;  %v748_v12 = vld [vmem:[%s8093_s26 + $0xfb0] sm:$0xff]  ;;  %v811_v13 = vld [vmem:[%s8093_s26 + $0x11a8] sm:$0xff] }
 0x375   : > { %v813_v15 = vld [vmem:[%s8093_s26 + $0x11b8] sm:$0xff]  ;;  %v1259_v40 = vld [vmem:[%s8093_s26 + $0x1fa8] sm:$0xff] }
 0x376   : > { %7332 = vmatpush1.bf16.msra.mxu0 %v7331_v37  ;;  %v362_v37 = vld [vmem:[%s8093_s26 + $0x3a0] sm:$0xff]  ;;  %v1133_v46 = vld [vmem:[%s8093_s26 + $0x1bb8] sm:$0xff] }
 0x377   : > { %7398 = vmatpush1.bf16.msra.mxu1 %v7397_v38  ;;  %7334 = vmatprep.subr.bf16.mxu0 %v7333_v41  ;;  %v300_v38 = vld [vmem:[%s8093_s26 + $0x1b0] sm:$0xff]  ;;  %v7483_v41 = vpack.c.bf16 %v365_v23, %v301_v21  ;;  %v7419_v49 = vpack.c.bf16 %v362_v37, %v298_v32  ;;  %v7499_v32 = vpack.c.bf16 %v877_v17, %v813_v15  ;;  %v1194_v17 = vld [vmem:[%s8093_s26 + $0x1da0] sm:$0xff] }
 0x378   : > { %7400 = vmatprep.subr.bf16.mxu1 %v7399_v16  ;;  %v429_v16 = vld [vmem:[%s8093_s26 + $0x5b8] sm:$0xff]  ;;  %v7485_v50 = vpack.c.bf16 %v364_v42, %v300_v38  ;;  %v876_v37 = vld [vmem:[%s8093_s26 + $0x13b0] sm:$0xff]  ;;  %v939_v38 = vld [vmem:[%s8093_s26 + $0x15a8] sm:$0xff]  ;;  %v7445_v15 = vpack.c.bf16 %v1259_v40, %v1195_v3 }
 0x379   : > { %v941_v42 = vld [vmem:[%s8093_s26 + $0x15b8] sm:$0xff] }
 0x37a   : > { %7336 = vmatpush1.bf16.msra.mxu0 %v7335_v54  ;;  %v490_v54 = vld [vmem:[%s8093_s26 + $0x7a0] sm:$0xff] }
 0x37b   : > { %7402 = vmatpush1.bf16.msra.mxu1 %v7401_v55  ;;  %7338 = vmatprep.subr.bf16.mxu0 %v7337_v56  ;;  %v428_v55 = vld [vmem:[%s8093_s26 + $0x5b0] sm:$0xff]  ;;  %v7487_v56 = vpack.c.bf16 %v493_v48, %v429_v16  ;;  %v7423_v18 = vpack.c.bf16 %v490_v54, %v426_v52  ;;  %v7503_v52 = vpack.c.bf16 %v1005_v45, %v941_v42 }
 0x37c   : > { %7404 = vmatprep.subr.bf16.mxu1 %v7403_v61  ;;  %v10160_v61 = vld.sshfl [vmem:[%s10699_s0] sm:$0x33 pattern:$0x76325410]  ;;  %v7489_v63 = vpack.c.bf16 %v492_v59, %v428_v55  ;;  %v1004_v54 = vld [vmem:[%s8093_s26 + $0x17b0] sm:$0xff]  ;;  %v1067_v55 = vld [vmem:[%s8093_s26 + $0x19a8] sm:$0xff]  ;;  %v2457_v59 = vrot.slane %v10034_v43, %v8925_v22 }
 0x37e   : > { %7340 = vmatpush1.bf16.msra.mxu0 %v7339_v28  ;;  %v554_v28 = vld [vmem:[%s8093_s26 + $0x9a0] sm:$0xff] }
 0x37f   : > { %7406 = vmatpush1.bf16.msra.mxu1 %v7405_v53  ;;  %7342 = vmatprep.subr.bf16.mxu0 %v7341_v44  ;;  %v618_v53 = vld [vmem:[%s8093_s26 + $0xba0] sm:$0xff]  ;;  %v556_v44 = vld [vmem:[%s8093_s26 + $0x9b0] sm:$0xff] }
 0x380   : > { %7408 = vmatprep.subr.bf16.mxu1 %v7407_v2  ;;  %v747_v2 = vld [vmem:[%s8093_s26 + $0xfa8] sm:$0xff]  ;;  %v7427_v4 = vpack.c.bf16 %v618_v53, %v554_v28  ;;  %v7493_v5 = vpack.c.bf16 %v620_v36, %v556_v44  ;;  %v1066_v53 = vld [vmem:[%s8093_s26 + $0x19a0] sm:$0xff] }
 0x381   : > { %v7429_v6 = vpack.c.bf16 %v747_v2, %v683_v58  ;;  %v1130_v44 = vld [vmem:[%s8093_s26 + $0x1ba0] sm:$0xff]  ;;  %v7507_v58 = vpack.c.bf16 %v1133_v46, %v1069_v60  ;;  %v1132_v2 = vld [vmem:[%s8093_s26 + $0x1bb0] sm:$0xff]  ;;  %v1453_v60 = vld [vmem:[%s8093_s26 + $0x25b8] sm:$0xff] }
 0x382   : > { %7344 = vmatpush1.bf16.msra.mxu0 %v7343_v7  ;;  %v682_v7 = vld [vmem:[%s8093_s26 + $0xda0] sm:$0xff]  ;;  %v1517_v46 = vld [vmem:[%s8093_s26 + $0x27b8] sm:$0xff] }
 0x383   : > { %7410 = vmatpush1.bf16.msra.mxu1 %v7409_v8  ;;  %7347 = vmatprep.subr.msk.bf16.mxu0 %vm8236_vm3, %v7345_v10  ;;  %v746_v8 = vld [vmem:[%s8093_s26 + $0xfa0] sm:$0xff]  ;;  %v684_v10 = vld [vmem:[%s8093_s26 + $0xdb0] sm:$0xff] }
 0x384   : > { %7413 = vmatprep.subr.msk.bf16.mxu1 %vm8236_vm3, %v7411_v14  ;;  %v875_v14 = vld [vmem:[%s8093_s26 + $0x13a8] sm:$0xff]  ;;  %v7431_v19 = vpack.c.bf16 %v746_v8, %v682_v7  ;;  %v7497_v21 = vpack.c.bf16 %v748_v12, %v684_v10  ;;  %v1261_v7 = vld [vmem:[%s8093_s26 + $0x1fb8] sm:$0xff]  ;;  %v7443_v12 = vpack.c.bf16 %v1130_v44, %v1066_v53  ;;  %v7519_v53 = vpack.c.bf16 %v1517_v46, %v1453_v60  ;;  %v1516_v44 = vld [vmem:[%s8093_s26 + $0x27b0] sm:$0xff] }
 0x385   : > { %v7433_v23 = vpack.c.bf16 %v875_v14, %v811_v13  ;;  %v1962_v46 = vld [vmem:[%s8093_s26 + $0x35a0] sm:$0xff] }
 0x386   : > { %7350 = vmatpush1.bf16.msk.msra.mxu0 %vm8236_vm3, %v7348_v24  ;;  %v810_v24 = vld [vmem:[%s8093_s26 + $0x11a0] sm:$0xff] }
 0x387   : > { %7416 = vmatpush1.bf16.msk.msra.mxu1 %vm8236_vm3, %v7414_v25  ;;  %7418 = vmatprep.subr.bf16.mxu0 %v7417_v31  ;;  %v874_v25 = vld [vmem:[%s8093_s26 + $0x13a0] sm:$0xff]  ;;  %v812_v31 = vld [vmem:[%s8093_s26 + $0x11b0] sm:$0xff] }
 0x388   : > { %7484 = vmatprep.subr.bf16.mxu1 %v7483_v41  ;;  %v1003_v41 = vld [vmem:[%s8093_s26 + $0x17a8] sm:$0xff]  ;;  %v7435_v47 = vpack.c.bf16 %v874_v25, %v810_v24  ;;  %v7501_v16 = vpack.c.bf16 %v876_v37, %v812_v31  ;;  %v1260_v25 = vld [vmem:[%s8093_s26 + $0x1fb0] sm:$0xff] }
 0x389   : > { %4605 = vmatmul.mubr.f32.vlgmr.msra.gmra.mrb[24].mxu0 %v10160_v61  ;;  %v7437_v48 = vpack.c.bf16 %v1003_v41, %v939_v38  ;;  %v1323_v31 = vld [vmem:[%s8093_s26 + $0x21a8] sm:$0xff]  ;;  %v1325_v38 = vld [vmem:[%s8093_s26 + $0x21b8] sm:$0xff] }
 0x38a   : > { %4676 = vmatmul.mubr.f32.vlgmr.msra.gmra.mrb[24].mxu1 %v10160_v61  ;;  %7420 = vmatpush1.bf16.msra.mxu0 %v7419_v49  ;;  %v938_v49 = vld [vmem:[%s8093_s26 + $0x15a0] sm:$0xff]  ;;  %v1389_v41 = vld [vmem:[%s8093_s26 + $0x23b8] sm:$0xff] }
 0x38b   : > { %7486 = vmatpush1.bf16.msra.mxu1 %v7485_v50  ;;  %7422 = vmatprep.subr.bf16.mxu0 %v7421_v51  ;;  %v1002_v50 = vld [vmem:[%s8093_s26 + $0x17a0] sm:$0xff]  ;;  %v940_v51 = vld [vmem:[%s8093_s26 + $0x15b0] sm:$0xff] }
 0x38c   : > { %7488 = vmatprep.subr.bf16.mxu1 %v7487_v56  ;;  %5672 = vmatprep.mubr.msk.f32.mxu0 %vm2640_vm0, %v8206_v20  ;;  %v1131_v56 = vld [vmem:[%s8093_s26 + $0x1ba8] sm:$0xff] }
 0x38d   : > { %5675 = vmatprep.mubr.msk.f32.mxu1 %vm2640_vm0, %v8206_v20  ;;  %v7441_v28 = vpack.c.bf16 %v1131_v56, %v1067_v55  ;;  %v1451_v55 = vld [vmem:[%s8093_s26 + $0x25a8] sm:$0xff] }
 0x38e   : > { %7424 = vmatpush1.bf16.msra.mxu0 %v7423_v18  ;;  %v7439_v18 = vpack.c.bf16 %v1002_v50, %v938_v49  ;;  %v1322_v49 = vld [vmem:[%s8093_s26 + $0x21a0] sm:$0xff]  ;;  %v1515_v56 = vld [vmem:[%s8093_s26 + $0x27a8] sm:$0xff] }
 0x38f   : > { %7490 = vmatpush1.bf16.msra.mxu1 %v7489_v63  ;;  %7426 = vmatprep.subr.bf16.mxu0 %v7425_v0  ;;  %v2469_v63 = vrot.slane %v10034_v43, %v8936_v30  ;;  %v7505_v0 = vpack.c.bf16 %v1004_v54, %v940_v51  ;;  %v1386_v50 = vld [vmem:[%s8093_s26 + $0x23a0] sm:$0xff]  ;;  %v1324_v51 = vld [vmem:[%s8093_s26 + $0x21b0] sm:$0xff] }
 0x390   : > { %7492 = vmatprep.subr.bf16.mxu1 %v7491_v1  ;;  %v1068_v1 = vld [vmem:[%s8093_s26 + $0x19b0] sm:$0xff] }
 0x391   : > { %v7509_v14 = vpack.c.bf16 %v1132_v2, %v1068_v1  ;;  %v1388_v54 = vld [vmem:[%s8093_s26 + $0x23b0] sm:$0xff]  ;;  %v1579_v1 = vld [vmem:[%s8093_s26 + $0x29a8] sm:$0xff]  ;;  %v1645_v2 = vld [vmem:[%s8093_s26 + $0x2bb8] sm:$0xff] }
 0x392   : > { %7428 = vmatpush1.bf16.msra.mxu0 %v7427_v4 }
 0x393   : > { %7494 = vmatpush1.bf16.msra.mxu1 %v7493_v5  ;;  %7430 = vmatprep.subr.bf16.mxu0 %v7429_v6  ;;  %v1197_v6 = vld [vmem:[%s8093_s26 + $0x1db8] sm:$0xff] }
 0x394   : > { %7496 = vmatprep.subr.bf16.mxu1 %v7495_v11  ;;  %v7511_v24 = vpack.c.bf16 %v1261_v7, %v1197_v6  ;;  %v1580_v6 = vld [vmem:[%s8093_s26 + $0x29b0] sm:$0xff] }
 0x396   : > { %7432 = vmatpush1.bf16.msra.mxu0 %v7431_v19  ;;  %v1258_v19 = vld [vmem:[%s8093_s26 + $0x1fa0] sm:$0xff] }
 0x397   : > { %7498 = vmatpush1.bf16.msra.mxu1 %v7497_v21  ;;  %7434 = vmatprep.subr.bf16.mxu0 %v7433_v23  ;;  %v1196_v21 = vld [vmem:[%s8093_s26 + $0x1db0] sm:$0xff]  ;;  %v7447_v45 = vpack.c.bf16 %v1258_v19, %v1194_v17  ;;  %v1706_v19 = vld [vmem:[%s8093_s26 + $0x2da0] sm:$0xff] }
 0x398   : > { %7500 = vmatprep.subr.bf16.mxu1 %v7499_v32  ;;  %v1387_v32 = vld [vmem:[%s8093_s26 + $0x23a8] sm:$0xff] }
 0x39a   : > { %7436 = vmatpush1.bf16.msra.mxu0 %v7435_v47 }
 0x39b   : > { %7502 = vmatpush1.bf16.msra.mxu1 %v7501_v16  ;;  %7438 = vmatprep.subr.bf16.mxu0 %v7437_v48  ;;  %v7513_v16 = vpack.c.bf16 %v1260_v25, %v1196_v21  ;;  %v7449_v48 = vpack.c.bf16 %v1387_v32, %v1323_v31  ;;  %v1770_v21 = vld [vmem:[%s8093_s26 + $0x2fa0] sm:$0xff]  ;;  %v1772_v25 = vld [vmem:[%s8093_s26 + $0x2fb0] sm:$0xff]  ;;  %v1835_v31 = vld [vmem:[%s8093_s26 + $0x31a8] sm:$0xff] }
 0x39c   : > { %v4180_v36 = vpop.f32.mrb[18].mxu0  ;;  %7504 = vmatprep.subr.bf16.mxu1 %v7503_v52  ;;  %v7515_v52 = vpack.c.bf16 %v1389_v41, %v1325_v38  ;;  %v1899_v32 = vld [vmem:[%s8093_s26 + $0x33a8] sm:$0xff]  ;;  %v1901_v38 = vld [vmem:[%s8093_s26 + $0x33b8] sm:$0xff]  ;;  %v7463_v41 = vpack.c.bf16 %v1770_v21, %v1706_v19  ;;  %v2284_v19 = vld [vmem:[%s8093_s26 + $0x3fb0] sm:$0x3] }
 0x39d   : > { %v4181_v4 = vadd.f32 %v4180_v36, %v2457_v59  ;;  %v4251_v5 = vpop.f32.mrb[18].mxu1  ;;  %v4182_v43 = vpop.f32.mrb[19].mxu0  ;;  %v1643_v36 = vld [vmem:[%s8093_s26 + $0x2ba8] sm:$0xff] }
 0x39e   : > { %v4252_v8 = vadd.f32 %v4251_v5, %v2465_v62  ;;  %v4183_v10 = vadd.f32 %v4182_v43, %v2461_v33  ;;  %v4253_v11 = vpop.f32.mrb[19].mxu1  ;;  %7440 = vmatpush1.bf16.msra.mxu0 %v7439_v18  ;;  %v7451_v62 = vpack.c.bf16 %v1386_v50, %v1322_v49  ;;  %v7517_v33 = vpack.c.bf16 %v1388_v54, %v1324_v51  ;;  %v1578_v5 = vld [vmem:[%s8093_s26 + $0x29a0] sm:$0xff]  ;;  %v1900_v50 = vld [vmem:[%s8093_s26 + $0x33b0] sm:$0xff]  ;;  %v1963_v51 = vld [vmem:[%s8093_s26 + $0x35a8] sm:$0xff] }
 0x39f   : > { %v4254_v13 = vadd.f32 %v4253_v11, %v2469_v63  ;;  %7506 = vmatpush1.bf16.msra.mxu1 %v7505_v0  ;;  %7442 = vmatprep.subr.bf16.mxu0 %v7441_v28  ;;  %v7453_v18 = vpack.c.bf16 %v1515_v56, %v1451_v55  ;;  %v1450_v63 = vld [vmem:[%s8093_s26 + $0x25a0] sm:$0xff]  ;;  %v1452_v28 = vld [vmem:[%s8093_s26 + $0x25b0] sm:$0xff]  ;;  %v1771_v11 = vld [vmem:[%s8093_s26 + $0x2fa8] sm:$0xff] }
 0x3a0   : > { %v5325_v23 = vcombine.low %v4181_v4, %v4183_v10  ;;  %7508 = vmatprep.subr.bf16.mxu1 %v7507_v58  ;;  %v1514_v0 = vld [vmem:[%s8093_s26 + $0x27a0] sm:$0xff]  ;;  %v1581_v58 = vld [vmem:[%s8093_s26 + $0x29b8] sm:$0xff]  ;;  %v7521_v40 = vpack.c.bf16 %v1516_v44, %v1452_v28  ;;  %v7457_v4 = vpack.c.bf16 %v1643_v36, %v1579_v1  ;;  %v1707_v10 = vld [vmem:[%s8093_s26 + $0x2da8] sm:$0xff] }
 0x3a1   : > { %v5326_v37 = vcombine.low %v4252_v8, %v4254_v13  ;;  %v7455_v3 = vpack.c.bf16 %v1514_v0, %v1450_v63  ;;  %v1642_v43 = vld [vmem:[%s8093_s26 + $0x2ba0] sm:$0xff]  ;;  %v7523_v7 = vpack.c.bf16 %v1645_v2, %v1581_v58  ;;  %v1644_v8 = vld [vmem:[%s8093_s26 + $0x2bb0] sm:$0xff]  ;;  %v1773_v13 = vld [vmem:[%s8093_s26 + $0x2fb8] sm:$0xff]  ;;  %v7461_v17 = vpack.c.bf16 %v1771_v11, %v1707_v10 }
 0x3a2   : > { %v5333_v42 = vrot.slane %v5325_v23, %v8787_v9  ;;  %7444 = vmatpush1.bf16.msra.mxu0 %v7443_v12  ;;  %v1709_v12 = vld [vmem:[%s8093_s26 + $0x2db8] sm:$0xff]  ;;  %v1708_v23 = vld [vmem:[%s8093_s26 + $0x2db0] sm:$0xff]  ;;  %v2091_v0 = vld [vmem:[%s8093_s26 + $0x39a8] sm:$0xff] }
 0x3a3   : > { %v5340_v47 = vrot.slane %v5326_v37, %v8787_v9  ;;  %7510 = vmatpush1.bf16.msra.mxu1 %v7509_v14  ;;  %7446 = vmatprep.subr.bf16.mxu0 %v7445_v15  ;;  %v7459_v14 = vpack.c.bf16 %v1642_v43, %v1578_v5  ;;  %v7525_v15 = vpack.c.bf16 %v1644_v8, %v1580_v6  ;;  %v1837_v37 = vld [vmem:[%s8093_s26 + $0x31b8] sm:$0xff]  ;;  %v2028_v63 = vld [vmem:[%s8093_s26 + $0x37b0] sm:$0xff]  ;;  %v2155_v28 = vld [vmem:[%s8093_s26 + $0x3ba8] sm:$0xff] }
 0x3a4   : > { %7512 = vmatprep.subr.bf16.mxu1 %v7511_v24  ;;  %v7527_v24 = vpack.c.bf16 %v1773_v13, %v1709_v12  ;;  %v7531_v49 = vpack.c.bf16 %v1901_v38, %v1837_v37  ;;  %v1965_v54 = vld [vmem:[%s8093_s26 + $0x35b8] sm:$0xff]  ;;  %v7473_v58 = vpack.c.bf16 %v2155_v28, %v2091_v0  ;;  %v2090_v2 = vld [vmem:[%s8093_s26 + $0x39a0] sm:$0xff]  ;;  %v2156_v5 = vld [vmem:[%s8093_s26 + $0x3bb0] sm:$0xff] }
 0x3a5   : > { %v5341_v59 = vcombine.low %v5333_v42, %v5340_v47  ;;  %v7529_v42 = vpack.c.bf16 %v1772_v25, %v1708_v23  ;;  %v1834_v47 = vld [vmem:[%s8093_s26 + $0x31a0] sm:$0xff]  ;;  %v2029_v55 = vld [vmem:[%s8093_s26 + $0x37b8] sm:$0xff]  ;;  %v2219_v43 = vld [vmem:[%s8093_s26 + $0x3da8] sm:$0xff] }
 0x3a6   : > { %7448 = vmatpush1.bf16.msra.mxu0 %v7447_v45  ;;  %v7465_v45 = vpack.c.bf16 %v1899_v32, %v1835_v31  ;;  %v2157_v44 = vld [vmem:[%s8093_s26 + $0x3bb8] sm:$0xff]  ;;  %v2283_v6 = vld [vmem:[%s8093_s26 + $0x3fa8] sm:$0x3]  ;;  %v2218_v13 = vld [vmem:[%s8093_s26 + $0x3da0] sm:$0xff] }
 0x3a7   : > { %5469 = vst [vmem:[%s8808_s6 + $0x48] sm:$0xff] %v5341_v59  ;;  %7514 = vmatpush1.bf16.msra.mxu1 %v7513_v16  ;;  %7450 = vmatprep.subr.bf16.mxu0 %v7449_v48  ;;  %v1898_v16 = vld [vmem:[%s8093_s26 + $0x33a0] sm:$0xff]  ;;  %v1836_v48 = vld [vmem:[%s8093_s26 + $0x31b0] sm:$0xff]  ;;  %v2285_v8 = vld [vmem:[%s8093_s26 + $0x3fb8] sm:$0x3]  ;;  %v7477_v12 = vpack.c.bf16 %v2283_v6, %v2219_v43 }
 0x3a8   : > { %7516 = vmatprep.subr.bf16.mxu1 %v7515_v52  ;;  %v2027_v52 = vld [vmem:[%s8093_s26 + $0x37a8] sm:$0xff]  ;;  %v7467_v56 = vpack.c.bf16 %v1898_v16, %v1834_v47  ;;  %v7533_v59 = vpack.c.bf16 %v1900_v50, %v1836_v48  ;;  %v369_v25 = vld [vmem:[%s8093_s26 + $0x3d8] sm:$0xff]  ;;  %v302_v38 = vld [vmem:[%s8093_s26 + $0x1c0] sm:$0xff] }
 0x3a9   : > { %v7469_v60 = vpack.c.bf16 %v2027_v52, %v1963_v51  ;;  %v303_v21 = vld [vmem:[%s8093_s26 + $0x1c8] sm:$0xff]  ;;  %v368_v47 = vld [vmem:[%s8093_s26 + $0x3d0] sm:$0xff]  ;;  %v497_v50 = vld [vmem:[%s8093_s26 + $0x7d8] sm:$0xff] }
 0x3aa   : > { %7452 = vmatpush1.bf16.msra.mxu0 %v7451_v62  ;;  %v2026_v62 = vld [vmem:[%s8093_s26 + $0x37a0] sm:$0xff]  ;;  %v367_v23 = vld [vmem:[%s8093_s26 + $0x3c8] sm:$0xff] }
 0x3ab   : > { %7518 = vmatpush1.bf16.msra.mxu1 %v7517_v33  ;;  %7454 = vmatprep.subr.bf16.mxu0 %v7453_v18  ;;  %v1964_v33 = vld [vmem:[%s8093_s26 + $0x35b0] sm:$0xff]  ;;  %v7535_v18 = vpack.c.bf16 %v2029_v55, %v1965_v54  ;;  %v7471_v1 = vpack.c.bf16 %v2026_v62, %v1962_v46  ;;  %v7549_v37 = vpack.c.bf16 %v367_v23, %v303_v21  ;;  %v431_v16 = vld [vmem:[%s8093_s26 + $0x5c8] sm:$0xff]  ;;  %v430_v55 = vld [vmem:[%s8093_s26 + $0x5c0] sm:$0xff] }
 0x3ac   : > { %7520 = vmatprep.subr.bf16.mxu1 %v7519_v53  ;;  %v2093_v53 = vld [vmem:[%s8093_s26 + $0x39b8] sm:$0xff]  ;;  %v7537_v36 = vpack.c.bf16 %v2028_v63, %v1964_v33  ;;  %v495_v48 = vld [vmem:[%s8093_s26 + $0x7c8] sm:$0xff]  ;;  %v496_v46 = vld [vmem:[%s8093_s26 + $0x7d0] sm:$0xff] }
 0x3ad   : > { %v7553_v54 = vpack.c.bf16 %v495_v48, %v431_v16  ;;  %v559_v62 = vld [vmem:[%s8093_s26 + $0x9c8] sm:$0xff]  ;;  %v625_v63 = vld [vmem:[%s8093_s26 + $0xbd8] sm:$0xff] }
 0x3ae   : > { %7456 = vmatpush1.bf16.msra.mxu0 %v7455_v3  ;;  %v2154_v3 = vld [vmem:[%s8093_s26 + $0x3ba0] sm:$0xff]  ;;  %v623_v33 = vld [vmem:[%s8093_s26 + $0xbc8] sm:$0xff] }
 0x3af   : > { %7522 = vmatpush1.bf16.msra.mxu1 %v7521_v40  ;;  %7458 = vmatprep.subr.bf16.mxu0 %v7457_v4  ;;  %v2092_v40 = vld [vmem:[%s8093_s26 + $0x39b0] sm:$0xff]  ;;  %v7539_v4 = vpack.c.bf16 %v2157_v44, %v2093_v53  ;;  %v7475_v10 = vpack.c.bf16 %v2154_v3, %v2090_v2  ;;  %v7557_v53 = vpack.c.bf16 %v623_v33, %v559_v62  ;;  %v558_v44 = vld [vmem:[%s8093_s26 + $0x9c0] sm:$0xff]  ;;  %v687_v3 = vld [vmem:[%s8093_s26 + $0xdc8] sm:$0xff] }
 0x3b0   : > { %7524 = vmatprep.subr.bf16.mxu1 %v7523_v7  ;;  %v2221_v7 = vld [vmem:[%s8093_s26 + $0x3db8] sm:$0xff]  ;;  %v7541_v11 = vpack.c.bf16 %v2156_v5, %v2092_v40  ;;  %v624_v2 = vld [vmem:[%s8093_s26 + $0xbd0] sm:$0xff]  ;;  %v751_v40 = vld [vmem:[%s8093_s26 + $0xfc8] sm:$0xff] }
 0x3b1   : > { %v7561_v6 = vpack.c.bf16 %v751_v40, %v687_v3  ;;  %v10348_v16 = vld [vmem:[%s8740_s30 + $0x28] sm:$0xff]  ;;  %v1137_v62 = vld [vmem:[%s8093_s26 + $0x1bd8] sm:$0xff]  ;;  %v1136_v3 = vld [vmem:[%s8093_s26 + $0x1bd0] sm:$0xff] }
 0x3b2   : > { %7460 = vmatpush1.bf16.msra.mxu0 %v7459_v14  ;;  %v2282_v14 = vld [vmem:[%s8093_s26 + $0x3fa0] sm:$0x3]  ;;  %v2481_v33 = vrot.slane %v10348_v16, %v8754_v34  ;;  %v1199_v40 = vld [vmem:[%s8093_s26 + $0x1dc8] sm:$0xff] }
 0x3b3   : > { %7526 = vmatpush1.bf16.msra.mxu1 %v7525_v15  ;;  %7462 = vmatprep.subr.bf16.mxu0 %v7461_v17  ;;  %v2220_v15 = vld [vmem:[%s8093_s26 + $0x3db0] sm:$0xff]  ;;  %v7543_v17 = vpack.c.bf16 %v2285_v8, %v2221_v7  ;;  %v7480_v31 = vpack.c.bf16 %v2282_v14, %v2218_v13  ;;  %v686_v7 = vld [vmem:[%s8093_s26 + $0xdc0] sm:$0xff]  ;;  %v815_v13 = vld [vmem:[%s8093_s26 + $0x11c8] sm:$0xff] }
 0x3b4   : > { %7528 = vmatprep.subr.bf16.mxu1 %v7527_v24  ;;  %v305_v24 = vld [vmem:[%s8093_s26 + $0x1d8] sm:$0xff]  ;;  %v7546_v32 = vpack.c.bf16 %v2284_v19, %v2220_v15  ;;  %v750_v8 = vld [vmem:[%s8093_s26 + $0xfc0] sm:$0xff]  ;;  %v879_v14 = vld [vmem:[%s8093_s26 + $0x13c8] sm:$0xff] }
 0x3b5   : > { %v817_v15 = vld [vmem:[%s8093_s26 + $0x11d8] sm:$0xff]  ;;  %v7563_v19 = vpack.c.bf16 %v750_v8, %v686_v7  ;;  %v7565_v23 = vpack.c.bf16 %v879_v14, %v815_v13 }
 0x3b6   : > { %7464 = vmatpush1.bf16.msra.mxu0 %v7463_v41  ;;  %v366_v41 = vld [vmem:[%s8093_s26 + $0x3c0] sm:$0xff]  ;;  %v1265_v7 = vld [vmem:[%s8093_s26 + $0x1fd8] sm:$0xff] }
 0x3b7   : > { %7530 = vmatpush1.bf16.msra.mxu1 %v7529_v42  ;;  %7466 = vmatprep.subr.bf16.mxu0 %v7465_v45  ;;  %v304_v42 = vld [vmem:[%s8093_s26 + $0x1d0] sm:$0xff]  ;;  %v7615_v45 = vpack.c.bf16 %v369_v25, %v305_v24  ;;  %v7551_v51 = vpack.c.bf16 %v366_v41, %v302_v38  ;;  %v814_v24 = vld [vmem:[%s8093_s26 + $0x11c0] sm:$0xff]  ;;  %v943_v38 = vld [vmem:[%s8093_s26 + $0x15c8] sm:$0xff] }
 0x3b8   : > { %7532 = vmatprep.subr.bf16.mxu1 %v7531_v49  ;;  %v433_v49 = vld [vmem:[%s8093_s26 + $0x5d8] sm:$0xff]  ;;  %v7617_v52 = vpack.c.bf16 %v368_v47, %v304_v42  ;;  %v878_v25 = vld [vmem:[%s8093_s26 + $0x13c0] sm:$0xff]  ;;  %v1007_v41 = vld [vmem:[%s8093_s26 + $0x17c8] sm:$0xff] }
 0x3b9   : > { %v945_v42 = vld [vmem:[%s8093_s26 + $0x15d8] sm:$0xff]  ;;  %v7567_v47 = vpack.c.bf16 %v878_v25, %v814_v24  ;;  %v1264_v25 = vld [vmem:[%s8093_s26 + $0x1fd0] sm:$0xff] }
 0x3ba   : > { %7468 = vmatpush1.bf16.msra.mxu0 %v7467_v56  ;;  %v494_v56 = vld [vmem:[%s8093_s26 + $0x7c0] sm:$0xff] }
 0x3bb   : > { %7534 = vmatpush1.bf16.msra.mxu1 %v7533_v59  ;;  %7470 = vmatprep.subr.bf16.mxu0 %v7469_v60  ;;  %v432_v59 = vld [vmem:[%s8093_s26 + $0x5d0] sm:$0xff]  ;;  %v7619_v60 = vpack.c.bf16 %v497_v50, %v433_v49  ;;  %v7555_v0 = vpack.c.bf16 %v494_v56, %v430_v55  ;;  %v7569_v49 = vpack.c.bf16 %v1007_v41, %v943_v38  ;;  %v942_v50 = vld [vmem:[%s8093_s26 + $0x15c0] sm:$0xff]  ;;  %v1071_v56 = vld [vmem:[%s8093_s26 + $0x19c8] sm:$0xff] }
 0x3bc   : > { %7536 = vmatprep.subr.bf16.mxu1 %v7535_v18  ;;  %v561_v18 = vld [vmem:[%s8093_s26 + $0x9d8] sm:$0xff]  ;;  %v7621_v28 = vpack.c.bf16 %v496_v46, %v432_v59  ;;  %v1008_v55 = vld [vmem:[%s8093_s26 + $0x17d0] sm:$0xff]  ;;  %v1135_v59 = vld [vmem:[%s8093_s26 + $0x1bc8] sm:$0xff] }
 0x3bd   : > { %v1073_v46 = vld [vmem:[%s8093_s26 + $0x19d8] sm:$0xff] }
 0x3be   : > { %7472 = vmatpush1.bf16.msra.mxu0 %v7471_v1  ;;  %v622_v1 = vld [vmem:[%s8093_s26 + $0xbc0] sm:$0xff]  ;;  %v1329_v38 = vld [vmem:[%s8093_s26 + $0x21d8] sm:$0xff] }
 0x3bf   : > { %7538 = vmatpush1.bf16.msra.mxu1 %v7537_v36  ;;  %7474 = vmatprep.subr.bf16.mxu0 %v7473_v58  ;;  %v560_v36 = vld [vmem:[%s8093_s26 + $0x9d0] sm:$0xff]  ;;  %v7623_v58 = vpack.c.bf16 %v625_v63, %v561_v18  ;;  %v7559_v5 = vpack.c.bf16 %v622_v1, %v558_v44  ;;  %v2477_v18 = vrot.slane %v10348_v16, %v8757_v35  ;;  %v1070_v44 = vld [vmem:[%s8093_s26 + $0x19c0] sm:$0xff]  ;;  %v1393_v41 = vld [vmem:[%s8093_s26 + $0x23d8] sm:$0xff] }
 0x3c0   : > { %7540 = vmatprep.subr.bf16.mxu1 %v7539_v4  ;;  %v753_v4 = vld [vmem:[%s8093_s26 + $0xfd8] sm:$0xff]  ;;  %v7625_v43 = vpack.c.bf16 %v624_v2, %v560_v36  ;;  %v1134_v1 = vld [vmem:[%s8093_s26 + $0x1bc0] sm:$0xff]  ;;  %v1072_v36 = vld [vmem:[%s8093_s26 + $0x19d0] sm:$0xff]  ;;  %v7639_v2 = vpack.c.bf16 %v1137_v62, %v1073_v46 }
 0x3c1   : > { %v7641_v14 = vpack.c.bf16 %v1136_v3, %v1072_v36  ;;  %v1457_v46 = vld [vmem:[%s8093_s26 + $0x25d8] sm:$0xff]  ;;  %v1583_v36 = vld [vmem:[%s8093_s26 + $0x29c8] sm:$0xff] }
 0x3c2   : > { %7476 = vmatpush1.bf16.msra.mxu0 %v7475_v10  ;;  %v688_v10 = vld [vmem:[%s8093_s26 + $0xdd0] sm:$0xff]  ;;  %v1521_v62 = vld [vmem:[%s8093_s26 + $0x27d8] sm:$0xff] }
 0x3c3   : > { %7542 = vmatpush1.bf16.msra.mxu1 %v7541_v11  ;;  %7479 = vmatprep.subr.msk.bf16.mxu0 %vm8236_vm3, %v7477_v12  ;;  %v752_v12 = vld [vmem:[%s8093_s26 + $0xfd0] sm:$0xff]  ;;  %v1649_v3 = vld [vmem:[%s8093_s26 + $0x2bd8] sm:$0xff] }
 0x3c4   : > { %7545 = vmatprep.subr.msk.bf16.mxu1 %vm8236_vm3, %v7543_v17  ;;  %v881_v17 = vld [vmem:[%s8093_s26 + $0x13d8] sm:$0xff]  ;;  %v7629_v21 = vpack.c.bf16 %v752_v12, %v688_v10  ;;  %v7575_v12 = vpack.c.bf16 %v1134_v1, %v1070_v44  ;;  %v7651_v44 = vpack.c.bf16 %v1521_v62, %v1457_v46  ;;  %v1520_v1 = vld [vmem:[%s8093_s26 + $0x27d0] sm:$0xff]  ;;  %v1966_v62 = vld [vmem:[%s8093_s26 + $0x35c0] sm:$0xff] }
 0x3c6   : > { %7482 = vmatpush1.bf16.msk.msra.mxu0 %vm8236_vm3, %v7480_v31  ;;  %v816_v31 = vld [vmem:[%s8093_s26 + $0x11d0] sm:$0xff] }
 0x3c7   : > { %7548 = vmatpush1.bf16.msk.msra.mxu1 %vm8236_vm3, %v7546_v32  ;;  %7550 = vmatprep.subr.bf16.mxu0 %v7549_v37  ;;  %v7631_v32 = vpack.c.bf16 %v881_v17, %v817_v15  ;;  %v880_v37 = vld [vmem:[%s8093_s26 + $0x13d0] sm:$0xff]  ;;  %v1198_v17 = vld [vmem:[%s8093_s26 + $0x1dc0] sm:$0xff] }
 0x3c8   : > { %7616 = vmatprep.subr.bf16.mxu1 %v7615_v45  ;;  %v1009_v45 = vld [vmem:[%s8093_s26 + $0x17d8] sm:$0xff]  ;;  %v7633_v48 = vpack.c.bf16 %v880_v37, %v816_v31  ;;  %v1327_v31 = vld [vmem:[%s8093_s26 + $0x21c8] sm:$0xff] }
 0x3c9   : > { %4747 = vmatmul.mubr.f32.vlgmr.msra.gmra.mrb[26].mxu0 %v10160_v61 }
 0x3ca   : > { %4818 = vmatmul.mubr.f32.vlgmr.msra.gmra.mrb[26].mxu1 %v10160_v61  ;;  %7552 = vmatpush1.bf16.msra.mxu0 %v7551_v51  ;;  %v689_v61 = vld [vmem:[%s8093_s26 + $0xdd8] sm:$0xff]  ;;  %v1006_v51 = vld [vmem:[%s8093_s26 + $0x17c0] sm:$0xff] }
 0x3cb   : > { %7618 = vmatpush1.bf16.msra.mxu1 %v7617_v52  ;;  %7554 = vmatprep.subr.bf16.mxu0 %v7553_v54  ;;  %v7627_v11 = vpack.c.bf16 %v753_v4, %v689_v61  ;;  %v944_v52 = vld [vmem:[%s8093_s26 + $0x15d0] sm:$0xff]  ;;  %v7635_v54 = vpack.c.bf16 %v1009_v45, %v945_v42  ;;  %v7571_v63 = vpack.c.bf16 %v1006_v51, %v942_v50  ;;  %v1263_v61 = vld [vmem:[%s8093_s26 + $0x1fc8] sm:$0xff]  ;;  %v1326_v50 = vld [vmem:[%s8093_s26 + $0x21c0] sm:$0xff] }
 0x3cc   : > { %7620 = vmatprep.subr.bf16.mxu1 %v7619_v60  ;;  %5678 = vmatprep.mubr.msk.f32.mxu0 %vm2640_vm0, %v8206_v20  ;;  %v2473_v60 = vrot.slane %v10348_v16, %v8746_v29  ;;  %v7577_v15 = vpack.c.bf16 %v1263_v61, %v1199_v40  ;;  %v1390_v51 = vld [vmem:[%s8093_s26 + $0x23c0] sm:$0xff] }
 0x3cd   : > { %5681 = vmatprep.mubr.msk.f32.mxu1 %vm2640_vm0, %v8206_v20 }
 0x3ce   : > { %7556 = vmatpush1.bf16.msra.mxu0 %v7555_v0  ;;  %v2485_v0 = vrot.slane %v10348_v16, %v8760_v39 }
 0x3cf   : > { %7622 = vmatpush1.bf16.msra.mxu1 %v7621_v28  ;;  %7558 = vmatprep.subr.bf16.mxu0 %v7557_v53  ;;  %v7637_v28 = vpack.c.bf16 %v1008_v55, %v944_v52  ;;  %v7573_v53 = vpack.c.bf16 %v1135_v59, %v1071_v56  ;;  %v1328_v52 = vld [vmem:[%s8093_s26 + $0x21d0] sm:$0xff]  ;;  %v1455_v56 = vld [vmem:[%s8093_s26 + $0x25c8] sm:$0xff] }
 0x3d0   : > { %7624 = vmatprep.subr.bf16.mxu1 %v7623_v58  ;;  %v1392_v55 = vld [vmem:[%s8093_s26 + $0x23d0] sm:$0xff]  ;;  %v1519_v59 = vld [vmem:[%s8093_s26 + $0x27c8] sm:$0xff] }
 0x3d2   : > { %7560 = vmatpush1.bf16.msra.mxu0 %v7559_v5 }
 0x3d3   : > { %7626 = vmatpush1.bf16.msra.mxu1 %v7625_v43  ;;  %7562 = vmatprep.subr.bf16.mxu0 %v7561_v6  ;;  %v1201_v6 = vld [vmem:[%s8093_s26 + $0x1dd8] sm:$0xff] }
 0x3d4   : > { %7628 = vmatprep.subr.bf16.mxu1 %v7627_v11  ;;  %v7643_v24 = vpack.c.bf16 %v1265_v7, %v1201_v6  ;;  %v1584_v6 = vld [vmem:[%s8093_s26 + $0x29d0] sm:$0xff] }
 0x3d6   : > { %7564 = vmatpush1.bf16.msra.mxu0 %v7563_v19  ;;  %v1262_v19 = vld [vmem:[%s8093_s26 + $0x1fc0] sm:$0xff] }
 0x3d7   : > { %7630 = vmatpush1.bf16.msra.mxu1 %v7629_v21  ;;  %7566 = vmatprep.subr.bf16.mxu0 %v7565_v23  ;;  %v1200_v21 = vld [vmem:[%s8093_s26 + $0x1dd0] sm:$0xff]  ;;  %v7579_v45 = vpack.c.bf16 %v1262_v19, %v1198_v17  ;;  %v1710_v19 = vld [vmem:[%s8093_s26 + $0x2dc0] sm:$0xff] }
 0x3d8   : > { %7632 = vmatprep.subr.bf16.mxu1 %v7631_v32  ;;  %v1391_v32 = vld [vmem:[%s8093_s26 + $0x23c8] sm:$0xff] }
 0x3da   : > { %7568 = vmatpush1.bf16.msra.mxu0 %v7567_v47 }
 0x3db   : > { %7634 = vmatpush1.bf16.msra.mxu1 %v7633_v48  ;;  %7570 = vmatprep.subr.bf16.mxu0 %v7569_v49  ;;  %v7645_v48 = vpack.c.bf16 %v1264_v25, %v1200_v21  ;;  %v7581_v49 = vpack.c.bf16 %v1391_v32, %v1327_v31  ;;  %v1774_v21 = vld [vmem:[%s8093_s26 + $0x2fc0] sm:$0xff]  ;;  %v1776_v25 = vld [vmem:[%s8093_s26 + $0x2fd0] sm:$0xff]  ;;  %v1839_v31 = vld [vmem:[%s8093_s26 + $0x31c8] sm:$0xff] }
 0x3dc   : > { %v4322_v58 = vpop.f32.mrb[20].mxu0  ;;  %7636 = vmatprep.subr.bf16.mxu1 %v7635_v54  ;;  %v7647_v54 = vpack.c.bf16 %v1393_v41, %v1329_v38  ;;  %v1903_v32 = vld [vmem:[%s8093_s26 + $0x33c8] sm:$0xff]  ;;  %v1905_v38 = vld [vmem:[%s8093_s26 + $0x33d8] sm:$0xff]  ;;  %v7595_v41 = vpack.c.bf16 %v1774_v21, %v1710_v19  ;;  %v2288_v19 = vld [vmem:[%s8093_s26 + $0x3fd0] sm:$0x3] }
 0x3dd   : > { %v4323_v4 = vadd.f32 %v4322_v58, %v2473_v60  ;;  %v4393_v5 = vpop.f32.mrb[20].mxu1  ;;  %v4324_v43 = vpop.f32.mrb[21].mxu0  ;;  %v1647_v58 = vld [vmem:[%s8093_s26 + $0x2bc8] sm:$0xff] }
 0x3de   : > { %v4394_v8 = vadd.f32 %v4393_v5, %v2481_v33  ;;  %v4325_v10 = vadd.f32 %v4324_v43, %v2477_v18  ;;  %v4395_v11 = vpop.f32.mrb[21].mxu1  ;;  %7572 = vmatpush1.bf16.msra.mxu0 %v7571_v63  ;;  %v7583_v33 = vpack.c.bf16 %v1390_v51, %v1326_v50  ;;  %v7649_v18 = vpack.c.bf16 %v1392_v55, %v1328_v52  ;;  %v1582_v5 = vld [vmem:[%s8093_s26 + $0x29c0] sm:$0xff]  ;;  %v1904_v51 = vld [vmem:[%s8093_s26 + $0x33d0] sm:$0xff]  ;;  %v1967_v52 = vld [vmem:[%s8093_s26 + $0x35c8] sm:$0xff] }
 0x3df   : > { %v4396_v13 = vadd.f32 %v4395_v11, %v2485_v0  ;;  %7638 = vmatpush1.bf16.msra.mxu1 %v7637_v28  ;;  %7574 = vmatprep.subr.bf16.mxu0 %v7573_v53  ;;  %v7585_v63 = vpack.c.bf16 %v1519_v59, %v1455_v56  ;;  %v1454_v0 = vld [vmem:[%s8093_s26 + $0x25c0] sm:$0xff]  ;;  %v1456_v53 = vld [vmem:[%s8093_s26 + $0x25d0] sm:$0xff]  ;;  %v1775_v11 = vld [vmem:[%s8093_s26 + $0x2fc8] sm:$0xff] }
 0x3e0   : > { %v5342_v23 = vcombine.low %v4323_v4, %v4325_v10  ;;  %7640 = vmatprep.subr.bf16.mxu1 %v7639_v2  ;;  %v1518_v28 = vld [vmem:[%s8093_s26 + $0x27c0] sm:$0xff]  ;;  %v1585_v2 = vld [vmem:[%s8093_s26 + $0x29d8] sm:$0xff]  ;;  %v7653_v61 = vpack.c.bf16 %v1520_v1, %v1456_v53  ;;  %v7589_v4 = vpack.c.bf16 %v1647_v58, %v1583_v36  ;;  %v1711_v10 = vld [vmem:[%s8093_s26 + $0x2dc8] sm:$0xff] }
 0x3e1   : > { %v5343_v37 = vcombine.low %v4394_v8, %v4396_v13  ;;  %v7587_v40 = vpack.c.bf16 %v1518_v28, %v1454_v0  ;;  %v1646_v43 = vld [vmem:[%s8093_s26 + $0x2bc0] sm:$0xff]  ;;  %v7655_v7 = vpack.c.bf16 %v1649_v3, %v1585_v2  ;;  %v1648_v8 = vld [vmem:[%s8093_s26 + $0x2bd0] sm:$0xff]  ;;  %v1777_v13 = vld [vmem:[%s8093_s26 + $0x2fd8] sm:$0xff]  ;;  %v7593_v17 = vpack.c.bf16 %v1775_v11, %v1711_v10 }
 0x3e2   : > { %v5350_v42 = vrot.slane %v5342_v23, %v8787_v9  ;;  %7576 = vmatpush1.bf16.msra.mxu0 %v7575_v12  ;;  %v1713_v12 = vld [vmem:[%s8093_s26 + $0x2dd8] sm:$0xff]  ;;  %v1712_v23 = vld [vmem:[%s8093_s26 + $0x2dd0] sm:$0xff]  ;;  %v2095_v28 = vld [vmem:[%s8093_s26 + $0x39c8] sm:$0xff] }
 0x3e3   : > { %v5357_v47 = vrot.slane %v5343_v37, %v8787_v9  ;;  %7642 = vmatpush1.bf16.msra.mxu1 %v7641_v14  ;;  %7578 = vmatprep.subr.bf16.mxu0 %v7577_v15  ;;  %v7591_v14 = vpack.c.bf16 %v1646_v43, %v1582_v5  ;;  %v7657_v15 = vpack.c.bf16 %v1648_v8, %v1584_v6  ;;  %v1841_v37 = vld [vmem:[%s8093_s26 + $0x31d8] sm:$0xff]  ;;  %v2032_v0 = vld [vmem:[%s8093_s26 + $0x37d0] sm:$0xff]  ;;  %v2159_v53 = vld [vmem:[%s8093_s26 + $0x3bc8] sm:$0xff] }
 0x3e4   : > { %7644 = vmatprep.subr.bf16.mxu1 %v7643_v24  ;;  %v7659_v24 = vpack.c.bf16 %v1777_v13, %v1713_v12  ;;  %v7663_v50 = vpack.c.bf16 %v1905_v38, %v1841_v37  ;;  %v1969_v55 = vld [vmem:[%s8093_s26 + $0x35d8] sm:$0xff]  ;;  %v7605_v2 = vpack.c.bf16 %v2159_v53, %v2095_v28  ;;  %v2094_v3 = vld [vmem:[%s8093_s26 + $0x39c0] sm:$0xff]  ;;  %v2160_v5 = vld [vmem:[%s8093_s26 + $0x3bd0] sm:$0xff] }
 0x3e5   : > { %v5358_v60 = vcombine.low %v5350_v42, %v5357_v47  ;;  %v7661_v42 = vpack.c.bf16 %v1776_v25, %v1712_v23  ;;  %v1838_v47 = vld [vmem:[%s8093_s26 + $0x31c0] sm:$0xff]  ;;  %v2033_v56 = vld [vmem:[%s8093_s26 + $0x37d8] sm:$0xff]  ;;  %v2223_v43 = vld [vmem:[%s8093_s26 + $0x3dc8] sm:$0xff] }
 0x3e6   : > { %7580 = vmatpush1.bf16.msra.mxu0 %v7579_v45  ;;  %v7597_v45 = vpack.c.bf16 %v1903_v32, %v1839_v31  ;;  %v2161_v1 = vld [vmem:[%s8093_s26 + $0x3bd8] sm:$0xff]  ;;  %v2287_v6 = vld [vmem:[%s8093_s26 + $0x3fc8] sm:$0x3]  ;;  %v2222_v13 = vld [vmem:[%s8093_s26 + $0x3dc0] sm:$0xff] }
 0x3e7   : > { %5470 = vst [vmem:[%s8808_s6 + $0x50] sm:$0xff] %v5358_v60  ;;  %7646 = vmatpush1.bf16.msra.mxu1 %v7645_v48  ;;  %7582 = vmatprep.subr.bf16.mxu0 %v7581_v49  ;;  %v1902_v48 = vld [vmem:[%s8093_s26 + $0x33c0] sm:$0xff]  ;;  %v1840_v49 = vld [vmem:[%s8093_s26 + $0x31d0] sm:$0xff]  ;;  %v2289_v8 = vld [vmem:[%s8093_s26 + $0x3fd8] sm:$0x3]  ;;  %v7609_v12 = vpack.c.bf16 %v2287_v6, %v2223_v43 }
 0x3e8   : > { %7648 = vmatprep.subr.bf16.mxu1 %v7647_v54  ;;  %v2031_v54 = vld [vmem:[%s8093_s26 + $0x37c8] sm:$0xff]  ;;  %v7599_v59 = vpack.c.bf16 %v1902_v48, %v1838_v47  ;;  %v7665_v60 = vpack.c.bf16 %v1904_v51, %v1840_v49  ;;  %v373_v25 = vld [vmem:[%s8093_s26 + $0x3f8] sm:$0xff]  ;;  %v306_v38 = vld [vmem:[%s8093_s26 + $0x1e0] sm:$0xff] }
 0x3e9   : > { %v7601_v46 = vpack.c.bf16 %v2031_v54, %v1967_v52  ;;  %v307_v21 = vld [vmem:[%s8093_s26 + $0x1e8] sm:$0xff]  ;;  %v372_v47 = vld [vmem:[%s8093_s26 + $0x3f0] sm:$0xff]  ;;  %v501_v51 = vld [vmem:[%s8093_s26 + $0x7f8] sm:$0xff] }
 0x3ea   : > { %7584 = vmatpush1.bf16.msra.mxu0 %v7583_v33  ;;  %v2030_v33 = vld [vmem:[%s8093_s26 + $0x37c0] sm:$0xff]  ;;  %v371_v23 = vld [vmem:[%s8093_s26 + $0x3e8] sm:$0xff]  ;;  %v629_v28 = vld [vmem:[%s8093_s26 + $0xbf8] sm:$0xff] }
 0x3eb   : > { %7650 = vmatpush1.bf16.msra.mxu1 %v7649_v18  ;;  %7586 = vmatprep.subr.bf16.mxu0 %v7585_v63  ;;  %v1968_v18 = vld [vmem:[%s8093_s26 + $0x35d0] sm:$0xff]  ;;  %v7667_v63 = vpack.c.bf16 %v2033_v56, %v1969_v55  ;;  %v7603_v36 = vpack.c.bf16 %v2030_v33, %v1966_v62  ;;  %v7681_v37 = vpack.c.bf16 %v371_v23, %v307_v21  ;;  %v435_v48 = vld [vmem:[%s8093_s26 + $0x5e8] sm:$0xff]  ;;  %v434_v56 = vld [vmem:[%s8093_s26 + $0x5e0] sm:$0xff] }
 0x3ec   : > { %7652 = vmatprep.subr.bf16.mxu1 %v7651_v44  ;;  %v2097_v44 = vld [vmem:[%s8093_s26 + $0x39d8] sm:$0xff]  ;;  %v7669_v58 = vpack.c.bf16 %v2032_v0, %v1968_v18  ;;  %v499_v49 = vld [vmem:[%s8093_s26 + $0x7e8] sm:$0xff]  ;;  %v500_v62 = vld [vmem:[%s8093_s26 + $0x7f0] sm:$0xff] }
 0x3ed   : > { %v7685_v55 = vpack.c.bf16 %v499_v49, %v435_v48  ;;  %v563_v33 = vld [vmem:[%s8093_s26 + $0x9e8] sm:$0xff]  ;;  %v565_v0 = vld [vmem:[%s8093_s26 + $0x9f8] sm:$0xff] }
 0x3ee   : > { %7588 = vmatpush1.bf16.msra.mxu0 %v7587_v40  ;;  %v2158_v40 = vld [vmem:[%s8093_s26 + $0x3bc0] sm:$0xff]  ;;  %v627_v18 = vld [vmem:[%s8093_s26 + $0xbe8] sm:$0xff]  ;;  %v757_v43 = vld [vmem:[%s8093_s26 + $0xff8] sm:$0xff] }
 0x3ef   : > { %7654 = vmatpush1.bf16.msra.mxu1 %v7653_v61  ;;  %7590 = vmatprep.subr.bf16.mxu0 %v7589_v4  ;;  %v2096_v61 = vld [vmem:[%s8093_s26 + $0x39d0] sm:$0xff]  ;;  %v7671_v4 = vpack.c.bf16 %v2161_v1, %v2097_v44  ;;  %v7607_v10 = vpack.c.bf16 %v2158_v40, %v2094_v3  ;;  %v7689_v1 = vpack.c.bf16 %v627_v18, %v563_v33  ;;  %v1141_v33 = vld [vmem:[%s8093_s26 + $0x1bf8] sm:$0xff] }
 0x3f0   : > { %7656 = vmatprep.subr.bf16.mxu1 %v7655_v7  ;;  %v2225_v7 = vld [vmem:[%s8093_s26 + $0x3dd8] sm:$0xff]  ;;  %v7673_v11 = vpack.c.bf16 %v2160_v5, %v2096_v61  ;;  %v7755_v3 = vpack.c.bf16 %v629_v28, %v565_v0  ;;  %v628_v40 = vld [vmem:[%s8093_s26 + $0xbf0] sm:$0xff]  ;;  %v691_v61 = vld [vmem:[%s8093_s26 + $0xde8] sm:$0xff]  ;;  %v2497_v18 = vrot.slane %v10348_v16, %v8930_v26  ;;  %v2493_v0 = vrot.slane %v10348_v16, %v8933_v27 }
 0x3f1   : > { %v693_v5 = vld [vmem:[%s8093_s26 + $0xdf8] sm:$0xff] }
 0x3f2   : > { %7592 = vmatpush1.bf16.msra.mxu0 %v7591_v14  ;;  %v2286_v14 = vld [vmem:[%s8093_s26 + $0x3fc0] sm:$0x3] }
 0x3f3   : > { %7658 = vmatpush1.bf16.msra.mxu1 %v7657_v15  ;;  %7594 = vmatprep.subr.bf16.mxu0 %v7593_v17  ;;  %v2224_v15 = vld [vmem:[%s8093_s26 + $0x3dd0] sm:$0xff]  ;;  %v7675_v17 = vpack.c.bf16 %v2289_v8, %v2225_v7  ;;  %v7612_v31 = vpack.c.bf16 %v2286_v14, %v2222_v13  ;;  %v7759_v13 = vpack.c.bf16 %v757_v43, %v693_v5  ;;  %v1267_v5 = vld [vmem:[%s8093_s26 + $0x1fe8] sm:$0xff] }
 0x3f4   : > { %7660 = vmatprep.subr.bf16.mxu1 %v7659_v24  ;;  %v309_v24 = vld [vmem:[%s8093_s26 + $0x1f8] sm:$0xff]  ;;  %v7678_v32 = vpack.c.bf16 %v2288_v19, %v2224_v15  ;;  %v756_v14 = vld [vmem:[%s8093_s26 + $0xff0] sm:$0xff]  ;;  %v819_v15 = vld [vmem:[%s8093_s26 + $0x11e8] sm:$0xff] }
 0x3f5   : > { %v885_v19 = vld [vmem:[%s8093_s26 + $0x13f8] sm:$0xff] }
 0x3f6   : > { %7596 = vmatpush1.bf16.msra.mxu0 %v7595_v41  ;;  %v370_v41 = vld [vmem:[%s8093_s26 + $0x3e0] sm:$0xff] }
 0x3f7   : > { %7662 = vmatpush1.bf16.msra.mxu1 %v7661_v42  ;;  %7598 = vmatprep.subr.bf16.mxu0 %v7597_v45  ;;  %v308_v42 = vld [vmem:[%s8093_s26 + $0x1f0] sm:$0xff]  ;;  %v7747_v45 = vpack.c.bf16 %v373_v25, %v309_v24  ;;  %v7683_v52 = vpack.c.bf16 %v370_v41, %v306_v38  ;;  %v818_v25 = vld [vmem:[%s8093_s26 + $0x11e0] sm:$0xff]  ;;  %v947_v41 = vld [vmem:[%s8093_s26 + $0x15e8] sm:$0xff] }
 0x3f8   : > { %7664 = vmatprep.subr.bf16.mxu1 %v7663_v50  ;;  %v437_v50 = vld [vmem:[%s8093_s26 + $0x5f8] sm:$0xff]  ;;  %v7749_v54 = vpack.c.bf16 %v372_v47, %v308_v42  ;;  %v884_v38 = vld [vmem:[%s8093_s26 + $0x13f0] sm:$0xff]  ;;  %v1011_v42 = vld [vmem:[%s8093_s26 + $0x17e8] sm:$0xff] }
 0x3f9   : > { %v1013_v47 = vld [vmem:[%s8093_s26 + $0x17f8] sm:$0xff] }
 0x3fa   : > { %7600 = vmatpush1.bf16.msra.mxu0 %v7599_v59  ;;  %v498_v59 = vld [vmem:[%s8093_s26 + $0x7e0] sm:$0xff] }
 0x3fb   : > { %7666 = vmatpush1.bf16.msra.mxu1 %v7665_v60  ;;  %7602 = vmatprep.subr.bf16.mxu0 %v7601_v46  ;;  %v436_v60 = vld [vmem:[%s8093_s26 + $0x5f0] sm:$0xff]  ;;  %v7751_v46 = vpack.c.bf16 %v501_v51, %v437_v50  ;;  %v7687_v53 = vpack.c.bf16 %v498_v59, %v434_v56  ;;  %v7701_v50 = vpack.c.bf16 %v1011_v42, %v947_v41  ;;  %v946_v51 = vld [vmem:[%s8093_s26 + $0x15e0] sm:$0xff]  ;;  %v1075_v59 = vld [vmem:[%s8093_s26 + $0x19e8] sm:$0xff] }
 0x3fc   : > { %7668 = vmatprep.subr.bf16.mxu1 %v7667_v63  ;;  %v10474_v63 = vld.sshfl [vmem:[%s10699_s0] sm:$0x33 pattern:$0x76325410]  ;;  %v7753_v44 = vpack.c.bf16 %v500_v62, %v436_v60  ;;  %v1012_v56 = vld [vmem:[%s8093_s26 + $0x17f0] sm:$0xff]  ;;  %v1139_v60 = vld [vmem:[%s8093_s26 + $0x1be8] sm:$0xff] }
 0x3fd   : > { %v1077_v62 = vld [vmem:[%s8093_s26 + $0x19f8] sm:$0xff] }
 0x3fe   : > { %7604 = vmatpush1.bf16.msra.mxu0 %v7603_v36  ;;  %v562_v36 = vld [vmem:[%s8093_s26 + $0x9e0] sm:$0xff]  ;;  %v1397_v41 = vld [vmem:[%s8093_s26 + $0x23f8] sm:$0xff] }
 0x3ff   : > { %7670 = vmatpush1.bf16.msra.mxu1 %v7669_v58  ;;  %7606 = vmatprep.subr.bf16.mxu0 %v7605_v2  ;;  %v626_v58 = vld [vmem:[%s8093_s26 + $0xbe0] sm:$0xff]  ;;  %v564_v2 = vld [vmem:[%s8093_s26 + $0x9f0] sm:$0xff] }
 0x400   : > { %7672 = vmatprep.subr.bf16.mxu1 %v7671_v4  ;;  %v755_v4 = vld [vmem:[%s8093_s26 + $0xfe8] sm:$0xff]  ;;  %v7691_v6 = vpack.c.bf16 %v626_v58, %v562_v36  ;;  %v7757_v7 = vpack.c.bf16 %v628_v40, %v564_v2  ;;  %v1074_v36 = vld [vmem:[%s8093_s26 + $0x19e0] sm:$0xff]  ;;  %v1076_v2 = vld [vmem:[%s8093_s26 + $0x19f0] sm:$0xff]  ;;  %v7771_v40 = vpack.c.bf16 %v1141_v33, %v1077_v62 }
 0x401   : > { %v7693_v8 = vpack.c.bf16 %v755_v4, %v691_v61  ;;  %v1138_v58 = vld [vmem:[%s8093_s26 + $0x1be0] sm:$0xff]  ;;  %v1140_v61 = vld [vmem:[%s8093_s26 + $0x1bf0] sm:$0xff]  ;;  %v1203_v4 = vld [vmem:[%s8093_s26 + $0x1de8] sm:$0xff] }
 0x402   : > { %7608 = vmatpush1.bf16.msra.mxu0 %v7607_v10  ;;  %v690_v10 = vld [vmem:[%s8093_s26 + $0xde0] sm:$0xff]  ;;  %v1525_v62 = vld [vmem:[%s8093_s26 + $0x27f8] sm:$0xff] }
 0x403   : > { %7674 = vmatpush1.bf16.msra.mxu1 %v7673_v11  ;;  %7611 = vmatprep.subr.msk.bf16.mxu0 %vm8236_vm3, %v7609_v12  ;;  %v754_v11 = vld [vmem:[%s8093_s26 + $0xfe0] sm:$0xff]  ;;  %v692_v12 = vld [vmem:[%s8093_s26 + $0xdf0] sm:$0xff] }
 0x404   : > { %7677 = vmatprep.subr.msk.bf16.mxu1 %vm8236_vm3, %v7675_v17  ;;  %v821_v17 = vld [vmem:[%s8093_s26 + $0x11f8] sm:$0xff]  ;;  %v7695_v21 = vpack.c.bf16 %v754_v11, %v690_v10  ;;  %v7761_v23 = vpack.c.bf16 %v756_v14, %v692_v12 }
 0x406   : > { %7614 = vmatpush1.bf16.msk.msra.mxu0 %vm8236_vm3, %v7612_v31  ;;  %v882_v31 = vld [vmem:[%s8093_s26 + $0x13e0] sm:$0xff] }
 0x407   : > { %7680 = vmatpush1.bf16.msk.msra.mxu1 %vm8236_vm3, %v7678_v32  ;;  %7682 = vmatprep.subr.bf16.mxu0 %v7681_v37  ;;  %v820_v32 = vld [vmem:[%s8093_s26 + $0x11f0] sm:$0xff]  ;;  %v7763_v37 = vpack.c.bf16 %v885_v19, %v821_v17  ;;  %v7699_v48 = vpack.c.bf16 %v882_v31, %v818_v25  ;;  %v1202_v17 = vld [vmem:[%s8093_s26 + $0x1de0] sm:$0xff]  ;;  %v1331_v31 = vld [vmem:[%s8093_s26 + $0x21e8] sm:$0xff] }
 0x408   : > { %7748 = vmatprep.subr.bf16.mxu1 %v7747_v45  ;;  %v949_v45 = vld [vmem:[%s8093_s26 + $0x15f8] sm:$0xff]  ;;  %v7765_v49 = vpack.c.bf16 %v884_v38, %v820_v32  ;;  %v1266_v19 = vld [vmem:[%s8093_s26 + $0x1fe0] sm:$0xff]  ;;  %v1268_v25 = vld [vmem:[%s8093_s26 + $0x1ff0] sm:$0xff] }
 0x409   : > { %4889 = vmatmul.mubr.f32.vlgmr.msra.gmra.mrb[28].mxu0 %v10474_v63  ;;  %v1395_v32 = vld [vmem:[%s8093_s26 + $0x23e8] sm:$0xff]  ;;  %v1333_v38 = vld [vmem:[%s8093_s26 + $0x21f8] sm:$0xff] }
 0x40a   : > { %4960 = vmatmul.mubr.f32.vlgmr.msra.gmra.mrb[28].mxu1 %v10474_v63  ;;  %7684 = vmatpush1.bf16.msra.mxu0 %v7683_v52  ;;  %v1010_v52 = vld [vmem:[%s8093_s26 + $0x17e0] sm:$0xff] }
 0x40b   : > { %7750 = vmatpush1.bf16.msra.mxu1 %v7749_v54  ;;  %7686 = vmatprep.subr.bf16.mxu0 %v7685_v55  ;;  %v948_v54 = vld [vmem:[%s8093_s26 + $0x15f0] sm:$0xff]  ;;  %v7767_v55 = vpack.c.bf16 %v1013_v47, %v949_v45  ;;  %v7703_v28 = vpack.c.bf16 %v1010_v52, %v946_v51  ;;  %v7711_v45 = vpack.c.bf16 %v1266_v19, %v1202_v17  ;;  %v1394_v51 = vld [vmem:[%s8093_s26 + $0x23e0] sm:$0xff] }
 0x40c   : > { %7752 = vmatprep.subr.bf16.mxu1 %v7751_v46  ;;  %5684 = vmatprep.mubr.msk.f32.mxu0 %vm2640_vm0, %v8206_v20  ;;  %v2489_v46 = vrot.slane %v10348_v16, %v8925_v22  ;;  %v1332_v52 = vld [vmem:[%s8093_s26 + $0x21f0] sm:$0xff]  ;;  %v1714_v17 = vld [vmem:[%s8093_s26 + $0x2de0] sm:$0xff] }
 0x40d   : > { %5687 = vmatprep.mubr.msk.f32.mxu1 %vm2640_vm0, %v8206_v20  ;;  %v883_v20 = vld [vmem:[%s8093_s26 + $0x13e8] sm:$0xff]  ;;  %v1778_v19 = vld [vmem:[%s8093_s26 + $0x2fe0] sm:$0xff] }
 0x40e   : > { %7688 = vmatpush1.bf16.msra.mxu0 %v7687_v53  ;;  %v7697_v24 = vpack.c.bf16 %v883_v20, %v819_v15  ;;  %v2501_v53 = vrot.slane %v10348_v16, %v8936_v30  ;;  %v7773_v15 = vpack.c.bf16 %v1140_v61, %v1076_v2  ;;  %v7709_v20 = vpack.c.bf16 %v1267_v5, %v1203_v4  ;;  %v1651_v2 = vld [vmem:[%s8093_s26 + $0x2be8] sm:$0xff] }
 0x40f   : > { %7754 = vmatpush1.bf16.msra.mxu1 %v7753_v44  ;;  %7690 = vmatprep.subr.bf16.mxu0 %v7689_v1  ;;  %v7769_v44 = vpack.c.bf16 %v1012_v56, %v948_v54  ;;  %v7705_v1 = vpack.c.bf16 %v1139_v60, %v1075_v59  ;;  %v7779_v54 = vpack.c.bf16 %v1397_v41, %v1333_v38  ;;  %v1459_v56 = vld [vmem:[%s8093_s26 + $0x25e8] sm:$0xff] }
 0x410   : > { %7756 = vmatprep.subr.bf16.mxu1 %v7755_v3  ;;  %v1523_v59 = vld [vmem:[%s8093_s26 + $0x27e8] sm:$0xff]  ;;  %v7727_v38 = vpack.c.bf16 %v1778_v19, %v1714_v17 }
 0x412   : > { %7692 = vmatpush1.bf16.msra.mxu0 %v7691_v6 }
 0x413   : > { %7758 = vmatpush1.bf16.msra.mxu1 %v7757_v7  ;;  %7694 = vmatprep.subr.bf16.mxu0 %v7693_v8  ;;  %v1205_v7 = vld [vmem:[%s8093_s26 + $0x1df8] sm:$0xff] }
 0x414   : > { %7760 = vmatprep.subr.bf16.mxu1 %v7759_v13  ;;  %v1269_v8 = vld [vmem:[%s8093_s26 + $0x1ff8] sm:$0xff]  ;;  %v7707_v13 = vpack.c.bf16 %v1138_v58, %v1074_v36  ;;  %v1524_v36 = vld [vmem:[%s8093_s26 + $0x27f0] sm:$0xff]  ;;  %v1587_v58 = vld [vmem:[%s8093_s26 + $0x29e8] sm:$0xff] }
 0x415   : > { %v7721_v5 = vpack.c.bf16 %v1651_v2, %v1587_v58 }
 0x416   : > { %7696 = vmatpush1.bf16.msra.mxu0 %v7695_v21  ;;  %v1204_v21 = vld [vmem:[%s8093_s26 + $0x1df0] sm:$0xff] }
 0x417   : > { %7762 = vmatpush1.bf16.msra.mxu1 %v7761_v23  ;;  %7698 = vmatprep.subr.bf16.mxu0 %v7697_v24  ;;  %v7775_v24 = vpack.c.bf16 %v1269_v8, %v1205_v7  ;;  %v1652_v8 = vld [vmem:[%s8093_s26 + $0x2bf0] sm:$0xff] }
 0x418   : > { %7764 = vmatprep.subr.bf16.mxu1 %v7763_v37 }
 0x41a   : > { %7700 = vmatpush1.bf16.msra.mxu0 %v7699_v48  ;;  %v7777_v48 = vpack.c.bf16 %v1268_v25, %v1204_v21  ;;  %v1716_v21 = vld [vmem:[%s8093_s26 + $0x2df0] sm:$0xff]  ;;  %v1843_v25 = vld [vmem:[%s8093_s26 + $0x31e8] sm:$0xff] }
 0x41b   : > { %7766 = vmatpush1.bf16.msra.mxu1 %v7765_v49  ;;  %7702 = vmatprep.subr.bf16.mxu0 %v7701_v50  ;;  %v7713_v49 = vpack.c.bf16 %v1395_v32, %v1331_v31  ;;  %v1330_v50 = vld [vmem:[%s8093_s26 + $0x21e0] sm:$0xff]  ;;  %v1907_v31 = vld [vmem:[%s8093_s26 + $0x33e8] sm:$0xff]  ;;  %v1845_v32 = vld [vmem:[%s8093_s26 + $0x31f8] sm:$0xff] }
 0x41c   : > { %v4464_v3 = vpop.f32.mrb[22].mxu0  ;;  %7768 = vmatprep.subr.bf16.mxu1 %v7767_v55  ;;  %v1396_v55 = vld [vmem:[%s8093_s26 + $0x23f0] sm:$0xff]  ;;  %v7715_v33 = vpack.c.bf16 %v1394_v51, %v1330_v50  ;;  %v1971_v51 = vld [vmem:[%s8093_s26 + $0x35e8] sm:$0xff] }
 0x41d   : > { %v4465_v43 = vadd.f32 %v4464_v3, %v2489_v46  ;;  %v4535_v6 = vpop.f32.mrb[22].mxu1  ;;  %v4466_v16 = vpop.f32.mrb[23].mxu0  ;;  %v1461_v46 = vld [vmem:[%s8093_s26 + $0x25f8] sm:$0xff]  ;;  %v1908_v50 = vld [vmem:[%s8093_s26 + $0x33f0] sm:$0xff] }
 0x41e   : > { %v4536_v10 = vadd.f32 %v4535_v6, %v2497_v18  ;;  %v4467_v11 = vadd.f32 %v4466_v16, %v2493_v0  ;;  %v4537_v12 = vpop.f32.mrb[23].mxu1  ;;  %7704 = vmatpush1.bf16.msra.mxu0 %v7703_v28  ;;  %v7781_v18 = vpack.c.bf16 %v1396_v55, %v1332_v52  ;;  %v7717_v0 = vpack.c.bf16 %v1523_v59, %v1459_v56  ;;  %v1458_v28 = vld [vmem:[%s8093_s26 + $0x25e0] sm:$0xff]  ;;  %v1589_v3 = vld [vmem:[%s8093_s26 + $0x29f8] sm:$0xff]  ;;  %v1588_v16 = vld [vmem:[%s8093_s26 + $0x29f0] sm:$0xff] }
 0x41f   : > { %v4538_v14 = vadd.f32 %v4537_v12, %v2501_v53  ;;  %7770 = vmatpush1.bf16.msra.mxu1 %v7769_v44  ;;  %7706 = vmatprep.subr.bf16.mxu0 %v7705_v1  ;;  %v1522_v53 = vld [vmem:[%s8093_s26 + $0x27e0] sm:$0xff]  ;;  %v1460_v44 = vld [vmem:[%s8093_s26 + $0x25f0] sm:$0xff]  ;;  %v7783_v1 = vpack.c.bf16 %v1525_v62, %v1461_v46  ;;  %v1717_v12 = vld [vmem:[%s8093_s26 + $0x2df8] sm:$0xff] }
 0x420   : > { %v5359_v23 = vcombine.low %v4465_v43, %v4467_v11  ;;  %7772 = vmatprep.subr.bf16.mxu1 %v7771_v40  ;;  %v1653_v40 = vld [vmem:[%s8093_s26 + $0x2bf8] sm:$0xff]  ;;  %v7719_v61 = vpack.c.bf16 %v1522_v53, %v1458_v28  ;;  %v7785_v4 = vpack.c.bf16 %v1524_v36, %v1460_v44  ;;  %v1586_v43 = vld [vmem:[%s8093_s26 + $0x29e0] sm:$0xff]  ;;  %v1779_v11 = vld [vmem:[%s8093_s26 + $0x2fe8] sm:$0xff] }
 0x421   : > { %v5360_v37 = vcombine.low %v4536_v10, %v4538_v14  ;;  %v1650_v6 = vld [vmem:[%s8093_s26 + $0x2be0] sm:$0xff]  ;;  %v7787_v7 = vpack.c.bf16 %v1653_v40, %v1589_v3  ;;  %v1715_v10 = vld [vmem:[%s8093_s26 + $0x2de8] sm:$0xff]  ;;  %v2037_v55 = vld [vmem:[%s8093_s26 + $0x37f8] sm:$0xff] }
 0x422   : > { %v5367_v42 = vrot.slane %v5359_v23, %v8787_v9  ;;  %7708 = vmatpush1.bf16.msra.mxu0 %v7707_v13  ;;  %v1781_v13 = vld [vmem:[%s8093_s26 + $0x2ff8] sm:$0xff]  ;;  %v7723_v14 = vpack.c.bf16 %v1650_v6, %v1586_v43  ;;  %v2035_v52 = vld [vmem:[%s8093_s26 + $0x37e8] sm:$0xff]  ;;  %v1970_v46 = vld [vmem:[%s8093_s26 + $0x35e0] sm:$0xff] }
 0x423   : > { %v5374_v47 = vrot.slane %v5360_v37, %v8787_v9  ;;  %7774 = vmatpush1.bf16.msra.mxu1 %v7773_v15  ;;  %7710 = vmatprep.subr.bf16.mxu0 %v7709_v20  ;;  %v7789_v15 = vpack.c.bf16 %v1652_v8, %v1588_v16  ;;  %v7725_v20 = vpack.c.bf16 %v1779_v11, %v1715_v10  ;;  %v1909_v37 = vld [vmem:[%s8093_s26 + $0x33f8] sm:$0xff]  ;;  %v2034_v62 = vld [vmem:[%s8093_s26 + $0x37e0] sm:$0xff]  ;;  %v2099_v28 = vld [vmem:[%s8093_s26 + $0x39e8] sm:$0xff] }
 0x424   : > { %7776 = vmatprep.subr.bf16.mxu1 %v7775_v24  ;;  %v7791_v23 = vpack.c.bf16 %v1781_v13, %v1717_v12  ;;  %v1780_v24 = vld [vmem:[%s8093_s26 + $0x2ff0] sm:$0xff]  ;;  %v2163_v53 = vld [vmem:[%s8093_s26 + $0x3be8] sm:$0xff]  ;;  %v2101_v44 = vld [vmem:[%s8093_s26 + $0x39f8] sm:$0xff]  ;;  %v7735_v36 = vpack.c.bf16 %v2034_v62, %v1970_v46 }
 0x425   : > { %v5375_v60 = vcombine.low %v5367_v42, %v5374_v47  ;;  %v7793_v41 = vpack.c.bf16 %v1780_v24, %v1716_v21  ;;  %v7729_v42 = vpack.c.bf16 %v1907_v31, %v1843_v25  ;;  %v1906_v47 = vld [vmem:[%s8093_s26 + $0x33e0] sm:$0xff]  ;;  %v7737_v2 = vpack.c.bf16 %v2163_v53, %v2099_v28  ;;  %v2227_v43 = vld [vmem:[%s8093_s26 + $0x3de8] sm:$0xff]  ;;  %v2229_v16 = vld [vmem:[%s8093_s26 + $0x3df8] sm:$0xff] }
 0x426   : > { %7712 = vmatpush1.bf16.msra.mxu0 %v7711_v45  ;;  %v1842_v45 = vld [vmem:[%s8093_s26 + $0x31e0] sm:$0xff]  ;;  %v2291_v6 = vld [vmem:[%s8093_s26 + $0x3fe8] sm:$0x3]  ;;  %v2300_v21 = vld [vmem:[%s8740_s30 + $0x30] sm:$0xff] }
 0x427   : > { %5471 = vst [vmem:[%s8808_s6 + $0x58] sm:$0xff] %v5375_v60  ;;  %7778 = vmatpush1.bf16.msra.mxu1 %v7777_v48  ;;  %7714 = vmatprep.subr.bf16.mxu0 %v7713_v49  ;;  %v1844_v48 = vld [vmem:[%s8093_s26 + $0x31f0] sm:$0xff]  ;;  %v7795_v49 = vpack.c.bf16 %v1909_v37, %v1845_v32  ;;  %v7731_v56 = vpack.c.bf16 %v1906_v47, %v1842_v45  ;;  %v2098_v3 = vld [vmem:[%s8093_s26 + $0x39e0] sm:$0xff] }
 0x428   : > { %7780 = vmatprep.subr.bf16.mxu1 %v7779_v54  ;;  %v1973_v54 = vld [vmem:[%s8093_s26 + $0x35f8] sm:$0xff]  ;;  %v7797_v59 = vpack.c.bf16 %v1908_v50, %v1844_v48  ;;  %v7733_v60 = vpack.c.bf16 %v2035_v52, %v1971_v51  ;;  %v2162_v40 = vld [vmem:[%s8093_s26 + $0x3be0] sm:$0xff]  ;;  %v7741_v11 = vpack.c.bf16 %v2291_v6, %v2227_v43  ;;  %v2513_v24 = vrot.slane %v2300_v21, %v8754_v34 }
 0x429   : > { %v7739_v8 = vpack.c.bf16 %v2162_v40, %v2098_v3  ;;  %v2226_v12 = vld [vmem:[%s8093_s26 + $0x3de0] sm:$0xff]  ;;  %v2509_v25 = vrot.slane %v2300_v21, %v8757_v35  ;;  %v2517_v31 = vrot.slane %v2300_v21, %v8760_v39  ;;  %v2521_v52 = vrot.slane %v2300_v21, %v8925_v22 }
 0x42a   : > { %7716 = vmatpush1.bf16.msra.mxu0 %v7715_v33  ;;  %v1972_v33 = vld [vmem:[%s8093_s26 + $0x35f0] sm:$0xff]  ;;  %v2290_v13 = vld [vmem:[%s8093_s26 + $0x3fe0] sm:$0x3] }
 0x42b   : > { %7782 = vmatpush1.bf16.msra.mxu1 %v7781_v18  ;;  %7718 = vmatprep.subr.bf16.mxu0 %v7717_v0  ;;  %v7799_v18 = vpack.c.bf16 %v2037_v55, %v1973_v54  ;;  %v2036_v0 = vld [vmem:[%s8093_s26 + $0x37f0] sm:$0xff]  ;;  %v7744_v17 = vpack.c.bf16 %v2290_v13, %v2226_v12  ;;  %v2529_v54 = vrot.slane %v2300_v21, %v8930_v26 }
 0x42c   : > { %7784 = vmatprep.subr.bf16.mxu1 %v7783_v1  ;;  %v2165_v1 = vld [vmem:[%s8093_s26 + $0x3bf8] sm:$0xff]  ;;  %v7801_v58 = vpack.c.bf16 %v2036_v0, %v1972_v33  ;;  %v2525_v55 = vrot.slane %v2300_v21, %v8933_v27 }
 0x42e   : > { %7720 = vmatpush1.bf16.msra.mxu0 %v7719_v61  ;;  %v2100_v61 = vld [vmem:[%s8093_s26 + $0x39f0] sm:$0xff] }
 0x42f   : > { %7786 = vmatpush1.bf16.msra.mxu1 %v7785_v4  ;;  %7722 = vmatprep.subr.bf16.mxu0 %v7721_v5  ;;  %v7803_v4 = vpack.c.bf16 %v2165_v1, %v2101_v44  ;;  %v2164_v5 = vld [vmem:[%s8093_s26 + $0x3bf0] sm:$0xff] }
 0x430   : > { %7788 = vmatprep.subr.bf16.mxu1 %v7787_v7  ;;  %v2293_v7 = vld [vmem:[%s8093_s26 + $0x3ff8] sm:$0x3]  ;;  %v7805_v10 = vpack.c.bf16 %v2164_v5, %v2100_v61 }
 0x432   : > { %7724 = vmatpush1.bf16.msra.mxu0 %v7723_v14  ;;  %v7807_v14 = vpack.c.bf16 %v2293_v7, %v2229_v16 }
 0x433   : > { %7790 = vmatpush1.bf16.msra.mxu1 %v7789_v15  ;;  %7726 = vmatprep.subr.bf16.mxu0 %v7725_v20  ;;  %v2228_v15 = vld [vmem:[%s8093_s26 + $0x3df0] sm:$0xff] }
 0x434   : > { %7792 = vmatprep.subr.bf16.mxu1 %v7791_v23  ;;  %v2292_v20 = vld [vmem:[%s8093_s26 + $0x3ff0] sm:$0x3]  ;;  %v2505_v23 = vrot.slane %v2300_v21, %v8746_v29  ;;  %s5477_s26 = scalar_lea.sflag [#allocation4], %s8089_s19 }
 0x435   : > { %v7810_v19 = vpack.c.bf16 %v2292_v20, %v2228_v15 }
 0x436   : > { %7728 = vmatpush1.bf16.msra.mxu0 %v7727_v38 }
 0x437   : > { %7794 = vmatpush1.bf16.msra.mxu1 %v7793_v41  ;;  %7730 = vmatprep.subr.bf16.mxu0 %v7729_v42 }
 0x438   : > { %7796 = vmatprep.subr.bf16.mxu1 %v7795_v49 }
 0x43a   : > { %7732 = vmatpush1.bf16.msra.mxu0 %v7731_v56  ;;  %v2533_v56 = vrot.slane %v2300_v21, %v8936_v30 }
 0x43b   : > { %7798 = vmatpush1.bf16.msra.mxu1 %v7797_v59  ;;  %7734 = vmatprep.subr.bf16.mxu0 %v7733_v60 }
 0x43c   : > { %7800 = vmatprep.subr.bf16.mxu1 %v7799_v18 }
 0x43e   : > { %7736 = vmatpush1.bf16.msra.mxu0 %v7735_v36 }
 0x43f   : > { %7802 = vmatpush1.bf16.msra.mxu1 %v7801_v58  ;;  %7738 = vmatprep.subr.bf16.mxu0 %v7737_v2  ;;  %v2301_v2 = vld [vmem:[%s8740_s30 + $0x38] sm:$0xff]  ;;  %s5485_s30 = ssub.s32 (%p8029_p9), 1723, %s8702_s9 }
 0x440   : > { %7804 = vmatprep.subr.bf16.mxu1 %v7803_v4  ;;  %v2537_v3 = vrot.slane %v2301_v2, %v8746_v29  ;;  %v2545_v40 = vrot.slane %v2301_v2, %v8754_v34  ;;  %v2541_v61 = vrot.slane %v2301_v2, %v8757_v35  ;;  %v2549_v4 = vrot.slane %v2301_v2, %v8760_v39  ;;  %p5486_p13 = scmp.lt.s32.totalorder (%p8029_p9), %s5485_s30, 64 }
 0x441   : > { %v2553_v35 = vrot.slane %v2301_v2, %v8925_v22  ;;  %v2561_v39 = vrot.slane %v2301_v2, %v8930_v26  ;;  %v2557_v15 = vrot.slane %v2301_v2, %v8933_v27  ;;  %v2565_v20 = vrot.slane %v2301_v2, %v8936_v30 }
 0x442   : > { %7740 = vmatpush1.bf16.msra.mxu0 %v7739_v8 }
 0x443   : > { %7806 = vmatpush1.bf16.msra.mxu1 %v7805_v10  ;;  %7743 = vmatprep.subr.msk.bf16.mxu0 %vm8236_vm3, %v7741_v11 }
 0x444   : > { %7809 = vmatprep.subr.msk.bf16.mxu1 %vm8236_vm3, %v7807_v14 }
 0x446   : > { %7746 = vmatpush1.bf16.msk.msra.mxu0 %vm8236_vm3, %v7744_v17 }
 0x447   : > { %7812 = vmatpush1.bf16.msk.msra.mxu1 %vm8236_vm3, %v7810_v19 }
 0x449   : > { %5031 = vmatmul.mubr.f32.vlgmr.msra.gmra.mrb[30].mxu0 %v10474_v63 }
 0x44a   : > { %5102 = vmatmul.mubr.f32.vlgmr.msra.gmra.mrb[30].mxu1 %v10474_v63 }
 0x45c   : > { %v4606_v32 = vpop.f32.mrb[24].mxu0 }
 0x45d   : > { %v4607_v37 = vadd.f32 %v4606_v32, %v2505_v23  ;;  %v4677_v38 = vpop.f32.mrb[24].mxu1  ;;  %v4608_v41 = vpop.f32.mrb[25].mxu0 }
 0x45e   : > { %v4678_v57 = vadd.f32 %v4677_v38, %v2513_v24  ;;  %v4609_v42 = vadd.f32 %v4608_v41, %v2509_v25  ;;  %v4679_v45 = vpop.f32.mrb[25].mxu1 }
 0x45f   : > { %v4680_v47 = vadd.f32 %v4679_v45, %v2517_v31 }
 0x460   : > { %v5376_v48 = vcombine.low %v4607_v37, %v4609_v42 }
 0x461   : > { %v5377_v63 = vcombine.low %v4678_v57, %v4680_v47 }
 0x462   : > { %v5384_v49 = vrot.slane %v5376_v48, %v8787_v9 }
 0x463   : > { %v5391_v50 = vrot.slane %v5377_v63, %v8787_v9 }
 0x465   : > { %v5392_v51 = vcombine.low %v5384_v49, %v5391_v50 }
 0x467   : > { %5472 = vst [vmem:[%s8808_s6 + $0x60] sm:$0xff] %v5392_v51 }
 0x49c   : > { %v4748_v59 = vpop.f32.mrb[26].mxu0 }
 0x49d   : > { %v4749_v60 = vadd.f32 %v4748_v59, %v2521_v52  ;;  %v4819_v46 = vpop.f32.mrb[26].mxu1  ;;  %v4750_v62 = vpop.f32.mrb[27].mxu0 }
 0x49e   : > { %v4820_v33 = vadd.f32 %v4819_v46, %v2529_v54  ;;  %v4751_v18 = vadd.f32 %v4750_v62, %v2525_v55  ;;  %v4821_v0 = vpop.f32.mrb[27].mxu1 }
 0x49f   : > { %v4822_v28 = vadd.f32 %v4821_v0, %v2533_v56 }
 0x4a0   : > { %v5393_v53 = vcombine.low %v4749_v60, %v4751_v18 }
 0x4a1   : > { %v5394_v44 = vcombine.low %v4820_v33, %v4822_v28 }
 0x4a2   : > { %v5401_v1 = vrot.slane %v5393_v53, %v8787_v9 }
 0x4a3   : > { %v5408_v36 = vrot.slane %v5394_v44, %v8787_v9 }
 0x4a5   : > { %v5409_v58 = vcombine.low %v5401_v1, %v5408_v36 }
 0x4a7   : > { %5473 = vst [vmem:[%s8808_s6 + $0x68] sm:$0xff] %v5409_v58 }
 0x4dc   : > { %v4890_v5 = vpop.f32.mrb[28].mxu0 }
 0x4dd   : > { %v4891_v43 = vadd.f32 %v4890_v5, %v2537_v3  ;;  %v4961_v6 = vpop.f32.mrb[28].mxu1  ;;  %v4892_v16 = vpop.f32.mrb[29].mxu0 }
 0x4de   : > { %v4962_v7 = vadd.f32 %v4961_v6, %v2545_v40  ;;  %v4893_v8 = vadd.f32 %v4892_v16, %v2541_v61  ;;  %v4963_v10 = vpop.f32.mrb[29].mxu1 }
 0x4df   : > { %v4964_v11 = vadd.f32 %v4963_v10, %v2549_v4 }
 0x4e0   : > { %v5410_v12 = vcombine.low %v4891_v43, %v4893_v8 }
 0x4e1   : > { %v5411_v13 = vcombine.low %v4962_v7, %v4964_v11 }
 0x4e2   : > { %v5418_v14 = vrot.slane %v5410_v12, %v8787_v9 }
 0x4e3   : > { %v5425_v29 = vrot.slane %v5411_v13, %v8787_v9 }
 0x4e5   : > { %v5426_v34 = vcombine.low %v5418_v14, %v5425_v29 }
 0x4e7   : > { %5474 = vst [vmem:[%s8808_s6 + $0x70] sm:$0xff] %v5426_v34 }
 0x51c   : > { %v5032_v17 = vpop.f32.mrb[30].mxu0 }
 0x51d   : > { %v5033_v19 = vadd.f32 %v5032_v17, %v2553_v35  ;;  %v5103_v21 = vpop.f32.mrb[30].mxu1  ;;  %v5034_v23 = vpop.f32.mrb[31].mxu0 }
 0x51e   : > { %v5104_v24 = vadd.f32 %v5103_v21, %v2561_v39  ;;  %v5035_v25 = vadd.f32 %v5034_v23, %v2557_v15  ;;  %v5105_v31 = vpop.f32.mrb[31].mxu1 }
 0x51f   : > { %v5106_v32 = vadd.f32 %v5105_v31, %v2565_v20 }
 0x520   : > { %v5427_v37 = vcombine.low %v5033_v19, %v5035_v25 }
 0x521   : > { %v5428_v38 = vcombine.low %v5104_v24, %v5106_v32  ;;  %5483 = sbr.rel (!%p8029_p9) target bundleno = 1347 (0x543), region = 40 }
 0x522   : > { %v5435_v22 = vrot.slane %v5427_v37, %v8787_v9 }
 0x523   : > { %v5442_v26 = vrot.slane %v5428_v38, %v8787_v9 }
 0x525   : > { %v5443_v41 = vcombine.low %v5435_v22, %v5442_v26 }
 0x527   : > { %5475 = vst [vmem:[%s8808_s6 + $0x78] sm:$0xff] %v5443_v41 }
 0x528   : > { %s10716_s30 = smov (!%p5486_p13, %s5485_s30), 64 }
 0x529   : > { %s10647_s5 = sshll.u32 %s10716_s30, 5 }
 0x52a   : > { %s5490_s7 = ssub.s32 2048, %s10647_s5 }
 0x52b   : > { %5491 = vsyncadd %s5477_s26, %s5490_s7  ;;  %p5691_p8 = scmp.ne.s32.totalorder %s10647_s5, 0  ;;  %s5700_s8 = sshll.u32 %s8006_s16, 11 }
 0x52c   : > { %s10657_s20 = scalar_lea.hbm %s10702_s3, %s5700_s8  ;;  %s5497_s9 = sshll.u32 %s8808_s6, 4  ;;  %s5498_s9 = int_to_ptr.vmem [resolvable:$true] %s5497_s9 }
 0x52d   : > { %s7891_s25 = scalar_lea.vmem %s5498_s9, %s10647_s5  ;;  %s7964_s22 = smov [#allocation5]  }
 0x52e   : > { %p7892_p9 = scmp.ne.s32.totalorder %s5498_s9, %s7891_s25  ;;  %s7895_s28 = sshll.u32 %s7964_s22, 4  ;;  %s7896_s28 = int_to_ptr.vmem [resolvable:$false] %s7895_s28 }
 0x52f   : > { %s7897_s29 = scalar_lea.vmem %s7896_s28, 4096  ;;  %p7898_p0 = scmp.lt.s32.totalorder %s5498_s9, %s7896_s28 }
 0x530   : > { %p7893_p11 = pnand %p7892_p9, %p5691_p8  ;;  %p7899_p1 = scmp.lt.s32.totalorder %s7897_s29, %s7891_s25 }
 0x532   : > { %p7894_p12 = pneg %p7893_p11  ;;  %p7900_p3 = por %p7899_p1, %p7898_p0 }
 0x534   : > { %p7901_p4 = pnand %p7900_p3, %p7894_p12 }
 0x536   : > { %7904 = shalt.err (!%p7901_p4)
}
 0x537   : > { %s7905_s16 = scalar_lea.hbm %s10657_s20, %s10647_s5  ;;  %s7909_s10 = scalar_lea.hbm %s10702_s3, 55136 }
 0x538   : > { %p7906_p5 = scmp.ne.s32.totalorder %s10657_s20, %s7905_s16  ;;  %p7910_p10 = scmp.lt.u32.totalorder %s10657_s20, %s10702_s3 }
 0x539   : > { %p7911_p6 = scmp.lt.u32.totalorder %s7909_s10, %s7905_s16  ;;  %p7913_p9 = scmp.lt.u32.totalorder %s7905_s16, %s10657_s20 }
 0x53a   : > { %p7907_p2 = pnand %p7906_p5, %p5691_p8 }
 0x53b   : > { %p7912_p13 = por %p7911_p6, %p7910_p10 }
 0x53c   : > { %p7908_p7 = pneg %p7907_p2 }
 0x53d   : > { %p7914_p11 = por %p7913_p9, %p7912_p13 }
 0x53f   : > { %p7915_p12 = pnand %p7914_p11, %p7908_p7 }
 0x541   : > { %7918 = shalt.err (!%p7915_p12)
}
 0x542   : > { %5500 = dma.vmem_to_hbm [thread:$0]  (%p5691_p8), %s5498_s9, %s10647_s5, %s10657_s20, %s5477_s26  }
 0x543 PF: > { %p7819_p0 = scmp.ge.s32.totalorder %s7957_s15, 2  ;;  %s5509_s30 = sand.u32 1, %s7945_s12  }
 0x544   : > { %p10708_p1 = scmp.ne.s32.totalorder %s10705_s24, 0  ;;  %s5510_s7 = scalar_lea.sflag [#allocation4], %s5509_s30 }
 0x546   : > { %p7816_p3 = pnand %p7819_p0, %p10708_p1 }
 0x548   : > { %7940 = dma.done.wait (!%p7816_p3), %s5510_s7, 2048  }
 0x549   : > { %7942 = vsyncadd (!%p7816_p3), %s5510_s7, 4294965248  ;;  %p16_p4 = scmp.ge.s32.totalorder %s8010_s18, 29   ;;  %s10709_s12 = smov %s7949_s13 }
 0x54a   : > { %s10710_s13 = smov %s7953_s14  ;;  %s10711_s14 = smov %s8022_s21 }
 0x54b   : > { %s10712_s15 = smov %s8010_s18  ;;  %18 = sbr.rel (!%p16_p4) target bundleno = 5 (0x5), region = 80 }
 0x552   :  { %5515 = vsyncpa [#allocation3], 1 }
 0x553   :  { %5517 = vsyncpa [#allocation3 + $0x1], 1 }
 0x554   :  { %5518 = vsyncpa [#allocation4], 1 }
 0x555   :  { %5520 = vsyncpa [#allocation4 + $0x1], 1 }

</bundles_post_ra>
